<compile_context>
chip_gen: v7x
topology: tpu7x:2x2x1
jax: 0.10.0
libtpu: 0.0.40
codegen_flags: <defaults>
</compile_context>

<pallas_src>
import jax
import jax.numpy as jnp
from jax.experimental import pallas as pl
from jax.experimental.pallas import tpu as pltpu


def _basic_block_kernel(x_ref, w1_ref, b1_ref, w2_ref, b2_ref, out_ref,
                        buf_ref, pat_ref):
    """One grid step == Nb batch images.

    x_ref   : (Nb, H, W, Cin)     unpadded NHWC input block (f32)
    w1_ref  : (9*Cp, Cp)          conv1 weights, BN1 folded, channel-padded (bf16)
    b1_ref  : (1, Cp)             BN1 folded bias, channel-padded (f32)
    w2_ref  : (9*Cp, Cp)          conv2 weights, BN2 folded, channel-padded (bf16)
    b2_ref  : (1, Cp)             BN2 folded bias, channel-padded (f32)
    out_ref : (Nb, H*W, Cp)       lane-dense output slab (f32)
    buf_ref : (Nb, H+2, W+2, Cp)  zero-bordered padded activation scratch (bf16)
    pat_ref : (Nb*H*W, 9*Cp)      im2col patch matrix (bf16)
    """
    Nb, H, W, Cin = x_ref.shape
    Cp = out_ref.shape[2]
    Hp, Wp = H + 2, W + 2
    M = Nb * H * W

    zero_row = jnp.zeros((Nb, 1, Wp, Cp), jnp.bfloat16)   # halo rows
    zero_col = jnp.zeros((Nb, H, 1, Cp), jnp.bfloat16)    # halo columns

    def stage_padded(interior_bf16):
        # interior: (Nb, H, W, Cp) bf16.  Zero only the top/bottom halo rows;
        # pad W in-register and write the interior rows with ONE aligned
        # full-width store (no sublane-offset partial stores).
        buf_ref[:, 0:1, :, :] = zero_row
        buf_ref[:, H + 1:Hp, :, :] = zero_row
        padded = jnp.concatenate([zero_col, interior_bf16, zero_col], axis=2)
        buf_ref[:, 1:H + 1, :, :] = padded

    def conv3x3(w_ref, b_ref):
        # im2col from the padded scratch: each tap writes a lane-aligned,
        # 128-wide column block of the bf16 patch matrix, then one MXU matmul
        # with f32 accumulation.  All 9*Cp columns are rewritten every call.
        for dy in range(3):
            for dx in range(3):
                k = dy * 3 + dx
                tap = buf_ref[:, dy:dy + H, dx:dx + W, :]          # (Nb,H,W,Cp)
                pat_ref[:, k * Cp:(k + 1) * Cp] = tap.reshape(M, Cp)
        return jnp.dot(pat_ref[...], w_ref[...],
                       preferred_element_type=jnp.float32) + b_ref[...]

    # ---- conv1 (BN1 scale folded) + bias + ReLU -----------------------------
    x_bf16 = x_ref[...].astype(jnp.bfloat16)                        # (Nb,H,W,Cin)
    if Cp > Cin:
        x_bf16 = jnp.concatenate(
            [x_bf16, jnp.zeros((Nb, H, W, Cp - Cin), jnp.bfloat16)], axis=3)
    stage_padded(x_bf16)
    y1 = jnp.maximum(conv3x3(w1_ref, b1_ref), 0.0)                  # (M, Cp) f32

    # ---- conv2 (BN2 scale folded) + bias + residual + ReLU ------------------
    stage_padded(y1.astype(jnp.bfloat16).reshape(Nb, H, W, Cp))
    y2 = conv3x3(w2_ref, b2_ref)                                    # (M, Cp) f32

    res = x_ref[...].reshape(Nb, H * W, Cin)                        # f32 residual
    if Cp > Cin:
        res = jnp.concatenate(
            [res, jnp.zeros((Nb, H * W, Cp - Cin), jnp.float32)], axis=2)
    out_ref[...] = jnp.maximum(y2.reshape(Nb, H * W, Cp) + res, 0.0)


def _round_up(x, m):
    return (x + m - 1) // m * m


def _pick_images_per_step(n, cap=4):
    """Largest divisor of n that is <= cap while keeping >= 2 grid steps
    (so v7x's two TensorCores both get work); falls back to n."""
    for d in range(min(n // 2, cap), 0, -1):
        if n % d == 0:
            return d
    return n


def _fold_and_pack(w_hwio, gamma, beta, mean, var, eps, cp):
    """Fold eval-mode BN into conv weights + bias; zero-pad channels to cp.

    Returns ((9*cp, cp) bf16 weights, (1, cp) f32 bias).  Row order of the
    packed weights is (dy, dx, ci) matching the in-kernel im2col columns.
    """
    scale = gamma / jnp.sqrt(var + eps)                 # (Co,)
    bias = beta - mean * scale                          # (Co,)
    wf = w_hwio * scale                                 # scale over out-ch axis
    ci, co = wf.shape[2], wf.shape[3]
    wp = jnp.zeros((3, 3, cp, cp), jnp.float32).at[:, :, :ci, :co].set(wf)
    w_packed = wp.astype(jnp.bfloat16).reshape(9 * cp, cp)
    b_packed = jnp.zeros((1, cp), jnp.float32).at[0, :co].set(bias)
    return w_packed, b_packed


def basic_block_pallas(x_nchw, params, eps=1e-5, max_images_per_step=4):
    """BasicBlock forward.  x_nchw: (N, C, H, W) float32."""
    x = jnp.transpose(x_nchw, (0, 2, 3, 1)).astype(jnp.float32)     # NHWC
    N, H, W, Cin = x.shape
    Ch = params["w1"].shape[3]
    assert Cin == Ch, "downsample=None requires in_channels == hid_channels"

    Cp = max(128, _round_up(Ch, 128))                   # lane-dense channel pad
    w1k, b1 = _fold_and_pack(params["w1"], params["g1"], params["be1"],
                             params["m1"], params["v1"], eps, Cp)
    w2k, b2 = _fold_and_pack(params["w2"], params["g2"], params["be2"],
                             params["m2"], params["v2"], eps, Cp)

    Nb = _pick_images_per_step(N, max_images_per_step)
    grid = (N // Nb,)
    Hp, Wp = H + 2, W + 2

    out_slab = pl.pallas_call(
        _basic_block_kernel,
        out_shape=jax.ShapeDtypeStruct((N, H * W, Cp), jnp.float32),
        grid_spec=pltpu.PrefetchScalarGridSpec(
            num_scalar_prefetch=0,
            grid=grid,
            in_specs=[
                pl.BlockSpec((Nb, H, W, Cin), lambda n: (n, 0, 0, 0)),
                pl.BlockSpec((9 * Cp, Cp), lambda n: (0, 0)),
                pl.BlockSpec((1, Cp), lambda n: (0, 0)),
                pl.BlockSpec((9 * Cp, Cp), lambda n: (0, 0)),
                pl.BlockSpec((1, Cp), lambda n: (0, 0)),
            ],
            out_specs=pl.BlockSpec((Nb, H * W, Cp), lambda n: (n, 0, 0)),
            scratch_shapes=[
                pltpu.VMEM((Nb, Hp, Wp, Cp), jnp.bfloat16),      # padded acts
                pltpu.VMEM((Nb * H * W, 9 * Cp), jnp.bfloat16),  # im2col patches
            ],
        ),
        compiler_params=pltpu.CompilerParams(
            dimension_semantics=("parallel",),        # images are independent
            vmem_limit_bytes=32 * 1024 * 1024,        # fits v5e/v6e/v7x budgets
        ),
    )(x, w1k, b1, w2k, b2)

    # Lane-dense slab -> NCHW (layout plumbing stays outside the kernel).
    out = out_slab[:, :, :Ch].reshape(N, H, W, Ch)
    return jnp.transpose(out, (0, 3, 1, 2))


def basic_block_ref(x_nchw, params, eps=1e-5):
    """Plain-JAX reference using the same folded-BN / bf16-matmul recipe."""
    x = jnp.transpose(x_nchw, (0, 2, 3, 1)).astype(jnp.float32)

    def fold(w, g, be, m, v):
        scale = g / jnp.sqrt(v + eps)
        return (w * scale).astype(jnp.bfloat16), (be - m * scale)

    w1f, b1 = fold(params["w1"], params["g1"], params["be1"],
                   params["m1"], params["v1"])
    w2f, b2 = fold(params["w2"], params["g2"], params["be2"],
                   params["m2"], params["v2"])

    def conv(a, w):
        return jax.lax.conv_general_dilated(
            a.astype(jnp.bfloat16), w,
            window_strides=(1, 1), padding=((1, 1), (1, 1)),
            dimension_numbers=("NHWC", "HWIO", "NHWC"),
            preferred_element_type=jnp.float32)

    out = jnp.maximum(conv(x, w1f) + b1.reshape(1, 1, 1, -1), 0.0)
    out = jnp.maximum(conv(out, w2f) + b2.reshape(1, 1, 1, -1) + x, 0.0)
    return jnp.transpose(out, (0, 3, 1, 2))


def make_params(key, cin, ch):
    ks = jax.random.split(key, 10)
    return {
        "w1": 0.1 * jax.random.normal(ks[0], (3, 3, cin, ch), jnp.float32),
        "w2": 0.1 * jax.random.normal(ks[1], (3, 3, ch, ch), jnp.float32),
        "g1": 1.0 + 0.1 * jax.random.normal(ks[2], (ch,), jnp.float32),
        "be1": 0.1 * jax.random.normal(ks[3], (ch,), jnp.float32),
        "m1": 0.1 * jax.random.normal(ks[4], (ch,), jnp.float32),
        "v1": 1.0 + 0.1 * jax.nn.softplus(jax.random.normal(ks[5], (ch,), jnp.float32)),
        "g2": 1.0 + 0.1 * jax.random.normal(ks[6], (ch,), jnp.float32),
        "be2": 0.1 * jax.random.normal(ks[7], (ch,), jnp.float32),
        "m2": 0.1 * jax.random.normal(ks[8], (ch,), jnp.float32),
        "v2": 1.0 + 0.1 * jax.nn.softplus(jax.random.normal(ks[9], (ch,), jnp.float32)),
    }


if __name__ == "__main__":
    key = jax.random.PRNGKey(0)
    k_x, k_p = jax.random.split(key)

    N, C, H, W = 2, 4, 16, 16          # in_channels = hid_channels = 4
    x = jax.random.normal(k_x, (N, C, H, W), jnp.float32)
    params = make_params(k_p, C, C)

    out = jax.block_until_ready(basic_block_pallas(x, params))
    ref = jax.block_until_ready(basic_block_ref(x, params))

    assert out.shape == (N, C, H, W)
    assert jnp.allclose(out, ref, atol=1e-2, rtol=1e-2), "mismatch vs JAX reference"

    print("KERNEL_OK")
</pallas_src>

<mosaic_0001>
module attributes {stable_mosaic.version = 11 : i64} {
  func.func @_basic_block_kernel(%arg0: i32, %arg1: memref<1x16x16x4xf32, #tpu.memory_space<vmem>>, %arg2: memref<1152x128xbf16, #tpu.memory_space<vmem>>, %arg3: memref<1x128xf32, #tpu.memory_space<vmem>>, %arg4: memref<1152x128xbf16, #tpu.memory_space<vmem>>, %arg5: memref<1x128xf32, #tpu.memory_space<vmem>>, %arg6: memref<1x256x128xf32, #tpu.memory_space<vmem>>, %arg7: memref<1x18x18x128xbf16, #tpu.memory_space<vmem>>, %arg8: memref<256x1152xbf16, #tpu.memory_space<vmem>>) attributes {dimension_semantics = [#tpu.dimension_semantics<parallel>], iteration_bounds = array<i64: 2>, scalar_prefetch = 0 : i64, scratch_operands = 2 : i64, tpu.core_type = #tpu.core_type<tc>, window_params = [{transform_indices = @transform_0, window_bounds = array<i64: 1, 16, 16, 4>}, {pipeline_mode = #tpu.pipeline_mode<synchronous>, transform_indices = @transform_1, window_bounds = array<i64: 1152, 128>}, {pipeline_mode = #tpu.pipeline_mode<synchronous>, transform_indices = @transform_2, window_bounds = array<i64: 1, 128>}, {pipeline_mode = #tpu.pipeline_mode<synchronous>, transform_indices = @transform_3, window_bounds = array<i64: 1152, 128>}, {pipeline_mode = #tpu.pipeline_mode<synchronous>, transform_indices = @transform_4, window_bounds = array<i64: 1, 128>}, {transform_indices = @transform_5, window_bounds = array<i64: 1, 256, 128>}]} {
    %cst = arith.constant 0.000000e+00 : bf16
    %0 = vector.broadcast %cst : bf16 to vector<1x1x18x128xbf16>
    %cst_0 = arith.constant 0.000000e+00 : bf16
    %1 = vector.broadcast %cst_0 : bf16 to vector<1x16x1x128xbf16>
    %c0 = arith.constant 0 : index
    %c0_1 = arith.constant 0 : index
    %c0_2 = arith.constant 0 : index
    %c0_3 = arith.constant 0 : index
    %2 = vector.load %arg1[%c0, %c0_1, %c0_2, %c0_3] : memref<1x16x16x4xf32, #tpu.memory_space<vmem>>, vector<1x16x16x4xf32>
    %3 = arith.truncf %2 : vector<1x16x16x4xf32> to vector<1x16x16x4xbf16>
    %cst_4 = arith.constant 0.000000e+00 : bf16
    %4 = vector.broadcast %cst_4 : bf16 to vector<1x16x16x124xbf16>
    %5 = tpu.concatenate %3, %4 in 3 : vector<1x16x16x4xbf16>, vector<1x16x16x124xbf16> -> vector<1x16x16x128xbf16>
    %c0_5 = arith.constant 0 : index
    %c0_6 = arith.constant 0 : index
    %c0_7 = arith.constant 0 : index
    %c0_8 = arith.constant 0 : index
    %6 = vector.load %arg7[%c0_5, %c0_6, %c0_7, %c0_8] : memref<1x18x18x128xbf16, #tpu.memory_space<vmem>>, vector<1x1x18x128xbf16>
    tpu.vector_store %arg7[%c0_5, %c0_6, %c0_7, %c0_8], %0 {strides = array<i32>} : memref<1x18x18x128xbf16, #tpu.memory_space<vmem>>, vector<1x1x18x128xbf16>,
    %c0_9 = arith.constant 0 : index
    %c17 = arith.constant 17 : index
    %c0_10 = arith.constant 0 : index
    %c0_11 = arith.constant 0 : index
    %7 = vector.load %arg7[%c0_9, %c17, %c0_10, %c0_11] : memref<1x18x18x128xbf16, #tpu.memory_space<vmem>>, vector<1x1x18x128xbf16>
    tpu.vector_store %arg7[%c0_9, %c17, %c0_10, %c0_11], %0 {strides = array<i32>} : memref<1x18x18x128xbf16, #tpu.memory_space<vmem>>, vector<1x1x18x128xbf16>,
    %8 = tpu.concatenate %1, %5, %1 in 2 : vector<1x16x1x128xbf16>, vector<1x16x16x128xbf16>, vector<1x16x1x128xbf16> -> vector<1x16x18x128xbf16>
    %c0_12 = arith.constant 0 : index
    %c1 = arith.constant 1 : index
    %c0_13 = arith.constant 0 : index
    %c0_14 = arith.constant 0 : index
    %9 = vector.load %arg7[%c0_12, %c1, %c0_13, %c0_14] : memref<1x18x18x128xbf16, #tpu.memory_space<vmem>>, vector<1x16x18x128xbf16>
    tpu.vector_store %arg7[%c0_12, %c1, %c0_13, %c0_14], %8 {strides = array<i32>} : memref<1x18x18x128xbf16, #tpu.memory_space<vmem>>, vector<1x16x18x128xbf16>,
    %c0_15 = arith.constant 0 : index
    %c0_16 = arith.constant 0 : index
    %c0_17 = arith.constant 0 : index
    %c0_18 = arith.constant 0 : index
    %10 = vector.load %arg7[%c0_15, %c0_16, %c0_17, %c0_18] : memref<1x18x18x128xbf16, #tpu.memory_space<vmem>>, vector<1x16x16x128xbf16>
    %11 = vector.shape_cast %10 : vector<1x16x16x128xbf16> to vector<256x128xbf16>
    %c0_19 = arith.constant 0 : index
    %c0_20 = arith.constant 0 : index
    %12 = vector.load %arg8[%c0_19, %c0_20] : memref<256x1152xbf16, #tpu.memory_space<vmem>>, vector<256x128xbf16>
    tpu.vector_store %arg8[%c0_19, %c0_20], %11 {strides = array<i32>} : memref<256x1152xbf16, #tpu.memory_space<vmem>>, vector<256x128xbf16>,
    %c0_21 = arith.constant 0 : index
    %c0_22 = arith.constant 0 : index
    %c1_23 = arith.constant 1 : index
    %c0_24 = arith.constant 0 : index
    %13 = vector.load %arg7[%c0_21, %c0_22, %c1_23, %c0_24] : memref<1x18x18x128xbf16, #tpu.memory_space<vmem>>, vector<1x16x16x128xbf16>
    %14 = vector.shape_cast %13 : vector<1x16x16x128xbf16> to vector<256x128xbf16>
    %c0_25 = arith.constant 0 : index
    %c128 = arith.constant 128 : index
    %15 = vector.load %arg8[%c0_25, %c128] : memref<256x1152xbf16, #tpu.memory_space<vmem>>, vector<256x128xbf16>
    tpu.vector_store %arg8[%c0_25, %c128], %14 {strides = array<i32>} : memref<256x1152xbf16, #tpu.memory_space<vmem>>, vector<256x128xbf16>,
    %c0_26 = arith.constant 0 : index
    %c0_27 = arith.constant 0 : index
    %c2 = arith.constant 2 : index
    %c0_28 = arith.constant 0 : index
    %16 = vector.load %arg7[%c0_26, %c0_27, %c2, %c0_28] : memref<1x18x18x128xbf16, #tpu.memory_space<vmem>>, vector<1x16x16x128xbf16>
    %17 = vector.shape_cast %16 : vector<1x16x16x128xbf16> to vector<256x128xbf16>
    %c0_29 = arith.constant 0 : index
    %c256 = arith.constant 256 : index
    %18 = vector.load %arg8[%c0_29, %c256] : memref<256x1152xbf16, #tpu.memory_space<vmem>>, vector<256x128xbf16>
    tpu.vector_store %arg8[%c0_29, %c256], %17 {strides = array<i32>} : memref<256x1152xbf16, #tpu.memory_space<vmem>>, vector<256x128xbf16>,
    %c0_30 = arith.constant 0 : index
    %c1_31 = arith.constant 1 : index
    %c0_32 = arith.constant 0 : index
    %c0_33 = arith.constant 0 : index
    %19 = vector.load %arg7[%c0_30, %c1_31, %c0_32, %c0_33] : memref<1x18x18x128xbf16, #tpu.memory_space<vmem>>, vector<1x16x16x128xbf16>
    %20 = vector.shape_cast %19 : vector<1x16x16x128xbf16> to vector<256x128xbf16>
    %c0_34 = arith.constant 0 : index
    %c384 = arith.constant 384 : index
    %21 = vector.load %arg8[%c0_34, %c384] : memref<256x1152xbf16, #tpu.memory_space<vmem>>, vector<256x128xbf16>
    tpu.vector_store %arg8[%c0_34, %c384], %20 {strides = array<i32>} : memref<256x1152xbf16, #tpu.memory_space<vmem>>, vector<256x128xbf16>,
    %c0_35 = arith.constant 0 : index
    %c1_36 = arith.constant 1 : index
    %c1_37 = arith.constant 1 : index
    %c0_38 = arith.constant 0 : index
    %22 = vector.load %arg7[%c0_35, %c1_36, %c1_37, %c0_38] : memref<1x18x18x128xbf16, #tpu.memory_space<vmem>>, vector<1x16x16x128xbf16>
    %23 = vector.shape_cast %22 : vector<1x16x16x128xbf16> to vector<256x128xbf16>
    %c0_39 = arith.constant 0 : index
    %c512 = arith.constant 512 : index
    %24 = vector.load %arg8[%c0_39, %c512] : memref<256x1152xbf16, #tpu.memory_space<vmem>>, vector<256x128xbf16>
    tpu.vector_store %arg8[%c0_39, %c512], %23 {strides = array<i32>} : memref<256x1152xbf16, #tpu.memory_space<vmem>>, vector<256x128xbf16>,
    %c0_40 = arith.constant 0 : index
    %c1_41 = arith.constant 1 : index
    %c2_42 = arith.constant 2 : index
    %c0_43 = arith.constant 0 : index
    %25 = vector.load %arg7[%c0_40, %c1_41, %c2_42, %c0_43] : memref<1x18x18x128xbf16, #tpu.memory_space<vmem>>, vector<1x16x16x128xbf16>
    %26 = vector.shape_cast %25 : vector<1x16x16x128xbf16> to vector<256x128xbf16>
    %c0_44 = arith.constant 0 : index
    %c640 = arith.constant 640 : index
    %27 = vector.load %arg8[%c0_44, %c640] : memref<256x1152xbf16, #tpu.memory_space<vmem>>, vector<256x128xbf16>
    tpu.vector_store %arg8[%c0_44, %c640], %26 {strides = array<i32>} : memref<256x1152xbf16, #tpu.memory_space<vmem>>, vector<256x128xbf16>,
    %c0_45 = arith.constant 0 : index
    %c2_46 = arith.constant 2 : index
    %c0_47 = arith.constant 0 : index
    %c0_48 = arith.constant 0 : index
    %28 = vector.load %arg7[%c0_45, %c2_46, %c0_47, %c0_48] : memref<1x18x18x128xbf16, #tpu.memory_space<vmem>>, vector<1x16x16x128xbf16>
    %29 = vector.shape_cast %28 : vector<1x16x16x128xbf16> to vector<256x128xbf16>
    %c0_49 = arith.constant 0 : index
    %c768 = arith.constant 768 : index
    %30 = vector.load %arg8[%c0_49, %c768] : memref<256x1152xbf16, #tpu.memory_space<vmem>>, vector<256x128xbf16>
    tpu.vector_store %arg8[%c0_49, %c768], %29 {strides = array<i32>} : memref<256x1152xbf16, #tpu.memory_space<vmem>>, vector<256x128xbf16>,
    %c0_50 = arith.constant 0 : index
    %c2_51 = arith.constant 2 : index
    %c1_52 = arith.constant 1 : index
    %c0_53 = arith.constant 0 : index
    %31 = vector.load %arg7[%c0_50, %c2_51, %c1_52, %c0_53] : memref<1x18x18x128xbf16, #tpu.memory_space<vmem>>, vector<1x16x16x128xbf16>
    %32 = vector.shape_cast %31 : vector<1x16x16x128xbf16> to vector<256x128xbf16>
    %c0_54 = arith.constant 0 : index
    %c896 = arith.constant 896 : index
    %33 = vector.load %arg8[%c0_54, %c896] : memref<256x1152xbf16, #tpu.memory_space<vmem>>, vector<256x128xbf16>
    tpu.vector_store %arg8[%c0_54, %c896], %32 {strides = array<i32>} : memref<256x1152xbf16, #tpu.memory_space<vmem>>, vector<256x128xbf16>,
    %c0_55 = arith.constant 0 : index
    %c2_56 = arith.constant 2 : index
    %c2_57 = arith.constant 2 : index
    %c0_58 = arith.constant 0 : index
    %34 = vector.load %arg7[%c0_55, %c2_56, %c2_57, %c0_58] : memref<1x18x18x128xbf16, #tpu.memory_space<vmem>>, vector<1x16x16x128xbf16>
    %35 = vector.shape_cast %34 : vector<1x16x16x128xbf16> to vector<256x128xbf16>
    %c0_59 = arith.constant 0 : index
    %c1024 = arith.constant 1024 : index
    %36 = vector.load %arg8[%c0_59, %c1024] : memref<256x1152xbf16, #tpu.memory_space<vmem>>, vector<256x128xbf16>
    tpu.vector_store %arg8[%c0_59, %c1024], %35 {strides = array<i32>} : memref<256x1152xbf16, #tpu.memory_space<vmem>>, vector<256x128xbf16>,
    %c0_60 = arith.constant 0 : index
    %c0_61 = arith.constant 0 : index
    %37 = vector.load %arg8[%c0_60, %c0_61] : memref<256x1152xbf16, #tpu.memory_space<vmem>>, vector<256x1152xbf16>
    %c0_62 = arith.constant 0 : index
    %c0_63 = arith.constant 0 : index
    %38 = vector.load %arg2[%c0_62, %c0_63] : memref<1152x128xbf16, #tpu.memory_space<vmem>>, vector<1152x128xbf16>
    %cst_64 = arith.constant dense<0.000000e+00> : vector<256x128xf32>
    %39 = tpu.matmul %37, %38, %cst_64 {dimension_numbers = #tpu.dot_dimension_numbers<[1], [0], [0], [1], [0, 0, 1, 1], [], []>} : vector<256x1152xbf16>, vector<1152x128xbf16>, vector<256x128xf32> -> vector<256x128xf32>
    %c0_65 = arith.constant 0 : index
    %c0_66 = arith.constant 0 : index
    %40 = vector.load %arg3[%c0_65, %c0_66] : memref<1x128xf32, #tpu.memory_space<vmem>>, vector<1x128xf32>
    %41 = vector.broadcast %40 : vector<1x128xf32> to vector<256x128xf32>
    %42 = arith.addf %39, %41 : vector<256x128xf32>
    %cst_67 = arith.constant 0.000000e+00 : f32
    %43 = vector.broadcast %cst_67 : f32 to vector<256x128xf32>
    %44 = arith.maximumf %42, %43 : vector<256x128xf32>
    %45 = arith.truncf %44 : vector<256x128xf32> to vector<256x128xbf16>
    %46 = vector.shape_cast %45 : vector<256x128xbf16> to vector<1x16x16x128xbf16>
    %c0_68 = arith.constant 0 : index
    %c0_69 = arith.constant 0 : index
    %c0_70 = arith.constant 0 : index
    %c0_71 = arith.constant 0 : index
    %47 = vector.load %arg7[%c0_68, %c0_69, %c0_70, %c0_71] : memref<1x18x18x128xbf16, #tpu.memory_space<vmem>>, vector<1x1x18x128xbf16>
    tpu.vector_store %arg7[%c0_68, %c0_69, %c0_70, %c0_71], %0 {strides = array<i32>} : memref<1x18x18x128xbf16, #tpu.memory_space<vmem>>, vector<1x1x18x128xbf16>,
    %c0_72 = arith.constant 0 : index
    %c17_73 = arith.constant 17 : index
    %c0_74 = arith.constant 0 : index
    %c0_75 = arith.constant 0 : index
    %48 = vector.load %arg7[%c0_72, %c17_73, %c0_74, %c0_75] : memref<1x18x18x128xbf16, #tpu.memory_space<vmem>>, vector<1x1x18x128xbf16>
    tpu.vector_store %arg7[%c0_72, %c17_73, %c0_74, %c0_75], %0 {strides = array<i32>} : memref<1x18x18x128xbf16, #tpu.memory_space<vmem>>, vector<1x1x18x128xbf16>,
    %49 = tpu.concatenate %1, %46, %1 in 2 : vector<1x16x1x128xbf16>, vector<1x16x16x128xbf16>, vector<1x16x1x128xbf16> -> vector<1x16x18x128xbf16>
    %c0_76 = arith.constant 0 : index
    %c1_77 = arith.constant 1 : index
    %c0_78 = arith.constant 0 : index
    %c0_79 = arith.constant 0 : index
    %50 = vector.load %arg7[%c0_76, %c1_77, %c0_78, %c0_79] : memref<1x18x18x128xbf16, #tpu.memory_space<vmem>>, vector<1x16x18x128xbf16>
    tpu.vector_store %arg7[%c0_76, %c1_77, %c0_78, %c0_79], %49 {strides = array<i32>} : memref<1x18x18x128xbf16, #tpu.memory_space<vmem>>, vector<1x16x18x128xbf16>,
    %c0_80 = arith.constant 0 : index
    %c0_81 = arith.constant 0 : index
    %c0_82 = arith.constant 0 : index
    %c0_83 = arith.constant 0 : index
    %51 = vector.load %arg7[%c0_80, %c0_81, %c0_82, %c0_83] : memref<1x18x18x128xbf16, #tpu.memory_space<vmem>>, vector<1x16x16x128xbf16>
    %52 = vector.shape_cast %51 : vector<1x16x16x128xbf16> to vector<256x128xbf16>
    %c0_84 = arith.constant 0 : index
    %c0_85 = arith.constant 0 : index
    %53 = vector.load %arg8[%c0_84, %c0_85] : memref<256x1152xbf16, #tpu.memory_space<vmem>>, vector<256x128xbf16>
    tpu.vector_store %arg8[%c0_84, %c0_85], %52 {strides = array<i32>} : memref<256x1152xbf16, #tpu.memory_space<vmem>>, vector<256x128xbf16>,
    %c0_86 = arith.constant 0 : index
    %c0_87 = arith.constant 0 : index
    %c1_88 = arith.constant 1 : index
    %c0_89 = arith.constant 0 : index
    %54 = vector.load %arg7[%c0_86, %c0_87, %c1_88, %c0_89] : memref<1x18x18x128xbf16, #tpu.memory_space<vmem>>, vector<1x16x16x128xbf16>
    %55 = vector.shape_cast %54 : vector<1x16x16x128xbf16> to vector<256x128xbf16>
    %c0_90 = arith.constant 0 : index
    %c128_91 = arith.constant 128 : index
    %56 = vector.load %arg8[%c0_90, %c128_91] : memref<256x1152xbf16, #tpu.memory_space<vmem>>, vector<256x128xbf16>
    tpu.vector_store %arg8[%c0_90, %c128_91], %55 {strides = array<i32>} : memref<256x1152xbf16, #tpu.memory_space<vmem>>, vector<256x128xbf16>,
    %c0_92 = arith.constant 0 : index
    %c0_93 = arith.constant 0 : index
    %c2_94 = arith.constant 2 : index
    %c0_95 = arith.constant 0 : index
    %57 = vector.load %arg7[%c0_92, %c0_93, %c2_94, %c0_95] : memref<1x18x18x128xbf16, #tpu.memory_space<vmem>>, vector<1x16x16x128xbf16>
    %58 = vector.shape_cast %57 : vector<1x16x16x128xbf16> to vector<256x128xbf16>
    %c0_96 = arith.constant 0 : index
    %c256_97 = arith.constant 256 : index
    %59 = vector.load %arg8[%c0_96, %c256_97] : memref<256x1152xbf16, #tpu.memory_space<vmem>>, vector<256x128xbf16>
    tpu.vector_store %arg8[%c0_96, %c256_97], %58 {strides = array<i32>} : memref<256x1152xbf16, #tpu.memory_space<vmem>>, vector<256x128xbf16>,
    %c0_98 = arith.constant 0 : index
    %c1_99 = arith.constant 1 : index
    %c0_100 = arith.constant 0 : index
    %c0_101 = arith.constant 0 : index
    %60 = vector.load %arg7[%c0_98, %c1_99, %c0_100, %c0_101] : memref<1x18x18x128xbf16, #tpu.memory_space<vmem>>, vector<1x16x16x128xbf16>
    %61 = vector.shape_cast %60 : vector<1x16x16x128xbf16> to vector<256x128xbf16>
    %c0_102 = arith.constant 0 : index
    %c384_103 = arith.constant 384 : index
    %62 = vector.load %arg8[%c0_102, %c384_103] : memref<256x1152xbf16, #tpu.memory_space<vmem>>, vector<256x128xbf16>
    tpu.vector_store %arg8[%c0_102, %c384_103], %61 {strides = array<i32>} : memref<256x1152xbf16, #tpu.memory_space<vmem>>, vector<256x128xbf16>,
    %c0_104 = arith.constant 0 : index
    %c1_105 = arith.constant 1 : index
    %c1_106 = arith.constant 1 : index
    %c0_107 = arith.constant 0 : index
    %63 = vector.load %arg7[%c0_104, %c1_105, %c1_106, %c0_107] : memref<1x18x18x128xbf16, #tpu.memory_space<vmem>>, vector<1x16x16x128xbf16>
    %64 = vector.shape_cast %63 : vector<1x16x16x128xbf16> to vector<256x128xbf16>
    %c0_108 = arith.constant 0 : index
    %c512_109 = arith.constant 512 : index
    %65 = vector.load %arg8[%c0_108, %c512_109] : memref<256x1152xbf16, #tpu.memory_space<vmem>>, vector<256x128xbf16>
    tpu.vector_store %arg8[%c0_108, %c512_109], %64 {strides = array<i32>} : memref<256x1152xbf16, #tpu.memory_space<vmem>>, vector<256x128xbf16>,
    %c0_110 = arith.constant 0 : index
    %c1_111 = arith.constant 1 : index
    %c2_112 = arith.constant 2 : index
    %c0_113 = arith.constant 0 : index
    %66 = vector.load %arg7[%c0_110, %c1_111, %c2_112, %c0_113] : memref<1x18x18x128xbf16, #tpu.memory_space<vmem>>, vector<1x16x16x128xbf16>
    %67 = vector.shape_cast %66 : vector<1x16x16x128xbf16> to vector<256x128xbf16>
    %c0_114 = arith.constant 0 : index
    %c640_115 = arith.constant 640 : index
    %68 = vector.load %arg8[%c0_114, %c640_115] : memref<256x1152xbf16, #tpu.memory_space<vmem>>, vector<256x128xbf16>
    tpu.vector_store %arg8[%c0_114, %c640_115], %67 {strides = array<i32>} : memref<256x1152xbf16, #tpu.memory_space<vmem>>, vector<256x128xbf16>,
    %c0_116 = arith.constant 0 : index
    %c2_117 = arith.constant 2 : index
    %c0_118 = arith.constant 0 : index
    %c0_119 = arith.constant 0 : index
    %69 = vector.load %arg7[%c0_116, %c2_117, %c0_118, %c0_119] : memref<1x18x18x128xbf16, #tpu.memory_space<vmem>>, vector<1x16x16x128xbf16>
    %70 = vector.shape_cast %69 : vector<1x16x16x128xbf16> to vector<256x128xbf16>
    %c0_120 = arith.constant 0 : index
    %c768_121 = arith.constant 768 : index
    %71 = vector.load %arg8[%c0_120, %c768_121] : memref<256x1152xbf16, #tpu.memory_space<vmem>>, vector<256x128xbf16>
    tpu.vector_store %arg8[%c0_120, %c768_121], %70 {strides = array<i32>} : memref<256x1152xbf16, #tpu.memory_space<vmem>>, vector<256x128xbf16>,
    %c0_122 = arith.constant 0 : index
    %c2_123 = arith.constant 2 : index
    %c1_124 = arith.constant 1 : index
    %c0_125 = arith.constant 0 : index
    %72 = vector.load %arg7[%c0_122, %c2_123, %c1_124, %c0_125] : memref<1x18x18x128xbf16, #tpu.memory_space<vmem>>, vector<1x16x16x128xbf16>
    %73 = vector.shape_cast %72 : vector<1x16x16x128xbf16> to vector<256x128xbf16>
    %c0_126 = arith.constant 0 : index
    %c896_127 = arith.constant 896 : index
    %74 = vector.load %arg8[%c0_126, %c896_127] : memref<256x1152xbf16, #tpu.memory_space<vmem>>, vector<256x128xbf16>
    tpu.vector_store %arg8[%c0_126, %c896_127], %73 {strides = array<i32>} : memref<256x1152xbf16, #tpu.memory_space<vmem>>, vector<256x128xbf16>,
    %c0_128 = arith.constant 0 : index
    %c2_129 = arith.constant 2 : index
    %c2_130 = arith.constant 2 : index
    %c0_131 = arith.constant 0 : index
    %75 = vector.load %arg7[%c0_128, %c2_129, %c2_130, %c0_131] : memref<1x18x18x128xbf16, #tpu.memory_space<vmem>>, vector<1x16x16x128xbf16>
    %76 = vector.shape_cast %75 : vector<1x16x16x128xbf16> to vector<256x128xbf16>
    %c0_132 = arith.constant 0 : index
    %c1024_133 = arith.constant 1024 : index
    %77 = vector.load %arg8[%c0_132, %c1024_133] : memref<256x1152xbf16, #tpu.memory_space<vmem>>, vector<256x128xbf16>
    tpu.vector_store %arg8[%c0_132, %c1024_133], %76 {strides = array<i32>} : memref<256x1152xbf16, #tpu.memory_space<vmem>>, vector<256x128xbf16>,
    %c0_134 = arith.constant 0 : index
    %c0_135 = arith.constant 0 : index
    %78 = vector.load %arg8[%c0_134, %c0_135] : memref<256x1152xbf16, #tpu.memory_space<vmem>>, vector<256x1152xbf16>
    %c0_136 = arith.constant 0 : index
    %c0_137 = arith.constant 0 : index
    %79 = vector.load %arg4[%c0_136, %c0_137] : memref<1152x128xbf16, #tpu.memory_space<vmem>>, vector<1152x128xbf16>
    %cst_138 = arith.constant dense<0.000000e+00> : vector<256x128xf32>
    %80 = tpu.matmul %78, %79, %cst_138 {dimension_numbers = #tpu.dot_dimension_numbers<[1], [0], [0], [1], [0, 0, 1, 1], [], []>} : vector<256x1152xbf16>, vector<1152x128xbf16>, vector<256x128xf32> -> vector<256x128xf32>
    %c0_139 = arith.constant 0 : index
    %c0_140 = arith.constant 0 : index
    %81 = vector.load %arg5[%c0_139, %c0_140] : memref<1x128xf32, #tpu.memory_space<vmem>>, vector<1x128xf32>
    %82 = vector.broadcast %81 : vector<1x128xf32> to vector<256x128xf32>
    %83 = arith.addf %80, %82 : vector<256x128xf32>
    %c0_141 = arith.constant 0 : index
    %c0_142 = arith.constant 0 : index
    %c0_143 = arith.constant 0 : index
    %c0_144 = arith.constant 0 : index
    %84 = vector.load %arg1[%c0_141, %c0_142, %c0_143, %c0_144] : memref<1x16x16x4xf32, #tpu.memory_space<vmem>>, vector<1x16x16x4xf32>
    %85 = vector.shape_cast %84 : vector<1x16x16x4xf32> to vector<1x256x4xf32>
    %cst_145 = arith.constant 0.000000e+00 : f32
    %86 = vector.broadcast %cst_145 : f32 to vector<1x256x124xf32>
    %87 = tpu.concatenate %85, %86 in 2 : vector<1x256x4xf32>, vector<1x256x124xf32> -> vector<1x256x128xf32>
    %88 = vector.shape_cast %83 : vector<256x128xf32> to vector<1x256x128xf32>
    %89 = arith.addf %88, %87 : vector<1x256x128xf32>
    %cst_146 = arith.constant 0.000000e+00 : f32
    %90 = vector.broadcast %cst_146 : f32 to vector<1x256x128xf32>
    %91 = arith.maximumf %89, %90 : vector<1x256x128xf32>
    %c0_147 = arith.constant 0 : index
    %c0_148 = arith.constant 0 : index
    %c0_149 = arith.constant 0 : index
    %92 = vector.load %arg6[%c0_147, %c0_148, %c0_149] : memref<1x256x128xf32, #tpu.memory_space<vmem>>, vector<1x256x128xf32>
    tpu.vector_store %arg6[%c0_147, %c0_148, %c0_149], %91 {strides = array<i32>} : memref<1x256x128xf32, #tpu.memory_space<vmem>>, vector<1x256x128xf32>,
    return
  }
  func.func @transform_0(%arg0: i32) -> (i32, i32, i32, i32) {
    %c0_i32 = arith.constant 0 : i32
    %c0_i32_0 = arith.constant 0 : i32
    %c0_i32_1 = arith.constant 0 : i32
    %c0_i32_2 = arith.constant 0 : i32
    return %arg0, %c0_i32, %c0_i32_0, %c0_i32_1 : i32, i32, i32, i32
  }
  func.func @transform_1(%arg0: i32) -> (i32, i32) {
    %c0_i32 = arith.constant 0 : i32
    %c0_i32_0 = arith.constant 0 : i32
    %c0_i32_1 = arith.constant 0 : i32
    return %c0_i32, %c0_i32_0 : i32, i32
  }
  func.func @transform_2(%arg0: i32) -> (i32, i32) {
    %c0_i32 = arith.constant 0 : i32
    %c0_i32_0 = arith.constant 0 : i32
    %c0_i32_1 = arith.constant 0 : i32
    return %c0_i32, %c0_i32_0 : i32, i32
  }
  func.func @transform_3(%arg0: i32) -> (i32, i32) {
    %c0_i32 = arith.constant 0 : i32
    %c0_i32_0 = arith.constant 0 : i32
    %c0_i32_1 = arith.constant 0 : i32
    return %c0_i32, %c0_i32_0 : i32, i32
  }
  func.func @transform_4(%arg0: i32) -> (i32, i32) {
    %c0_i32 = arith.constant 0 : i32
    %c0_i32_0 = arith.constant 0 : i32
    %c0_i32_1 = arith.constant 0 : i32
    return %c0_i32, %c0_i32_0 : i32, i32
  }
  func.func @transform_5(%arg0: i32) -> (i32, i32, i32) {
    %c0_i32 = arith.constant 0 : i32
    %c0_i32_0 = arith.constant 0 : i32
    %c0_i32_1 = arith.constant 0 : i32
    return %arg0, %c0_i32, %c0_i32_0 : i32, i32, i32
  }
}

</mosaic_0001>

<bundles_post_ra>
// kernel: tpu_custom_call.1
= control target key start
LH: loop header
LB: loop body
LE: loop exit
PB: predicated region body
PF: predicated region fallthrough
CT: control target
= control target key end

     0   :  { %10 = vsyncpa [#allocation5], 0  ;;  %s15496_s0 = inlined_call_operand.vmem [shape: f32[2,16,16,4], index: 0, kind: input, shape index: {}]   ;;  %s15497_s1 = inlined_call_operand.vmem [shape: bf16[1152,128], index: 1, kind: input, shape index: {}]   ;;  %s15498_s2 = inlined_call_operand.vmem [shape: f32[1,128], index: 2, kind: input, shape index: {}]   ;;  %s15499_s3 = inlined_call_operand.hbm [shape: bf16[1152,128], index: 3, kind: input, shape index: {}]   ;;  %s15500_s4 = inlined_call_operand.vmem [shape: f32[1,128], index: 4, kind: input, shape index: {}]   ;;  %s15501_s5 = inlined_call_operand.hbm [shape: f32[2,256,128], index: 5, kind: output, shape index: {}]  }
   0x1   :  { %11 = vsyncpa [#allocation6], 0 }
   0x2   :  { %13 = vsyncpa [#allocation6 + $0x1], 0  ;;  %s12264_s18 = smov 0   ;;  %s12266_s19 = smov 0  }
   0x3   :  { %s12268_s20 = smov 0   ;;  %s12270_s21 = smov 0  }
   0x4 LB: > { %s12285_s22 = sadd.s32 4294967295, %s12225_s21   ;;  %s10153_s23 = sadd.s32 4294967294, %s12225_s21   ;;  %s12225_s21 = sphi %s12270_s21, %s15638_s21   ;;  %s12221_s20 = sphi %s12268_s20, %s15637_s20   ;;  %s12217_s19 = sphi %s12266_s19, %s15636_s19   ;;  %s12213_s18 = sphi %s12264_s18, %s15635_s18  }
   0x5   : > { %s12289_s24 = sadd.s32 1, %s12225_s21   ;;  %s136_s25 = sadd.s32 1, %s12221_s20 }
   0x6   : > { %s133_s26 = ssub.s32 %s12225_s21, %s12289_s24  ;;  %p146_p0 = scmp.ne.s32.totalorder %s12221_s20, %s12217_s19 }
   0x7   : > { %p134_p1 = scmp.eq.s32.totalorder %s133_s26, 0  ;;  %p147_p2 = scmp.eq.s32.totalorder %s12285_s22, 1 }
   0x8   : > { %p152_p3 = scmp.ne.s32.totalorder %s12217_s19, %s12213_s18  ;;  %p153_p4 = scmp.eq.s32.totalorder %s10153_s23, 1 }
   0x9   : > { %s12300_s27 = scalar_select %p134_p1, %s12221_s20, %s136_s25  }
   0xa   : > { %p12302_p5 = por %p147_p2, %p146_p0  ;;  %p12306_p6 = por %p153_p4, %p152_p3 }
   0xb   : > { %p10154_p7 = scmp.ge.s32.totalorder %s12225_s21, 1  ;;  %p160_p8 = scmp.lt.s32.totalorder %s12225_s21, 3 }
   0xc   : > { %s15511_s28 = scalar_select %p12302_p5, 1, 0 }
   0xd   : > { %s15512_s29 = scalar_select %p12306_p6, 1, 0 }
   0xe   : > { %p15502_p9 = scmp.eq.s32.totalorder %s12285_s22, 0  ;;  %p12313_p10 = pnand %p10154_p7, %p160_p8 }
   0xf   : > { %s12227_s6 = smov [#allocation4]   ;;  %s12131_s11 = scalar_lea.hbm %s15499_s3, 9216 }
  0x10   : > { %s15513_s30 = scalar_select %p12313_p10, 1, 0 }
  0x11   : > { %s178_s7 = sshll.u32 %s12227_s6, 4  ;;  %p11841_p11 = pneg %p12313_p10  ;;  %s179_s7 = int_to_ptr.vmem [resolvable:$true] %s178_s7 }
  0x12   : > { %p12132_p13 = scmp.ne.s32.totalorder %s15499_s3, %s12131_s11  ;;  %p12138_p3 = scmp.lt.u32.totalorder %s12131_s11, %s15499_s3 }
  0x13   : > { %p12321_p12 = pnand %p15502_p9, %p11841_p11 }
  0x15   : > { %p12133_p0 = pneg %p12321_p12 }
  0x17   : > { %p12134_p1 = pnand %p12133_p0, %p12132_p13 }
  0x19   : > { %p12135_p2 = pneg %p12134_p1 }
  0x1b   : > { %p12140_p4 = pnand %p12138_p3, %p12135_p2 }
  0x1d   : > { %12143 = shalt.err (!%p12140_p4)
}
  0x1e   : > { %s12144_s16 = scalar_lea.vmem %s179_s7, 9216  ;;  %p12152_p9 = scmp.lt.s32.totalorder %s179_s7, %s179_s7 }
  0x1f   : > { %p12145_p7 = scmp.ne.s32.totalorder %s179_s7, %s12144_s16  ;;  %p12153_p6 = scmp.lt.s32.totalorder %s12144_s16, %s12144_s16 }
  0x21   : > { %p12147_p8 = pnand %p12145_p7, %p12133_p0  ;;  %p12154_p5 = por %p12153_p6, %p12152_p9 }
  0x23   : > { %p12148_p11 = pneg %p12147_p8 }
  0x25   : > { %p12155_p10 = pnand %p12154_p5, %p12148_p11 }
  0x27   : > { %12158 = shalt.err (!%p12155_p10)
}
  0x28   : > { %s12228_s17 = smov 64   ;;  %s12229_s23 = smov 4  }
  0x29   : > { %11844 = dma.hbm_to_vmem [thread:$0]  (!%p12321_p12), %s15499_s3, 9216, %s179_s7, [#allocation5], %s12228_s17, %s12228_s17, %s12229_s23  }
  0x2a   : > { %p15515_p13 = scmp.ne.s32.totalorder %s15513_s30, 0 }
  0x2c   : > { %205 = sbr.rel (%p15515_p13) target bundleno = 1248 (0x4e0), region = 40 }
  0x33   : > { %p15516_p1 = scmp.eq.s32.totalorder %s12285_s22, 0 }
  0x35   : > { %12204 = dma.done.wait (%p15516_p1), [#allocation5], 9216   ;;  %p15517_p0 = pmov %p15516_p1 }
  0x36   : > { %v15505_v0 = vmov 0   ;;  %v11890_v1 = vld [vmem:[%s15497_s1 + $0x40] sm:$0xff]   ;;  %v11894_v5 = vld [vmem:[%s15497_s1 + $0x48] sm:$0xff]   ;;  %v11898_v9 = vld [vmem:[%s15497_s1 + $0x50] sm:$0xff]   ;;  %p233_p5 = scmp.lt.s32.totalorder %s12285_s22, 1  ;;  %vm287_vm3 = vcmask 31744  }
  0x37   : > { %12206 = vsyncadd (%p15517_p0), [#allocation5], 4294958080  ;;  %321 = vst [vmem:[#allocation2] sm:$0xf] %v15505_v0  ;;  %v11891_v2 = vld [vmem:[%s15497_s1] sm:$0xff]   ;;  %10795 = vmatprep.subr.bf16.mxu0 %v11890_v1  ;;  %v11895_v6 = vld [vmem:[%s15497_s1 + $0x8] sm:$0xff]  }
  0x38   : > { %322 = vst [vmem:[#allocation2 + $0x4] sm:$0xf] %v15505_v0  ;;  %323 = vst [vmem:[#allocation2 + $0x8] sm:$0x1] %v15505_v0  ;;  %v11892_v3 = vld [vmem:[%s15497_s1 + $0xc0] sm:$0xff]   ;;  %10796 = vmatpush3.bf16.msra.mxu0 %v11891_v2  ;;  %v11896_v7 = vld [vmem:[%s15497_s1 + $0xc8] sm:$0xff]  }
  0x39   : > { %325 = vst [vmem:[#allocation2 + $0xcc] sm:$0xf] %v15505_v0  ;;  %326 = vst [vmem:[#allocation2 + $0xd0] sm:$0xf] %v15505_v0  ;;  %v11893_v4 = vld [vmem:[%s15497_s1 + $0x80] sm:$0xff]   ;;  %10907 = vmatprep.subr.bf16.mxu1 %v11892_v3  ;;  %10797 = vmatprep.subr.bf16.mxu0 %v11894_v5  ;;  %v11897_v8 = vld [vmem:[%s15497_s1 + $0x88] sm:$0xff]  }
  0x3a   : > { %327 = vst [vmem:[#allocation2 + $0xd4] sm:$0x1] %v15505_v0  ;;  %10908 = vmatpush3.bf16.msra.mxu1 %v11893_v4  ;;  %v11899_v10 = vld [vmem:[%s15497_s1 + $0x10] sm:$0xff]   ;;  %v11902_v13 = vld [vmem:[%s15497_s1 + $0x58] sm:$0xff]   ;;  %v11906_v17 = vld [vmem:[%s15497_s1 + $0x60] sm:$0xff]   ;;  %s234_s11 = scalar_select %p233_p5, %s12285_s22, 1 }
  0x3b   : > { %10909 = vmatprep.subr.bf16.mxu1 %v11896_v7  ;;  %v11900_v11 = vld [vmem:[%s15497_s1 + $0xd0] sm:$0xff]   ;;  %v11903_v14 = vld [vmem:[%s15497_s1 + $0x18] sm:$0xff]   ;;  %v11907_v18 = vld [vmem:[%s15497_s1 + $0x20] sm:$0xff]   ;;  %vm908_vm0 = vsmask.f32 3328  ;;  %v15518_v45 = vmov 0 }
  0x3c   : > { %10798 = vmatpush3.bf16.msra.mxu0 %v11895_v6  ;;  %v11901_v12 = vld [vmem:[%s15497_s1 + $0x90] sm:$0xff]   ;;  %v11904_v15 = vld [vmem:[%s15497_s1 + $0xd8] sm:$0xff]   ;;  %v11908_v19 = vld [vmem:[%s15497_s1 + $0xe0] sm:$0xff]   ;;  %vm909_vm1 = vsmask.f32 7440  ;;  %s10793_s26 = sshll.u32 %s234_s11, 8 }
  0x3d   : > { %10799 = vmatprep.subr.bf16.mxu0 %v11898_v9  ;;  %v11905_v16 = vld [vmem:[%s15497_s1 + $0x98] sm:$0xff]   ;;  %v11909_v20 = vld [vmem:[%s15497_s1 + $0xa0] sm:$0xff]   ;;  %v11910_v21 = vld [vmem:[%s15497_s1 + $0x68] sm:$0xff]   ;;  %vm457_vm2 = vsmask.f32 256  ;;  %s12454_s9 = scalar_lea.vmem %s15496_s0, %s10793_s26  ;;  %vm456_vm5 = vcmask 1040384  }
  0x3e   : > { %10910 = vmatpush3.bf16.msra.mxu1 %v11897_v8  ;;  %v11911_v22 = vld [vmem:[%s15497_s1 + $0x28] sm:$0xff]   ;;  %v11914_v25 = vld [vmem:[%s15497_s1 + $0x70] sm:$0xff]   ;;  %v11918_v29 = vld [vmem:[%s15497_s1 + $0x78] sm:$0xff]   ;;  %vm1471_vm6 = vcmask 1042432   ;;  %vm1472_vm7 = vcmask 1046532   ;;  %v15521_v56 = vmov 0 }
  0x3f   : > { %10911 = vmatprep.subr.bf16.mxu1 %v11900_v11  ;;  %v11912_v23 = vld [vmem:[%s15497_s1 + $0xe8] sm:$0xff]   ;;  %v11915_v26 = vld [vmem:[%s15497_s1 + $0x30] sm:$0xff]   ;;  %v11919_v30 = vld [vmem:[%s15497_s1 + $0x38] sm:$0xff]   ;;  %s230_s30 = sand.u32 1, %s12217_s19   ;;  %p15633_p9 = scmp.ne.s32.totalorder %s15511_s28, 0 }
  0x40   : > { %10800 = vmatpush3.bf16.msra.mxu0 %v11899_v10  ;;  %v11913_v24 = vld [vmem:[%s15497_s1 + $0xa8] sm:$0xff]   ;;  %v11916_v27 = vld [vmem:[%s15497_s1 + $0xf0] sm:$0xff]   ;;  %v11920_v31 = vld [vmem:[%s15497_s1 + $0xf8] sm:$0xff]   ;;  %s10159_s6 = sshll.u32 %s230_s30, 8  ;;  %s12231_s14 = smov [#allocation7]  }
  0x41   : > { %10801 = vmatprep.subr.bf16.mxu0 %v11902_v13  ;;  %v11917_v28 = vld [vmem:[%s15497_s1 + $0xb0] sm:$0xff]   ;;  %v860_v32 = vld [vmem:[#allocation2] sm:$0xf]  ;;  %v861_v33 = vld [vmem:[#allocation2 + $0x4] sm:$0xf]  ;;  %s15328_s7 = scalar_lea.vmem [#allocation7], %s10159_s6 }
  0x42   : > { %10912 = vmatpush3.bf16.msra.mxu1 %v11901_v12  ;;  %v862_v34 = vld [vmem:[#allocation2 + $0x8] sm:$0x1]  ;;  %v912_v35 = vshrl.u32 %v860_v32, 16  ;;  %v915_v36 = vshll.u32 %v860_v32, 16  ;;  %v921_v37 = vshll.u32 %v861_v33, 16  ;;  %v925_v38 = vshrl.u32 %v861_v33, 16  ;;  %vm12458_vm4 = vmor %vm908_vm0, %vm909_vm1 }
  0x43   : > { %10913 = vmatprep.subr.bf16.mxu1 %v11904_v15  ;;  %v931_v39 = vshll.u32 %v862_v34, 16  ;;  %v11921_v40 = vld [vmem:[%s15497_s1 + $0xb8] sm:$0xff]   ;;  %v15519_v45 = vsel %vm12458_vm4, 4294967295, %v15518_v45  ;;  %v11923_v49 = vld [vmem:[%s15497_s1 + $0x140] sm:$0xff]   ;;  %v240_v51 = vld [vmem:[%s12454_s9 + $0x8] sm:$0xff]  ;;  %s10079_s8 = sshll.u32 %s15328_s7, 4  ;;  %s15448_s8 = int_to_ptr.vmem [resolvable:$true] %s10079_s8 }
  0x44   : > { %10802 = vmatpush3.bf16.msra.mxu0 %v11903_v14  ;;  %v914_v41 = vrot.slane %v912_v35, 4  ;;  %v917_v42 = vrot.slane %v915_v36, 5  ;;  %v923_v43 = vrot.slane %v921_v37, 5  ;;  %v927_v44 = vrot.slane %v925_v38, 4  ;;  %15520 = vst [vmem:[#allocation10_spill] sm:$0xff] %v15519_v45  ;;  %v239_v50 = vld [vmem:[%s12454_s9] sm:$0xff]  ;;  %vm12468_vm8 = vmand %vm456_vm5, %vm457_vm2 }
  0x45   : > { %10803 = vmatprep.subr.bf16.mxu0 %v11906_v17  ;;  %v933_v48 = vrot.slane %v931_v39, 5  ;;  %v11922_v52 = vld [vmem:[#allocation2] sm:$0xff]   ;;  %v271_v53 = vpack.c.bf16 %v240_v51, %v239_v50  ;;  %v15522_v56 = vsel %vm12468_vm8, 4294967295, %v15521_v56  ;;  %v1377_v60 = vld [vmem:[#allocation2 + $0x8] sm:$0x1]  ;;  %vm12474_vm9 = vmor %vm1471_vm6, %vm1472_vm7  ;;  %s12159_s13 = scalar_lea.vmem %s15448_s8, 4096 }
  0x46   : > { %10914 = vmatpush3.bf16.msra.mxu1 %v11905_v16  ;;  %v918_v46 = vor.u32 %v917_v42, %v914_v41  ;;  %v928_v47 = vor.u32 %v927_v44, %v923_v43  ;;  %15523 = vst [vmem:[#allocation11_spill] sm:$0xff] %v15522_v56  ;;  %v1375_v57 = vld [vmem:[#allocation2] sm:$0xe]  ;;  %v1376_v58 = vld [vmem:[#allocation2 + $0x4] sm:$0xf]  ;;  %v241_v1 = vld [vmem:[%s12454_s9 + $0x10] sm:$0xff]  ;;  %p12160_p6 = scmp.ne.s32.totalorder %s15448_s8, %s12159_s13 }
  0x47   : > { %10915 = vmatprep.subr.bf16.mxu1 %v11908_v19  ;;  %v290_v59 = vsel %vm287_vm3, %v271_v53, 0  ;;  %v10242_v62 = vrot.slane %v1375_v57, 9  ;;  %v1476_v63 = vrot.slane %v1376_v58, 5  ;;  %5135 = vst [vmem:[#allocation2] sm:$0xf] %v15505_v0  ;;  %v11925_v6 = vld [vmem:[%s15497_s1 + $0x100] sm:$0xff]  }
  0x48   : > { %10804 = vmatpush3.bf16.msra.mxu0 %v11907_v18  ;;  %v919_v54 = vrot.slane %v918_v46, 4  ;;  %v929_v55 = vrot.slane %v928_v47, 4  ;;  %5136 = vst [vmem:[#allocation2 + $0x4] sm:$0xf] %v15505_v0  ;;  %v328_v4 = vshrl.u32 %v290_v59, 16  ;;  %v331_v5 = vshll.u32 %v290_v59, 16  ;;  %p12161_p10 = pnand %p12160_p6, %p15633_p9 }
  0x49   : > { %10805 = vmatprep.subr.bf16.mxu0 %v11910_v21  ;;  %5137 = vst [vmem:[#allocation2 + $0x8] sm:$0x1] %v15505_v0  ;;  %v242_v7 = vld [vmem:[%s12454_s9 + $0x18] sm:$0xff]  ;;  %v243_v9 = vld [vmem:[%s12454_s9 + $0x20] sm:$0xff]  ;;  %v244_v10 = vld [vmem:[%s12454_s9 + $0x28] sm:$0xff]  ;;  %v1478_v15 = vrot.slane %v1476_v63, 4  ;;  %v12501_v21 = vsel %vm12474_vm9, %v10242_v62, %v1476_v63 }
  0x4a   : > { %10916 = vmatpush3.bf16.msra.mxu1 %v11909_v20  ;;  %v924_v2 = vsel %vm12458_vm4, %v919_v54, %v923_v43  ;;  %v934_v3 = vsel %vm12458_vm4, %v929_v55, %v933_v48  ;;  %v330_v11 = vrot.slane %v328_v4, 7  ;;  %v272_v12 = vpack.c.bf16 %v242_v7, %v241_v1  ;;  %v11929_v13 = vld [vmem:[%s15497_s1 + $0x148] sm:$0xff]   ;;  %v245_v17 = vld [vmem:[%s12454_s9 + $0x30] sm:$0xff]  ;;  %v246_v18 = vld [vmem:[%s12454_s9 + $0x38] sm:$0xff]  ;;  %p12162_p12 = pneg %p12161_p10  ;;  %s12163_s15 = sshll.u32 %s12231_s14, 4  ;;  %s12164_s15 = int_to_ptr.vmem [resolvable:$false] %s12163_s15 }
  0x4b   : > { %10917 = vmatprep.subr.bf16.mxu1 %v11912_v23  ;;  %v10226_v8 = vcombine.low %v924_v2, %v934_v3  ;;  %v273_v14 = vpack.c.bf16 %v244_v10, %v243_v9  ;;  %v1479_v16 = vrot.slane %v1377_v60, 5  ;;  %v11931_v23 = vld [vmem:[%s15497_s1 + $0x108] sm:$0xff]   ;;  %v274_v33 = vpack.c.bf16 %v246_v18, %v245_v17  ;;  %v11935_v34 = vld [vmem:[%s15497_s1 + $0x150] sm:$0xff]   ;;  %v11941_v55 = vld [vmem:[%s15497_s1 + $0x158] sm:$0xff]   ;;  %s12165_s16 = scalar_lea.vmem %s12164_s15, 8192  ;;  %p12166_p2 = scmp.lt.s32.totalorder %s15448_s8, %s12164_s15 }
  0x4c   : > { %10806 = vmatpush3.bf16.msra.mxu0 %v11911_v22  ;;  %v333_v19 = vor.u32 %v331_v5, %v330_v11  ;;  %v475_v20 = vsel %vm12468_vm8, %v330_v11, 0  ;;  %v292_v22 = vsel %vm287_vm3, %v272_v12, 0  ;;  %v249_v39 = vld [vmem:[%s12454_s9 + $0x50] sm:$0xff]  ;;  %v11943_v3 = vld [vmem:[%s15497_s1 + $0x118] sm:$0xff]   ;;  %p12167_p3 = scmp.lt.s32.totalorder %s12165_s16, %s12159_s13 }
  0x4d   : > { %10807 = vmatprep.subr.bf16.mxu0 %v11914_v25  ;;  %4314 = vmatprep.mubr.bf16.mxu0 %v10226_v8  ;;  %v10164_v25 = vcombine.low %v475_v20, %v475_v20  ;;  %v12519_v41 = vsel %vm12474_vm9, %v1478_v15, %v1479_v16  ;;  %v296_v43 = vsel %vm287_vm3, %v274_v33, 0  ;;  %v11937_v50 = vld [vmem:[%s15497_s1 + $0x110] sm:$0xff]   ;;  %v11947_v8 = vld [vmem:[%s15497_s1 + $0x160] sm:$0xff]  }
  0x4e   : > { %10918 = vmatpush3.bf16.msra.mxu1 %v11913_v24  ;;  %v247_v24 = vld [vmem:[%s12454_s9 + $0x40] sm:$0xff]  ;;  %v346_v48 = vshrl.u32 %v296_v43, 16  ;;  %v10258_v9 = vcombine.low %v12501_v21, %v12519_v41  ;;  %p12168_p4 = por %p12167_p3, %p12166_p2 }
  0x4f   : > { %10919 = vmatprep.subr.bf16.mxu1 %v11916_v27  ;;  %v337_v27 = vshll.u32 %v292_v22, 16  ;;  %670 = vst [vmem:[#allocation2 + $0x14] sm:$0x1] %v10164_v25 }
  0x50   : > { %10808 = vmatpush3.bf16.msra.mxu0 %v11915_v26  ;;  %v334_v26 = vshrl.u32 %v292_v22, 16  ;;  %v348_v59 = vrot.slane %v346_v48, 7  ;;  %p12169_p7 = pnand %p12168_p4, %p12162_p12 }
  0x51   : > { %10809 = vmatprep.subr.bf16.mxu0 %v11918_v29  ;;  %v248_v29 = vld [vmem:[%s12454_s9 + $0x48] sm:$0xff] }
  0x52   : > { %10920 = vmatpush3.bf16.msra.mxu1 %v11917_v28  ;;  %v294_v28 = vsel %vm287_vm3, %v273_v14, 0  ;;  %v336_v37 = vrot.slane %v334_v26, 7  ;;  %v275_v38 = vpack.c.bf16 %v248_v29, %v247_v24  ;;  %v478_v7 = vsel %vm12468_vm8, %v348_v59, 0 }
  0x53   : > { %10921 = vmatprep.subr.bf16.mxu1 %v11920_v31  ;;  %v340_v31 = vshrl.u32 %v294_v28, 16  ;;  %v343_v32 = vshll.u32 %v294_v28, 16  ;;  %v10173_v12 = vcombine.low %v478_v7, %v478_v7 }
  0x54   : > { %10810 = vmatpush3.bf16.msra.mxu0 %v11919_v30  ;;  %v459_v30 = vsel %vm12468_vm8, 0, %v333_v19  ;;  %v339_v46 = vor.u32 %v337_v27, %v336_v37  ;;  %v476_v47 = vsel %vm12468_vm8, %v336_v37, 0  ;;  %v12530_v54 = vsel %vm287_vm3, %v275_v38, 0  ;;  %v11949_v27 = vld [vmem:[%s15497_s1 + $0x120] sm:$0xff]  }
  0x55   : > { %11019 = vmatprep.subr.bf16.mxu0 %v11923_v49  ;;  %v10162_v35 = vcombine.low %v459_v30, %v459_v30  ;;  %v10163_v36 = vcombine.high %v459_v30, %v459_v30  ;;  %v342_v42 = vrot.slane %v340_v31, 7  ;;  %v349_v49 = vshll.u32 %v296_v43, 16  ;;  %679 = vst [vmem:[#allocation2 + $0x38] sm:$0x1] %v10173_v12 }
  0x56   : > { %10922 = vmatpush3.bf16.msra.mxu1 %v11921_v40  ;;  %v250_v40 = vld [vmem:[%s12454_s9 + $0x58] sm:$0xff]  ;;  %v10167_v51 = vcombine.low %v476_v47, %v476_v47  ;;  %v460_v57 = vsel %vm12468_vm8, 0, %v339_v46  ;;  %v352_v60 = vshrl.u32 %v12530_v54, 16  ;;  %v355_v2 = vshll.u32 %v12530_v54, 16  ;;  %v865_v10 = vld [vmem:[#allocation2 + $0x14] sm:$0x1] }
  0x57   : > { %4315 = vmatmul.mubr.bf16.vlgmr.msra.gmra.mrb[0].mxu0 %v11922_v52  ;;  %v276_v44 = vpack.c.bf16 %v250_v40, %v249_v39  ;;  %668 = vst [vmem:[#allocation2 + $0xc] sm:$0xf] %v10162_v35  ;;  %669 = vst [vmem:[#allocation2 + $0x10] sm:$0xf] %v10163_v36  ;;  %v345_v52 = vor.u32 %v343_v32, %v342_v42  ;;  %v477_v53 = vsel %vm12468_vm8, %v342_v42, 0  ;;  %v955_v15 = vshll.u32 %v865_v10, 16 }
  0x58   : > { %11020 = vmatpush3.bf16.msra.mxu0 %v11925_v6  ;;  %v10170_v58 = vcombine.low %v477_v53, %v477_v53  ;;  %v10165_v62 = vcombine.low %v460_v57, %v460_v57  ;;  %v10166_v63 = vcombine.high %v460_v57, %v460_v57  ;;  %673 = vst [vmem:[#allocation2 + $0x20] sm:$0x1] %v10167_v51  ;;  %v12551_v11 = vld [vmem:[#allocation2 + $0x14] sm:$0x1] }
  0x59   : > { %11021 = vmatprep.subr.bf16.mxu0 %v11929_v13  ;;  %v461_v1 = vsel %vm12468_vm8, 0, %v345_v52  ;;  %v351_v6 = vor.u32 %v349_v49, %v348_v59  ;;  %v12553_v13 = vrot.slane %v352_v60, 7  ;;  %v12556_v14 = vsel %vm287_vm3, %v276_v44, 0 }
  0x5a   : > { %v10168_v4 = vcombine.low %v461_v1, %v461_v1  ;;  %v10169_v5 = vcombine.high %v461_v1, %v461_v1  ;;  %676 = vst [vmem:[#allocation2 + $0x2c] sm:$0x1] %v10170_v58  ;;  %671 = vst [vmem:[#allocation2 + $0x18] sm:$0xf] %v10165_v62  ;;  %v1486_v16 = vrot.slane %v12551_v11, 5  ;;  %v358_v18 = vshrl.u32 %v12556_v14, 16 }
  0x5b   : > { %672 = vst [vmem:[#allocation2 + $0x1c] sm:$0xf] %v10166_v63  ;;  %v462_v17 = vsel %vm12468_vm8, 0, %v351_v6  ;;  %v479_v22 = vsel %vm12468_vm8, %v12553_v13, 0  ;;  %v957_v25 = vrot.slane %v955_v15, 5 }
  0x5c   : > { %11022 = vmatpush3.bf16.msra.mxu0 %v11931_v23  ;;  %674 = vst [vmem:[#allocation2 + $0x24] sm:$0xf] %v10168_v4  ;;  %675 = vst [vmem:[#allocation2 + $0x28] sm:$0xf] %v10169_v5  ;;  %v10171_v20 = vcombine.low %v462_v17, %v462_v17  ;;  %v10172_v21 = vcombine.high %v462_v17, %v462_v17  ;;  %v10176_v26 = vcombine.low %v479_v22, %v479_v22 }
  0x5d   : > { %11023 = vmatprep.subr.bf16.mxu0 %v11935_v34 }
  0x5e   : > { %v11924_v19 = vld [vmem:[#allocation2 + $0xc] sm:$0xff]   ;;  %677 = vst [vmem:[#allocation2 + $0x30] sm:$0xf] %v10171_v20  ;;  %678 = vst [vmem:[#allocation2 + $0x34] sm:$0xf] %v10172_v21 }
  0x5f   : > { %v863_v23 = vld [vmem:[#allocation2 + $0xc] sm:$0xf]  ;;  %v864_v24 = vld [vmem:[#allocation2 + $0x10] sm:$0xf]  ;;  %4475 = vmatprep.mubr.bf16.mxu1 %v11924_v19  ;;  %682 = vst [vmem:[#allocation2 + $0x44] sm:$0x1] %v10176_v26 }
  0x60   : > { %11024 = vmatpush3.bf16.msra.mxu0 %v11937_v50  ;;  %v936_v28 = vshrl.u32 %v863_v23, 16  ;;  %v939_v29 = vshll.u32 %v863_v23, 16  ;;  %v945_v30 = vshll.u32 %v864_v24, 16  ;;  %v949_v31 = vshrl.u32 %v864_v24, 16  ;;  %4476 = vmatmul.mubr.bf16.vlgmr.msra.gmra.mrb[0].mxu1 %v10258_v9  ;;  %v1378_v32 = vld [vmem:[#allocation2 + $0xc] sm:$0xe] }
  0x61   : > { %11025 = vmatprep.subr.bf16.mxu0 %v11941_v55  ;;  %v1379_v33 = vld [vmem:[#allocation2 + $0x10] sm:$0xf]  ;;  %v868_v38 = vld [vmem:[#allocation2 + $0x20] sm:$0x1]  ;;  %v10243_v40 = vrot.slane %v1378_v32, 9 }
  0x62   : > { %v938_v34 = vrot.slane %v936_v28, 4  ;;  %v941_v35 = vrot.slane %v939_v29, 5  ;;  %v947_v36 = vrot.slane %v945_v30, 5  ;;  %v951_v37 = vrot.slane %v949_v31, 4  ;;  %v11927_v39 = vld [vmem:[#allocation2 + $0x18] sm:$0xff]   ;;  %v11926_v55 = vld [vmem:[#allocation2 + $0xc] sm:$0xff]  }
  0x63   : > { %v1483_v43 = vrot.slane %v1379_v33, 5  ;;  %v866_v44 = vld [vmem:[#allocation2 + $0x18] sm:$0xf]  ;;  %v867_v46 = vld [vmem:[#allocation2 + $0x1c] sm:$0xf]  ;;  %v979_v47 = vshll.u32 %v868_v38, 16  ;;  %4483 = vmatprep.mubr.bf16.mxu1 %v11927_v39 }
  0x64   : > { %11026 = vmatpush3.bf16.msra.mxu0 %v11943_v3  ;;  %v942_v41 = vor.u32 %v941_v35, %v938_v34  ;;  %v952_v42 = vor.u32 %v951_v37, %v947_v36  ;;  %v960_v48 = vshrl.u32 %v866_v44, 16  ;;  %v963_v49 = vshll.u32 %v866_v44, 16  ;;  %v11930_v6 = vld [vmem:[#allocation2 + $0x24] sm:$0xff]   ;;  %v1381_v7 = vld [vmem:[#allocation2 + $0x18] sm:$0xe]  ;;  %v12585_v34 = vld [vmem:[%s12454_s9 + $0x70] sm:$0xff] }
  0x65   : > { %11027 = vmatprep.subr.bf16.mxu0 %v11947_v8  ;;  %v969_v50 = vshll.u32 %v867_v46, 16  ;;  %v973_v51 = vshrl.u32 %v867_v46, 16  ;;  %v1484_v57 = vsel %vm12474_vm9, %v10243_v40, %v1483_v43  ;;  %v1485_v58 = vrot.slane %v1483_v43, 4  ;;  %v1382_v12 = vld [vmem:[#allocation2 + $0x1c] sm:$0xf]  ;;  %v12577_v24 = vld [vmem:[%s12454_s9 + $0x60] sm:$0xff] }
  0x66   : > { %v943_v52 = vrot.slane %v942_v41, 4  ;;  %v953_v53 = vrot.slane %v952_v42, 4  ;;  %v962_v59 = vrot.slane %v960_v48, 4  ;;  %v965_v60 = vrot.slane %v963_v49, 5  ;;  %v1383_v15 = vld [vmem:[#allocation2 + $0x20] sm:$0x1] }
  0x67   : > { %v971_v62 = vrot.slane %v969_v50, 5  ;;  %v975_v63 = vrot.slane %v973_v51, 4  ;;  %v1487_v4 = vsel %vm12474_vm9, %v1485_v58, %v1486_v16  ;;  %v981_v5 = vrot.slane %v979_v47, 5  ;;  %v869_v17 = vld [vmem:[#allocation2 + $0x24] sm:$0xf]  ;;  %v12580_v16 = vld [vmem:[%s12454_s9 + $0x68] sm:$0xff] }
  0x68   : > { %11028 = vmatpush3.bf16.msra.mxu0 %v11949_v27  ;;  %v948_v1 = vsel %vm12458_vm4, %v943_v52, %v947_v36  ;;  %v958_v3 = vsel %vm12458_vm4, %v953_v53, %v957_v25  ;;  %v10259_v9 = vcombine.low %v1484_v57, %v1487_v4  ;;  %v966_v10 = vor.u32 %v965_v60, %v962_v59  ;;  %v870_v22 = vld [vmem:[#allocation2 + $0x28] sm:$0xf]  ;;  %v871_v27 = vld [vmem:[#allocation2 + $0x2c] sm:$0x1]  ;;  %v11928_v40 = vld [vmem:[#allocation2 + $0x18] sm:$0xff]  }
  0x69   : > { %v10227_v8 = vcombine.low %v948_v1, %v958_v3  ;;  %v976_v11 = vor.u32 %v975_v63, %v971_v62  ;;  %v10244_v19 = vrot.slane %v1381_v7, 9  ;;  %v1490_v20 = vrot.slane %v1382_v12, 5  ;;  %v12594_v44 = vld [vmem:[%s12454_s9 + $0x78] sm:$0xff]  ;;  %v1384_v48 = vld [vmem:[#allocation2 + $0x24] sm:$0xe] }
  0x6a   : > { %v1493_v21 = vrot.slane %v1383_v15, 5  ;;  %v984_v23 = vshrl.u32 %v869_v17, 16  ;;  %4484 = vmatmul.mubr.bf16.gmra.mrb[4].mxu1 %v10259_v9  ;;  %v967_v25 = vrot.slane %v966_v10, 4  ;;  %v987_v28 = vshll.u32 %v869_v17, 16  ;;  %v1385_v49 = vld [vmem:[#allocation2 + $0x28] sm:$0xf] }
  0x6b   : > { %4322 = vmatprep.mubr.bf16.mxu0 %v10227_v8  ;;  %v977_v26 = vrot.slane %v976_v11, 4  ;;  %v993_v29 = vshll.u32 %v870_v22, 16  ;;  %4491 = vmatprep.mubr.bf16.mxu1 %v11930_v6  ;;  %v1491_v30 = vsel %vm12474_vm9, %v10244_v19, %v1490_v20  ;;  %v1492_v31 = vrot.slane %v1490_v20, 4  ;;  %v1386_v50 = vld [vmem:[#allocation2 + $0x2c] sm:$0x1] }
  0x6c   : > { %4323 = vmatmul.mubr.bf16.gmra.mrb[4].mxu0 %v11926_v55  ;;  %v986_v32 = vrot.slane %v984_v23, 4  ;;  %v997_v33 = vshrl.u32 %v870_v22, 16  ;;  %v972_v35 = vsel %vm12458_vm4, %v967_v25, %v971_v62  ;;  %v989_v37 = vrot.slane %v987_v28, 5  ;;  %v11933_v55 = vld [vmem:[#allocation2 + $0x30] sm:$0xff]   ;;  %v874_v1 = vld [vmem:[#allocation2 + $0x38] sm:$0x1] }
  0x6d   : > { %v982_v36 = vsel %vm12458_vm4, %v977_v26, %v981_v5  ;;  %v995_v38 = vrot.slane %v993_v29, 5  ;;  %v1494_v41 = vsel %vm12474_vm9, %v1492_v31, %v1493_v21  ;;  %v1003_v43 = vshll.u32 %v871_v27, 16  ;;  %v872_v59 = vld [vmem:[#allocation2 + $0x30] sm:$0xf]  ;;  %v873_v63 = vld [vmem:[#allocation2 + $0x34] sm:$0xf] }
  0x6e   : > { %v10228_v39 = vcombine.low %v972_v35, %v982_v36  ;;  %v999_v42 = vrot.slane %v997_v33, 4  ;;  %v10260_v46 = vcombine.low %v1491_v30, %v1494_v41  ;;  %v990_v47 = vor.u32 %v989_v37, %v986_v32  ;;  %v11953_v9 = vld [vmem:[%s15497_s1 + $0x168] sm:$0xff]   ;;  %v1387_v19 = vld [vmem:[#allocation2 + $0x30] sm:$0xe]  ;;  %v1388_v20 = vld [vmem:[#allocation2 + $0x34] sm:$0xf] }
  0x6f   : > { %v277_v51 = vpack.c.bf16 %v12580_v16, %v12577_v24  ;;  %v1005_v53 = vrot.slane %v1003_v43, 5  ;;  %v10245_v57 = vrot.slane %v1384_v48, 9  ;;  %v1497_v58 = vrot.slane %v1385_v49, 5  ;;  %v12615_v21 = vld [vmem:[%s12454_s9 + $0x80] sm:$0xff]  ;;  %v12618_v22 = vld [vmem:[%s12454_s9 + $0x88] sm:$0xff]  ;;  %11029 = vmatprep.subr.bf16.mxu0 %v11953_v9  ;;  %v257_v36 = vld [vmem:[%s12454_s9 + $0x90] sm:$0xff] }
  0x70   : > { %4330 = vmatprep.mubr.bf16.mxu0 %v10228_v39  ;;  %v1000_v52 = vor.u32 %v999_v42, %v995_v38  ;;  %v991_v60 = vrot.slane %v990_v47, 4  ;;  %v1500_v62 = vrot.slane %v1386_v50, 5  ;;  %v357_v3 = vor.u32 %v355_v2, %v12553_v13  ;;  %v1389_v28 = vld [vmem:[#allocation2 + $0x38] sm:$0x1]  ;;  %v877_v29 = vld [vmem:[#allocation2 + $0x44] sm:$0x1] }
  0x71   : > { %v278_v4 = vpack.c.bf16 %v12594_v44, %v12585_v34  ;;  %v1498_v6 = vsel %vm12474_vm9, %v10245_v57, %v1497_v58  ;;  %v1499_v7 = vrot.slane %v1497_v58, 4  ;;  %v1008_v8 = vshrl.u32 %v872_v59, 16  ;;  %v11932_v30 = vld [vmem:[#allocation2 + $0x24] sm:$0xff]   ;;  %v258_v41 = vld [vmem:[%s12454_s9 + $0x98] sm:$0xff]  ;;  %v11934_v34 = vld [vmem:[#allocation2 + $0x30] sm:$0xff]  }
  0x72   : > { %v1001_v5 = vrot.slane %v1000_v52, 4  ;;  %4492 = vmatmul.mubr.bf16.gmra.mrb[8].mxu1 %v10260_v46  ;;  %v996_v54 = vsel %vm12458_vm4, %v991_v60, %v995_v38  ;;  %v1011_v2 = vshll.u32 %v872_v59, 16  ;;  %v1017_v13 = vshll.u32 %v873_v63, 16  ;;  %v11955_v48 = vld [vmem:[%s15497_s1 + $0x128] sm:$0xff]   ;;  %v12634_v58 = vld [vmem:[#allocation2 + $0x44] sm:$0x1] }
  0x73   : > { %v1021_v10 = vshrl.u32 %v873_v63, 16  ;;  %4499 = vmatprep.mubr.bf16.mxu1 %v11933_v55  ;;  %v1501_v12 = vsel %vm12474_vm9, %v1499_v7, %v1500_v62  ;;  %v1010_v15 = vrot.slane %v1008_v8, 4  ;;  %v1027_v17 = vshll.u32 %v874_v1, 16  ;;  %11030 = vmatpush3.bf16.msra.mxu0 %v11955_v48  ;;  %v11959_v60 = vld [vmem:[%s15497_s1 + $0x170] sm:$0xff]   ;;  %v11962_v16 = vld [vmem:[%s15497_s1 + $0x1c0] sm:$0xff]   ;;  %v11964_v48 = vld [vmem:[%s15497_s1 + $0x1c8] sm:$0xff]  }
  0x74   : > { %4331 = vmatmul.mubr.bf16.gmra.mrb[8].mxu0 %v11928_v40  ;;  %v1006_v11 = vsel %vm12458_vm4, %v1001_v5, %v1005_v53  ;;  %v10261_v25 = vcombine.low %v1498_v6, %v1501_v12  ;;  %v1013_v26 = vrot.slane %v1011_v2, 5  ;;  %v1019_v27 = vrot.slane %v1017_v13, 5  ;;  %11031 = vmatprep.subr.bf16.mxu0 %v11959_v60  ;;  %v11961_v8 = vld [vmem:[%s15497_s1 + $0x130] sm:$0xff]  }
  0x75   : > { %v10229_v23 = vcombine.low %v996_v54, %v1006_v11  ;;  %v1023_v31 = vrot.slane %v1021_v10, 4  ;;  %v1029_v32 = vrot.slane %v1027_v17, 5  ;;  %v463_v33 = vsel %vm12468_vm8, 0, %v357_v3  ;;  %11131 = vmatprep.subr.bf16.mxu1 %v11962_v16  ;;  %v11963_v17 = vld [vmem:[%s15497_s1 + $0x180] sm:$0xff]  }
  0x76   : > { %v10246_v35 = vrot.slane %v1387_v19, 9  ;;  %v1014_v37 = vor.u32 %v1013_v26, %v1010_v15  ;;  %v10174_v38 = vcombine.low %v463_v33, %v463_v33  ;;  %v10175_v39 = vcombine.high %v463_v33, %v463_v33  ;;  %11132 = vmatpush3.bf16.msra.mxu1 %v11963_v17  ;;  %v12685_v33 = vld [vmem:[%s12454_s9 + $0xa0] sm:$0xff] }
  0x77   : > { %4338 = vmatprep.mubr.bf16.mxu0 %v10229_v23  ;;  %v1504_v40 = vrot.slane %v1388_v20, 5  ;;  %v1024_v42 = vor.u32 %v1023_v31, %v1019_v27  ;;  %v1507_v43 = vrot.slane %v1389_v28, 5  ;;  %v1051_v46 = vshll.u32 %v877_v29, 16  ;;  %11032 = vmatpush3.bf16.msra.mxu0 %v11961_v8 }
  0x78   : > { %v360_v47 = vrot.slane %v358_v18, 7  ;;  %v1015_v49 = vrot.slane %v1014_v37, 4  ;;  %680 = vst [vmem:[#allocation2 + $0x3c] sm:$0xf] %v10174_v38  ;;  %681 = vst [vmem:[#allocation2 + $0x40] sm:$0xf] %v10175_v39  ;;  %v279_v53 = vpack.c.bf16 %v12618_v22, %v12615_v21  ;;  %v280_v59 = vpack.c.bf16 %v258_v41, %v257_v36  ;;  %11133 = vmatprep.subr.bf16.mxu1 %v11964_v48 }
  0x79   : > { %v1506_v50 = vrot.slane %v1504_v40, 4  ;;  %v361_v52 = vshll.u32 %v12556_v14, 16  ;;  %v1025_v55 = vrot.slane %v1024_v42, 4  ;;  %v1505_v57 = vsel %vm12474_vm9, %v10246_v35, %v1504_v40  ;;  %v12688_v35 = vld [vmem:[%s12454_s9 + $0xa8] sm:$0xff] }
  0x7a   : > { %v480_v18 = vsel %vm12468_vm8, %v360_v47, 0  ;;  %4500 = vmatmul.mubr.bf16.gmra.mrb[12].mxu1 %v10261_v25  ;;  %v1020_v14 = vsel %vm12458_vm4, %v1015_v49, %v1019_v27  ;;  %v12643_v62 = vrot.slane %v1051_v46, 5  ;;  %v302_v6 = vsel %vm287_vm3, %v277_v51, 0 }
  0x7b   : > { %v363_v63 = vor.u32 %v361_v52, %v360_v47  ;;  %v10179_v1 = vcombine.low %v480_v18, %v480_v18  ;;  %v1030_v3 = vsel %vm12458_vm4, %v1025_v55, %v1029_v32  ;;  %v1508_v5 = vsel %vm12474_vm9, %v1506_v50, %v1507_v43  ;;  %v11965_v55 = vld [vmem:[%s15497_s1 + $0x188] sm:$0xff]  }
  0x7c   : > { %4339 = vmatmul.mubr.bf16.gmra.mrb[12].mxu0 %v11932_v30  ;;  %v12657_v7 = vsel %vm287_vm3, %v278_v4, 0  ;;  %v10230_v9 = vcombine.low %v1020_v14, %v1030_v3  ;;  %v364_v2 = vshrl.u32 %v302_v6, 16  ;;  %v367_v24 = vshll.u32 %v302_v6, 16  ;;  %11134 = vmatpush3.bf16.msra.mxu1 %v11965_v55 }
  0x7d   : > { %v464_v54 = vsel %vm12468_vm8, 0, %v363_v63  ;;  %685 = vst [vmem:[#allocation2 + $0x50] sm:$0x1] %v10179_v1  ;;  %v1514_v4 = vrot.slane %v12634_v58, 5  ;;  %v370_v13 = vshrl.u32 %v12657_v7, 16  ;;  %v10262_v10 = vcombine.low %v1505_v57, %v1508_v5 }
  0x7e   : > { %v10177_v44 = vcombine.low %v464_v54, %v464_v54  ;;  %v10178_v51 = vcombine.high %v464_v54, %v464_v54  ;;  %4346 = vmatprep.mubr.bf16.mxu0 %v10230_v9  ;;  %v12669_v11 = vrot.slane %v364_v2, 7  ;;  %v373_v12 = vshll.u32 %v12657_v7, 16 }
  0x7f   : > { %v12673_v15 = vsel %vm287_vm3, %v279_v53, 0  ;;  %v11936_v19 = vld [vmem:[#allocation2 + $0x3c] sm:$0xff]   ;;  %v12679_v20 = vsel %vm287_vm3, %v280_v59, 0  ;;  %v372_v32 = vrot.slane %v370_v13, 7  ;;  %v281_v3 = vpack.c.bf16 %v12688_v35, %v12685_v33 }
  0x80   : > { %683 = vst [vmem:[#allocation2 + $0x48] sm:$0xf] %v10177_v44  ;;  %684 = vst [vmem:[#allocation2 + $0x4c] sm:$0xf] %v10178_v51  ;;  %v875_v21 = vld [vmem:[#allocation2 + $0x3c] sm:$0xf]  ;;  %v369_v23 = vor.u32 %v367_v24, %v12669_v11  ;;  %4507 = vmatprep.mubr.bf16.mxu1 %v11936_v19 }
  0x81   : > { %v876_v22 = vld [vmem:[#allocation2 + $0x40] sm:$0xf]  ;;  %v1032_v25 = vshrl.u32 %v875_v21, 16  ;;  %v1035_v26 = vshll.u32 %v875_v21, 16  ;;  %v1390_v29 = vld [vmem:[#allocation2 + $0x3c] sm:$0xe]  ;;  %v375_v1 = vor.u32 %v373_v12, %v372_v32 }
  0x82   : > { %v1041_v27 = vshll.u32 %v876_v22, 16  ;;  %v1045_v28 = vshrl.u32 %v876_v22, 16  ;;  %4508 = vmatmul.mubr.bf16.gmra.mrb[16].mxu1 %v10262_v10  ;;  %v1391_v30 = vld [vmem:[#allocation2 + $0x40] sm:$0xf]  ;;  %v465_v31 = vsel %vm12468_vm8, 0, %v369_v23  ;;  %v10247_v41 = vrot.slane %v1390_v29, 9 }
  0x83   : > { %v1034_v36 = vrot.slane %v1032_v25, 4  ;;  %v1037_v37 = vrot.slane %v1035_v26, 5  ;;  %v1511_v42 = vrot.slane %v1391_v30, 5  ;;  %v10180_v46 = vcombine.low %v465_v31, %v465_v31  ;;  %v11938_v2 = vld [vmem:[#allocation2 + $0x3c] sm:$0xff]   ;;  %v11968_v26 = vld [vmem:[%s15497_s1 + $0x1d0] sm:$0xff]  }
  0x84   : > { %4347 = vmatmul.mubr.bf16.gmra.mrb[16].mxu0 %v11934_v34  ;;  %v1043_v38 = vrot.slane %v1041_v27, 5  ;;  %v1047_v39 = vrot.slane %v1045_v28, 4  ;;  %v880_v40 = vld [vmem:[#allocation2 + $0x50] sm:$0x1]  ;;  %v10181_v52 = vcombine.high %v465_v31, %v465_v31  ;;  %v466_v23 = vsel %vm12468_vm8, 0, %v375_v1  ;;  %11135 = vmatprep.subr.bf16.mxu1 %v11968_v26 }
  0x85   : > { %v1075_v43 = vshll.u32 %v880_v40, 16  ;;  %v12690_v47 = vld [vmem:[#allocation2 + $0x50] sm:$0x1]  ;;  %v1038_v49 = vor.u32 %v1037_v37, %v1034_v36  ;;  %v1512_v58 = vsel %vm12474_vm9, %v10247_v41, %v1511_v42  ;;  %v1513_v18 = vrot.slane %v1511_v42, 4  ;;  %686 = vst [vmem:[#allocation2 + $0x54] sm:$0xf] %v10180_v46 }
  0x86   : > { %v1048_v50 = vor.u32 %v1047_v39, %v1043_v38  ;;  %v1521_v53 = vrot.slane %v12690_v47, 5  ;;  %687 = vst [vmem:[#allocation2 + $0x58] sm:$0xf] %v10181_v52  ;;  %v482_v25 = vsel %vm12468_vm8, %v372_v32, 0  ;;  %v10183_v32 = vcombine.low %v466_v23, %v466_v23 }
  0x87   : > { %v11939_v57 = vld [vmem:[#allocation2 + $0x48] sm:$0xff]   ;;  %v1039_v59 = vrot.slane %v1038_v49, 4  ;;  %v1515_v5 = vsel %vm12474_vm9, %v1513_v18, %v1514_v4  ;;  %v1077_v17 = vrot.slane %v1075_v43, 5  ;;  %v10184_v39 = vcombine.high %v466_v23, %v466_v23 }
  0x88   : > { %v1049_v60 = vrot.slane %v1048_v50, 4  ;;  %v878_v14 = vld [vmem:[#allocation2 + $0x48] sm:$0xf]  ;;  %v879_v63 = vld [vmem:[#allocation2 + $0x4c] sm:$0xf]  ;;  %4515 = vmatprep.mubr.bf16.mxu1 %v11939_v57  ;;  %v10263_v24 = vcombine.low %v1512_v58, %v1515_v5  ;;  %v10185_v40 = vcombine.low %v482_v25, %v482_v25 }
  0x89   : > { %v1056_v6 = vshrl.u32 %v878_v14, 16  ;;  %v1059_v7 = vshll.u32 %v878_v14, 16  ;;  %v1065_v8 = vshll.u32 %v879_v63, 16  ;;  %v1044_v9 = vsel %vm12458_vm4, %v1039_v59, %v1043_v38  ;;  %v1393_v34 = vld [vmem:[#allocation2 + $0x48] sm:$0xe] }
  0x8a   : > { %v1054_v54 = vsel %vm12458_vm4, %v1049_v60, %v12643_v62  ;;  %v1069_v16 = vshrl.u32 %v879_v63, 16  ;;  %v1394_v12 = vld [vmem:[#allocation2 + $0x4c] sm:$0xf]  ;;  %4516 = vmatmul.mubr.bf16.gmra.mrb[20].mxu1 %v10263_v24  ;;  %v10248_v19 = vrot.slane %v1393_v34, 9  ;;  %v481_v62 = vsel %vm12468_vm8, %v12669_v11, 0  ;;  %v11969_v11 = vld [vmem:[%s15497_s1 + $0x190] sm:$0xff]  }
  0x8b   : > { %v10231_v44 = vcombine.low %v1044_v9, %v1054_v54  ;;  %v1058_v51 = vrot.slane %v1056_v6, 4  ;;  %v1061_v13 = vrot.slane %v1059_v7, 5  ;;  %v1067_v10 = vrot.slane %v1065_v8, 5  ;;  %v11940_v42 = vld [vmem:[#allocation2 + $0x48] sm:$0xff]   ;;  %11136 = vmatpush3.bf16.msra.mxu1 %v11969_v11  ;;  %689 = vst [vmem:[#allocation2 + $0x60] sm:$0xf] %v10183_v32 }
  0x8c   : > { %v1071_v4 = vrot.slane %v1069_v16, 4  ;;  %v1518_v21 = vrot.slane %v1394_v12, 5  ;;  %v10182_v30 = vcombine.low %v481_v62, %v481_v62  ;;  %v881_v31 = vld [vmem:[#allocation2 + $0x54] sm:$0xf]  ;;  %690 = vst [vmem:[#allocation2 + $0x64] sm:$0xf] %v10184_v39 }
  0x8d   : > { %4354 = vmatprep.mubr.bf16.mxu0 %v10231_v44  ;;  %v1062_v22 = vor.u32 %v1061_v13, %v1058_v51  ;;  %v11942_v37 = vld [vmem:[#allocation2 + $0x54] sm:$0xff]   ;;  %v1080_v46 = vshrl.u32 %v881_v31, 16  ;;  %v1083_v47 = vshll.u32 %v881_v31, 16  ;;  %691 = vst [vmem:[#allocation2 + $0x68] sm:$0x1] %v10185_v40  ;;  %v12741_v8 = vld [vmem:[%s12454_s9 + $0xc0] sm:$0xff] }
  0x8e   : > { %4355 = vmatmul.mubr.bf16.gmra.mrb[20].mxu0 %v11938_v2  ;;  %v1072_v27 = vor.u32 %v1071_v4, %v1067_v10  ;;  %v1519_v28 = vsel %vm12474_vm9, %v10248_v19, %v1518_v21  ;;  %v1520_v29 = vrot.slane %v1518_v21, 4  ;;  %v882_v38 = vld [vmem:[#allocation2 + $0x58] sm:$0xf]  ;;  %688 = vst [vmem:[#allocation2 + $0x5c] sm:$0x1] %v10182_v30  ;;  %4523 = vmatprep.mubr.bf16.mxu1 %v11942_v37  ;;  %v12735_v6 = vld [vmem:[%s12454_s9 + $0xb0] sm:$0xff] }
  0x8f   : > { %v1063_v36 = vrot.slane %v1062_v22, 4  ;;  %v1089_v50 = vshll.u32 %v882_v38, 16  ;;  %v1093_v52 = vshrl.u32 %v882_v38, 16  ;;  %v1396_v55 = vld [vmem:[#allocation2 + $0x54] sm:$0xe]  ;;  %v1082_v57 = vrot.slane %v1080_v46, 4 }
  0x90   : > { %v1073_v41 = vrot.slane %v1072_v27, 4  ;;  %v1522_v43 = vsel %vm12474_vm9, %v1520_v29, %v1521_v53  ;;  %v1085_v58 = vrot.slane %v1083_v47, 5  ;;  %v1397_v18 = vld [vmem:[#allocation2 + $0x58] sm:$0xf]  ;;  %v10249_v59 = vrot.slane %v1396_v55, 9  ;;  %v12744_v9 = vld [vmem:[%s12454_s9 + $0xc8] sm:$0xff] }
  0x91   : > { %v1068_v48 = vsel %vm12458_vm4, %v1063_v36, %v1067_v10  ;;  %v10264_v49 = vcombine.low %v1519_v28, %v1522_v43  ;;  %v11970_v60 = vld [vmem:[%s15497_s1 + $0x1d8] sm:$0xff]   ;;  %v1091_v63 = vrot.slane %v1089_v50, 5  ;;  %v1095_v1 = vrot.slane %v1093_v52, 4  ;;  %v12753_v44 = vld [vmem:[%s12454_s9 + $0xd0] sm:$0xff] }
  0x92   : > { %v1078_v53 = vsel %vm12458_vm4, %v1073_v41, %v1077_v17  ;;  %v1525_v5 = vrot.slane %v1397_v18, 5  ;;  %v12738_v7 = vld [vmem:[%s12454_s9 + $0xb8] sm:$0xff]  ;;  %v1086_v2 = vor.u32 %v1085_v58, %v1082_v57  ;;  %v376_v24 = vshrl.u32 %v12673_v15, 16  ;;  %11137 = vmatprep.subr.bf16.mxu1 %v11970_v60  ;;  %v884_v29 = vld [vmem:[#allocation2 + $0x60] sm:$0xf] }
  0x93   : > { %v10232_v14 = vcombine.low %v1068_v48, %v1078_v53  ;;  %v11971_v54 = vld [vmem:[%s15497_s1 + $0x198] sm:$0xff]   ;;  %4524 = vmatmul.mubr.bf16.gmra.mrb[24].mxu1 %v10264_v49  ;;  %v379_v16 = vshll.u32 %v12673_v15, 16  ;;  %v382_v34 = vshrl.u32 %v12679_v20, 16  ;;  %v1096_v10 = vor.u32 %v1095_v1, %v1091_v63  ;;  %v11945_v27 = vld [vmem:[#allocation2 + $0x60] sm:$0xff]  }
  0x94   : > { %v12756_v51 = vld [vmem:[%s12454_s9 + $0xd8] sm:$0xff]  ;;  %v1527_v12 = vrot.slane %v1525_v5, 4  ;;  %v385_v4 = vshll.u32 %v12679_v20, 16  ;;  %11138 = vmatpush3.bf16.msra.mxu1 %v11971_v54  ;;  %v1087_v17 = vrot.slane %v1086_v2, 4  ;;  %v378_v15 = vrot.slane %v376_v24, 7  ;;  %4531 = vmatprep.mubr.bf16.mxu1 %v11945_v27  ;;  %v11946_v27 = vld [vmem:[#allocation2 + $0x60] sm:$0xff]  }
  0x95   : > { %v11973_v13 = vld [vmem:[%s15497_s1 + $0x178] sm:$0xff]   ;;  %4362 = vmatprep.mubr.bf16.mxu0 %v10232_v14  ;;  %v384_v19 = vrot.slane %v382_v34, 7  ;;  %v12766_v21 = vsel %vm287_vm3, %v281_v3, 0  ;;  %v1097_v62 = vrot.slane %v1096_v10, 4  ;;  %v1526_v20 = vsel %vm12474_vm9, %v10249_v59, %v1525_v5  ;;  %v885_v30 = vld [vmem:[#allocation2 + $0x64] sm:$0xf] }
  0x96   : > { %4363 = vmatmul.mubr.bf16.gmra.mrb[24].mxu0 %v11940_v42  ;;  %11033 = vmatprep.subr.bf16.mxu0 %v11973_v13  ;;  %v883_v22 = vld [vmem:[#allocation2 + $0x5c] sm:$0x1]  ;;  %v388_v25 = vshrl.u32 %v12766_v21, 16  ;;  %v282_v28 = vpack.c.bf16 %v12738_v7, %v12735_v6  ;;  %v283_v33 = vpack.c.bf16 %v12744_v9, %v12741_v8  ;;  %v1092_v35 = vsel %vm12458_vm4, %v1087_v17, %v1091_v63  ;;  %v11944_v37 = vld [vmem:[#allocation2 + $0x54] sm:$0xff]   ;;  %v886_v38 = vld [vmem:[#allocation2 + $0x68] sm:$0x1] }
  0x97   : > { %v1398_v23 = vld [vmem:[#allocation2 + $0x5c] sm:$0x1]  ;;  %v1099_v26 = vshll.u32 %v883_v22, 16  ;;  %v381_v31 = vor.u32 %v379_v16, %v378_v15  ;;  %v284_v11 = vpack.c.bf16 %v12756_v51, %v12753_v44  ;;  %v1104_v32 = vshrl.u32 %v884_v29, 16  ;;  %v1399_v52 = vld [vmem:[#allocation2 + $0x60] sm:$0xe] }
  0x98   : > { %v1528_v3 = vrot.slane %v1398_v23, 5  ;;  %v1107_v39 = vshll.u32 %v884_v29, 16  ;;  %v1113_v40 = vshll.u32 %v885_v30, 16  ;;  %v1117_v42 = vshrl.u32 %v885_v30, 16  ;;  %v1400_v55 = vld [vmem:[#allocation2 + $0x64] sm:$0xf] }
  0x99   : > { %v1101_v36 = vrot.slane %v1099_v26, 5  ;;  %v1123_v43 = vshll.u32 %v886_v38, 16  ;;  %v387_v46 = vor.u32 %v385_v4, %v384_v19  ;;  %v1106_v49 = vrot.slane %v1104_v32, 4  ;;  %v1401_v59 = vld [vmem:[#allocation2 + $0x68] sm:$0x1]  ;;  %v11975_v16 = vld [vmem:[%s15497_s1 + $0x138] sm:$0xff]  }
  0x9a   : > { %v1529_v41 = vsel %vm12474_vm9, %v1527_v12, %v1528_v3  ;;  %v1109_v50 = vrot.slane %v1107_v39, 5  ;;  %v1115_v57 = vrot.slane %v1113_v40, 5  ;;  %v1119_v58 = vrot.slane %v1117_v42, 4  ;;  %v11976_v4 = vld [vmem:[%s15497_s1 + $0x1e0] sm:$0xff]   ;;  %11034 = vmatpush3.bf16.msra.mxu0 %v11975_v16  ;;  %v11979_v32 = vld [vmem:[%s15497_s1 + $0x1a8] sm:$0xff]  }
  0x9b   : > { %v1102_v47 = vsel %vm12458_vm4, %v1097_v62, %v1101_v36  ;;  %v10265_v48 = vcombine.low %v1526_v20, %v1529_v41  ;;  %v1125_v18 = vrot.slane %v1123_v43, 5  ;;  %v467_v14 = vsel %vm12468_vm8, 0, %v381_v31  ;;  %v11977_v26 = vld [vmem:[%s15497_s1 + $0x1a0] sm:$0xff]   ;;  %11139 = vmatprep.subr.bf16.mxu1 %v11976_v4  ;;  %v11978_v31 = vld [vmem:[%s15497_s1 + $0x1e8] sm:$0xff]  }
  0x9c   : > { %v10233_v53 = vcombine.low %v1092_v35, %v1102_v47  ;;  %v1110_v60 = vor.u32 %v1109_v50, %v1106_v49  ;;  %v10250_v63 = vrot.slane %v1399_v52, 9  ;;  %v1532_v1 = vrot.slane %v1400_v55, 5  ;;  %11140 = vmatpush3.bf16.msra.mxu1 %v11977_v26 }
  0x9d   : > { %4532 = vmatmul.mubr.bf16.gmra.mrb[28].mxu1 %v10265_v48  ;;  %v1120_v5 = vor.u32 %v1119_v58, %v1115_v57  ;;  %v10186_v54 = vcombine.low %v467_v14, %v467_v14  ;;  %v10187_v2 = vcombine.high %v467_v14, %v467_v14  ;;  %v1535_v24 = vrot.slane %v1401_v59, 5  ;;  %11141 = vmatprep.subr.bf16.mxu1 %v11978_v31  ;;  %v12855_v58 = vld [vmem:[%s12454_s9 + $0xe8] sm:$0xff] }
  0x9e   : > { %4370 = vmatprep.mubr.bf16.mxu0 %v10233_v53  ;;  %v1111_v34 = vrot.slane %v1110_v60, 4  ;;  %v12790_v13 = vsel %vm12474_vm9, %v10250_v63, %v1532_v1  ;;  %v1534_v10 = vrot.slane %v1532_v1, 4  ;;  %v483_v12 = vsel %vm12468_vm8, %v378_v15, 0 }
  0x9f   : > { %4371 = vmatmul.mubr.bf16.gmra.mrb[28].mxu0 %v11944_v37  ;;  %v1121_v17 = vrot.slane %v1120_v5, 4  ;;  %692 = vst [vmem:[#allocation2 + $0x6c] sm:$0xf] %v10186_v54  ;;  %693 = vst [vmem:[#allocation2 + $0x70] sm:$0xf] %v10187_v2  ;;  %v10188_v22 = vcombine.low %v483_v12, %v483_v12  ;;  %v468_v62 = vsel %vm12468_vm8, 0, %v387_v46 }
  0xa0   : > { %v484_v23 = vsel %vm12468_vm8, %v384_v19, 0  ;;  %v1116_v15 = vsel %vm12458_vm4, %v1111_v34, %v1115_v57  ;;  %v1536_v20 = vsel %vm12474_vm9, %v1534_v10, %v1535_v24  ;;  %v10189_v35 = vcombine.low %v468_v62, %v468_v62  ;;  %11142 = vmatpush3.bf16.msra.mxu1 %v11979_v32  ;;  %v12852_v57 = vld [vmem:[%s12454_s9 + $0xe0] sm:$0xff] }
  0xa1   : > { %v10190_v3 = vcombine.high %v468_v62, %v468_v62  ;;  %v1126_v29 = vsel %vm12458_vm4, %v1121_v17, %v1125_v18  ;;  %694 = vst [vmem:[#allocation2 + $0x74] sm:$0x1] %v10188_v22  ;;  %v10191_v19 = vcombine.low %v484_v23, %v484_v23  ;;  %v390_v30 = vrot.slane %v388_v25, 7 }
  0xa2   : > { %v10234_v36 = vcombine.low %v1116_v15, %v1126_v29  ;;  %695 = vst [vmem:[#allocation2 + $0x78] sm:$0xf] %v10189_v35  ;;  %v391_v37 = vshll.u32 %v12766_v21, 16  ;;  %v12820_v38 = vsel %vm287_vm3, %v282_v28, 0  ;;  %v12826_v25 = vsel %vm287_vm3, %v283_v33, 0 }
  0xa3   : > { %696 = vst [vmem:[#allocation2 + $0x7c] sm:$0xf] %v10190_v3  ;;  %v10266_v39 = vcombine.low %v12790_v13, %v1536_v20  ;;  %697 = vst [vmem:[#allocation2 + $0x80] sm:$0x1] %v10191_v19  ;;  %v485_v21 = vsel %vm12468_vm8, %v390_v30, 0  ;;  %v394_v6 = vshrl.u32 %v12820_v38, 16  ;;  %v285_v26 = vpack.c.bf16 %v12855_v58, %v12852_v57 }
  0xa4   : > { %v400_v7 = vshrl.u32 %v12826_v25, 16  ;;  %4378 = vmatprep.mubr.bf16.mxu0 %v10234_v36  ;;  %v393_v8 = vor.u32 %v391_v37, %v390_v30  ;;  %v10194_v9 = vcombine.low %v485_v21, %v485_v21  ;;  %v397_v28 = vshll.u32 %v12820_v38, 16 }
  0xa5   : > { %v12841_v33 = vsel %vm287_vm3, %v284_v11, 0  ;;  %v12843_v40 = vrot.slane %v394_v6, 7  ;;  %v403_v42 = vshll.u32 %v12826_v25, 16 }
  0xa6   : > { %v12845_v41 = vrot.slane %v400_v7, 7  ;;  %v406_v43 = vshrl.u32 %v12841_v33, 16  ;;  %v11948_v46 = vld [vmem:[#allocation2 + $0x6c] sm:$0xff]   ;;  %v469_v47 = vsel %vm12468_vm8, 0, %v393_v8  ;;  %700 = vst [vmem:[#allocation2 + $0x8c] sm:$0x1] %v10194_v9 }
  0xa7   : > { %4379 = vmatmul.mubr.bf16.gmra.mrb[32].mxu0 %v11946_v27  ;;  %v887_v44 = vld [vmem:[#allocation2 + $0x6c] sm:$0xf]  ;;  %v888_v51 = vld [vmem:[#allocation2 + $0x70] sm:$0xf]  ;;  %v10192_v11 = vcombine.low %v469_v47, %v469_v47  ;;  %v10193_v48 = vcombine.high %v469_v47, %v469_v47  ;;  %4539 = vmatprep.mubr.bf16.mxu1 %v11948_v46  ;;  %v409_v59 = vshll.u32 %v12841_v33, 16 }
  0xa8   : > { %v889_v49 = vld [vmem:[#allocation2 + $0x74] sm:$0x1]  ;;  %v1128_v50 = vshrl.u32 %v887_v44, 16  ;;  %v1131_v52 = vshll.u32 %v887_v44, 16  ;;  %v1137_v55 = vshll.u32 %v888_v51, 16  ;;  %v1141_v53 = vshrl.u32 %v888_v51, 16  ;;  %4540 = vmatmul.mubr.bf16.gmra.mrb[32].mxu1 %v10266_v39 }
  0xa9   : > { %v1147_v18 = vshll.u32 %v889_v49, 16  ;;  %698 = vst [vmem:[#allocation2 + $0x84] sm:$0xf] %v10192_v11  ;;  %699 = vst [vmem:[#allocation2 + $0x88] sm:$0xf] %v10193_v48  ;;  %v11950_v20 = vld [vmem:[#allocation2 + $0x6c] sm:$0xff]   ;;  %v399_v49 = vor.u32 %v397_v28, %v12843_v40 }
  0xaa   : > { %v1130_v60 = vrot.slane %v1128_v50, 4  ;;  %v1133_v14 = vrot.slane %v1131_v52, 5  ;;  %v1139_v63 = vrot.slane %v1137_v55, 5  ;;  %v1143_v1 = vrot.slane %v1141_v53, 4  ;;  %v11951_v54 = vld [vmem:[#allocation2 + $0x78] sm:$0xff]  }
  0xab   : > { %v1149_v5 = vrot.slane %v1147_v18, 5  ;;  %v1402_v2 = vld [vmem:[#allocation2 + $0x6c] sm:$0xe]  ;;  %v1403_v24 = vld [vmem:[#allocation2 + $0x70] sm:$0xf]  ;;  %4547 = vmatprep.mubr.bf16.mxu1 %v11951_v54 }
  0xac   : > { %v1134_v16 = vor.u32 %v1133_v14, %v1130_v60  ;;  %v1144_v34 = vor.u32 %v1143_v1, %v1139_v63  ;;  %v1404_v13 = vld [vmem:[#allocation2 + $0x74] sm:$0x1]  ;;  %v10251_v10 = vrot.slane %v1402_v2, 9  ;;  %v1539_v12 = vrot.slane %v1403_v24, 5  ;;  %v890_v4 = vld [vmem:[#allocation2 + $0x78] sm:$0xf] }
  0xad   : > { %v1542_v17 = vrot.slane %v1404_v13, 5  ;;  %v891_v22 = vld [vmem:[#allocation2 + $0x7c] sm:$0xf]  ;;  %v892_v62 = vld [vmem:[#allocation2 + $0x80] sm:$0x1]  ;;  %v1152_v23 = vshrl.u32 %v890_v4, 16  ;;  %v405_v60 = vor.u32 %v403_v42, %v12845_v41 }
  0xae   : > { %v1135_v15 = vrot.slane %v1134_v16, 4  ;;  %v1145_v27 = vrot.slane %v1144_v34, 4  ;;  %v1540_v35 = vsel %vm12474_vm9, %v10251_v10, %v1539_v12  ;;  %v1541_v3 = vrot.slane %v1539_v12, 4  ;;  %v1405_v46 = vld [vmem:[#allocation2 + $0x78] sm:$0xe] }
  0xaf   : > { %v1154_v29 = vrot.slane %v1152_v23, 4  ;;  %v1155_v19 = vshll.u32 %v890_v4, 16  ;;  %v1161_v30 = vshll.u32 %v891_v22, 16  ;;  %v1165_v31 = vshrl.u32 %v891_v22, 16  ;;  %v1406_v47 = vld [vmem:[#allocation2 + $0x7c] sm:$0xf] }
  0xb0   : > { %v1140_v36 = vsel %vm12458_vm4, %v1135_v15, %v1139_v63  ;;  %v1150_v37 = vsel %vm12458_vm4, %v1145_v27, %v1149_v5  ;;  %v1543_v32 = vsel %vm12474_vm9, %v1541_v3, %v1542_v17  ;;  %v1171_v39 = vshll.u32 %v892_v62, 16  ;;  %v11954_v21 = vld [vmem:[#allocation2 + $0x84] sm:$0xff]   ;;  %v1407_v51 = vld [vmem:[#allocation2 + $0x80] sm:$0x1]  ;;  %v895_v38 = vld [vmem:[#allocation2 + $0x8c] sm:$0x1] }
  0xb1   : > { %v10235_v6 = vcombine.low %v1140_v36, %v1150_v37  ;;  %v10267_v7 = vcombine.low %v1540_v35, %v1543_v32  ;;  %v1157_v8 = vrot.slane %v1155_v19, 5  ;;  %v1163_v9 = vrot.slane %v1161_v30, 5  ;;  %v893_v53 = vld [vmem:[#allocation2 + $0x84] sm:$0xf]  ;;  %v894_v18 = vld [vmem:[#allocation2 + $0x88] sm:$0xf] }
  0xb2   : > { %v1167_v44 = vrot.slane %v1165_v31, 4  ;;  %v10252_v11 = vrot.slane %v1405_v46, 9  ;;  %v1546_v48 = vrot.slane %v1406_v47, 5  ;;  %v1173_v52 = vrot.slane %v1171_v39, 5  ;;  %v1408_v42 = vld [vmem:[#allocation2 + $0x84] sm:$0xe] }
  0xb3   : > { %4386 = vmatprep.mubr.bf16.mxu0 %v10235_v6  ;;  %4548 = vmatmul.mubr.bf16.gmra.mrb[36].mxu1 %v10267_v7  ;;  %v1158_v50 = vor.u32 %v1157_v8, %v1154_v29  ;;  %v1549_v55 = vrot.slane %v1407_v51, 5  ;;  %v1176_v28 = vshrl.u32 %v893_v53, 16  ;;  %v1179_v54 = vshll.u32 %v893_v53, 16  ;;  %v1409_v22 = vld [vmem:[#allocation2 + $0x88] sm:$0xf]  ;;  %v11952_v15 = vld [vmem:[#allocation2 + $0x78] sm:$0xff]  }
  0xb4   : > { %4387 = vmatmul.mubr.bf16.gmra.mrb[36].mxu0 %v11950_v20  ;;  %v1168_v14 = vor.u32 %v1167_v44, %v1163_v9  ;;  %4555 = vmatprep.mubr.bf16.mxu1 %v11954_v21  ;;  %v1547_v63 = vsel %vm12474_vm9, %v10252_v11, %v1546_v48  ;;  %v1548_v1 = vrot.slane %v1546_v48, 4  ;;  %v1185_v2 = vshll.u32 %v894_v18, 16  ;;  %v1410_v62 = vld [vmem:[#allocation2 + $0x8c] sm:$0x1]  ;;  %v11982_v31 = vld [vmem:[%s15497_s1 + $0x1f0] sm:$0xff]   ;;  %v11956_v57 = vld [vmem:[#allocation2 + $0x84] sm:$0xff]  }
  0xb5   : > { %v1159_v5 = vrot.slane %v1158_v50, 4  ;;  %v1189_v24 = vshrl.u32 %v894_v18, 16  ;;  %v1178_v13 = vrot.slane %v1176_v28, 4  ;;  %v1195_v25 = vshll.u32 %v895_v38, 16  ;;  %v11983_v21 = vld [vmem:[%s15497_s1 + $0x1b0] sm:$0xff]   ;;  %11143 = vmatprep.subr.bf16.mxu1 %v11982_v31  ;;  %v11984_v50 = vld [vmem:[%s15497_s1 + $0x1f8] sm:$0xff]  }
  0xb6   : > { %v1169_v16 = vrot.slane %v1168_v14, 4  ;;  %v1550_v34 = vsel %vm12474_vm9, %v1548_v1, %v1549_v55  ;;  %v1181_v4 = vrot.slane %v1179_v54, 5  ;;  %v1187_v17 = vrot.slane %v1185_v2, 5  ;;  %11144 = vmatpush3.bf16.msra.mxu1 %v11983_v21  ;;  %v11985_v38 = vld [vmem:[%s15497_s1 + $0x1b8] sm:$0xff]   ;;  %v12933_v2 = vld [vmem:[#allocation2 + $0x14] sm:$0x1] }
  0xb7   : > { %v1164_v10 = vsel %vm12458_vm4, %v1159_v5, %v1163_v9  ;;  %v10268_v12 = vcombine.low %v1547_v63, %v1550_v34  ;;  %v1191_v27 = vrot.slane %v1189_v24, 4  ;;  %v1197_v20 = vrot.slane %v1195_v25, 5  ;;  %11145 = vmatprep.subr.bf16.mxu1 %v11984_v50  ;;  %v12947_v50 = vld [vmem:[%s12454_s9 + $0xf0] sm:$0xff] }
  0xb8   : > { %v1174_v23 = vsel %vm12458_vm4, %v1169_v16, %v1173_v52  ;;  %v470_v35 = vsel %vm12468_vm8, 0, %v399_v49  ;;  %v1182_v29 = vor.u32 %v1181_v4, %v1178_v13  ;;  %v10253_v37 = vrot.slane %v1408_v42, 9 }
  0xb9   : > { %v10236_v3 = vcombine.low %v1164_v10, %v1174_v23  ;;  %v10195_v19 = vcombine.low %v470_v35, %v470_v35  ;;  %v10196_v30 = vcombine.high %v470_v35, %v470_v35  ;;  %v1192_v36 = vor.u32 %v1191_v27, %v1187_v17 }
  0xba   : > { %v1553_v32 = vrot.slane %v1409_v22, 5  ;;  %v1556_v39 = vrot.slane %v1410_v62, 5  ;;  %v1183_v6 = vrot.slane %v1182_v29, 4  ;;  %v486_v7 = vsel %vm12468_vm8, %v12843_v40, 0  ;;  %11146 = vmatpush3.bf16.msra.mxu1 %v11985_v38 }
  0xbb   : > { %4394 = vmatprep.mubr.bf16.mxu0 %v10236_v3  ;;  %4556 = vmatmul.mubr.bf16.gmra.mrb[40].mxu1 %v10268_v12  ;;  %701 = vst [vmem:[#allocation2 + $0x90] sm:$0xf] %v10195_v19  ;;  %702 = vst [vmem:[#allocation2 + $0x94] sm:$0xf] %v10196_v30  ;;  %v471_v8 = vsel %vm12468_vm8, 0, %v405_v60  ;;  %v487_v9 = vsel %vm12468_vm8, %v12845_v41, 0  ;;  %v10197_v51 = vcombine.low %v486_v7, %v486_v7 }
  0xbc   : > { %4395 = vmatmul.mubr.bf16.gmra.mrb[40].mxu0 %v11952_v15  ;;  %v1193_v46 = vrot.slane %v1192_v36, 4  ;;  %v1554_v47 = vsel %vm12474_vm9, %v10253_v37, %v1553_v32  ;;  %v1555_v44 = vrot.slane %v1553_v32, 4  ;;  %v1188_v11 = vsel %vm12458_vm4, %v1183_v6, %v1187_v17  ;;  %v12905_v41 = vld [vmem:[#allocation2 + $0xc] sm:$0xe]  ;;  %v12917_v60 = vld [vmem:[#allocation2 + $0x10] sm:$0xf] }
  0xbd   : > { %v10198_v48 = vcombine.low %v471_v8, %v471_v8  ;;  %v10199_v40 = vcombine.high %v471_v8, %v471_v8  ;;  %v10200_v49 = vcombine.low %v487_v9, %v487_v9  ;;  %703 = vst [vmem:[#allocation2 + $0x98] sm:$0x1] %v10197_v51  ;;  %v408_v53 = vrot.slane %v406_v43, 7  ;;  %v12925_v43 = vld [vmem:[%s15497_s1 + $0x200] sm:$0xff]  }
  0xbe   : > { %v1198_v52 = vsel %vm12458_vm4, %v1193_v46, %v1197_v20  ;;  %v1557_v55 = vsel %vm12474_vm9, %v1555_v44, %v1556_v39  ;;  %v318_v18 = vsel %vm287_vm3, %v285_v26, 0  ;;  %v10306_v24 = vrot.slane %v12905_v41, 9  ;;  %11739 = vmatprep.subr.bf16.mxu0 %v12925_v43 }
  0xbf   : > { %v10237_v14 = vcombine.low %v1188_v11, %v1198_v52  ;;  %704 = vst [vmem:[#allocation2 + $0x9c] sm:$0xf] %v10198_v48  ;;  %705 = vst [vmem:[#allocation2 + $0xa0] sm:$0xf] %v10199_v40  ;;  %v412_v63 = vshrl.u32 %v318_v18, 16  ;;  %v415_v1 = vshll.u32 %v318_v18, 16  ;;  %v10269_v58 = vcombine.low %v1554_v47, %v1557_v55 }
  0xc0   : > { %706 = vst [vmem:[#allocation2 + $0xa4] sm:$0x1] %v10200_v49  ;;  %v411_v26 = vor.u32 %v409_v59, %v408_v53  ;;  %v488_v28 = vsel %vm12468_vm8, %v408_v53, 0  ;;  %v2420_v16 = vrot.slane %v12917_v60, 5  ;;  %v2423_v27 = vrot.slane %v12933_v2, 5  ;;  %v12950_v52 = vld [vmem:[%s12454_s9 + $0xf8] sm:$0xff] }
  0xc1   : > { %4402 = vmatprep.mubr.bf16.mxu0 %v10237_v14  ;;  %v10203_v5 = vcombine.low %v488_v28, %v488_v28  ;;  %v12931_v54 = vrot.slane %v412_v63, 7 }
  0xc2   : > { %v11957_v34 = vld [vmem:[#allocation2 + $0x90] sm:$0xff]   ;;  %v472_v13 = vsel %vm12468_vm8, 0, %v411_v26 }
  0xc3   : > { %v896_v33 = vld [vmem:[#allocation2 + $0x90] sm:$0xf]  ;;  %v897_v59 = vld [vmem:[#allocation2 + $0x94] sm:$0xf]  ;;  %v10201_v25 = vcombine.low %v472_v13, %v472_v13  ;;  %v10202_v42 = vcombine.high %v472_v13, %v472_v13  ;;  %709 = vst [vmem:[#allocation2 + $0xb0] sm:$0x1] %v10203_v5  ;;  %v417_v10 = vor.u32 %v415_v1, %v12931_v54  ;;  %4563 = vmatprep.mubr.bf16.mxu1 %v11957_v34 }
  0xc4   : > { %4403 = vmatmul.mubr.bf16.gmra.mrb[44].mxu0 %v11956_v57  ;;  %v1200_v12 = vshrl.u32 %v896_v33, 16  ;;  %v1203_v4 = vshll.u32 %v896_v33, 16  ;;  %v1209_v17 = vshll.u32 %v897_v59, 16  ;;  %v1213_v22 = vshrl.u32 %v897_v59, 16  ;;  %4564 = vmatmul.mubr.bf16.gmra.mrb[44].mxu1 %v10269_v58  ;;  %v898_v62 = vld [vmem:[#allocation2 + $0x98] sm:$0x1] }
  0xc5   : > { %v1411_v23 = vld [vmem:[#allocation2 + $0x90] sm:$0xe]  ;;  %707 = vst [vmem:[#allocation2 + $0xa8] sm:$0xf] %v10201_v25  ;;  %708 = vst [vmem:[#allocation2 + $0xac] sm:$0xf] %v10202_v42 }
  0xc6   : > { %v473_v15 = vsel %vm12468_vm8, 0, %v417_v10  ;;  %v1202_v20 = vrot.slane %v1200_v12, 4  ;;  %v1205_v35 = vrot.slane %v1203_v4, 5  ;;  %v1211_v3 = vrot.slane %v1209_v17, 5  ;;  %v11960_v30 = vld [vmem:[#allocation2 + $0x9c] sm:$0xff]   ;;  %v11958_v48 = vld [vmem:[#allocation2 + $0x90] sm:$0xff]  }
  0xc7   : > { %v1215_v29 = vrot.slane %v1213_v22, 4  ;;  %v1219_v19 = vshll.u32 %v898_v62, 16  ;;  %v1412_v31 = vld [vmem:[#allocation2 + $0x94] sm:$0xf]  ;;  %v10204_v36 = vcombine.low %v473_v15, %v473_v15  ;;  %v10205_v37 = vcombine.high %v473_v15, %v473_v15  ;;  %v1413_v21 = vld [vmem:[#allocation2 + $0x98] sm:$0x1]  ;;  %4571 = vmatprep.mubr.bf16.mxu1 %v11960_v30 }
  0xc8   : > { %v1206_v32 = vor.u32 %v1205_v35, %v1202_v20  ;;  %v10254_v6 = vrot.slane %v1411_v23, 9  ;;  %v1560_v7 = vrot.slane %v1412_v31, 5  ;;  %v899_v8 = vld [vmem:[#allocation2 + $0x9c] sm:$0xf]  ;;  %v1563_v46 = vrot.slane %v1413_v21, 5 }
  0xc9   : > { %v1216_v39 = vor.u32 %v1215_v29, %v1211_v3  ;;  %v1221_v9 = vrot.slane %v1219_v19, 5  ;;  %v900_v47 = vld [vmem:[#allocation2 + $0xa0] sm:$0xf]  ;;  %v901_v44 = vld [vmem:[#allocation2 + $0xa4] sm:$0x1]  ;;  %v1224_v55 = vshrl.u32 %v899_v8, 16  ;;  %v286_v15 = vpack.c.bf16 %v12950_v52, %v12947_v50 }
  0xca   : > { %710 = vst [vmem:[#allocation2 + $0xb4] sm:$0xf] %v10204_v36  ;;  %711 = vst [vmem:[#allocation2 + $0xb8] sm:$0xf] %v10205_v37  ;;  %v1207_v51 = vrot.slane %v1206_v32, 4  ;;  %v1561_v40 = vsel %vm12474_vm9, %v10254_v6, %v1560_v7  ;;  %v1562_v49 = vrot.slane %v1560_v7, 4  ;;  %v12974_v52 = vsel %vm12474_vm9, %v10306_v24, %v2420_v16 }
  0xcb   : > { %v1217_v11 = vrot.slane %v1216_v39, 4  ;;  %v1227_v53 = vshll.u32 %v899_v8, 16  ;;  %v1233_v18 = vshll.u32 %v900_v47, 16  ;;  %v1237_v14 = vshrl.u32 %v900_v47, 16  ;;  %v1414_v13 = vld [vmem:[#allocation2 + $0x9c] sm:$0xe] }
  0xcc   : > { %v1212_v63 = vsel %vm12458_vm4, %v1207_v51, %v1211_v3  ;;  %v1564_v38 = vsel %vm12474_vm9, %v1562_v49, %v1563_v46  ;;  %v1243_v57 = vshll.u32 %v901_v44, 16  ;;  %v11967_v58 = vld [vmem:[#allocation2 + $0xa8] sm:$0xff]   ;;  %v1226_v5 = vrot.slane %v1224_v55, 4  ;;  %v1415_v33 = vld [vmem:[#allocation2 + $0xa0] sm:$0xf] }
  0xcd   : > { %v1222_v1 = vsel %vm12458_vm4, %v1217_v11, %v1221_v9  ;;  %v10270_v28 = vcombine.low %v1561_v40, %v1564_v38  ;;  %v1229_v34 = vrot.slane %v1227_v53, 5  ;;  %v1235_v59 = vrot.slane %v1233_v18, 5  ;;  %v1416_v10 = vld [vmem:[#allocation2 + $0xa4] sm:$0x1]  ;;  %v902_v62 = vld [vmem:[#allocation2 + $0xa8] sm:$0xf] }
  0xce   : > { %v10238_v26 = vcombine.low %v1212_v63, %v1222_v1  ;;  %v1239_v25 = vrot.slane %v1237_v14, 4  ;;  %v1245_v42 = vrot.slane %v1243_v57, 5  ;;  %v10255_v12 = vrot.slane %v1414_v13, 9  ;;  %v903_v23 = vld [vmem:[#allocation2 + $0xac] sm:$0xf]  ;;  %v11966_v39 = vld [vmem:[#allocation2 + $0x9c] sm:$0xff]  }
  0xcf   : > { %4572 = vmatmul.mubr.bf16.gmra.mrb[48].mxu1 %v10270_v28  ;;  %v1230_v4 = vor.u32 %v1229_v34, %v1226_v5  ;;  %v1567_v17 = vrot.slane %v1415_v33, 5  ;;  %v1570_v22 = vrot.slane %v1416_v10, 5  ;;  %v904_v35 = vld [vmem:[#allocation2 + $0xb0] sm:$0x1]  ;;  %v1248_v3 = vshrl.u32 %v902_v62, 16 }
  0xd0   : > { %4410 = vmatprep.mubr.bf16.mxu0 %v10238_v26  ;;  %v1240_v20 = vor.u32 %v1239_v25, %v1235_v59  ;;  %4579 = vmatprep.mubr.bf16.mxu1 %v11967_v58  ;;  %v1251_v29 = vshll.u32 %v902_v62, 16  ;;  %v1257_v19 = vshll.u32 %v903_v23, 16  ;;  %v1261_v37 = vshrl.u32 %v903_v23, 16  ;;  %v1417_v40 = vld [vmem:[#allocation2 + $0xa8] sm:$0xe] }
  0xd1   : > { %4411 = vmatmul.mubr.bf16.gmra.mrb[48].mxu0 %v11958_v48  ;;  %v1231_v30 = vrot.slane %v1230_v4, 4  ;;  %v1568_v31 = vsel %vm12474_vm9, %v10255_v12, %v1567_v17  ;;  %v1569_v36 = vrot.slane %v1567_v17, 4  ;;  %v1250_v21 = vrot.slane %v1248_v3, 4  ;;  %v11974_v8 = vld [vmem:[#allocation2 + $0xb4] sm:$0xff]   ;;  %v1418_v49 = vld [vmem:[#allocation2 + $0xac] sm:$0xf] }
  0xd2   : > { %v1241_v32 = vrot.slane %v1240_v20, 4  ;;  %v1253_v6 = vrot.slane %v1251_v29, 5  ;;  %v1259_v7 = vrot.slane %v1257_v19, 5  ;;  %v1263_v47 = vrot.slane %v1261_v37, 4  ;;  %v1419_v50 = vld [vmem:[#allocation2 + $0xb0] sm:$0x1] }
  0xd3   : > { %v1236_v9 = vsel %vm12458_vm4, %v1231_v30, %v1235_v59  ;;  %v1571_v46 = vsel %vm12474_vm9, %v1569_v36, %v1570_v22  ;;  %v1267_v44 = vshll.u32 %v904_v35, 16  ;;  %v10256_v14 = vrot.slane %v1417_v40, 9  ;;  %v905_v63 = vld [vmem:[#allocation2 + $0xb4] sm:$0xf]  ;;  %v906_v1 = vld [vmem:[#allocation2 + $0xb8] sm:$0xf] }
  0xd4   : > { %v1246_v51 = vsel %vm12458_vm4, %v1241_v32, %v1245_v42  ;;  %v10271_v11 = vcombine.low %v1568_v31, %v1571_v46  ;;  %v1254_v48 = vor.u32 %v1253_v6, %v1250_v21  ;;  %v1264_v53 = vor.u32 %v1263_v47, %v1259_v7  ;;  %v1420_v25 = vld [vmem:[#allocation2 + $0xb4] sm:$0xe]  ;;  %v1421_v42 = vld [vmem:[#allocation2 + $0xb8] sm:$0xf]  ;;  %v1810_v20 = vld [vmem:[#allocation2 + $0xc] sm:$0xf] }
  0xd5   : > { %v10239_v55 = vcombine.low %v1236_v9, %v1246_v51  ;;  %v1269_v18 = vrot.slane %v1267_v44, 5  ;;  %v1574_v57 = vrot.slane %v1418_v49, 5  ;;  %v1577_v58 = vrot.slane %v1419_v50, 5  ;;  %v11972_v35 = vld [vmem:[#allocation2 + $0xa8] sm:$0xff]   ;;  %v1812_v44 = vld [vmem:[#allocation2 + $0x14] sm:$0x1] }
  0xd6   : > { %v1255_v38 = vrot.slane %v1254_v48, 4  ;;  %v489_v26 = vsel %vm12468_vm8, %v12931_v54, 0  ;;  %v1265_v41 = vrot.slane %v1264_v53, 4  ;;  %v1272_v5 = vshrl.u32 %v905_v63, 16 }
  0xd7   : > { %4418 = vmatprep.mubr.bf16.mxu0 %v10239_v55  ;;  %4580 = vmatmul.mubr.bf16.gmra.mrb[52].mxu1 %v10271_v11  ;;  %v10206_v28 = vcombine.low %v489_v26, %v489_v26  ;;  %v1275_v24 = vshll.u32 %v905_v63, 16  ;;  %v1575_v13 = vsel %vm12474_vm9, %v10256_v14, %v1574_v57  ;;  %v1576_v33 = vrot.slane %v1574_v57, 4  ;;  %v2756_v57 = vld [vmem:[#allocation2 + $0x1c] sm:$0xf] }
  0xd8   : > { %v1260_v34 = vsel %vm12458_vm4, %v1255_v38, %v1259_v7  ;;  %4587 = vmatprep.mubr.bf16.mxu1 %v11974_v8  ;;  %v1281_v59 = vshll.u32 %v906_v1, 16  ;;  %v1270_v54 = vsel %vm12458_vm4, %v1265_v41, %v1269_v18  ;;  %v1274_v10 = vrot.slane %v1272_v5, 4  ;;  %v1811_v8 = vld [vmem:[#allocation2 + $0x10] sm:$0xf]  ;;  %v2755_v18 = vld [vmem:[#allocation2 + $0x18] sm:$0xf] }
  0xd9   : > { %4419 = vmatmul.mubr.bf16.gmra.mrb[52].mxu0 %v11966_v39  ;;  %712 = vst [vmem:[#allocation2 + $0xbc] sm:$0x1] %v10206_v28  ;;  %v1277_v12 = vrot.slane %v1275_v24, 5  ;;  %v1285_v4 = vshrl.u32 %v906_v1, 16  ;;  %v10240_v17 = vcombine.low %v1260_v34, %v1270_v54  ;;  %v1578_v22 = vsel %vm12474_vm9, %v1576_v33, %v1577_v58  ;;  %v2757_v58 = vld [vmem:[#allocation2 + $0x20] sm:$0x1] }
  0xda   : > { %v12987_v62 = vrot.slane %v1281_v59, 5  ;;  %v320_v23 = vsel %vm287_vm3, %v286_v15, 0  ;;  %v10272_v3 = vcombine.low %v1575_v13, %v1578_v22  ;;  %v10257_v36 = vrot.slane %v1420_v25, 9  ;;  %v2325_v5 = vld [vmem:[#allocation2 + $0x18] sm:$0xe] }
  0xdb   : > { %v1278_v29 = vor.u32 %v1277_v12, %v1274_v10  ;;  %v1287_v19 = vrot.slane %v1285_v4, 4  ;;  %v418_v30 = vshrl.u32 %v320_v23, 16  ;;  %4426 = vmatprep.mubr.bf16.mxu0 %v10240_v17  ;;  %v421_v31 = vshll.u32 %v320_v23, 16  ;;  %v2326_v24 = vld [vmem:[#allocation2 + $0x1c] sm:$0xf]  ;;  %v11980_v54 = vld [vmem:[#allocation2 + $0xb4] sm:$0xff]  }
  0xdc   : > { %v1581_v37 = vrot.slane %v1421_v42, 5  ;;  %v2422_v32 = vrot.slane %v2420_v16, 4  ;;  %v1859_v7 = vshrl.u32 %v1810_v20, 16  ;;  %v1862_v9 = vshll.u32 %v1810_v20, 16  ;;  %v2327_v25 = vld [vmem:[#allocation2 + $0x20] sm:$0x1] }
  0xdd   : > { %v1279_v39 = vrot.slane %v1278_v29, 4  ;;  %v1288_v21 = vor.u32 %v1287_v19, %v12987_v62  ;;  %v12993_v6 = vrot.slane %v418_v30, 7  ;;  %v1868_v53 = vshll.u32 %v1811_v8, 16  ;;  %v1813_v20 = vld [vmem:[#allocation2 + $0x18] sm:$0xf] }
  0xde   : > { %v12999_v15 = vsel %vm12474_vm9, %v2422_v32, %v2423_v27  ;;  %v13004_v60 = vsel %vm12474_vm9, %v10257_v36, %v1581_v37  ;;  %v1583_v16 = vrot.slane %v1581_v37, 4  ;;  %v1861_v48 = vrot.slane %v1859_v7, 4  ;;  %v1814_v32 = vld [vmem:[#allocation2 + $0x1c] sm:$0xf] }
  0xdf   : > { %4588 = vmatmul.mubr.bf16.gmra.mrb[56].mxu1 %v10272_v3  ;;  %v1289_v46 = vrot.slane %v1288_v21, 4  ;;  %v423_v47 = vor.u32 %v421_v31, %v12993_v6  ;;  %v1284_v2 = vsel %vm12458_vm4, %v1279_v39, %v12987_v62  ;;  %v10322_v11 = vcombine.low %v12974_v52, %v12999_v15  ;;  %v1815_v15 = vld [vmem:[#allocation2 + $0x20] sm:$0x1] }
  0xe0   : > { %v907_v51 = vld [vmem:[#allocation2 + $0xbc] sm:$0x1]  ;;  %v1864_v40 = vrot.slane %v1862_v9, 5  ;;  %v1872_v38 = vshrl.u32 %v1811_v8, 16  ;;  %v1870_v52 = vrot.slane %v1868_v53, 5  ;;  %v1878_v28 = vshll.u32 %v1812_v44, 16 }
  0xe1   : > { %4427 = vmatmul.mubr.bf16.gmra.mrb[56].mxu0 %v11972_v35  ;;  %v1422_v27 = vld [vmem:[#allocation2 + $0xbc] sm:$0x1]  ;;  %v1291_v49 = vshll.u32 %v907_v51, 16  ;;  %v474_v50 = vsel %vm12468_vm8, 0, %v423_v47  ;;  %v2804_v59 = vshrl.u32 %v2755_v18, 16  ;;  %v2807_v12 = vshll.u32 %v2755_v18, 16 }
  0xe2   : > { %v1584_v55 = vrot.slane %v1422_v27, 5  ;;  %v10207_v14 = vcombine.low %v474_v50, %v474_v50  ;;  %v10208_v63 = vcombine.high %v474_v50, %v474_v50  ;;  %v1865_v1 = vor.u32 %v1864_v40, %v1861_v48  ;;  %v2759_v44 = vld [vmem:[#allocation2 + $0x28] sm:$0xf] }
  0xe3   : > { %v1293_v26 = vrot.slane %v1291_v49, 5  ;;  %v1874_v33 = vrot.slane %v1872_v38, 4  ;;  %v1880_v10 = vrot.slane %v1878_v28, 5  ;;  %v2813_v4 = vshll.u32 %v2756_v57, 16  ;;  %v2329_v38 = vld [vmem:[#allocation2 + $0x28] sm:$0xf] }
  0xe4   : > { %v1585_v41 = vsel %vm12474_vm9, %v1583_v16, %v1584_v55  ;;  %713 = vst [vmem:[#allocation2 + $0xc0] sm:$0xf] %v10207_v14  ;;  %714 = vst [vmem:[#allocation2 + $0xc4] sm:$0xf] %v10208_v63  ;;  %v1866_v13 = vrot.slane %v1865_v1, 4  ;;  %v2806_v23 = vrot.slane %v2804_v59, 4 }
  0xe5   : > { %v10273_v34 = vcombine.low %v13004_v60, %v1585_v41  ;;  %v1294_v42 = vsel %vm12458_vm4, %v1289_v46, %v1293_v26  ;;  %v1875_v62 = vor.u32 %v1874_v33, %v1870_v52  ;;  %v2809_v35 = vrot.slane %v2807_v12, 5  ;;  %v2758_v16 = vld [vmem:[#allocation2 + $0x24] sm:$0xf]  ;;  %v2760_v63 = vld [vmem:[#allocation2 + $0x2c] sm:$0x1] }
  0xe6   : > { %v10241_v17 = vcombine.low %v1284_v2, %v1294_v42  ;;  %v1871_v22 = vsel %vm12458_vm4, %v1866_v13, %v1870_v52  ;;  %v2815_v3 = vrot.slane %v2813_v4, 5  ;;  %v2817_v29 = vshrl.u32 %v2756_v57, 16  ;;  %v2328_v1 = vld [vmem:[#allocation2 + $0x24] sm:$0xe]  ;;  %v2330_v52 = vld [vmem:[#allocation2 + $0x2c] sm:$0x1] }
  0xe7   : > { %v2823_v19 = vshll.u32 %v2757_v58, 16  ;;  %v1876_v30 = vrot.slane %v1875_v62, 4  ;;  %v10307_v31 = vrot.slane %v2325_v5, 9  ;;  %v2427_v36 = vrot.slane %v2326_v24, 5  ;;  %v1816_v33 = vld [vmem:[#allocation2 + $0x24] sm:$0xf] }
  0xe8   : > { %4434 = vmatprep.mubr.bf16.mxu0 %v10241_v17  ;;  %v2430_v37 = vrot.slane %v2327_v25, 5  ;;  %v2810_v39 = vor.u32 %v2809_v35, %v2806_v23  ;;  %v2819_v21 = vrot.slane %v2817_v29, 4  ;;  %v1883_v8 = vshrl.u32 %v1813_v20, 16  ;;  %v11989_v59 = vld [vmem:[%s15497_s1 + $0x208] sm:$0xff]  }
  0xe9   : > { %4435 = vmatmul.mubr.bf16.gmra.mrb[60].mxu0 %v11980_v54  ;;  %v2825_v7 = vrot.slane %v2823_v19, 5  ;;  %v1881_v9 = vsel %vm12458_vm4, %v1876_v30, %v1880_v10  ;;  %v2428_v46 = vsel %vm12474_vm9, %v10307_v31, %v2427_v36  ;;  %v2429_v47 = vrot.slane %v2427_v36, 4  ;;  %v1817_v31 = vld [vmem:[#allocation2 + $0x28] sm:$0xf]  ;;  %v11992_v36 = vld [vmem:[%s15497_s1 + $0x210] sm:$0xff]  }
  0xea   : > { %4636 = vmatprep.mubr.bf16.mxu0 %v10322_v11  ;;  %v1886_v60 = vshll.u32 %v1813_v20, 16  ;;  %v10290_v2 = vcombine.low %v1871_v22, %v1881_v9  ;;  %v2811_v27 = vrot.slane %v2810_v39, 4  ;;  %v2820_v48 = vor.u32 %v2819_v21, %v2815_v3  ;;  %v11987_v22 = vld [vmem:[#allocation2 + $0x18] sm:$0xff]  }
  0xeb   : > { %v11981_v51 = vld [vmem:[#allocation2 + $0xc0] sm:$0xff]   ;;  %v2431_v40 = vsel %vm12474_vm9, %v2429_v47, %v2430_v37  ;;  %v1885_v49 = vrot.slane %v1883_v8, 4  ;;  %v1892_v11 = vshll.u32 %v1814_v32, 16  ;;  %v1896_v14 = vshrl.u32 %v1814_v32, 16  ;;  %v1818_v8 = vld [vmem:[#allocation2 + $0x2c] sm:$0x1] }
  0xec   : > { %v1888_v50 = vrot.slane %v1886_v60, 5  ;;  %4595 = vmatprep.mubr.bf16.mxu1 %v11981_v51  ;;  %v2816_v55 = vsel %vm12458_vm4, %v2811_v27, %v2815_v3  ;;  %v2821_v53 = vrot.slane %v2820_v48, 4  ;;  %v10323_v18 = vcombine.low %v2428_v46, %v2431_v40  ;;  %v2761_v46 = vld [vmem:[#allocation2 + $0x30] sm:$0xf]  ;;  %v2762_v51 = vld [vmem:[#allocation2 + $0x34] sm:$0xf] }
  0xed   : > { %4596 = vmatmul.mubr.bf16.gmra.mrb[60].mxu1 %v10273_v34  ;;  %v1894_v58 = vrot.slane %v1892_v11, 5  ;;  %v1902_v26 = vshll.u32 %v1815_v15, 16  ;;  %v2828_v41 = vshrl.u32 %v2758_v16, 16  ;;  %v1898_v5 = vrot.slane %v1896_v14, 4  ;;  %v2331_v11 = vld [vmem:[#allocation2 + $0x30] sm:$0xe] }
  0xee   : > { %v1889_v57 = vor.u32 %v1888_v50, %v1885_v49  ;;  %v2826_v28 = vsel %vm12458_vm4, %v2821_v53, %v2825_v7  ;;  %v2831_v24 = vshll.u32 %v2758_v16, 16  ;;  %v2837_v13 = vshll.u32 %v2759_v44, 16  ;;  %v2763_v50 = vld [vmem:[#allocation2 + $0x38] sm:$0x1] }
  0xef   : > { %v10354_v25 = vcombine.low %v2816_v55, %v2826_v28  ;;  %v1904_v54 = vrot.slane %v1902_v26, 5  ;;  %v2830_v34 = vrot.slane %v2828_v41, 4  ;;  %v1899_v10 = vor.u32 %v1898_v5, %v1894_v58  ;;  %v11988_v41 = vld [vmem:[#allocation2 + $0x24] sm:$0xff]  }
  0xf0   : > { %v1890_v42 = vrot.slane %v1889_v57, 4  ;;  %v2833_v12 = vrot.slane %v2831_v24, 5  ;;  %v2839_v4 = vrot.slane %v2837_v13, 5  ;;  %v2841_v17 = vshrl.u32 %v2759_v44, 16  ;;  %v2333_v24 = vld [vmem:[#allocation2 + $0x38] sm:$0x1] }
  0xf1   : > { %4637 = vmatmul.mubr.bf16.vlgmr.msra.gmra.mrb[64].mxu0 %v10290_v2  ;;  %4797 = vmatprep.mubr.bf16.mxu1 %v10354_v25  ;;  %v2847_v23 = vshll.u32 %v2760_v63, 16  ;;  %v10308_v20 = vrot.slane %v2328_v1, 9  ;;  %v2434_v35 = vrot.slane %v2329_v38, 5  ;;  %v1900_v3 = vrot.slane %v1899_v10, 4  ;;  %v11995_v2 = vld [vmem:[%s15497_s1 + $0x218] sm:$0xff]  }
  0xf2   : > { %11740 = vmatpush3.bf16.msra.mxu0 %v12925_v43  ;;  %v1895_v62 = vsel %vm12458_vm4, %v1890_v42, %v1894_v58  ;;  %4644 = vmatprep.mubr.bf16.mxu0 %v10323_v18  ;;  %v2834_v29 = vor.u32 %v2833_v12, %v2830_v34  ;;  %v2843_v19 = vrot.slane %v2841_v17, 4  ;;  %v2437_v30 = vrot.slane %v2330_v52, 5  ;;  %v2332_v58 = vld [vmem:[#allocation2 + $0x34] sm:$0xf]  ;;  %v11998_v42 = vld [vmem:[%s15497_s1 + $0x220] sm:$0xff]  }
  0xf3   : > { %11741 = vmatprep.subr.bf16.mxu0 %v11989_v59  ;;  %v2849_v37 = vrot.slane %v2847_v23, 5  ;;  %v2435_v43 = vsel %vm12474_vm9, %v10308_v20, %v2434_v35  ;;  %v2436_v32 = vrot.slane %v2434_v35, 4  ;;  %v1907_v39 = vshrl.u32 %v1816_v33, 16  ;;  %v1820_v20 = vld [vmem:[#allocation2 + $0x34] sm:$0xf] }
  0xf4   : > { %v1905_v21 = vsel %vm12458_vm4, %v1900_v3, %v1904_v54  ;;  %v2835_v7 = vrot.slane %v2834_v29, 4  ;;  %v2844_v15 = vor.u32 %v2843_v19, %v2839_v4  ;;  %v1910_v9 = vshll.u32 %v1816_v33, 16 }
  0xf5   : > { %4798 = vmatmul.mubr.bf16.vlgmr.msra.gmra.mrb[64].mxu1 %v11987_v22  ;;  %v10291_v47 = vcombine.low %v1895_v62, %v1905_v21  ;;  %v2438_v60 = vsel %vm12474_vm9, %v2436_v32, %v2437_v30  ;;  %v1909_v16 = vrot.slane %v1907_v39, 4  ;;  %v1916_v44 = vshll.u32 %v1817_v31, 16  ;;  %v1821_v21 = vld [vmem:[#allocation2 + $0x38] sm:$0x1] }
  0xf6   : > { %11742 = vmatpush3.bf16.msra.mxu0 %v11989_v59  ;;  %v2840_v27 = vsel %vm12458_vm4, %v2835_v7, %v2839_v4  ;;  %v2845_v48 = vrot.slane %v2844_v15, 4  ;;  %v10324_v40 = vcombine.low %v2435_v43, %v2438_v60  ;;  %v1912_v49 = vrot.slane %v1910_v9, 5  ;;  %v1819_v4 = vld [vmem:[#allocation2 + $0x30] sm:$0xf]  ;;  %v12001_v43 = vld [vmem:[%s15497_s1 + $0x228] sm:$0xff]  }
  0xf7   : > { %11743 = vmatprep.subr.bf16.mxu0 %v11992_v36  ;;  %v1918_v55 = vrot.slane %v1916_v44, 5  ;;  %v1920_v53 = vshrl.u32 %v1817_v31, 16  ;;  %v1926_v18 = vshll.u32 %v1818_v8, 16  ;;  %v2852_v14 = vshrl.u32 %v2761_v46, 16  ;;  %v2764_v8 = vld [vmem:[#allocation2 + $0x3c] sm:$0xf] }
  0xf8   : > { %v2850_v63 = vsel %vm12458_vm4, %v2845_v48, %v2849_v37  ;;  %v1913_v1 = vor.u32 %v1912_v49, %v1909_v16  ;;  %v2855_v38 = vshll.u32 %v2761_v46, 16  ;;  %v2861_v57 = vshll.u32 %v2762_v51, 16  ;;  %v11990_v60 = vld [vmem:[#allocation2 + $0x30] sm:$0xff]   ;;  %v2765_v44 = vld [vmem:[#allocation2 + $0x40] sm:$0xf] }
  0xf9   : > { %4645 = vmatmul.mubr.bf16.gmra.mrb[68].mxu0 %v10291_v47  ;;  %v10355_v26 = vcombine.low %v2840_v27, %v2850_v63  ;;  %v1922_v52 = vrot.slane %v1920_v53, 4  ;;  %v1928_v28 = vrot.slane %v1926_v18, 5  ;;  %v2854_v5 = vrot.slane %v2852_v14, 4  ;;  %v12004_v53 = vld [vmem:[%s15497_s1 + $0x230] sm:$0xff]  }
  0xfa   : > { %4652 = vmatprep.mubr.bf16.mxu0 %v10324_v40  ;;  %11744 = vmatpush3.bf16.msra.mxu0 %v11992_v36  ;;  %v1914_v13 = vrot.slane %v1913_v1, 4  ;;  %v2857_v33 = vrot.slane %v2855_v38, 5  ;;  %v2863_v59 = vrot.slane %v2861_v57, 5  ;;  %v2865_v25 = vshrl.u32 %v2762_v51, 16  ;;  %v2334_v38 = vld [vmem:[#allocation2 + $0x3c] sm:$0xe] }
  0xfb   : > { %11745 = vmatprep.subr.bf16.mxu0 %v11995_v2  ;;  %4805 = vmatprep.mubr.bf16.mxu1 %v10355_v26  ;;  %v1923_v54 = vor.u32 %v1922_v52, %v1918_v55  ;;  %v2871_v34 = vshll.u32 %v2763_v50, 16  ;;  %v10309_v10 = vrot.slane %v2331_v11, 9  ;;  %v2441_v12 = vrot.slane %v2332_v58, 5  ;;  %v2766_v50 = vld [vmem:[#allocation2 + $0x44] sm:$0x1] }
  0xfc   : > { %v1919_v17 = vsel %vm12458_vm4, %v1914_v13, %v1918_v55  ;;  %v2858_v22 = vor.u32 %v2857_v33, %v2854_v5  ;;  %v2867_v62 = vrot.slane %v2865_v25, 4  ;;  %v2444_v23 = vrot.slane %v2333_v24, 5  ;;  %v2335_v57 = vld [vmem:[#allocation2 + $0x40] sm:$0xf] }
  0xfd   : > { %4806 = vmatmul.mubr.bf16.gmra.mrb[68].mxu1 %v11988_v41  ;;  %v1924_v35 = vrot.slane %v1923_v54, 4  ;;  %v2873_v3 = vrot.slane %v2871_v34, 5  ;;  %v2442_v29 = vsel %vm12474_vm9, %v10309_v10, %v2441_v12  ;;  %v2443_v19 = vrot.slane %v2441_v12, 4  ;;  %v1823_v10 = vld [vmem:[#allocation2 + $0x40] sm:$0xf]  ;;  %v12007_v12 = vld [vmem:[%s15497_s1 + $0x238] sm:$0xff]  }
  0xfe   : > { %11746 = vmatpush3.bf16.msra.mxu0 %v11995_v2  ;;  %v2859_v30 = vrot.slane %v2858_v22, 4  ;;  %v2868_v31 = vor.u32 %v2867_v62, %v2863_v59  ;;  %v1931_v36 = vshrl.u32 %v1819_v4, 16  ;;  %v1934_v37 = vshll.u32 %v1819_v4, 16 }
  0xff   : > { %11747 = vmatprep.subr.bf16.mxu0 %v11998_v42  ;;  %v1929_v32 = vsel %vm12458_vm4, %v1924_v35, %v1928_v28  ;;  %v2445_v39 = vsel %vm12474_vm9, %v2443_v19, %v2444_v23  ;;  %v1940_v7 = vshll.u32 %v1820_v20, 16  ;;  %v1944_v15 = vshrl.u32 %v1820_v20, 16  ;;  %v2336_v28 = vld [vmem:[#allocation2 + $0x44] sm:$0x1]  ;;  %v2767_v19 = vld [vmem:[#allocation2 + $0x48] sm:$0xf] }
 0x100   : > { %v10292_v9 = vcombine.low %v1919_v17, %v1929_v32  ;;  %v2864_v46 = vsel %vm12458_vm4, %v2859_v30, %v2863_v59  ;;  %v2869_v47 = vrot.slane %v2868_v31, 4  ;;  %v10325_v16 = vcombine.low %v2442_v29, %v2445_v39  ;;  %v1822_v59 = vld [vmem:[#allocation2 + $0x3c] sm:$0xf]  ;;  %v1824_v23 = vld [vmem:[#allocation2 + $0x44] sm:$0x1] }
 0x101   : > { %v1933_v51 = vrot.slane %v1931_v36, 4  ;;  %v1936_v2 = vrot.slane %v1934_v37, 5  ;;  %v1942_v27 = vrot.slane %v1940_v7, 5  ;;  %v1946_v48 = vrot.slane %v1944_v15, 4  ;;  %v2768_v7 = vld [vmem:[#allocation2 + $0x4c] sm:$0xf] }
 0x102   : > { %11748 = vmatpush3.bf16.msra.mxu0 %v11998_v42  ;;  %v2874_v40 = vsel %vm12458_vm4, %v2869_v47, %v2873_v3  ;;  %v1950_v49 = vshll.u32 %v1821_v21, 16  ;;  %v2876_v11 = vshrl.u32 %v2764_v8, 16  ;;  %v2879_v55 = vshll.u32 %v2764_v8, 16  ;;  %v11991_v15 = vld [vmem:[#allocation2 + $0x3c] sm:$0xff]  }
 0x103   : > { %4653 = vmatmul.mubr.bf16.gmra.mrb[72].mxu0 %v10292_v9  ;;  %11749 = vmatprep.subr.bf16.mxu0 %v12001_v43  ;;  %v10356_v18 = vcombine.low %v2864_v46, %v2874_v40  ;;  %v1937_v14 = vor.u32 %v1936_v2, %v1933_v51  ;;  %v1947_v63 = vor.u32 %v1946_v48, %v1942_v27  ;;  %v2885_v1 = vshll.u32 %v2765_v44, 16  ;;  %v2338_v48 = vld [vmem:[#allocation2 + $0x4c] sm:$0xf] }
 0x104   : > { %4660 = vmatprep.mubr.bf16.mxu0 %v10325_v16  ;;  %v1952_v58 = vrot.slane %v1950_v49, 5  ;;  %v2878_v26 = vrot.slane %v2876_v11, 4  ;;  %v2881_v41 = vrot.slane %v2879_v55, 5  ;;  %v2889_v52 = vshrl.u32 %v2765_v44, 16  ;;  %v2339_v55 = vld [vmem:[#allocation2 + $0x50] sm:$0x1] }
 0x105   : > { %4813 = vmatprep.mubr.bf16.mxu1 %v10356_v18  ;;  %v1938_v5 = vrot.slane %v1937_v14, 4  ;;  %v1948_v24 = vrot.slane %v1947_v63, 4  ;;  %v2887_v13 = vrot.slane %v2885_v1, 5  ;;  %v2895_v33 = vshll.u32 %v2766_v50, 16 }
 0x106   : > { %11750 = vmatpush3.bf16.msra.mxu0 %v12001_v43  ;;  %4814 = vmatmul.mubr.bf16.gmra.mrb[72].mxu1 %v11990_v60  ;;  %v2882_v25 = vor.u32 %v2881_v41, %v2878_v26  ;;  %v2891_v42 = vrot.slane %v2889_v52, 4  ;;  %v10310_v54 = vrot.slane %v2334_v38, 9  ;;  %v2448_v34 = vrot.slane %v2335_v57, 5  ;;  %v2769_v60 = vld [vmem:[#allocation2 + $0x50] sm:$0x1] }
 0x107   : > { %11751 = vmatprep.subr.bf16.mxu0 %v12004_v53  ;;  %v1943_v4 = vsel %vm12458_vm4, %v1938_v5, %v1942_v27  ;;  %v1953_v17 = vsel %vm12458_vm4, %v1948_v24, %v1952_v58  ;;  %v2897_v22 = vrot.slane %v2895_v33, 5  ;;  %v2451_v62 = vrot.slane %v2336_v28, 5  ;;  %v2337_v27 = vld [vmem:[#allocation2 + $0x48] sm:$0xe] }
 0x108   : > { %v10293_v20 = vcombine.low %v1943_v4, %v1953_v17  ;;  %v2883_v35 = vrot.slane %v2882_v25, 4  ;;  %v2892_v3 = vor.u32 %v2891_v42, %v2887_v13  ;;  %v2449_v29 = vsel %vm12474_vm9, %v10310_v54, %v2448_v34  ;;  %v1826_v25 = vld [vmem:[#allocation2 + $0x4c] sm:$0xf]  ;;  %v1827_v42 = vld [vmem:[#allocation2 + $0x50] sm:$0x1] }
 0x109   : > { %v2450_v30 = vrot.slane %v2448_v34, 4  ;;  %v1955_v31 = vshrl.u32 %v1822_v59, 16  ;;  %v1958_v36 = vshll.u32 %v1822_v59, 16  ;;  %v1964_v37 = vshll.u32 %v1823_v10, 16 }
 0x10a   : > { %11752 = vmatpush3.bf16.msra.mxu0 %v12004_v53  ;;  %v2888_v43 = vsel %vm12458_vm4, %v2883_v35, %v2887_v13  ;;  %v2893_v32 = vrot.slane %v2892_v3, 4  ;;  %v1968_v39 = vshrl.u32 %v1823_v10, 16  ;;  %v1974_v21 = vshll.u32 %v1824_v23, 16  ;;  %v1825_v53 = vld [vmem:[#allocation2 + $0x48] sm:$0xf] }
 0x10b   : > { %4661 = vmatmul.mubr.bf16.gmra.mrb[76].mxu0 %v10293_v20  ;;  %11753 = vmatprep.subr.bf16.mxu0 %v12007_v12  ;;  %v2452_v8 = vsel %vm12474_vm9, %v2450_v30, %v2451_v62  ;;  %v1957_v9 = vrot.slane %v1955_v31, 4  ;;  %v1960_v46 = vrot.slane %v1958_v36, 5  ;;  %v1966_v47 = vrot.slane %v1964_v37, 5  ;;  %v2770_v23 = vld [vmem:[#allocation2 + $0x54] sm:$0xf] }
 0x10c   : > { %v2898_v16 = vsel %vm12458_vm4, %v2893_v32, %v2897_v22  ;;  %v10326_v44 = vcombine.low %v2449_v29, %v2452_v8  ;;  %v1970_v51 = vrot.slane %v1968_v39, 4  ;;  %v1976_v2 = vrot.slane %v1974_v21, 5  ;;  %v2340_v32 = vld [vmem:[#allocation2 + $0x54] sm:$0xe]  ;;  %v11993_v21 = vld [vmem:[#allocation2 + $0x48] sm:$0xff]  }
 0x10d   : > { %v10357_v40 = vcombine.low %v2888_v43, %v2898_v16  ;;  %v1961_v49 = vor.u32 %v1960_v46, %v1957_v9  ;;  %v2900_v50 = vshrl.u32 %v2767_v19, 16  ;;  %v2903_v11 = vshll.u32 %v2767_v19, 16  ;;  %v2771_v19 = vld [vmem:[#allocation2 + $0x58] sm:$0xf]  ;;  %v2772_v43 = vld [vmem:[#allocation2 + $0x5c] sm:$0x1] }
 0x10e   : > { %11754 = vmatpush3.bf16.msra.mxu0 %v12007_v12  ;;  %4668 = vmatprep.mubr.bf16.mxu0 %v10326_v44  ;;  %v1971_v18 = vor.u32 %v1970_v51, %v1966_v47  ;;  %v2909_v14 = vshll.u32 %v2768_v7, 16  ;;  %v2913_v63 = vshrl.u32 %v2768_v7, 16  ;;  %v2919_v1 = vshll.u32 %v2769_v60, 16  ;;  %v2341_v9 = vld [vmem:[#allocation2 + $0x58] sm:$0xf] }
 0x10f   : > { %4821 = vmatprep.mubr.bf16.mxu1 %v10357_v40  ;;  %v1962_v38 = vrot.slane %v1961_v49, 4  ;;  %v2902_v57 = vrot.slane %v2900_v50, 4  ;;  %v2905_v58 = vrot.slane %v2903_v11, 5  ;;  %v10311_v26 = vrot.slane %v2337_v27, 9  ;;  %v2342_v46 = vld [vmem:[#allocation2 + $0x5c] sm:$0x1] }
 0x110   : > { %4822 = vmatmul.mubr.bf16.gmra.mrb[76].mxu1 %v11991_v15  ;;  %v1972_v41 = vrot.slane %v1971_v18, 4  ;;  %v2911_v52 = vrot.slane %v2909_v14, 5  ;;  %v2915_v28 = vrot.slane %v2913_v63, 4  ;;  %v2921_v5 = vrot.slane %v2919_v1, 5  ;;  %v1828_v51 = vld [vmem:[#allocation2 + $0x54] sm:$0xf] }
 0x111   : > { %v1967_v24 = vsel %vm12458_vm4, %v1962_v38, %v1966_v47  ;;  %v2906_v13 = vor.u32 %v2905_v58, %v2902_v57  ;;  %v2455_v33 = vrot.slane %v2338_v48, 5  ;;  %v2458_v59 = vrot.slane %v2339_v55, 5  ;;  %v1829_v49 = vld [vmem:[#allocation2 + $0x58] sm:$0xf] }
 0x112   : > { %v1977_v54 = vsel %vm12458_vm4, %v1972_v41, %v1976_v2  ;;  %v2916_v34 = vor.u32 %v2915_v28, %v2911_v52  ;;  %v1979_v10 = vshrl.u32 %v1825_v53, 16  ;;  %v1982_v12 = vshll.u32 %v1825_v53, 16  ;;  %v1830_v28 = vld [vmem:[#allocation2 + $0x5c] sm:$0x1] }
 0x113   : > { %v10294_v4 = vcombine.low %v1967_v24, %v1977_v54  ;;  %v2907_v17 = vrot.slane %v2906_v13, 4  ;;  %v2456_v22 = vsel %vm12474_vm9, %v10311_v26, %v2455_v33  ;;  %v2457_v62 = vrot.slane %v2455_v33, 4  ;;  %v2774_v54 = vld [vmem:[#allocation2 + $0x64] sm:$0xf] }
 0x114   : > { %v2917_v20 = vrot.slane %v2916_v34, 4  ;;  %v1981_v35 = vrot.slane %v1979_v10, 4  ;;  %v1984_v3 = vrot.slane %v1982_v12, 5  ;;  %v1988_v29 = vshll.u32 %v1826_v25, 16 }
 0x115   : > { %4669 = vmatmul.mubr.bf16.gmra.mrb[80].mxu0 %v10294_v4  ;;  %v2912_v30 = vsel %vm12458_vm4, %v2907_v17, %v2911_v52  ;;  %v2459_v31 = vsel %vm12474_vm9, %v2457_v62, %v2458_v59  ;;  %v1992_v36 = vshrl.u32 %v1826_v25, 16  ;;  %v1998_v37 = vshll.u32 %v1827_v42, 16  ;;  %v2773_v42 = vld [vmem:[#allocation2 + $0x60] sm:$0xf]  ;;  %v2775_v17 = vld [vmem:[#allocation2 + $0x68] sm:$0x1] }
 0x116   : > { %v2922_v39 = vsel %vm12458_vm4, %v2917_v20, %v2921_v5  ;;  %v10327_v7 = vcombine.low %v2456_v22, %v2459_v31  ;;  %v1985_v15 = vor.u32 %v1984_v3, %v1981_v35  ;;  %v1990_v8 = vrot.slane %v1988_v29, 5  ;;  %v2343_v35 = vld [vmem:[#allocation2 + $0x60] sm:$0xe] }
 0x117   : > { %v10358_v47 = vcombine.low %v2912_v30, %v2922_v39  ;;  %v1994_v60 = vrot.slane %v1992_v36, 4  ;;  %v2000_v16 = vrot.slane %v1998_v37, 5  ;;  %v2924_v44 = vshrl.u32 %v2770_v23, 16  ;;  %v2344_v36 = vld [vmem:[#allocation2 + $0x64] sm:$0xf] }
 0x118   : > { %4676 = vmatprep.mubr.bf16.mxu0 %v10327_v7  ;;  %v1986_v2 = vrot.slane %v1985_v15, 4  ;;  %v2927_v27 = vshll.u32 %v2770_v23, 16  ;;  %v2933_v48 = vshll.u32 %v2771_v19, 16  ;;  %v2937_v40 = vshrl.u32 %v2771_v19, 16  ;;  %v11994_v19 = vld [vmem:[#allocation2 + $0x54] sm:$0xff]  }
 0x119   : > { %4829 = vmatprep.mubr.bf16.mxu1 %v10358_v47  ;;  %v1995_v50 = vor.u32 %v1994_v60, %v1990_v8  ;;  %v2926_v11 = vrot.slane %v2924_v44, 4  ;;  %v2943_v55 = vshll.u32 %v2772_v43, 16  ;;  %v10312_v53 = vrot.slane %v2340_v32, 9  ;;  %v1831_v7 = vld [vmem:[#allocation2 + $0x60] sm:$0xf] }
 0x11a   : > { %4830 = vmatmul.mubr.bf16.gmra.mrb[80].mxu1 %v11993_v21  ;;  %v1991_v18 = vsel %vm12458_vm4, %v1986_v2, %v1990_v8  ;;  %v2929_v14 = vrot.slane %v2927_v27, 5  ;;  %v2935_v63 = vrot.slane %v2933_v48, 5  ;;  %v2939_v1 = vrot.slane %v2937_v40, 4  ;;  %v2345_v21 = vld [vmem:[#allocation2 + $0x68] sm:$0x1] }
 0x11b   : > { %v1996_v38 = vrot.slane %v1995_v50, 4  ;;  %v2945_v57 = vrot.slane %v2943_v55, 5  ;;  %v2462_v58 = vrot.slane %v2341_v9, 5  ;;  %v2465_v26 = vrot.slane %v2342_v46, 5 }
 0x11c   : > { %v2930_v41 = vor.u32 %v2929_v14, %v2926_v11  ;;  %v2940_v52 = vor.u32 %v2939_v1, %v2935_v63  ;;  %v2003_v5 = vshrl.u32 %v1828_v51, 16  ;;  %v2006_v24 = vshll.u32 %v1828_v51, 16  ;;  %v1832_v1 = vld [vmem:[#allocation2 + $0x64] sm:$0xf] }
 0x11d   : > { %v2001_v13 = vsel %vm12458_vm4, %v1996_v38, %v2000_v16  ;;  %v2463_v33 = vsel %vm12474_vm9, %v10312_v53, %v2462_v58  ;;  %v2464_v59 = vrot.slane %v2462_v58, 4  ;;  %v2012_v25 = vshll.u32 %v1829_v49, 16 }
 0x11e   : > { %v10295_v34 = vcombine.low %v1991_v18, %v2001_v13  ;;  %v2931_v10 = vrot.slane %v2930_v41, 4  ;;  %v2941_v12 = vrot.slane %v2940_v52, 4  ;;  %v2005_v4 = vrot.slane %v2003_v5, 4  ;;  %v1833_v41 = vld [vmem:[#allocation2 + $0x68] sm:$0x1] }
 0x11f   : > { %v2466_v22 = vsel %vm12474_vm9, %v2464_v59, %v2465_v26  ;;  %v2008_v62 = vrot.slane %v2006_v24, 5  ;;  %v2014_v23 = vrot.slane %v2012_v25, 5  ;;  %v2016_v20 = vshrl.u32 %v1829_v49, 16  ;;  %v2777_v59 = vld [vmem:[#allocation2 + $0x70] sm:$0xf] }
 0x120   : > { %4677 = vmatmul.mubr.bf16.gmra.mrb[84].mxu0 %v10295_v34  ;;  %v2936_v3 = vsel %vm12458_vm4, %v2931_v10, %v2935_v63  ;;  %v2946_v29 = vsel %vm12458_vm4, %v2941_v12, %v2945_v57  ;;  %v10328_v30 = vcombine.low %v2463_v33, %v2466_v22  ;;  %v2022_v31 = vshll.u32 %v1830_v28, 16  ;;  %v2776_v28 = vld [vmem:[#allocation2 + $0x6c] sm:$0xf]  ;;  %v2778_v12 = vld [vmem:[#allocation2 + $0x74] sm:$0x1] }
 0x121   : > { %v10359_v37 = vcombine.low %v2936_v3, %v2946_v29  ;;  %v2009_v43 = vor.u32 %v2008_v62, %v2005_v4  ;;  %v2018_v32 = vrot.slane %v2016_v20, 4  ;;  %v2948_v39 = vshrl.u32 %v2773_v42, 16  ;;  %v11996_v62 = vld [vmem:[#allocation2 + $0x60] sm:$0xff]  }
 0x122   : > { %4684 = vmatprep.mubr.bf16.mxu0 %v10328_v30  ;;  %v2024_v15 = vrot.slane %v2022_v31, 5  ;;  %v2951_v8 = vshll.u32 %v2773_v42, 16  ;;  %v2957_v9 = vshll.u32 %v2774_v54, 16  ;;  %v2961_v46 = vshrl.u32 %v2774_v54, 16  ;;  %v2347_v31 = vld [vmem:[#allocation2 + $0x70] sm:$0xf] }
 0x123   : > { %4837 = vmatprep.mubr.bf16.mxu1 %v10359_v37  ;;  %v2010_v47 = vrot.slane %v2009_v43, 4  ;;  %v2019_v60 = vor.u32 %v2018_v32, %v2014_v23  ;;  %v2950_v16 = vrot.slane %v2948_v39, 4  ;;  %v2967_v44 = vshll.u32 %v2775_v17, 16  ;;  %v2348_v39 = vld [vmem:[#allocation2 + $0x74] sm:$0x1] }
 0x124   : > { %4838 = vmatmul.mubr.bf16.gmra.mrb[84].mxu1 %v11994_v19  ;;  %v2953_v2 = vrot.slane %v2951_v8, 5  ;;  %v2959_v27 = vrot.slane %v2957_v9, 5  ;;  %v2963_v48 = vrot.slane %v2961_v46, 4  ;;  %v10313_v40 = vrot.slane %v2343_v35, 9  ;;  %v2346_v35 = vld [vmem:[#allocation2 + $0x6c] sm:$0xe] }
 0x125   : > { %v2015_v49 = vsel %vm12458_vm4, %v2010_v47, %v2014_v23  ;;  %v2020_v50 = vrot.slane %v2019_v60, 4  ;;  %v2969_v11 = vrot.slane %v2967_v44, 5  ;;  %v2469_v55 = vrot.slane %v2344_v36, 5  ;;  %v1834_v9 = vld [vmem:[#allocation2 + $0x6c] sm:$0xf] }
 0x126   : > { %v2954_v18 = vor.u32 %v2953_v2, %v2950_v16  ;;  %v2964_v14 = vor.u32 %v2963_v48, %v2959_v27  ;;  %v2472_v63 = vrot.slane %v2345_v21, 5  ;;  %v2027_v38 = vshrl.u32 %v1831_v7, 16  ;;  %v1835_v44 = vld [vmem:[#allocation2 + $0x70] sm:$0xf] }
 0x127   : > { %v2025_v57 = vsel %vm12458_vm4, %v2020_v50, %v2024_v15  ;;  %v2470_v58 = vsel %vm12474_vm9, %v10313_v40, %v2469_v55  ;;  %v2471_v26 = vrot.slane %v2469_v55, 4  ;;  %v2030_v52 = vshll.u32 %v1831_v7, 16  ;;  %v1836_v55 = vld [vmem:[#allocation2 + $0x74] sm:$0x1] }
 0x128   : > { %v10296_v5 = vcombine.low %v2015_v49, %v2025_v57  ;;  %v2955_v24 = vrot.slane %v2954_v18, 4  ;;  %v2965_v13 = vrot.slane %v2964_v14, 4  ;;  %v2029_v33 = vrot.slane %v2027_v38, 4 }
 0x129   : > { %v2473_v42 = vsel %vm12474_vm9, %v2471_v26, %v2472_v63  ;;  %v2032_v54 = vrot.slane %v2030_v52, 5  ;;  %v2036_v34 = vshll.u32 %v1832_v1, 16  ;;  %v2040_v10 = vshrl.u32 %v1832_v1, 16  ;;  %v2779_v52 = vld [vmem:[#allocation2 + $0x78] sm:$0xf] }
 0x12a   : > { %v13112_v51 = vpop.f32.mrb[0].mxu0  ;;  %4685 = vmatmul.mubr.bf16.gmra.mrb[88].mxu0 %v10296_v5  ;;  %v2960_v17 = vsel %vm12458_vm4, %v2955_v24, %v2959_v27  ;;  %v2970_v22 = vsel %vm12458_vm4, %v2965_v13, %v2969_v11  ;;  %v10329_v23 = vcombine.low %v2470_v58, %v2473_v42  ;;  %v2046_v20 = vshll.u32 %v1833_v41, 16  ;;  %v11997_v24 = vld [vmem:[#allocation2 + $0x6c] sm:$0xff]   ;;  %v2781_v42 = vld [vmem:[#allocation2 + $0x80] sm:$0x1] }
 0x12b   : > { %v13116_v53 = vpop.f32.mrb[1].mxu0  ;;  %v10360_v3 = vcombine.low %v2960_v17, %v2970_v22  ;;  %v2033_v29 = vor.u32 %v2032_v54, %v2029_v33  ;;  %v2038_v19 = vrot.slane %v2036_v34, 5  ;;  %v2042_v30 = vrot.slane %v2040_v10, 4 }
 0x12c   : > { %v13122_v25 = vpop.f32.mrb[2].mxu0  ;;  %4692 = vmatprep.mubr.bf16.mxu0 %v10329_v23  ;;  %v2048_v36 = vrot.slane %v2046_v20, 5  ;;  %v2972_v37 = vshrl.u32 %v2776_v28, 16  ;;  %v2975_v43 = vshll.u32 %v2776_v28, 16  ;;  %v2981_v32 = vshll.u32 %v2777_v59, 16 }
 0x12d   : > { %v13126_v4 = vpop.f32.mrb[3].mxu0  ;;  %4845 = vmatprep.mubr.bf16.mxu1 %v10360_v3  ;;  %v2034_v21 = vrot.slane %v2033_v29, 4  ;;  %v2043_v7 = vor.u32 %v2042_v30, %v2038_v19  ;;  %v2985_v15 = vshrl.u32 %v2777_v59, 16  ;;  %v2991_v8 = vshll.u32 %v2778_v12, 16  ;;  %v2780_v28 = vld [vmem:[#allocation2 + $0x7c] sm:$0xf] }
 0x12e   : > { %4846 = vmatmul.mubr.bf16.gmra.mrb[88].mxu1 %v11996_v62  ;;  %v2974_v46 = vrot.slane %v2972_v37, 4  ;;  %v2977_v47 = vrot.slane %v2975_v43, 5  ;;  %v2983_v60 = vrot.slane %v2981_v32, 5  ;;  %v10314_v16 = vrot.slane %v2346_v35, 9  ;;  %v2349_v20 = vld [vmem:[#allocation2 + $0x78] sm:$0xe] }
 0x12f   : > { %v2039_v2 = vsel %vm12458_vm4, %v2034_v21, %v2038_v19  ;;  %v2044_v27 = vrot.slane %v2043_v7, 4  ;;  %v2987_v48 = vrot.slane %v2985_v15, 4  ;;  %v2993_v40 = vrot.slane %v2991_v8, 5  ;;  %v2350_v35 = vld [vmem:[#allocation2 + $0x7c] sm:$0xf] }
 0x130   : > { %v2978_v49 = vor.u32 %v2977_v47, %v2974_v46  ;;  %v2476_v50 = vrot.slane %v2347_v31, 5  ;;  %v2479_v11 = vrot.slane %v2348_v39, 5  ;;  %v2051_v18 = vshrl.u32 %v1834_v9, 16  ;;  %v1837_v47 = vld [vmem:[#allocation2 + $0x78] sm:$0xf] }
 0x131   : > { %v2049_v14 = vsel %vm12458_vm4, %v2044_v27, %v2048_v36  ;;  %v2988_v63 = vor.u32 %v2987_v48, %v2983_v60  ;;  %v2054_v1 = vshll.u32 %v1834_v9, 16  ;;  %v2060_v38 = vshll.u32 %v1835_v44, 16  ;;  %v2351_v36 = vld [vmem:[#allocation2 + $0x80] sm:$0x1]  ;;  %v1838_v48 = vld [vmem:[#allocation2 + $0x7c] sm:$0xf] }
 0x132   : > { %v10297_v57 = vcombine.low %v2039_v2, %v2049_v14  ;;  %v2979_v58 = vrot.slane %v2978_v49, 4  ;;  %v2477_v26 = vsel %vm12474_vm9, %v10314_v16, %v2476_v50  ;;  %v2478_v41 = vrot.slane %v2476_v50, 4 }
 0x133   : > { %v2989_v5 = vrot.slane %v2988_v63, 4  ;;  %v2053_v13 = vrot.slane %v2051_v18, 4  ;;  %v2056_v33 = vrot.slane %v2054_v1, 5  ;;  %v2062_v59 = vrot.slane %v2060_v38, 5  ;;  %v13144_v3 = vpop.f32.mrb[0].mxu1 }
 0x134   : > { %4693 = vmatmul.mubr.bf16.gmra.mrb[92].mxu0 %v10297_v57  ;;  %v2984_v54 = vsel %vm12458_vm4, %v2979_v58, %v2983_v60  ;;  %v2480_v34 = vsel %vm12474_vm9, %v2478_v41, %v2479_v11  ;;  %v2064_v10 = vshrl.u32 %v1835_v44, 16  ;;  %v2070_v12 = vshll.u32 %v1836_v55, 16  ;;  %v13146_v37 = vpop.f32.mrb[1].mxu1  ;;  %v1839_v63 = vld [vmem:[#allocation2 + $0x80] sm:$0x1] }
 0x135   : > { %v2994_v17 = vsel %vm12458_vm4, %v2989_v5, %v2993_v40  ;;  %v10330_v22 = vcombine.low %v2477_v26, %v2480_v34  ;;  %v2057_v62 = vor.u32 %v2056_v33, %v2053_v13  ;;  %v2996_v23 = vshrl.u32 %v2779_v52, 16  ;;  %v13148_v7 = vpop.f32.mrb[2].mxu1  ;;  %v2782_v38 = vld [vmem:[#allocation2 + $0x84] sm:$0xf] }
 0x136   : > { %v10361_v29 = vcombine.low %v2984_v54, %v2994_v17  ;;  %v2066_v19 = vrot.slane %v2064_v10, 4  ;;  %v2072_v30 = vrot.slane %v2070_v12, 5  ;;  %v2999_v31 = vshll.u32 %v2779_v52, 16  ;;  %v13150_v60 = vpop.f32.mrb[3].mxu1  ;;  %v2783_v52 = vld [vmem:[#allocation2 + $0x88] sm:$0xf] }
 0x137   : > { %4700 = vmatprep.mubr.bf16.mxu0 %v10330_v22  ;;  %v2058_v43 = vrot.slane %v2057_v62, 4  ;;  %v2998_v32 = vrot.slane %v2996_v23, 4  ;;  %v3005_v39 = vshll.u32 %v2780_v28, 16  ;;  %v3009_v21 = vshrl.u32 %v2780_v28, 16  ;;  %v2352_v12 = vld [vmem:[#allocation2 + $0x84] sm:$0xe] }
 0x138   : > { %4853 = vmatprep.mubr.bf16.mxu1 %v10361_v29  ;;  %v2067_v15 = vor.u32 %v2066_v19, %v2062_v59  ;;  %v3001_v8 = vrot.slane %v2999_v31, 5  ;;  %v3015_v9 = vshll.u32 %v2781_v42, 16  ;;  %v10315_v46 = vrot.slane %v2349_v20, 9  ;;  %v11999_v23 = vld [vmem:[#allocation2 + $0x78] sm:$0xff]  }
 0x139   : > { %4854 = vmatmul.mubr.bf16.gmra.mrb[92].mxu1 %v11997_v24  ;;  %v2063_v16 = vsel %vm12458_vm4, %v2058_v43, %v2062_v59  ;;  %v3007_v44 = vrot.slane %v3005_v39, 5  ;;  %v3011_v2 = vrot.slane %v3009_v21, 4  ;;  %v2483_v27 = vrot.slane %v2350_v35, 5  ;;  %v2784_v59 = vld [vmem:[#allocation2 + $0x8c] sm:$0x1] }
 0x13a   : > { %v2068_v40 = vrot.slane %v2067_v15, 4  ;;  %v3002_v49 = vor.u32 %v3001_v8, %v2998_v32  ;;  %v3017_v50 = vrot.slane %v3015_v9, 5  ;;  %v2486_v11 = vrot.slane %v2351_v36, 5  ;;  %v2353_v39 = vld [vmem:[#allocation2 + $0x88] sm:$0xf] }
 0x13b   : > { %v3012_v55 = vor.u32 %v3011_v2, %v3007_v44  ;;  %v2484_v18 = vsel %vm12474_vm9, %v10315_v46, %v2483_v27  ;;  %v2485_v14 = vrot.slane %v2483_v27, 4  ;;  %v2075_v1 = vshrl.u32 %v1837_v47, 16 }
 0x13c   : > { %v2073_v57 = vsel %vm12458_vm4, %v2068_v40, %v2072_v30  ;;  %v3003_v58 = vrot.slane %v3002_v49, 4  ;;  %v2078_v26 = vshll.u32 %v1837_v47, 16  ;;  %v2084_v41 = vshll.u32 %v1838_v48, 16  ;;  %v1840_v40 = vld [vmem:[#allocation2 + $0x84] sm:$0xf] }
 0x13d   : > { %v10298_v5 = vcombine.low %v2063_v16, %v2073_v57  ;;  %v3013_v24 = vrot.slane %v3012_v55, 4  ;;  %v2487_v13 = vsel %vm12474_vm9, %v2485_v14, %v2486_v11  ;;  %v2077_v33 = vrot.slane %v2075_v1, 4  ;;  %v13166_v22 = vpop.f32.mrb[4].mxu1  ;;  %v2354_v16 = vld [vmem:[#allocation2 + $0x8c] sm:$0x1] }
 0x13e   : > { %v3008_v42 = vsel %vm12458_vm4, %v3003_v58, %v3007_v44  ;;  %v10331_v54 = vcombine.low %v2484_v18, %v2487_v13  ;;  %v2080_v34 = vrot.slane %v2078_v26, 5  ;;  %v2086_v10 = vrot.slane %v2084_v41, 5  ;;  %v13172_v30 = vpop.f32.mrb[5].mxu1  ;;  %v1841_v18 = vld [vmem:[#allocation2 + $0x88] sm:$0xf] }
 0x13f   : > { %v13158_v28 = vpop.f32.mrb[4].mxu0  ;;  %4701 = vmatmul.mubr.bf16.gmra.mrb[96].mxu0 %v10298_v5  ;;  %v3018_v62 = vsel %vm12458_vm4, %v3013_v24, %v3017_v50  ;;  %v2088_v20 = vshrl.u32 %v1838_v48, 16  ;;  %v2094_v35 = vshll.u32 %v1839_v63, 16  ;;  %v3020_v29 = vshrl.u32 %v2782_v38, 16  ;;  %v13176_v15 = vpop.f32.mrb[6].mxu1 }
 0x140   : > { %v13164_v17 = vpop.f32.mrb[5].mxu0  ;;  %v10362_v31 = vcombine.low %v3008_v42, %v3018_v62  ;;  %4708 = vmatprep.mubr.bf16.mxu0 %v10331_v54  ;;  %v2081_v36 = vor.u32 %v2080_v34, %v2077_v33  ;;  %v3023_v43 = vshll.u32 %v2782_v38, 16  ;;  %v3029_v32 = vshll.u32 %v2783_v52, 16  ;;  %v13178_v14 = vpop.f32.mrb[7].mxu1  ;;  %v1842_v5 = vld [vmem:[#allocation2 + $0x8c] sm:$0x1] }
 0x141   : > { %v13170_v19 = vpop.f32.mrb[6].mxu0  ;;  %v2090_v8 = vrot.slane %v2088_v20, 4  ;;  %v2096_v9 = vrot.slane %v2094_v35, 5  ;;  %v3022_v46 = vrot.slane %v3020_v29, 4  ;;  %v3033_v47 = vshrl.u32 %v2783_v52, 16 }
 0x142   : > { %v13174_v21 = vpop.f32.mrb[7].mxu0  ;;  %4861 = vmatprep.mubr.bf16.mxu1 %v10362_v31  ;;  %v2082_v44 = vrot.slane %v2081_v36, 4  ;;  %v3025_v2 = vrot.slane %v3023_v43, 5  ;;  %v3031_v27 = vrot.slane %v3029_v32, 5  ;;  %v3039_v48 = vshll.u32 %v2784_v59, 16  ;;  %v12000_v32 = vld [vmem:[#allocation2 + $0x84] sm:$0xff]  }
 0x143   : > { %4862 = vmatmul.mubr.bf16.gmra.mrb[96].mxu1 %v11999_v23  ;;  %v2091_v49 = vor.u32 %v2090_v8, %v2086_v10  ;;  %v3035_v50 = vrot.slane %v3033_v47, 4  ;;  %v10316_v11 = vrot.slane %v2352_v12, 9  ;;  %v2490_v55 = vrot.slane %v2353_v39, 5  ;;  %v2785_v42 = vld [vmem:[#allocation2 + $0x90] sm:$0xf] }
 0x144   : > { %v2087_v63 = vsel %vm12458_vm4, %v2082_v44, %v2086_v10  ;;  %v3026_v1 = vor.u32 %v3025_v2, %v3022_v46  ;;  %v3041_v38 = vrot.slane %v3039_v48, 5  ;;  %v2493_v57 = vrot.slane %v2354_v16, 5  ;;  %v2786_v62 = vld [vmem:[#allocation2 + $0x94] sm:$0xf]  ;;  %v2787_v23 = vld [vmem:[#allocation2 + $0x98] sm:$0x1] }
 0x145   : > { %v2092_v58 = vrot.slane %v2091_v49, 4  ;;  %v3036_v26 = vor.u32 %v3035_v50, %v3031_v27  ;;  %v2491_v41 = vsel %vm12474_vm9, %v10316_v11, %v2490_v55  ;;  %v2492_v52 = vrot.slane %v2490_v55, 4  ;;  %v13196_v47 = vpop.f32.mrb[8].mxu1 }
 0x146   : > { %v3027_v24 = vrot.slane %v3026_v1, 4  ;;  %v2099_v13 = vshrl.u32 %v1840_v40, 16  ;;  %v2102_v33 = vshll.u32 %v1840_v40, 16  ;;  %v2108_v59 = vshll.u32 %v1841_v18, 16  ;;  %v13200_v40 = vpop.f32.mrb[9].mxu1 }
 0x147   : > { %v2097_v54 = vsel %vm12458_vm4, %v2092_v58, %v2096_v9  ;;  %v3037_v34 = vrot.slane %v3036_v26, 4  ;;  %v2494_v10 = vsel %vm12474_vm9, %v2492_v52, %v2493_v57  ;;  %v2112_v12 = vshrl.u32 %v1841_v18, 16  ;;  %v13190_v36 = vpop.f32.mrb[8].mxu0 }
 0x148   : > { %v10299_v20 = vcombine.low %v2087_v63, %v2097_v54  ;;  %v3032_v35 = vsel %vm12458_vm4, %v3027_v24, %v3031_v27  ;;  %v10332_v29 = vcombine.low %v2491_v41, %v2494_v10  ;;  %v2101_v31 = vrot.slane %v2099_v13, 4  ;;  %v13194_v46 = vpop.f32.mrb[9].mxu0  ;;  %v13204_v63 = vpop.f32.mrb[10].mxu1  ;;  %v2355_v24 = vld [vmem:[#allocation2 + $0x90] sm:$0xe] }
 0x149   : > { %v3042_v43 = vsel %vm12458_vm4, %v3037_v34, %v3041_v38  ;;  %v2104_v39 = vrot.slane %v2102_v33, 5  ;;  %v2110_v8 = vrot.slane %v2108_v59, 5  ;;  %v2114_v9 = vrot.slane %v2112_v12, 4  ;;  %v13198_v48 = vpop.f32.mrb[10].mxu0  ;;  %v2356_v54 = vld [vmem:[#allocation2 + $0x94] sm:$0xf] }
 0x14a   : > { %4709 = vmatmul.mubr.bf16.gmra.mrb[100].mxu0 %v10299_v20  ;;  %v10363_v16 = vcombine.low %v3032_v35, %v3042_v43  ;;  %v2118_v44 = vshll.u32 %v1842_v5, 16  ;;  %v3044_v2 = vshrl.u32 %v2785_v42, 16  ;;  %v3047_v27 = vshll.u32 %v2785_v42, 16  ;;  %v13202_v18 = vpop.f32.mrb[11].mxu0  ;;  %v2357_v34 = vld [vmem:[#allocation2 + $0x98] sm:$0x1] }
 0x14b   : > { %4716 = vmatprep.mubr.bf16.mxu0 %v10332_v29  ;;  %v2105_v49 = vor.u32 %v2104_v39, %v2101_v31  ;;  %v2115_v50 = vor.u32 %v2114_v9, %v2110_v8  ;;  %v3053_v11 = vshll.u32 %v2786_v62, 16  ;;  %v3057_v55 = vshrl.u32 %v2786_v62, 16  ;;  %v13214_v10 = vpop.f32.mrb[11].mxu1  ;;  %v12002_v43 = vld [vmem:[#allocation2 + $0x90] sm:$0xff]  }
 0x14c   : > { %4869 = vmatprep.mubr.bf16.mxu1 %v10363_v16  ;;  %v2120_v1 = vrot.slane %v2118_v44, 5  ;;  %v3046_v38 = vrot.slane %v3044_v2, 4  ;;  %v3049_v57 = vrot.slane %v3047_v27, 5  ;;  %v3063_v58 = vshll.u32 %v2787_v23, 16  ;;  %v2788_v44 = vld [vmem:[#allocation2 + $0x9c] sm:$0xf] }
 0x14d   : > { %4870 = vmatmul.mubr.bf16.gmra.mrb[100].mxu1 %v12000_v32  ;;  %v2106_v26 = vrot.slane %v2105_v49, 4  ;;  %v2116_v41 = vrot.slane %v2115_v50, 4  ;;  %v3055_v52 = vrot.slane %v3053_v11, 5  ;;  %v3059_v5 = vrot.slane %v3057_v55, 4  ;;  %v13234_v27 = vpop.f32.mrb[12].mxu1 }
 0x14e   : > { %v3050_v13 = vor.u32 %v3049_v57, %v3046_v38  ;;  %v3065_v33 = vrot.slane %v3063_v58, 5  ;;  %v13208_v59 = vadd.f32 %v13116_v53, %v13112_v51  ;;  %v13212_v42 = vadd.f32 %v13126_v4, %v13122_v25  ;;  %v1843_v51 = vld [vmem:[#allocation2 + $0x90] sm:$0xf]  ;;  %v1844_v53 = vld [vmem:[#allocation2 + $0x94] sm:$0xf] }
 0x14f   : > { %v2111_v12 = vsel %vm12458_vm4, %v2106_v26, %v2110_v8  ;;  %v2121_v62 = vsel %vm12458_vm4, %v2116_v41, %v2120_v1  ;;  %v3060_v23 = vor.u32 %v3059_v5, %v3055_v52  ;;  %v13222_v20 = vadd.f32 %v13146_v37, %v13144_v3  ;;  %v1845_v4 = vld [vmem:[#allocation2 + $0x98] sm:$0x1]  ;;  %v13224_v29 = vpop.f32.mrb[12].mxu0  ;;  %v2789_v1 = vld [vmem:[#allocation2 + $0xa0] sm:$0xf] }
 0x150   : > { %15526 = vst [vmem:[#allocation12_spill] sm:$0xff] %v13208_v59  ;;  %15527 = vst [vmem:[#allocation13_spill] sm:$0xff] %v13212_v42  ;;  %v10300_v35 = vcombine.low %v2111_v12, %v2121_v62  ;;  %v3051_v25 = vrot.slane %v3050_v13, 4  ;;  %v10317_v32 = vrot.slane %v2355_v24, 9  ;;  %v2497_v39 = vrot.slane %v2356_v54, 5  ;;  %v13232_v2 = vpop.f32.mrb[13].mxu0 }
 0x151   : > { %15528 = vst [vmem:[#allocation14_spill] sm:$0xff] %v13222_v20  ;;  %v3061_v31 = vrot.slane %v3060_v23, 4  ;;  %v2500_v8 = vrot.slane %v2357_v34, 5  ;;  %v13230_v3 = vadd.f32 %v13150_v60, %v13148_v7  ;;  %v2123_v37 = vshrl.u32 %v1843_v51, 16  ;;  %v13240_v38 = vpop.f32.mrb[14].mxu0  ;;  %v13242_v7 = vpop.f32.mrb[13].mxu1 }
 0x152   : > { %4717 = vmatmul.mubr.bf16.gmra.mrb[104].mxu0 %v10300_v35  ;;  %v3056_v9 = vsel %vm12458_vm4, %v3051_v25, %v3055_v52  ;;  %v2126_v16 = vshll.u32 %v1843_v51, 16  ;;  %v2498_v50 = vsel %vm12474_vm9, %v10317_v32, %v2497_v39  ;;  %v2499_v11 = vrot.slane %v2497_v39, 4  ;;  %v13244_v41 = vpop.f32.mrb[15].mxu0  ;;  %v13246_v52 = vpop.f32.mrb[14].mxu1  ;;  %v2358_v32 = vld [vmem:[#allocation2 + $0x9c] sm:$0xe] }
 0x153   : > { %15529 = vst [vmem:[#allocation15_spill] sm:$0xff] %v13230_v3  ;;  %v3066_v49 = vsel %vm12458_vm4, %v3061_v31, %v3065_v33  ;;  %v2132_v55 = vshll.u32 %v1844_v53, 16  ;;  %v2125_v57 = vrot.slane %v2123_v37, 4  ;;  %v2136_v26 = vshrl.u32 %v1844_v53, 16  ;;  %v2790_v33 = vld [vmem:[#allocation2 + $0xa4] sm:$0x1] }
 0x154   : > { %v10364_v60 = vcombine.low %v3056_v9, %v3066_v49  ;;  %v2128_v58 = vrot.slane %v2126_v16, 5  ;;  %v2501_v5 = vsel %vm12474_vm9, %v2499_v11, %v2500_v8  ;;  %v2142_v13 = vshll.u32 %v1845_v4, 16  ;;  %v13250_v34 = vpop.f32.mrb[15].mxu1  ;;  %v2359_v39 = vld [vmem:[#allocation2 + $0xa0] sm:$0xf]  ;;  %v12005_v3 = vld [vmem:[#allocation2 + $0xa8] sm:$0xff]  }
 0x155   : > { %v2134_v24 = vrot.slane %v2132_v55, 5  ;;  %v3068_v54 = vshrl.u32 %v2788_v44, 16  ;;  %v10333_v12 = vcombine.low %v2498_v50, %v2501_v5  ;;  %v2138_v23 = vrot.slane %v2136_v26, 4  ;;  %v2360_v16 = vld [vmem:[#allocation2 + $0xa4] sm:$0x1] }
 0x156   : > { %4877 = vmatprep.mubr.bf16.mxu1 %v10364_v60  ;;  %v2129_v62 = vor.u32 %v2128_v58, %v2125_v57  ;;  %v3071_v51 = vshll.u32 %v2788_v44, 16  ;;  %v2144_v53 = vrot.slane %v2142_v13, 5  ;;  %v3077_v25 = vshll.u32 %v2789_v1, 16  ;;  %v1846_v55 = vld [vmem:[#allocation2 + $0x9c] sm:$0xf] }
 0x157   : > { %4878 = vmatmul.mubr.bf16.gmra.mrb[104].mxu1 %v12002_v43  ;;  %v3070_v35 = vrot.slane %v3068_v54, 4  ;;  %v3081_v31 = vshrl.u32 %v2789_v1, 16  ;;  %4724 = vmatprep.mubr.bf16.mxu0 %v10333_v12  ;;  %v2139_v9 = vor.u32 %v2138_v23, %v2134_v24  ;;  %v3087_v37 = vshll.u32 %v2790_v33, 16  ;;  %v13252_v49 = vpop.f32.mrb[16].mxu0  ;;  %v1847_v58 = vld [vmem:[#allocation2 + $0xa0] sm:$0xf] }
 0x158   : > { %v2130_v8 = vrot.slane %v2129_v62, 4  ;;  %v3073_v4 = vrot.slane %v3071_v51, 5  ;;  %v3079_v11 = vrot.slane %v3077_v25, 5  ;;  %v13256_v44 = vadd.f32 %v13164_v17, %v13158_v28  ;;  %v13268_v33 = vpop.f32.mrb[17].mxu0  ;;  %v13270_v28 = vpop.f32.mrb[16].mxu1  ;;  %v12003_v51 = vld [vmem:[#allocation2 + $0x9c] sm:$0xff]  }
 0x159   : > { %v3083_v50 = vrot.slane %v3081_v31, 4  ;;  %v13260_v43 = vadd.f32 %v13174_v21, %v13170_v19  ;;  %v2140_v60 = vrot.slane %v2139_v9, 4  ;;  %v3089_v5 = vrot.slane %v3087_v37, 5  ;;  %v13276_v12 = vpop.f32.mrb[17].mxu1  ;;  %v2791_v9 = vld [vmem:[#allocation2 + $0xa8] sm:$0xf] }
 0x15a   : > { %15530 = vst [vmem:[#allocation16_spill] sm:$0xff] %v13256_v44  ;;  %v2135_v1 = vsel %vm12458_vm4, %v2130_v8, %v2134_v24  ;;  %v3074_v57 = vor.u32 %v3073_v4, %v3070_v35  ;;  %v13266_v13 = vadd.f32 %v13172_v30, %v13166_v22  ;;  %v10318_v21 = vrot.slane %v2358_v32, 9  ;;  %v13274_v24 = vpop.f32.mrb[18].mxu0  ;;  %v1848_v30 = vld [vmem:[#allocation2 + $0xa4] sm:$0x1]  ;;  %v13284_v31 = vpop.f32.mrb[18].mxu1 }
 0x15b   : > { %15531 = vst [vmem:[#allocation17_spill] sm:$0xff] %v13260_v43  ;;  %v3084_v26 = vor.u32 %v3083_v50, %v3079_v11  ;;  %v2145_v17 = vsel %vm12458_vm4, %v2140_v60, %v2144_v53  ;;  %v2504_v54 = vrot.slane %v2359_v39, 5  ;;  %v2507_v35 = vrot.slane %v2360_v16, 5  ;;  %v13282_v25 = vpop.f32.mrb[19].mxu0  ;;  %v13290_v4 = vpop.f32.mrb[19].mxu1 }
 0x15c   : > { %15532 = vst [vmem:[#allocation18_spill] sm:$0xff] %v13266_v13  ;;  %v3075_v19 = vrot.slane %v3074_v57, 4  ;;  %v10301_v62 = vcombine.low %v2135_v1, %v2145_v17  ;;  %v13280_v22 = vadd.f32 %v13178_v14, %v13176_v15  ;;  %v2147_v8 = vshrl.u32 %v1846_v55, 16  ;;  %v2792_v1 = vld [vmem:[#allocation2 + $0xac] sm:$0xf] }
 0x15d   : > { %v3085_v23 = vrot.slane %v3084_v26, 4  ;;  %v2505_v32 = vsel %vm12474_vm9, %v10318_v21, %v2504_v54  ;;  %v2506_v39 = vrot.slane %v2504_v54, 4  ;;  %v2150_v14 = vshll.u32 %v1846_v55, 16  ;;  %v2361_v13 = vld [vmem:[#allocation2 + $0xa8] sm:$0xe] }
 0x15e   : > { %15533 = vst [vmem:[#allocation19_spill] sm:$0xff] %v13280_v22  ;;  %v3080_v53 = vsel %vm12458_vm4, %v3075_v19, %v3079_v11  ;;  %4725 = vmatmul.mubr.bf16.gmra.mrb[108].mxu0 %v10301_v62  ;;  %v2156_v16 = vshll.u32 %v1847_v58, 16  ;;  %v2160_v50 = vshrl.u32 %v1847_v58, 16  ;;  %v2149_v26 = vrot.slane %v2147_v8, 4  ;;  %v2793_v19 = vld [vmem:[#allocation2 + $0xb0] sm:$0x1] }
 0x15f   : > { %v3090_v15 = vsel %vm12458_vm4, %v3085_v23, %v3089_v5  ;;  %v2508_v57 = vsel %vm12474_vm9, %v2506_v39, %v2507_v35  ;;  %v2166_v17 = vshll.u32 %v1848_v30, 16  ;;  %v2152_v54 = vrot.slane %v2150_v14, 5  ;;  %v13302_v30 = vpop.f32.mrb[20].mxu1  ;;  %v2364_v59 = vld [vmem:[#allocation2 + $0xb4] sm:$0xe] }
 0x160   : > { %v10365_v11 = vcombine.low %v3080_v53, %v3090_v15  ;;  %v10334_v21 = vcombine.low %v2505_v32, %v2508_v57  ;;  %v2158_v0 = vrot.slane %v2156_v16, 5  ;;  %v2162_v62 = vrot.slane %v2160_v50, 4 }
 0x161   : > { %v13292_v37 = vpop.f32.mrb[20].mxu0  ;;  %v2168_v55 = vrot.slane %v2166_v17, 5  ;;  %v3092_v5 = vshrl.u32 %v2791_v9, 16  ;;  %v3095_v58 = vshll.u32 %v2791_v9, 16  ;;  %v3101_v23 = vshll.u32 %v2792_v1, 16 }
 0x162   : > { %v13296_v60 = vpop.f32.mrb[21].mxu0  ;;  %4885 = vmatprep.mubr.bf16.mxu1 %v10365_v11  ;;  %4732 = vmatprep.mubr.bf16.mxu0 %v10334_v21  ;;  %v2153_v53 = vor.u32 %v2152_v54, %v2149_v26  ;;  %v2163_v15 = vor.u32 %v2162_v62, %v2158_v0  ;;  %v3105_v35 = vshrl.u32 %v2792_v1, 16  ;;  %v3111_v39 = vshll.u32 %v2793_v19, 16  ;;  %v2362_v9 = vld [vmem:[#allocation2 + $0xac] sm:$0xf]  ;;  %v13310_v11 = vpop.f32.mrb[21].mxu1 }
 0x163   : > { %v13300_v22 = vpop.f32.mrb[22].mxu0  ;;  %4886 = vmatmul.mubr.bf16.gmra.mrb[108].mxu1 %v12003_v51  ;;  %v3094_v8 = vrot.slane %v3092_v5, 4  ;;  %v3097_v14 = vrot.slane %v3095_v58, 5  ;;  %v3103_v16 = vrot.slane %v3101_v23, 5  ;;  %v13308_v50 = vadd.f32 %v13194_v46, %v13190_v36  ;;  %v2363_v17 = vld [vmem:[#allocation2 + $0xb0] sm:$0x1] }
 0x164   : > { %v13304_v32 = vpop.f32.mrb[23].mxu0  ;;  %v2154_v51 = vrot.slane %v2153_v53, 4  ;;  %v2164_v57 = vrot.slane %v2163_v15, 4  ;;  %v3107_v26 = vrot.slane %v3105_v35, 4  ;;  %v13312_v1 = vpop.f32.mrb[22].mxu1  ;;  %v3113_v21 = vrot.slane %v3111_v39, 5 }
 0x165   : > { %15534 = vst [vmem:[#allocation20_spill] sm:$0xff] %v13308_v50  ;;  %v3098_v19 = vor.u32 %v3097_v14, %v3094_v8  ;;  %v13316_v54 = vadd.f32 %v13202_v18, %v13198_v48  ;;  %v13320_v62 = vadd.f32 %v13200_v40, %v13196_v47  ;;  %v1849_v36 = vld [vmem:[#allocation2 + $0xa8] sm:$0xf]  ;;  %v13322_v46 = vpop.f32.mrb[23].mxu1  ;;  %v10319_v15 = vrot.slane %v2361_v13, 9 }
 0x166   : > { %v2159_v58 = vsel %vm12458_vm4, %v2154_v51, %v2158_v0  ;;  %v2169_v23 = vsel %vm12458_vm4, %v2164_v57, %v2168_v55  ;;  %v3108_v53 = vor.u32 %v3107_v26, %v3103_v16  ;;  %v1850_v35 = vld [vmem:[#allocation2 + $0xac] sm:$0xf]  ;;  %v2511_v47 = vrot.slane %v2362_v9, 5  ;;  %v1851_v40 = vld [vmem:[#allocation2 + $0xb0] sm:$0x1]  ;;  %v13334_v14 = vpop.f32.mrb[24].mxu1 }
 0x167   : > { %15535 = vst [vmem:[#allocation21_spill] sm:$0xff] %v13316_v54  ;;  %15536 = vst [vmem:[#allocation22_spill] sm:$0xff] %v13320_v62  ;;  %v10302_v18 = vcombine.low %v2159_v58, %v2169_v23  ;;  %v3099_v39 = vrot.slane %v3098_v19, 4  ;;  %v2514_v20 = vrot.slane %v2363_v17, 5  ;;  %v13338_v0 = vadd.f32 %v13214_v10, %v13204_v63  ;;  %v13342_v51 = vpop.f32.mrb[25].mxu1  ;;  %v12010_v57 = vld [vmem:[#allocation4 + $0x40] sm:$0xff]  }
 0x168   : > { %v3109_v62 = vrot.slane %v3108_v53, 4  ;;  %v2171_v55 = vshrl.u32 %v1849_v36, 16  ;;  %v2512_v26 = vsel %vm12474_vm9, %v10319_v15, %v2511_v47  ;;  %v2513_v19 = vrot.slane %v2511_v47, 4  ;;  %v2794_v17 = vld [vmem:[#allocation2 + $0xb4] sm:$0xf]  ;;  %v13348_v23 = vpop.f32.mrb[26].mxu1  ;;  %11267 = vmatprep.subr.bf16.mxu1 %v12010_v57 }
 0x169   : > { %v13324_v5 = vpop.f32.mrb[24].mxu0  ;;  %15537 = vst [vmem:[#allocation23_spill] sm:$0xff] %v13338_v0  ;;  %4733 = vmatmul.mubr.bf16.gmra.mrb[112].mxu0 %v10302_v18  ;;  %v3104_v9 = vsel %vm12458_vm4, %v3099_v39, %v3103_v16  ;;  %v2174_v58 = vshll.u32 %v1849_v36, 16  ;;  %15538 = vst [vmem:[#allocation24_spill] sm:$0xff] %v13348_v23  ;;  %v12011_v63 = vld [vmem:[#allocation4] sm:$0xff]   ;;  %v2180_v0 = vshll.u32 %v1850_v35, 16 }
 0x16a   : > { %v13330_v48 = vpop.f32.mrb[25].mxu0  ;;  %v3114_v10 = vsel %vm12458_vm4, %v3109_v62, %v3113_v21  ;;  %v2173_v53 = vrot.slane %v2171_v55, 4  ;;  %v2184_v54 = vshrl.u32 %v1850_v35, 16  ;;  %v2795_v50 = vld [vmem:[#allocation2 + $0xb8] sm:$0xf]  ;;  %v13352_v18 = vpop.f32.mrb[27].mxu1  ;;  %v2515_v15 = vsel %vm12474_vm9, %v2513_v19, %v2514_v20  ;;  %11268 = vmatpush3.bf16.msra.mxu1 %v12011_v63 }
 0x16b   : > { %v13332_v8 = vpop.f32.mrb[26].mxu0  ;;  %15539 = vst [vmem:[#allocation25_spill] sm:$0xff] %v13352_v18  ;;  %v10366_v16 = vcombine.low %v3104_v9, %v3114_v10  ;;  %v2176_v39 = vrot.slane %v2174_v58, 5  ;;  %v2190_v36 = vshll.u32 %v1851_v40, 16  ;;  %v2796_v47 = vld [vmem:[#allocation2 + $0xbc] sm:$0x1]  ;;  %v10335_v43 = vcombine.low %v2512_v26, %v2515_v15 }
 0x16c   : > { %v13340_v13 = vpop.f32.mrb[27].mxu0  ;;  %v2182_v44 = vrot.slane %v2180_v0, 5  ;;  %v2186_v42 = vrot.slane %v2184_v54, 4  ;;  %v3116_v23 = vshrl.u32 %v2794_v17, 16  ;;  %v3119_v35 = vshll.u32 %v2794_v17, 16 }
 0x16d   : > { %4893 = vmatprep.mubr.bf16.mxu1 %v10366_v16  ;;  %v2177_v21 = vor.u32 %v2176_v39, %v2173_v53  ;;  %v2192_v62 = vrot.slane %v2190_v36, 5  ;;  %v3125_v55 = vshll.u32 %v2795_v50, 16  ;;  %4740 = vmatprep.mubr.bf16.mxu0 %v10335_v43  ;;  %v3129_v9 = vshrl.u32 %v2795_v50, 16  ;;  %v2365_v19 = vld [vmem:[#allocation2 + $0xb8] sm:$0xf] }
 0x16e   : > { %4894 = vmatmul.mubr.bf16.gmra.mrb[112].mxu1 %v12005_v3  ;;  %v2187_v57 = vor.u32 %v2186_v42, %v2182_v44  ;;  %v3118_v20 = vrot.slane %v3116_v23, 4  ;;  %v3135_v40 = vshll.u32 %v2796_v47, 16  ;;  %v3121_v54 = vrot.slane %v3119_v35, 5  ;;  %v2366_v50 = vld [vmem:[#allocation2 + $0xbc] sm:$0x1] }
 0x16f   : > { %v2178_v0 = vrot.slane %v2177_v21, 4  ;;  %v3127_v26 = vrot.slane %v3125_v55, 5  ;;  %v13362_v63 = vadd.f32 %v13232_v2, %v13224_v29  ;;  %v3131_v43 = vrot.slane %v3129_v9, 4  ;;  %v1852_v2 = vld [vmem:[#allocation2 + $0xb4] sm:$0xf] }
 0x170   : > { %v13356_v18 = vpop.f32.mrb[28].mxu1  ;;  %v2188_v3 = vrot.slane %v2187_v57, 4  ;;  %v13370_v42 = vadd.f32 %v13244_v41, %v13240_v38  ;;  %v3122_v16 = vor.u32 %v3121_v54, %v3118_v20  ;;  %v13378_v29 = vadd.f32 %v13242_v7, %v13234_v27  ;;  %v1853_v21 = vld [vmem:[#allocation2 + $0xb8] sm:$0xf]  ;;  %v1854_v9 = vld [vmem:[#allocation2 + $0xbc] sm:$0x1] }
 0x171   : > { %v13358_v58 = vpop.f32.mrb[29].mxu1  ;;  %v2183_v53 = vsel %vm12458_vm4, %v2178_v0, %v2182_v44  ;;  %v3132_v41 = vor.u32 %v3131_v43, %v3127_v26  ;;  %v3137_v36 = vrot.slane %v3135_v40, 5  ;;  %v10320_v47 = vrot.slane %v2364_v59, 9  ;;  %v12006_v43 = vld [vmem:[#allocation2 + $0xb4] sm:$0xff]  }
 0x172   : > { %v13364_v17 = vpop.f32.mrb[28].mxu0  ;;  %v13366_v10 = vpop.f32.mrb[30].mxu1  ;;  %15540 = vst [vmem:[#allocation26_spill] sm:$0xff] %v13378_v29  ;;  %v2193_v38 = vsel %vm12458_vm4, %v2188_v3, %v2192_v62  ;;  %v3123_v55 = vrot.slane %v3122_v16, 4  ;;  %v2518_v57 = vrot.slane %v2365_v19, 5  ;;  %v2521_v20 = vrot.slane %v2366_v50, 5 }
 0x173   : > { %v13372_v23 = vpop.f32.mrb[29].mxu0  ;;  %v13382_v39 = vpop.f32.mrb[31].mxu1  ;;  %v10303_v44 = vcombine.low %v2183_v53, %v2193_v38  ;;  %v3133_v27 = vrot.slane %v3132_v41, 4  ;;  %v13390_v7 = vadd.f32 %v13250_v34, %v13246_v52  ;;  %v2195_v0 = vshrl.u32 %v1852_v2, 16  ;;  %v2797_v34 = vld [vmem:[#allocation2 + $0xc0] sm:$0xf] }
 0x174   : > { %v13380_v15 = vpop.f32.mrb[30].mxu0  ;;  %v2198_v54 = vshll.u32 %v1852_v2, 16  ;;  %v3128_v62 = vsel %vm12458_vm4, %v3123_v55, %v3127_v26  ;;  %v2519_v59 = vsel %vm12474_vm9, %v10320_v47, %v2518_v57  ;;  %v2520_v40 = vrot.slane %v2518_v57, 4  ;;  %v2798_v26 = vld [vmem:[#allocation2 + $0xc4] sm:$0xf] }
 0x175   : > { %v13386_v35 = vpop.f32.mrb[31].mxu0  ;;  %15541 = vst [vmem:[#allocation27_spill] sm:$0xff] %v13390_v7  ;;  %4741 = vmatmul.mubr.bf16.gmra.mrb[116].mxu0 %v10303_v44  ;;  %v2204_v3 = vshll.u32 %v1853_v21, 16  ;;  %v3138_v19 = vsel %vm12458_vm4, %v3133_v27, %v3137_v36  ;;  %v2197_v50 = vrot.slane %v2195_v0, 4  ;;  %v2208_v52 = vshrl.u32 %v1853_v21, 16 }
 0x176   : > { %v2200_v53 = vrot.slane %v2198_v54, 5  ;;  %v10367_v16 = vcombine.low %v3128_v62, %v3138_v19  ;;  %v2522_v2 = vsel %vm12474_vm9, %v2520_v40, %v2521_v20  ;;  %v2214_v41 = vshll.u32 %v1854_v9, 16  ;;  %v2367_v20 = vld [vmem:[#allocation2 + $0xc0] sm:$0xe] }
 0x177   : > { %v2206_v38 = vrot.slane %v2204_v3, 5  ;;  %v10336_v47 = vcombine.low %v2519_v59, %v2522_v2  ;;  %v2210_v57 = vrot.slane %v2208_v52, 4  ;;  %v490_v36 = vsel %vm12468_vm8, %v12993_v6, 0  ;;  %v12012_v6 = vld [vmem:[#allocation4 + $0x48] sm:$0xff]  }
 0x178   : > { %v2201_v55 = vor.u32 %v2200_v53, %v2197_v50  ;;  %4901 = vmatprep.mubr.bf16.mxu1 %v10367_v16  ;;  %v2216_v21 = vrot.slane %v2214_v41, 5  ;;  %v10209_v0 = vcombine.low %v490_v36, %v490_v36  ;;  %v3140_v54 = vshrl.u32 %v2797_v34, 16  ;;  %v2368_v2 = vld [vmem:[#allocation2 + $0xc4] sm:$0xf]  ;;  %v1855_v36 = vld [vmem:[#allocation2 + $0xc0] sm:$0xf]  ;;  %11269 = vmatprep.subr.bf16.mxu1 %v12012_v6 }
 0x179   : > { %v3143_v62 = vshll.u32 %v2797_v34, 16  ;;  %4902 = vmatmul.mubr.bf16.gmra.mrb[116].mxu1 %v12006_v43  ;;  %4748 = vmatprep.mubr.bf16.mxu0 %v10336_v47  ;;  %v2211_v59 = vor.u32 %v2210_v57, %v2206_v38  ;;  %v3149_v3 = vshll.u32 %v2798_v26, 16  ;;  %v3153_v19 = vshrl.u32 %v2798_v26, 16 }
 0x17a   : > { %v13400_v44 = vpop.f32.mrb[32].mxu0  ;;  %v2202_v9 = vrot.slane %v2201_v55, 4  ;;  %715 = vst [vmem:[#allocation2 + $0xc8] sm:$0x1] %v10209_v0  ;;  %v3142_v52 = vrot.slane %v3140_v54, 4  ;;  %v13415_v34 = vadd.f32 %v13268_v33, %v13252_v49  ;;  %v13419_v43 = vadd.f32 %v13282_v25, %v13274_v24  ;;  %v12013_v25 = vld [vmem:[#allocation4 + $0x8] sm:$0xff]  }
 0x17b   : > { %v13405_v27 = vpop.f32.mrb[33].mxu0  ;;  %v13409_v50 = vpop.f32.mrb[32].mxu1  ;;  %v3145_v16 = vrot.slane %v3143_v62, 5  ;;  %v2212_v47 = vrot.slane %v2211_v59, 4  ;;  %v13425_v55 = vrot.slane %v3149_v3, 5  ;;  %v3155_v57 = vrot.slane %v3153_v19, 4  ;;  %11270 = vmatpush3.bf16.msra.mxu1 %v12013_v25 }
 0x17c   : > { %v13407_v40 = vpop.f32.mrb[34].mxu0  ;;  %v13421_v41 = vpop.f32.mrb[33].mxu1  ;;  %v2207_v26 = vsel %vm12458_vm4, %v2202_v9, %v2206_v38  ;;  %v13431_v33 = vadd.f32 %v13276_v12, %v13270_v28  ;;  %v10321_v62 = vrot.slane %v2367_v20, 9  ;;  %v2525_v9 = vrot.slane %v2368_v2, 5  ;;  %v1856_v59 = vld [vmem:[#allocation2 + $0xc4] sm:$0xf] }
 0x17d   : > { %v13411_v53 = vpop.f32.mrb[35].mxu0  ;;  %v13427_v0 = vpop.f32.mrb[34].mxu1  ;;  %v3146_v49 = vor.u32 %v3145_v16, %v3142_v52  ;;  %v2217_v54 = vsel %vm12458_vm4, %v2212_v47, %v2216_v21  ;;  %v3156_v38 = vor.u32 %v3155_v57, %v13425_v55  ;;  %v13440_v6 = vadd.f32 %v13290_v4, %v13284_v31  ;;  %v2800_v21 = vld [vmem:[#allocation2 + $0xcc] sm:$0xf]  ;;  %v2801_v57 = vld [vmem:[#allocation2 + $0xd0] sm:$0xf] }
 0x17e   : > { %15542 = vst [vmem:[#allocation28_spill] sm:$0xff] %v13431_v33  ;;  %v13433_v24 = vpop.f32.mrb[35].mxu1  ;;  %v10304_v3 = vcombine.low %v2207_v26, %v2217_v54  ;;  %v2219_v52 = vshrl.u32 %v1855_v36, 16  ;;  %v2526_v12 = vsel %vm12474_vm9, %v10321_v62, %v2525_v9  ;;  %v2527_v16 = vrot.slane %v2525_v9, 4 }
 0x17f   : > { %v3147_v19 = vrot.slane %v3146_v49, 4  ;;  %15543 = vst [vmem:[#allocation29_spill] sm:$0xff] %v13440_v6  ;;  %v3157_v28 = vrot.slane %v3156_v38, 4  ;;  %v2222_v56 = vshll.u32 %v1855_v36, 16  ;;  %v2228_v26 = vshll.u32 %v1856_v59, 16 }
 0x180   : > { %4749 = vmatmul.mubr.bf16.gmra.mrb[120].mxu0 %v10304_v3  ;;  %v2221_v2 = vrot.slane %v2219_v52, 4  ;;  %v2232_v47 = vshrl.u32 %v1856_v59, 16  ;;  %v13449_v25 = vadd.f32 %v13296_v60, %v13292_v37  ;;  %v13453_v36 = vadd.f32 %v13304_v32, %v13300_v22  ;;  %v2802_v3 = vld [vmem:[#allocation2 + $0xd4] sm:$0x1] }
 0x181   : > { %v3152_v20 = vsel %vm12458_vm4, %v3147_v19, %v13425_v55  ;;  %v2799_v31 = vld [vmem:[#allocation2 + $0xc8] sm:$0x1]  ;;  %v13457_v54 = vadd.f32 %v13310_v11, %v13302_v30  ;;  %v13461_v55 = vadd.f32 %v13322_v46, %v13312_v1  ;;  %v2224_v9 = vrot.slane %v2222_v56, 5 }
 0x182   : > { %v2369_v4 = vld [vmem:[#allocation2 + $0xc8] sm:$0x1]  ;;  %15544 = vst [vmem:[#allocation30_spill] sm:$0xff] %v13449_v25  ;;  %15545 = vst [vmem:[#allocation31_spill] sm:$0xff] %v13453_v36  ;;  %v3159_v38 = vshll.u32 %v2799_v31, 16  ;;  %v2230_v59 = vrot.slane %v2228_v26, 5 }
 0x183   : > { %v1857_v49 = vld [vmem:[#allocation2 + $0xc8] sm:$0x1]  ;;  %15546 = vst [vmem:[#allocation32_spill] sm:$0xff] %v13457_v54  ;;  %15547 = vst [vmem:[#allocation33_spill] sm:$0xff] %v13461_v55  ;;  %v2528_v62 = vrot.slane %v2369_v4, 5  ;;  %v2234_v19 = vrot.slane %v2232_v47, 4  ;;  %v2225_v32 = vor.u32 %v2224_v9, %v2221_v2 }
 0x184   : > { %v2238_v37 = vshll.u32 %v1857_v49, 16  ;;  %v3164_v60 = vshrl.u32 %v2800_v21, 16  ;;  %v3167_v52 = vshll.u32 %v2800_v21, 16  ;;  %v3161_v22 = vrot.slane %v3159_v38, 5  ;;  %v3267_v54 = vld [vmem:[#allocation2 + $0x18] sm:$0xe] }
 0x185   : > { %v2529_v30 = vsel %vm12474_vm9, %v2527_v16, %v2528_v62  ;;  %v3173_v11 = vshll.u32 %v2801_v57, 16  ;;  %v2235_v26 = vor.u32 %v2234_v19, %v2230_v59  ;;  %v3268_v4 = vld [vmem:[#allocation2 + $0x1c] sm:$0xf]  ;;  %v12008_v16 = vld [vmem:[#allocation2 + $0xc0] sm:$0xff]   ;;  %v2226_v2 = vrot.slane %v2225_v32, 4 }
 0x186   : > { %v13463_v6 = vpop.f32.mrb[36].mxu1  ;;  %v10337_v56 = vcombine.low %v2526_v12, %v2529_v30  ;;  %v2240_v31 = vrot.slane %v2238_v37, 5  ;;  %v3166_v47 = vrot.slane %v3164_v60, 4  ;;  %v3162_v38 = vsel %vm12458_vm4, %v3157_v28, %v3161_v22  ;;  %v3269_v30 = vld [vmem:[#allocation2 + $0x20] sm:$0x1] }
 0x187   : > { %v13467_v1 = vpop.f32.mrb[36].mxu0  ;;  %v13469_v46 = vpop.f32.mrb[37].mxu1  ;;  %v3169_v62 = vrot.slane %v3167_v52, 5  ;;  %v13477_v9 = vrot.slane %v3173_v11, 5  ;;  %v10368_v12 = vcombine.low %v3152_v20, %v3162_v38  ;;  %v2236_v19 = vrot.slane %v2235_v26, 4 }
 0x188   : > { %v13471_v49 = vpop.f32.mrb[37].mxu0  ;;  %v13473_v21 = vpop.f32.mrb[38].mxu1  ;;  %4756 = vmatprep.mubr.bf16.mxu0 %v10337_v56  ;;  %v3177_v37 = vshrl.u32 %v2801_v57, 16  ;;  %v3183_v60 = vshll.u32 %v2802_v3, 16  ;;  %v2231_v28 = vsel %vm12458_vm4, %v2226_v2, %v2230_v59  ;;  %v3270_v32 = vld [vmem:[#allocation2 + $0x24] sm:$0xe] }
 0x189   : > { %v13479_v55 = vpop.f32.mrb[38].mxu0  ;;  %v13481_v33 = vpop.f32.mrb[39].mxu1  ;;  %v3170_v22 = vor.u32 %v3169_v62, %v3166_v47  ;;  %v3271_v52 = vld [vmem:[#allocation2 + $0x28] sm:$0xf]  ;;  %v3272_v11 = vld [vmem:[#allocation2 + $0x2c] sm:$0x1]  ;;  %4909 = vmatprep.mubr.bf16.mxu1 %v10368_v12  ;;  %v2241_v29 = vsel %vm12458_vm4, %v2236_v19, %v2240_v31 }
 0x18a   : > { %v13483_v7 = vpop.f32.mrb[39].mxu0  ;;  %v3179_v36 = vrot.slane %v3177_v37, 4  ;;  %v3185_v20 = vrot.slane %v3183_v60, 5  ;;  %v10370_v56 = vrot.slane %v3267_v54, 9  ;;  %v13492_v57 = vld [vmem:[%s15498_s2] ss:$0 sm:$0xff]  ;;  %4910 = vmatmul.mubr.bf16.gmra.mrb[120].mxu1 %v12008_v16  ;;  %v10305_v3 = vcombine.low %v2231_v28, %v2241_v29 }
 0x18b   : > { %v3171_v26 = vrot.slane %v3170_v22, 4  ;;  %v13494_v59 = vld [vmem:[#allocation2 + $0xcc] sm:$0xff]   ;;  %v3365_v47 = vrot.slane %v3268_v4, 5  ;;  %v3368_v38 = vrot.slane %v3269_v30, 5  ;;  %v10371_v12 = vrot.slane %v3270_v32, 9 }
 0x18c   : > { %v3273_v2 = vld [vmem:[#allocation2 + $0x30] sm:$0xe]  ;;  %v3180_v62 = vor.u32 %v3179_v36, %v13477_v9  ;;  %v3372_v31 = vrot.slane %v3271_v52, 5  ;;  %v3375_v19 = vrot.slane %v3272_v11, 5  ;;  %v3274_v37 = vld [vmem:[#allocation2 + $0x34] sm:$0xf]  ;;  %4757 = vmatmul.mubr.bf16.gmra.mrb[124].mxu0 %v10305_v3  ;;  %v13510_v36 = vadd.f32 %v13330_v48, %v13324_v5 }
 0x18d   : > { %v13497_v54 = vld [vmem:[#allocation2 + $0x38] sm:$0x1]  ;;  %v13501_v25 = vld [vmem:[#allocation2 + $0xcc] sm:$0xe]  ;;  %v3176_v29 = vsel %vm12458_vm4, %v3171_v26, %v13477_v9  ;;  %v3366_v4 = vsel %vm12474_vm9, %v10370_v56, %v3365_v47  ;;  %v3367_v16 = vrot.slane %v3365_v47, 4  ;;  %v15553_v3 = vmov 0  }
 0x18e   : > { %v13499_v60 = vpop.f32.mrb[40].mxu1  ;;  %15549 = vst [vmem:[#allocation35_spill] sm:$0xff] %v13501_v25  ;;  %15550 = vst [vmem:[#allocation36_spill] sm:$0xff] %v13510_v36  ;;  %v3276_v30 = vld [vmem:[#allocation2 + $0x3c] sm:$0xe]  ;;  %v3181_v9 = vrot.slane %v3180_v62, 4  ;;  %v3373_v56 = vsel %vm12474_vm9, %v10371_v12, %v3372_v31  ;;  %v13525_v5 = vadd.f32 %v13340_v13, %v13332_v8  ;;  %v13538_v62 = vadd.f32 %v13342_v51, %v13334_v14 }
 0x18f   : > { %15548 = vst [vmem:[#allocation34_spill] sm:$0xff] %v13499_v60  ;;  %v3277_v28 = vld [vmem:[#allocation2 + $0x40] sm:$0xf]  ;;  %v13512_v22 = vld [vmem:[#allocation2 + $0x44] sm:$0x1]  ;;  %v13514_v32 = vpop.f32.mrb[40].mxu0 }
 0x190   : > { %v13516_v52 = vpop.f32.mrb[41].mxu1  ;;  %v13518_v11 = vld [vmem:[#allocation2 + $0xd0] sm:$0xf]  ;;  %5138 = vst [vmem:[#allocation2 + $0xcc] sm:$0xf] %v15553_v3  ;;  %v3374_v26 = vrot.slane %v3372_v31, 4 }
 0x191   : > { %15551 = vst [vmem:[#allocation37_spill] sm:$0xff] %v13516_v52  ;;  %15552 = vst [vmem:[#allocation38_spill] sm:$0xff] %v13518_v11  ;;  %v13527_v48 = vpop.f32.mrb[41].mxu0  ;;  %v13529_v47 = vpop.f32.mrb[42].mxu1  ;;  %v13531_v25 = vld [vmem:[#allocation2 + $0xd4] sm:$0x1]  ;;  %v3369_v11 = vsel %vm12474_vm9, %v3367_v16, %v3368_v38  ;;  %v3186_v38 = vsel %vm12458_vm4, %v3181_v9, %v3185_v20 }
 0x192   : > { %15554 = vst [vmem:[#allocation39_spill] sm:$0xff] %v13525_v5  ;;  %15555 = vst [vmem:[#allocation40_spill] sm:$0xff] %v13529_v47  ;;  %v10372_v12 = vrot.slane %v3273_v2, 9  ;;  %v3279_v31 = vld [vmem:[#allocation2 + $0x48] sm:$0xe]  ;;  %v13540_v36 = vpop.f32.mrb[42].mxu0  ;;  %v10386_v16 = vcombine.low %v3366_v4, %v3369_v11  ;;  %v3376_v14 = vsel %vm12474_vm9, %v3374_v26, %v3375_v19  ;;  %v13580_v26 = vadd.f32 %v13358_v58, %v13356_v18 }
 0x193   : > { %15556 = vst [vmem:[#allocation41_spill] sm:$0xff] %v13531_v25  ;;  %5139 = vst [vmem:[#allocation2 + $0xd0] sm:$0xf] %v15553_v3  ;;  %v13542_v8 = vpop.f32.mrb[43].mxu1  ;;  %v12014_v13 = vld [vmem:[#allocation4 + $0x50] sm:$0xff]   ;;  %v13553_v2 = vpop.f32.mrb[43].mxu0  ;;  %v10387_v47 = vcombine.low %v3373_v56, %v3376_v14 }
 0x194   : > { %15557 = vst [vmem:[#allocation42_spill] sm:$0xff] %v13538_v62  ;;  %15558 = vst [vmem:[#allocation43_spill] sm:$0xff] %v13542_v8  ;;  %v15559_v25 = vld [vmem:[#allocation12_spill] sm:$0xff]  ;;  %v10369_v62 = vcombine.low %v3176_v29, %v3186_v38  ;;  %v3379_v8 = vrot.slane %v3274_v37, 5  ;;  %v3281_v52 = vld [vmem:[#allocation2 + $0x50] sm:$0x1]  ;;  %11271 = vmatprep.subr.bf16.mxu1 %v12014_v13  ;;  %11755 = vmatprep.mubr.bf16.mxu0 %v10386_v16  ;;  %v13565_v37 = vadd.f32 %v13372_v23, %v13364_v17 }
 0x195   : > { %5140 = vst [vmem:[#allocation2 + $0xd4] sm:$0x1] %v15553_v3  ;;  %v13547_v5 = vadd.f32 %v15559_v25, %v13492_v57  ;;  %v3280_v51 = vld [vmem:[#allocation2 + $0x4c] sm:$0xf]  ;;  %v3382_v3 = vrot.slane %v13497_v54, 5  ;;  %v10373_v20 = vrot.slane %v3276_v30, 9  ;;  %v13569_v54 = vadd.f32 %v13386_v35, %v13380_v15  ;;  %11756 = vmatmul.mubr.bf16.vlgmr.msra.gmra.mrb[128].mxu0 %v10387_v47 }
 0x196   : > { %v15561_v25 = vld [vmem:[#allocation24_spill] sm:$0xff]  ;;  %v3386_v4 = vrot.slane %v3277_v28, 5  ;;  %v3389_v11 = vrot.slane %v13512_v22, 5  ;;  %4917 = vmatprep.mubr.bf16.mxu1 %v10369_v62  ;;  %v3380_v29 = vsel %vm12474_vm9, %v10372_v12, %v3379_v8  ;;  %v3381_v9 = vrot.slane %v3379_v8, 4  ;;  %v13571_v56 = vld [vmem:[#allocation2 + $0x54] sm:$0xe] }
 0x197   : > { %15560 = vst [vmem:[#allocation12_spill] sm:$0xff] %v13547_v5  ;;  %v15562_v5 = vld [vmem:[#allocation25_spill] sm:$0xff]  ;;  %v12015_v19 = vld [vmem:[#allocation4 + $0x10] sm:$0xff]   ;;  %v13573_v30 = vld [vmem:[#allocation2 + $0x58] sm:$0xf]  ;;  %4918 = vmatmul.mubr.bf16.gmra.mrb[124].mxu1 %v13494_v59  ;;  %v10374_v17 = vrot.slane %v3279_v31, 9  ;;  %v13600_v16 = vadd.f32 %v13382_v39, %v13366_v10 }
 0x198   : > { %v13558_v60 = vadd.f32 %v15562_v5, %v15561_v25  ;;  %v3387_v28 = vsel %vm12474_vm9, %v10373_v20, %v3386_v4  ;;  %v3388_v22 = vrot.slane %v3386_v4, 4  ;;  %v3284_v23 = vld [vmem:[#allocation2 + $0x5c] sm:$0x1]  ;;  %v13582_v5 = vld [vmem:[#allocation2 + $0x64] sm:$0xf]  ;;  %v15563_v15 = vld [vmem:[#allocation13_spill] sm:$0xff]  ;;  %v3383_v59 = vsel %vm12474_vm9, %v3381_v9, %v3382_v3  ;;  %11272 = vmatpush3.bf16.msra.mxu1 %v12015_v19 }
 0x199   : > { %v13586_v35 = vadd.f32 %v15563_v15, %v13492_v57  ;;  %v15564_v62 = vld [vmem:[#allocation16_spill] sm:$0xff]  ;;  %v3393_v8 = vrot.slane %v3280_v51, 5  ;;  %v3285_v13 = vld [vmem:[#allocation2 + $0x60] sm:$0xe]  ;;  %v13594_v18 = vpop.f32.mrb[44].mxu0  ;;  %v10388_v58 = vcombine.low %v3380_v29, %v3383_v59  ;;  %v3396_v38 = vrot.slane %v3281_v52, 5 }
 0x19a   : > { %v13590_v12 = vadd.f32 %v15564_v62, %v13492_v57  ;;  %v3390_v31 = vsel %vm12474_vm9, %v3388_v22, %v3389_v11  ;;  %15565 = vst [vmem:[#allocation24_spill] sm:$0xff] %v13600_v16  ;;  %v3287_v14 = vld [vmem:[#allocation2 + $0x68] sm:$0x1]  ;;  %v13602_v25 = vpop.f32.mrb[45].mxu0  ;;  %v13604_v47 = vpop.f32.mrb[44].mxu1  ;;  %v15566_v51 = vld [vmem:[#allocation17_spill] sm:$0xff]  ;;  %v10861_v29 = vadd.f32 %v13405_v27, %v13400_v44  ;;  %v10864_v9 = vadd.f32 %v13411_v53, %v13407_v40 }
 0x19b   : > { %v13608_v3 = vadd.f32 %v15566_v51, %v13492_v57  ;;  %v10389_v20 = vcombine.low %v3387_v28, %v3390_v31  ;;  %v3394_v4 = vsel %vm12474_vm9, %v10374_v17, %v3393_v8  ;;  %v3395_v19 = vrot.slane %v3393_v8, 4  ;;  %v13612_v11 = vpop.f32.mrb[46].mxu0  ;;  %v13614_v52 = vpop.f32.mrb[45].mxu1  ;;  %11759 = vmatprep.mubr.bf16.mxu0 %v10388_v58  ;;  %v13622_v28 = vld [vmem:[#allocation2 + $0x70] sm:$0xf]  ;;  %v15567_v58 = vld [vmem:[#allocation20_spill] sm:$0xff] }
 0x19c   : > { %v10375_v10 = vrot.slane %v13571_v56, 9  ;;  %v3400_v39 = vrot.slane %v13573_v30, 5  ;;  %v13624_v22 = vpop.f32.mrb[47].mxu0  ;;  %v13626_v17 = vpop.f32.mrb[46].mxu1  ;;  %v3403_v62 = vrot.slane %v3284_v23, 5  ;;  %v10973_v56 = vadd.f32 %v13421_v41, %v13409_v50  ;;  %v15568_v50 = vld [vmem:[#allocation21_spill] sm:$0xff] }
 0x19d   : > { %v3397_v15 = vsel %vm12474_vm9, %v3395_v19, %v3396_v38  ;;  %v3407_v30 = vrot.slane %v13582_v5, 5  ;;  %v13633_v59 = vpop.f32.mrb[47].mxu1  ;;  %v4381_v40 = vadd.f32 %v10861_v29, %v13492_v57  ;;  %v10376_v53 = vrot.slane %v3285_v13, 9  ;;  %v3288_v8 = vld [vmem:[#allocation2 + $0x6c] sm:$0xe]  ;;  %11760 = vmatmul.mubr.bf16.gmra.mrb[132].mxu0 %v10389_v20  ;;  %v15574_v45 = vld [vmem:[#allocation34_spill] sm:$0xff] }
 0x19e   : > { %v10390_v44 = vcombine.low %v3394_v4, %v3397_v15  ;;  %v3402_v27 = vrot.slane %v3400_v39, 4  ;;  %v13638_v31 = vadd.f32 %v15567_v58, %v13492_v57  ;;  %v4384_v38 = vadd.f32 %v10864_v9, %v13492_v57  ;;  %v3290_v19 = vld [vmem:[#allocation2 + $0x74] sm:$0x1]  ;;  %v3291_v29 = vld [vmem:[#allocation2 + $0x78] sm:$0xe] }
 0x19f   : > { %v3409_v23 = vrot.slane %v3407_v30, 4  ;;  %v3410_v51 = vrot.slane %v3287_v14, 5  ;;  %v13643_v41 = vadd.f32 %v15568_v50, %v13492_v57  ;;  %v13647_v5 = vadd.f32 %v13362_v63, %v13492_v57  ;;  %v3292_v15 = vld [vmem:[#allocation2 + $0x7c] sm:$0xf]  ;;  %v3293_v20 = vld [vmem:[#allocation2 + $0x80] sm:$0x1] }
 0x1a0   : > { %v13649_v4 = vadd.f32 %v10973_v56, %v4381_v40  ;;  %v10976_v13 = vadd.f32 %v13433_v24, %v13427_v0  ;;  %v13655_v9 = vadd.f32 %v13370_v42, %v13492_v57  ;;  %v13659_v14 = vadd.f32 %v13415_v34, %v13492_v57  ;;  %v13664_v40 = vld [vmem:[#allocation2 + $0x88] sm:$0xf]  ;;  %11763 = vmatprep.mubr.bf16.mxu0 %v10390_v44  ;;  %v13797_v16 = vld [vmem:[#allocation2 + $0xb4] sm:$0xe] }
 0x1a1   : > { %v3401_v63 = vsel %vm12474_vm9, %v10375_v10, %v3400_v39  ;;  %v3414_v56 = vrot.slane %v13622_v28, 5  ;;  %v3404_v0 = vsel %vm12474_vm9, %v3402_v27, %v3403_v62  ;;  %v10867_v42 = vadd.f32 %v13471_v49, %v13467_v1  ;;  %v13682_v49 = vld [vmem:[#allocation2 + $0x84] sm:$0xe] }
 0x1a2   : > { %15569 = vst [vmem:[#allocation25_spill] sm:$0xff] %v13649_v4  ;;  %v13668_v24 = vadd.f32 %v10976_v13, %v4384_v38  ;;  %v10870_v34 = vadd.f32 %v13483_v7, %v13479_v55  ;;  %v3408_v10 = vsel %vm12474_vm9, %v10376_v53, %v3407_v30  ;;  %v3411_v39 = vsel %vm12474_vm9, %v3409_v23, %v3410_v51  ;;  %v13684_v7 = vld [vmem:[#allocation2 + $0x94] sm:$0xf]  ;;  %v13686_v55 = vpop.f32.mrb[48].mxu1  ;;  %v13690_v23 = vld [vmem:[#allocation2 + $0x8c] sm:$0x1] }
 0x1a3   : > { %v10377_v28 = vrot.slane %v3288_v8, 9  ;;  %v10979_v44 = vadd.f32 %v13469_v46, %v13463_v6  ;;  %v3417_v62 = vrot.slane %v3290_v19, 5  ;;  %v4389_v27 = vadd.f32 %v10867_v42, %v13492_v57  ;;  %v13694_v46 = vpop.f32.mrb[49].mxu1 }
 0x1a4   : > { %15570 = vst [vmem:[#allocation13_spill] sm:$0xff] %v13668_v24  ;;  %v4392_v58 = vadd.f32 %v10870_v34, %v13492_v57  ;;  %v3421_v1 = vrot.slane %v3292_v15, 5  ;;  %v10391_v30 = vcombine.low %v3401_v63, %v3404_v0  ;;  %v3416_v53 = vrot.slane %v3414_v56, 4  ;;  %v13692_v6 = vpop.f32.mrb[48].mxu0  ;;  %v13703_v15 = vld [vmem:[#allocation2 + $0x90] sm:$0xe] }
 0x1a5   : > { %v10378_v38 = vrot.slane %v3291_v29, 9  ;;  %v10982_v8 = vadd.f32 %v13481_v33, %v13473_v21  ;;  %v13698_v51 = vadd.f32 %v13419_v43, %v13492_v57  ;;  %v10392_v19 = vcombine.low %v3408_v10, %v3411_v39  ;;  %v13705_v29 = vld [vmem:[#allocation2 + $0x98] sm:$0x1]  ;;  %v13707_v33 = vpop.f32.mrb[49].mxu0  ;;  %v13709_v21 = vpop.f32.mrb[50].mxu1 }
 0x1a6   : > { %v13700_v50 = vadd.f32 %v10979_v44, %v4389_v27  ;;  %v3428_v13 = vrot.slane %v13664_v40, 5  ;;  %v15572_v63 = vld [vmem:[#allocation30_spill] sm:$0xff]  ;;  %v3423_v42 = vrot.slane %v3421_v1, 4  ;;  %v3424_v43 = vrot.slane %v3293_v20, 5  ;;  %v13717_v10 = vld [vmem:[#allocation2 + $0xa0] sm:$0xf]  ;;  %11764 = vmatmul.mubr.bf16.gmra.mrb[136].mxu0 %v10391_v30 }
 0x1a7   : > { %v13713_v0 = vadd.f32 %v15572_v63, %v13492_v57  ;;  %v13715_v34 = vadd.f32 %v10982_v8, %v4392_v58  ;;  %v13719_v39 = vpop.f32.mrb[50].mxu0  ;;  %v13721_v40 = vpop.f32.mrb[51].mxu1  ;;  %v12016_v44 = vld [vmem:[#allocation4 + $0x58] sm:$0xff]   ;;  %v3415_v27 = vsel %vm12474_vm9, %v10377_v28, %v3414_v56  ;;  %v10876_v63 = vadd.f32 %v13553_v2, %v13540_v36  ;;  %11767 = vmatprep.mubr.bf16.mxu0 %v10392_v19  ;;  %v13742_v28 = vld [vmem:[#allocation2 + $0x9c] sm:$0xe]  ;;  %v15577_v30 = vld [vmem:[#allocation43_spill] sm:$0xff] }
 0x1a8   : > { %15571 = vst [vmem:[#allocation16_spill] sm:$0xff] %v13700_v50  ;;  %v10873_v50 = vadd.f32 %v13527_v48, %v13514_v32  ;;  %v15575_v20 = vld [vmem:[#allocation37_spill] sm:$0xff]  ;;  %v13731_v8 = vpop.f32.mrb[51].mxu0  ;;  %v3418_v24 = vsel %vm12474_vm9, %v3416_v53, %v3417_v62  ;;  %v3422_v4 = vsel %vm12474_vm9, %v10378_v38, %v3421_v1  ;;  %v10379_v56 = vrot.slane %v13682_v49, 9  ;;  %11273 = vmatprep.subr.bf16.mxu1 %v12016_v44  ;;  %v13750_v38 = vld [vmem:[#allocation2 + $0xac] sm:$0xf] }
 0x1a9   : > { %15573 = vst [vmem:[#allocation17_spill] sm:$0xff] %v13715_v34  ;;  %v10985_v58 = vadd.f32 %v15575_v20, %v15574_v45  ;;  %v12017_v34 = vld [vmem:[#allocation4 + $0x18] sm:$0xff]   ;;  %v3435_v32 = vrot.slane %v13684_v7, 5  ;;  %v3430_v36 = vrot.slane %v3428_v13, 4  ;;  %v3431_v48 = vrot.slane %v13690_v23, 5  ;;  %v15576_v7 = vld [vmem:[#allocation40_spill] sm:$0xff] }
 0x1aa   : > { %v4397_v45 = vadd.f32 %v10873_v50, %v13492_v57  ;;  %v4400_v2 = vadd.f32 %v10876_v63, %v13492_v57  ;;  %11274 = vmatpush3.bf16.msra.mxu1 %v12017_v34  ;;  %v3425_v62 = vsel %vm12474_vm9, %v3423_v42, %v3424_v43  ;;  %v10380_v1 = vrot.slane %v13703_v15, 9  ;;  %v3302_v50 = vld [vmem:[#allocation2 + $0xa4] sm:$0x1]  ;;  %v13757_v63 = vpop.f32.mrb[52].mxu1 }
 0x1ab   : > { %v3438_v49 = vrot.slane %v13705_v29, 5  ;;  %v10988_v53 = vadd.f32 %v15577_v30, %v15576_v7  ;;  %v3437_v19 = vrot.slane %v3435_v32, 4  ;;  %v3442_v44 = vrot.slane %v13717_v10, 5  ;;  %v15580_v10 = vld [vmem:[#allocation31_spill] sm:$0xff] }
 0x1ac   : > { %v13752_v23 = vadd.f32 %v10985_v58, %v4397_v45  ;;  %v10879_v34 = vadd.f32 %v13602_v25, %v13594_v18  ;;  %v10393_v42 = vcombine.low %v3415_v27, %v3418_v24  ;;  %v10882_v29 = vadd.f32 %v13624_v22, %v13612_v11  ;;  %v13765_v20 = vpop.f32.mrb[52].mxu0  ;;  %v13767_v58 = vpop.f32.mrb[53].mxu1  ;;  %v15581_v18 = vld [vmem:[#allocation36_spill] sm:$0xff]  ;;  %v3305_v11 = vld [vmem:[#allocation2 + $0xb0] sm:$0x1] }
 0x1ad   : > { %v13759_v15 = vadd.f32 %v10988_v53, %v4400_v2  ;;  %v10991_v43 = vadd.f32 %v13614_v52, %v13604_v47  ;;  %v13771_v45 = vadd.f32 %v15580_v10, %v13492_v57  ;;  %v13775_v25 = vadd.f32 %v15581_v18, %v13492_v57  ;;  %v3303_v2 = vld [vmem:[#allocation2 + $0xa8] sm:$0xe]  ;;  %v10890_v22 = vpop.f32.mrb[53].mxu0  ;;  %v13778_v7 = vpop.f32.mrb[54].mxu1  ;;  %v15582_v47 = vld [vmem:[#allocation39_spill] sm:$0xff] }
 0x1ae   : > { %15578 = vst [vmem:[#allocation20_spill] sm:$0xff] %v13752_v23  ;;  %v10394_v24 = vcombine.low %v3422_v4, %v3425_v62  ;;  %v4405_v27 = vadd.f32 %v10879_v34, %v13492_v57  ;;  %v13782_v52 = vadd.f32 %v15582_v47, %v13492_v57  ;;  %v3429_v30 = vsel %vm12474_vm9, %v10379_v56, %v3428_v13  ;;  %v13788_v18 = vld [vmem:[#allocation2 + $0xb8] sm:$0xf]  ;;  %v10892_v4 = vpop.f32.mrb[54].mxu0  ;;  %v11005_v62 = vpop.f32.mrb[55].mxu1 }
 0x1af   : > { %15579 = vst [vmem:[#allocation21_spill] sm:$0xff] %v13759_v15  ;;  %v10381_v53 = vrot.slane %v13742_v28, 9  ;;  %v4408_v10 = vadd.f32 %v10882_v29, %v13492_v57  ;;  %v3432_v34 = vsel %vm12474_vm9, %v3430_v36, %v3431_v48  ;;  %v3449_v23 = vrot.slane %v13750_v38, 5  ;;  %v13799_v13 = vld [vmem:[#allocation2 + $0xc4] sm:$0xf]  ;;  %v10893_v56 = vpop.f32.mrb[55].mxu0  ;;  %11768 = vmatmul.mubr.bf16.gmra.mrb[140].mxu0 %v10393_v42 }
 0x1b0   : > { %v13792_v15 = vadd.f32 %v10991_v43, %v4405_v27  ;;  %v10994_v47 = vadd.f32 %v13633_v59, %v13626_v17  ;;  %v3436_v28 = vsel %vm12474_vm9, %v10380_v1, %v3435_v32  ;;  %v3439_v29 = vsel %vm12474_vm9, %v3437_v19, %v3438_v49  ;;  %v13805_v43 = vld [vmem:[#allocation2 + $0xbc] sm:$0x1]  ;;  %11771 = vmatprep.mubr.bf16.mxu0 %v10394_v24  ;;  %v13814_v27 = vld [vmem:[#allocation2 + $0xc0] sm:$0xe]  ;;  %v13816_v32 = vld [vmem:[#allocation2 + $0xc8] sm:$0x1] }
 0x1b1   : > { %v3444_v36 = vrot.slane %v3442_v44, 4  ;;  %v3445_v48 = vrot.slane %v3302_v50, 5  ;;  %v10885_v59 = vadd.f32 %v13707_v33, %v13692_v6  ;;  %v10888_v42 = vadd.f32 %v13731_v8, %v13719_v39 }
 0x1b2   : > { %v13807_v38 = vadd.f32 %v10994_v47, %v4408_v10  ;;  %v10395_v1 = vcombine.low %v3429_v30, %v3432_v34  ;;  %v10382_v49 = vrot.slane %v3303_v2, 9  ;;  %v3452_v19 = vrot.slane %v3305_v11, 5  ;;  %v11007_v6 = vpop.f32.mrb[56].mxu1 }
 0x1b3   : > { %v10997_v50 = vadd.f32 %v13694_v46, %v13686_v55  ;;  %v10396_v24 = vcombine.low %v3436_v28, %v3439_v29  ;;  %v3451_v10 = vrot.slane %v3449_v23, 4  ;;  %v4413_v47 = vadd.f32 %v10885_v59, %v13492_v57  ;;  %v11008_v55 = vpop.f32.mrb[57].mxu1 }
 0x1b4   : > { %v4416_v17 = vadd.f32 %v10888_v42, %v13492_v57  ;;  %v13824_v33 = vsel %vm12474_vm9, %v10381_v53, %v3442_v44  ;;  %v3463_v8 = vrot.slane %v13799_v13, 5  ;;  %v11000_v2 = vadd.f32 %v13721_v40, %v13709_v21  ;;  %v10895_v11 = vpop.f32.mrb[56].mxu0  ;;  %v11010_v29 = vpop.f32.mrb[58].mxu1 }
 0x1b5   : > { %v3446_v46 = vsel %vm12474_vm9, %v3444_v36, %v3445_v48  ;;  %v15583_v30 = vrot.slane %v13788_v18, 5  ;;  %v13837_v44 = vadd.f32 %v10997_v50, %v4413_v47  ;;  %v10896_v53 = vpop.f32.mrb[57].mxu0  ;;  %v3450_v59 = vsel %vm12474_vm9, %v10382_v49, %v3449_v23  ;;  %v11011_v48 = vpop.f32.mrb[59].mxu1 }
 0x1b6   : > { %v10384_v21 = vrot.slane %v13814_v27, 9  ;;  %v3466_v40 = vrot.slane %v13816_v32, 5  ;;  %v13843_v42 = vadd.f32 %v11000_v2, %v4416_v17  ;;  %v10898_v36 = vpop.f32.mrb[58].mxu0  ;;  %v3465_v50 = vrot.slane %v3463_v8, 4  ;;  %v15586_v2 = vld [vmem:[#allocation15_spill] sm:$0xff] }
 0x1b7   : > { %v13834_v34 = vrot.slane %v15583_v30, 4  ;;  %v3453_v30 = vsel %vm12474_vm9, %v3451_v10, %v3452_v19  ;;  %v10891_v47 = vadd.f32 %v10890_v22, %v13765_v20  ;;  %v10894_v28 = vadd.f32 %v10893_v56, %v10892_v4  ;;  %v10899_v39 = vpop.f32.mrb[59].mxu0  ;;  %11772 = vmatmul.mubr.bf16.gmra.mrb[144].mxu0 %v10395_v1 }
 0x1b8   : > { %v4373_v23 = vadd.f32 %v13565_v37, %v13492_v57  ;;  %v11003_v17 = vadd.f32 %v13767_v58, %v13757_v63  ;;  %v11006_v27 = vadd.f32 %v11005_v62, %v13778_v7  ;;  %v10897_v32 = vadd.f32 %v10896_v53, %v10895_v11  ;;  %11775 = vmatprep.mubr.bf16.mxu0 %v10396_v24  ;;  %v15584_v7 = vld [vmem:[#allocation12_spill] sm:$0xff]  ;;  %v15585_v62 = vld [vmem:[#allocation14_spill] sm:$0xff] }
 0x1b9   : > { %v4376_v49 = vadd.f32 %v13569_v54, %v13492_v57  ;;  %v10397_v19 = vcombine.low %v13824_v33, %v3446_v46  ;;  %v4421_v20 = vadd.f32 %v10891_v47, %v13492_v57  ;;  %v4424_v22 = vadd.f32 %v10894_v28, %v13492_v57  ;;  %v15587_v46 = vld [vmem:[#allocation18_spill] sm:$0xff] }
 0x1ba   : > { %v10398_v4 = vcombine.low %v3450_v59, %v3453_v30  ;;  %v4429_v37 = vadd.f32 %v10897_v32, %v13492_v57  ;;  %v10900_v56 = vadd.f32 %v10899_v39, %v10898_v36  ;;  %v11009_v1 = vadd.f32 %v11008_v55, %v11007_v6  ;;  %v12018_v6 = vld [vmem:[#allocation4 + $0x60] sm:$0xff]   ;;  %v15588_v55 = vld [vmem:[#allocation19_spill] sm:$0xff] }
 0x1bb   : > { %v13861_v10 = vadd.f32 %v11003_v17, %v4421_v20  ;;  %v13863_v63 = vadd.f32 %v11006_v27, %v4424_v22  ;;  %v11012_v58 = vadd.f32 %v11011_v48, %v11010_v29  ;;  %v4478_v54 = vadd.f32 %v15585_v62, %v15584_v7  ;;  %v15589_v29 = vld [vmem:[#allocation22_spill] sm:$0xff]  ;;  %v15590_v36 = vld [vmem:[#allocation23_spill] sm:$0xff]  ;;  %11275 = vmatprep.subr.bf16.mxu1 %v12018_v6 }
 0x1bc   : > { %v4432_v24 = vadd.f32 %v10900_v56, %v13492_v57  ;;  %v13868_v33 = vadd.f32 %v11009_v1, %v4429_v37  ;;  %v4481_v11 = vadd.f32 %v15586_v2, %v13586_v35  ;;  %v13874_v28 = vadd.f32 %v15587_v46, %v13590_v12  ;;  %v10901_v39 = vpop.f32.mrb[60].mxu0  ;;  %v15591_v35 = vld [vmem:[#allocation26_spill] sm:$0xff]  ;;  %v15592_v17 = vld [vmem:[#allocation27_spill] sm:$0xff]  ;;  %v15596_v56 = vld [vmem:[#allocation33_spill] sm:$0xff] }
 0x1bd   : > { %v13878_v53 = vadd.f32 %v15588_v55, %v13608_v3  ;;  %v13882_v59 = vadd.f32 %v15589_v29, %v13638_v31  ;;  %v13886_v48 = vadd.f32 %v15590_v36, %v13643_v41  ;;  %v13890_v30 = vadd.f32 %v15591_v35, %v13647_v5  ;;  %v10902_v47 = vpop.f32.mrb[61].mxu0  ;;  %v15593_v3 = vld [vmem:[#allocation28_spill] sm:$0xff]  ;;  %v15594_v31 = vld [vmem:[#allocation29_spill] sm:$0xff]  ;;  %v15598_v7 = vld [vmem:[#allocation38_spill] sm:$0xff] }
 0x1be   : > { %v13892_v12 = vadd.f32 %v11012_v58, %v4432_v24  ;;  %v13896_v27 = vadd.f32 %v15592_v17, %v13655_v9  ;;  %v13900_v32 = vadd.f32 %v15593_v3, %v13659_v14  ;;  %v13904_v20 = vadd.f32 %v15594_v31, %v13698_v51  ;;  %v10904_v22 = vpop.f32.mrb[62].mxu0  ;;  %v15595_v5 = vld [vmem:[#allocation32_spill] sm:$0xff]  ;;  %v15597_v9 = vld [vmem:[#allocation42_spill] sm:$0xff] }
 0x1bf   : > { %v10903_v41 = vadd.f32 %v10902_v47, %v10901_v39  ;;  %v13908_v37 = vadd.f32 %v15595_v5, %v13713_v0  ;;  %v13912_v1 = vadd.f32 %v15596_v56, %v13771_v45  ;;  %v13916_v58 = vadd.f32 %v15597_v9, %v13775_v25  ;;  %v12019_v14 = vld [vmem:[#allocation4 + $0x20] sm:$0xff]   ;;  %11776 = vmatmul.mubr.bf16.gmra.mrb[148].mxu0 %v10397_v19  ;;  %v10905_v62 = vpop.f32.mrb[63].mxu0  ;;  %v15599_v2 = vld [vmem:[#allocation24_spill] sm:$0xff] }
 0x1c0   : > { %v3470_v51 = vrot.slane %v15598_v7, 5  ;;  %v13921_v24 = vadd.f32 %v13558_v60, %v13782_v52  ;;  %v13924_v0 = vadd.f32 %v13580_v26, %v4373_v23  ;;  %v13927_v46 = vadd.f32 %v15599_v2, %v4376_v49  ;;  %11779 = vmatprep.mubr.bf16.mxu0 %v10398_v4  ;;  %11276 = vmatpush3.bf16.msra.mxu1 %v12019_v14  ;;  %v11013_v4 = vpop.f32.mrb[60].mxu1 }
 0x1c1   : > { %v15600_v45 = vrot.slane %v13788_v18, 5  ;;  %v15601_v25 = vrot.slane %v13797_v16, 9  ;;  %v15602_v6 = vrot.slane %v13805_v43, 5  ;;  %v10906_v52 = vadd.f32 %v10905_v62, %v10904_v22  ;;  %v15603_v16 = vld [vmem:[#allocation35_spill] sm:$0xff]  ;;  %v15604_v43 = vld [vmem:[#allocation41_spill] sm:$0xff]  ;;  %v11014_v55 = vpop.f32.mrb[61].mxu1 }
 0x1c2   : > { %v3464_v26 = vsel %vm12474_vm9, %v10384_v21, %v3463_v8  ;;  %v3467_v18 = vsel %vm12474_vm9, %v3465_v50, %v3466_v40  ;;  %v10385_v23 = vrot.slane %v15603_v16, 9  ;;  %v4437_v49 = vadd.f32 %v10903_v41, %v13492_v57  ;;  %v11016_v13 = vpop.f32.mrb[62].mxu1 }
 0x1c3   : > { %v3457_v19 = vsel %vm12474_vm9, %v15601_v25, %v15600_v45  ;;  %v3460_v60 = vsel %vm12474_vm9, %v13834_v34, %v15602_v6  ;;  %v3473_v39 = vrot.slane %v15604_v43, 5  ;;  %v3472_v34 = vrot.slane %v3470_v51, 4  ;;  %v11017_v17 = vpop.f32.mrb[63].mxu1 }
 0x1c4   : > { %v10399_v29 = vcombine.low %v3457_v19, %v3460_v60  ;;  %v4440_v36 = vadd.f32 %v10906_v52, %v13492_v57  ;;  %v11015_v35 = vadd.f32 %v11014_v55, %v11013_v4  ;;  %v10400_v47 = vcombine.low %v3464_v26, %v3467_v18  ;;  %v11035_v8 = vpop.f32.mrb[64].mxu0 }
 0x1c5   : > { %v11018_v40 = vadd.f32 %v11017_v17, %v11016_v13  ;;  %v11036_v50 = vpop.f32.mrb[65].mxu0  ;;  %v3471_v5 = vsel %vm12474_vm9, %v10385_v23, %v3470_v51  ;;  %v3474_v57 = vsel %vm12474_vm9, %v3472_v34, %v3473_v39 }
 0x1c6   : > { %v13950_v21 = vadd.f32 %v11015_v35, %v4437_v49  ;;  %v11037_v3 = vadd.f32 %v11036_v50, %v11035_v8  ;;  %v11038_v31 = vpop.f32.mrb[66].mxu0  ;;  %v10401_v2 = vcombine.low %v3471_v5, %v3474_v57 }
 0x1c7   : > { %11780 = vmatmul.mubr.bf16.gmra.mrb[152].mxu0 %v10399_v29  ;;  %v13952_v41 = vadd.f32 %v11018_v40, %v4440_v36  ;;  %v11039_v22 = vpop.f32.mrb[67].mxu0  ;;  %v12020_v29 = vld [vmem:[#allocation4 + $0x68] sm:$0xff]  }
 0x1c8   : > { %11783 = vmatprep.mubr.bf16.mxu0 %v10400_v47  ;;  %v4639_v56 = vadd.f32 %v11037_v3, %v4478_v54  ;;  %v11040_v9 = vadd.f32 %v11039_v22, %v11038_v31  ;;  %v11147_v14 = vpop.f32.mrb[64].mxu1  ;;  %11277 = vmatprep.subr.bf16.mxu1 %v12020_v29  ;;  %v12021_v47 = vld [vmem:[#allocation4 + $0x28] sm:$0xff]  }
 0x1c9   : > { %v11148_v62 = vpop.f32.mrb[65].mxu1  ;;  %11278 = vmatpush3.bf16.msra.mxu1 %v12021_v47  ;;  %v12023_v47 = vld [vmem:[#allocation4 + $0x70] sm:$0xff]  }
 0x1ca   : > { %v4642_v7 = vadd.f32 %v11040_v9, %v4481_v11  ;;  %v11149_v45 = vadd.f32 %v11148_v62, %v11147_v14  ;;  %v11150_v25 = vpop.f32.mrb[66].mxu1  ;;  %11279 = vmatprep.subr.bf16.mxu1 %v12023_v47 }
 0x1cb   : > { %v11151_v19 = vpop.f32.mrb[67].mxu1 }
 0x1cc   : > { %v11041_v6 = vpop.f32.mrb[68].mxu0  ;;  %v11152_v60 = vadd.f32 %v11151_v19, %v11150_v25  ;;  %v13958_v26 = vadd.f32 %v11149_v45, %v4639_v56 }
 0x1cd   : > { %v11042_v52 = vpop.f32.mrb[69].mxu0 }
 0x1ce   : > { %v11043_v18 = vadd.f32 %v11042_v52, %v11041_v6  ;;  %v11044_v16 = vpop.f32.mrb[70].mxu0  ;;  %v13960_v23 = vadd.f32 %v11152_v60, %v4642_v7 }
 0x1cf   : > { %11784 = vmatmul.mubr.bf16.gmra.mrb[156].mxu0 %v10401_v2  ;;  %v11045_v51 = vpop.f32.mrb[71].mxu0 }
 0x1d0   : > { %v4647_v54 = vadd.f32 %v11043_v18, %v13874_v28  ;;  %v11046_v49 = vadd.f32 %v11045_v51, %v11044_v16  ;;  %v11153_v11 = vpop.f32.mrb[68].mxu1 }
 0x1d1   : > { %v11154_v43 = vpop.f32.mrb[69].mxu1 }
 0x1d2   : > { %v4650_v4 = vadd.f32 %v11046_v49, %v13878_v53  ;;  %v11155_v39 = vadd.f32 %v11154_v43, %v11153_v11  ;;  %v11156_v55 = vpop.f32.mrb[70].mxu1 }
 0x1d3   : > { %v11157_v34 = vpop.f32.mrb[71].mxu1 }
 0x1d4   : > { %v11158_v36 = vadd.f32 %v11157_v34, %v11156_v55  ;;  %v13964_v35 = vadd.f32 %v11155_v39, %v4647_v54 }
 0x1d6   : > { %v11047_v13 = vpop.f32.mrb[72].mxu0  ;;  %v13966_v8 = vadd.f32 %v11158_v36, %v4650_v4 }
 0x1d7   : > { %v11048_v17 = vpop.f32.mrb[73].mxu0 }
 0x1d8   : > { %v11049_v40 = vadd.f32 %v11048_v17, %v11047_v13  ;;  %v11050_v28 = vpop.f32.mrb[74].mxu0  ;;  %v12022_v13 = vld [vmem:[#allocation4 + $0xc0] sm:$0xff]  }
 0x1d9   : > { %v11051_v50 = vpop.f32.mrb[75].mxu0  ;;  %v11159_v3 = vpop.f32.mrb[72].mxu1  ;;  %11379 = vmatprep.subr.bf16.mxu0 %v12022_v13 }
 0x1da   : > { %v4655_v53 = vadd.f32 %v11049_v40, %v13882_v59  ;;  %v11052_v31 = vadd.f32 %v11051_v50, %v11050_v28  ;;  %v11160_v22 = vpop.f32.mrb[73].mxu1  ;;  %v12025_v40 = vld [vmem:[#allocation4 + $0x30] sm:$0xff]  }
 0x1db   : > { %v11161_v57 = vadd.f32 %v11160_v22, %v11159_v3  ;;  %v11162_v56 = vpop.f32.mrb[74].mxu1  ;;  %11280 = vmatpush3.bf16.msra.mxu1 %v12025_v40  ;;  %v12030_v40 = vld [vmem:[#allocation4 + $0xd8] sm:$0xff]  }
 0x1dc   : > { %v4658_v5 = vadd.f32 %v11052_v31, %v13886_v48  ;;  %v11163_v9 = vpop.f32.mrb[75].mxu1 }
 0x1dd   : > { %v11164_v14 = vadd.f32 %v11163_v9, %v11162_v56  ;;  %v13970_v62 = vadd.f32 %v11161_v57, %v4655_v53 }
 0x1de   : > { %v11053_v7 = vpop.f32.mrb[76].mxu0 }
 0x1df   : > { %v11054_v2 = vpop.f32.mrb[77].mxu0  ;;  %v13972_v19 = vadd.f32 %v11164_v14, %v4658_v5 }
 0x1e0   : > { %v11055_v45 = vadd.f32 %v11054_v2, %v11053_v7  ;;  %v11056_v25 = vpop.f32.mrb[78].mxu0 }
 0x1e1   : > { %v11057_v6 = vpop.f32.mrb[79].mxu0 }
 0x1e2   : > { %v4663_v59 = vadd.f32 %v11055_v45, %v13890_v30  ;;  %v11058_v60 = vadd.f32 %v11057_v6, %v11056_v25 }
 0x1e3   : > { %v11165_v52 = vpop.f32.mrb[76].mxu1 }
 0x1e4   : > { %v4666_v18 = vadd.f32 %v11058_v60, %v13896_v27  ;;  %v11166_v48 = vpop.f32.mrb[77].mxu1  ;;  %v12024_v27 = vld [vmem:[#allocation4 + $0x80] sm:$0xff]  }
 0x1e5   : > { %v11167_v16 = vadd.f32 %v11166_v48, %v11165_v52  ;;  %v11168_v51 = vpop.f32.mrb[78].mxu1  ;;  %11380 = vmatpush3.bf16.msra.mxu0 %v12024_v27  ;;  %v12026_v48 = vld [vmem:[#allocation4 + $0xc8] sm:$0xff]  }
 0x1e6   : > { %v11169_v54 = vpop.f32.mrb[79].mxu1  ;;  %11381 = vmatprep.subr.bf16.mxu0 %v12026_v48 }
 0x1e7   : > { %v11170_v49 = vadd.f32 %v11169_v54, %v11168_v51  ;;  %v13976_v11 = vadd.f32 %v11167_v16, %v4663_v59  ;;  %v12027_v51 = vld [vmem:[#allocation4 + $0x88] sm:$0xff]   ;;  %v12028_v54 = vld [vmem:[#allocation4 + $0xd0] sm:$0xff]  }
 0x1e8   : > { %v11059_v4 = vpop.f32.mrb[80].mxu0 }
 0x1e9   : > { %v11060_v43 = vpop.f32.mrb[81].mxu0  ;;  %v13978_v39 = vadd.f32 %v11170_v49, %v4666_v18  ;;  %11382 = vmatpush3.bf16.msra.mxu0 %v12027_v51 }
 0x1ea   : > { %v11061_v55 = vadd.f32 %v11060_v43, %v11059_v4  ;;  %v11062_v29 = vpop.f32.mrb[82].mxu0  ;;  %11383 = vmatprep.subr.bf16.mxu0 %v12028_v54  ;;  %v12039_v54 = vld [vmem:[#allocation4 + $0xb0] sm:$0xff]  }
 0x1eb   : > { %v11063_v34 = vpop.f32.mrb[83].mxu0 }
 0x1ec   : > { %v4671_v30 = vadd.f32 %v11061_v55, %v13900_v32  ;;  %v11064_v36 = vadd.f32 %v11063_v34, %v11062_v29 }
 0x1ed   : > { %v11171_v17 = vpop.f32.mrb[80].mxu1 }
 0x1ee   : > { %v4674_v28 = vadd.f32 %v11064_v36, %v13904_v20  ;;  %v11172_v50 = vpop.f32.mrb[81].mxu1 }
 0x1ef   : > { %v11173_v53 = vadd.f32 %v11172_v50, %v11171_v17  ;;  %v11174_v3 = vpop.f32.mrb[82].mxu1  ;;  %v12031_v50 = vld [vmem:[#allocation4 + $0x98] sm:$0xff]  }
 0x1f0   : > { %v11175_v31 = vpop.f32.mrb[83].mxu1 }
 0x1f1   : > { %v11176_v22 = vadd.f32 %v11175_v31, %v11174_v3  ;;  %v13982_v5 = vadd.f32 %v11173_v53, %v4671_v30  ;;  %v12032_v53 = vld [vmem:[#allocation4 + $0xe0] sm:$0xff]   ;;  %v12033_v3 = vld [vmem:[#allocation4 + $0x78] sm:$0xff]  }
 0x1f2   : > { %11281 = vmatprep.subr.bf16.mxu1 %v12033_v3 }
 0x1f3   : > { %v11065_v32 = vpop.f32.mrb[84].mxu0  ;;  %v13984_v57 = vadd.f32 %v11176_v22, %v4674_v28  ;;  %v12035_v22 = vld [vmem:[#allocation4 + $0x38] sm:$0xff]  }
 0x1f4   : > { %v11066_v56 = vpop.f32.mrb[85].mxu0  ;;  %11282 = vmatpush3.bf16.msra.mxu1 %v12035_v22 }
 0x1f5   : > { %v11067_v9 = vadd.f32 %v11066_v56, %v11065_v32  ;;  %v11068_v14 = vpop.f32.mrb[86].mxu0 }
 0x1f6   : > { %v11069_v7 = vpop.f32.mrb[87].mxu0 }
 0x1f7   : > { %v4679_v20 = vadd.f32 %v11067_v9, %v13908_v37  ;;  %v11177_v2 = vpop.f32.mrb[84].mxu1  ;;  %v11070_v45 = vadd.f32 %v11069_v7, %v11068_v14  ;;  %v12029_v37 = vld [vmem:[#allocation4 + $0x90] sm:$0xff]  }
 0x1f8   : > { %v11178_v25 = vpop.f32.mrb[85].mxu1  ;;  %11384 = vmatpush3.bf16.msra.mxu0 %v12029_v37 }
 0x1f9   : > { %v4682_v6 = vadd.f32 %v11070_v45, %v13912_v1  ;;  %v11179_v59 = vadd.f32 %v11178_v25, %v11177_v2  ;;  %v11180_v60 = vpop.f32.mrb[86].mxu1  ;;  %11385 = vmatprep.subr.bf16.mxu0 %v12030_v40  ;;  %v12036_v25 = vld [vmem:[#allocation4 + $0xe8] sm:$0xff]  }
 0x1fa   : > { %v11181_v52 = vpop.f32.mrb[87].mxu1 }
 0x1fb   : > { %v11182_v18 = vadd.f32 %v11181_v52, %v11180_v60  ;;  %v13988_v16 = vadd.f32 %v11179_v59, %v4679_v20  ;;  %v12037_v59 = vld [vmem:[#allocation4 + $0xa8] sm:$0xff]   ;;  %v12038_v60 = vld [vmem:[#allocation4 + $0xf0] sm:$0xff]  }
 0x1fc   : > { %11386 = vmatpush3.bf16.msra.mxu0 %v12031_v50  ;;  %v15605_v50 = vld [vmem:[#allocation25_spill] sm:$0xff] }
 0x1fd   : > { %v11071_v49 = vpop.f32.mrb[88].mxu0  ;;  %v13990_v4 = vadd.f32 %v11182_v18, %v4682_v6  ;;  %11387 = vmatprep.subr.bf16.mxu0 %v12032_v53 }
 0x1fe   : > { %v11072_v43 = vpop.f32.mrb[89].mxu0 }
 0x1ff   : > { %v11073_v55 = vadd.f32 %v11072_v43, %v11071_v49  ;;  %v11074_v29 = vpop.f32.mrb[90].mxu0 }
 0x200   : > { %v11075_v1 = vpop.f32.mrb[91].mxu0 }
 0x201   : > { %v4687_v34 = vadd.f32 %v11073_v55, %v13916_v58  ;;  %v11183_v30 = vpop.f32.mrb[88].mxu1  ;;  %v11076_v36 = vadd.f32 %v11075_v1, %v11074_v29  ;;  %v12034_v58 = vld [vmem:[#allocation4 + $0xa0] sm:$0xff]   ;;  %v12040_v1 = vld [vmem:[#allocation4 + $0xf8] sm:$0xff]  }
 0x202   : > { %v11184_v13 = vpop.f32.mrb[89].mxu1  ;;  %11388 = vmatpush3.bf16.msra.mxu0 %v12034_v58 }
 0x203   : > { %v4690_v47 = vadd.f32 %v11076_v36, %v13921_v24  ;;  %v11185_v27 = vadd.f32 %v11184_v13, %v11183_v30  ;;  %v11186_v17 = vpop.f32.mrb[90].mxu1  ;;  %11389 = vmatprep.subr.bf16.mxu0 %v12036_v25  ;;  %v5685_v36 = vld [vmem:[#allocation2] sm:$0xf]  ;;  %v5686_v13 = vld [vmem:[#allocation2 + $0x4] sm:$0xf] }
 0x204   : > { %v11187_v28 = vpop.f32.mrb[91].mxu1  ;;  %v5737_v40 = vshll.u32 %v5685_v36, 16  ;;  %v5747_v22 = vshrl.u32 %v5686_v13, 16 }
 0x205   : > { %v11188_v31 = vadd.f32 %v11187_v28, %v11186_v17  ;;  %v13994_v32 = vadd.f32 %v11185_v27, %v4687_v34  ;;  %v5687_v27 = vld [vmem:[#allocation2 + $0x8] sm:$0x1]  ;;  %v5734_v17 = vshrl.u32 %v5685_v36, 16  ;;  %v5743_v28 = vshll.u32 %v5686_v13, 16  ;;  %v12042_v36 = vld [vmem:[#allocation2] sm:$0xff]  }
 0x206   : > { %11390 = vmatpush3.bf16.msra.mxu0 %v12037_v59  ;;  %v5753_v58 = vshll.u32 %v5687_v27, 16  ;;  %v12045_v59 = vld [vmem:[#allocation4 + $0x140] sm:$0xff]  }
 0x207   : > { %v11077_v56 = vpop.f32.mrb[92].mxu0  ;;  %v13996_v9 = vadd.f32 %v11188_v31, %v4690_v47  ;;  %11391 = vmatprep.subr.bf16.mxu0 %v12038_v60  ;;  %11491 = vmatprep.subr.bf16.mxu1 %v12045_v59 }
 0x208   : > { %v11078_v24 = vpop.f32.mrb[93].mxu0 }
 0x209   : > { %v11079_v14 = vadd.f32 %v11078_v24, %v11077_v56  ;;  %v11080_v7 = vpop.f32.mrb[94].mxu0  ;;  %v5736_v24 = vrot.slane %v5734_v17, 4  ;;  %v12046_v17 = vld [vmem:[#allocation4 + $0x100] sm:$0xff]  }
 0x20a   : > { %v11081_v20 = vpop.f32.mrb[95].mxu0  ;;  %11392 = vmatpush3.bf16.msra.mxu0 %v12039_v54 }
 0x20b   : > { %v4695_v2 = vadd.f32 %v11079_v14, %v13924_v0  ;;  %v11082_v45 = vadd.f32 %v11081_v20, %v11080_v7  ;;  %11393 = vmatprep.subr.bf16.mxu0 %v12040_v1  ;;  %v5739_v14 = vrot.slane %v5737_v40, 5  ;;  %v5745_v7 = vrot.slane %v5743_v28, 5  ;;  %v15606_v20 = vld [vmem:[#allocation13_spill] sm:$0xff] }
 0x20c   : > { %v11189_v6 = vpop.f32.mrb[92].mxu1 }
 0x20d   : > { %v4698_v52 = vadd.f32 %v11082_v45, %v13927_v46  ;;  %v11190_v18 = vpop.f32.mrb[93].mxu1  ;;  %v12041_v46 = vld [vmem:[#allocation4 + $0xb8] sm:$0xff]  }
 0x20e   : > { %v11191_v48 = vadd.f32 %v11190_v18, %v11189_v6  ;;  %v11192_v51 = vpop.f32.mrb[94].mxu1  ;;  %11394 = vmatpush3.bf16.msra.mxu0 %v12041_v46  ;;  %v5749_v6 = vrot.slane %v5747_v22, 4 }
 0x20f   : > { %v11193_v49 = vpop.f32.mrb[95].mxu1 }
 0x210   : > { %v11194_v43 = vadd.f32 %v11193_v49, %v11192_v51  ;;  %v14000_v37 = vadd.f32 %v11191_v48, %v4695_v2  ;;  %v5750_v48 = vor.u32 %v5749_v6, %v5745_v7  ;;  %v5755_v51 = vrot.slane %v5753_v58, 5 }
 0x212   : > { %v11083_v55 = vpop.f32.mrb[96].mxu0  ;;  %v14002_v0 = vadd.f32 %v11194_v43, %v4698_v52  ;;  %v5740_v52 = vor.u32 %v5739_v14, %v5736_v24  ;;  %v5751_v43 = vrot.slane %v5750_v48, 4 }
 0x213   : > { %v11084_v29 = vpop.f32.mrb[97].mxu0 }
 0x214   : > { %v11085_v34 = vadd.f32 %v11084_v29, %v11083_v55  ;;  %v11086_v30 = vpop.f32.mrb[98].mxu0  ;;  %v5741_v49 = vrot.slane %v5740_v52, 4  ;;  %v5756_v46 = vsel %vm12458_vm4, %v5751_v43, %v5755_v51  ;;  %v15610_v52 = vld [vmem:[#allocation20_spill] sm:$0xff] }
 0x215   : > { %v11087_v47 = vpop.f32.mrb[99].mxu0 }
 0x216   : > { %v4703_v53 = vadd.f32 %v11085_v34, %v15605_v50  ;;  %v11195_v3 = vpop.f32.mrb[96].mxu1  ;;  %v11088_v31 = vadd.f32 %v11087_v47, %v11086_v30  ;;  %v5746_v34 = vsel %vm12458_vm4, %v5741_v49, %v5745_v7  ;;  %v15608_v50 = vld [vmem:[#allocation16_spill] sm:$0xff]  ;;  %v15611_v49 = vld [vmem:[#allocation21_spill] sm:$0xff] }
 0x217   : > { %v11196_v56 = vpop.f32.mrb[97].mxu1  ;;  %v10539_v27 = vcombine.low %v5746_v34, %v5756_v46 }
 0x218   : > { %v4706_v2 = vadd.f32 %v11088_v31, %v15606_v20  ;;  %v11197_v45 = vadd.f32 %v11196_v56, %v11195_v3  ;;  %v11198_v25 = vpop.f32.mrb[98].mxu1  ;;  %v15609_v56 = vld [vmem:[#allocation17_spill] sm:$0xff] }
 0x219   : > { %v11199_v60 = vpop.f32.mrb[99].mxu1  ;;  %9132 = vmatprep.mubr.bf16.mxu1 %v10539_v27 }
 0x21a   : > { %v11200_v18 = vadd.f32 %v11199_v60, %v11198_v25  ;;  %v14006_v54 = vadd.f32 %v11197_v45, %v4703_v53  ;;  %9133 = vmatmul.mubr.bf16.vlgmr.msra.gmra.mrb[128].mxu1 %v12042_v36 }
 0x21b   : > { %11492 = vmatpush3.bf16.msra.mxu1 %v12046_v17 }
 0x21c   : > { %v14008_v55 = vadd.f32 %v11200_v18, %v4706_v2 }
 0x21d   : > { %v11089_v29 = vpop.f32.mrb[100].mxu0 }
 0x21e   : > { %v11090_v30 = vpop.f32.mrb[101].mxu0 }
 0x21f   : > { %v11091_v13 = vadd.f32 %v11090_v30, %v11089_v29  ;;  %v11092_v47 = vpop.f32.mrb[102].mxu0 }
 0x220   : > { %v11201_v40 = vpop.f32.mrb[100].mxu1  ;;  %v11093_v28 = vpop.f32.mrb[103].mxu0 }
 0x221   : > { %v4711_v53 = vadd.f32 %v11091_v13, %v15608_v50  ;;  %v11094_v3 = vadd.f32 %v11093_v28, %v11092_v47  ;;  %v11202_v31 = vpop.f32.mrb[101].mxu1  ;;  %v12051_v47 = vld [vmem:[#allocation4 + $0x148] sm:$0xff]  }
 0x222   : > { %v11203_v22 = vadd.f32 %v11202_v31, %v11201_v40  ;;  %v11204_v58 = vpop.f32.mrb[102].mxu1  ;;  %11493 = vmatprep.subr.bf16.mxu1 %v12051_v47  ;;  %v12052_v40 = vld [vmem:[#allocation4 + $0x108] sm:$0xff]  }
 0x223   : > { %v4714_v24 = vadd.f32 %v11094_v3, %v15609_v56  ;;  %v11205_v14 = vpop.f32.mrb[103].mxu1  ;;  %11494 = vmatpush3.bf16.msra.mxu1 %v12052_v40  ;;  %v12057_v40 = vld [vmem:[#allocation4 + $0x150] sm:$0xff]  }
 0x224   : > { %v11206_v7 = vadd.f32 %v11205_v14, %v11204_v58  ;;  %v14016_v20 = vadd.f32 %v11203_v22, %v4711_v53  ;;  %11495 = vmatprep.subr.bf16.mxu1 %v12057_v40 }
 0x225   : > { %v11095_v2 = vpop.f32.mrb[104].mxu0 }
 0x226   : > { %v11096_v45 = vpop.f32.mrb[105].mxu0  ;;  %v14018_v25 = vadd.f32 %v11206_v7, %v4714_v24 }
 0x227   : > { %v11097_v6 = vadd.f32 %v11096_v45, %v11095_v2  ;;  %v11098_v59 = vpop.f32.mrb[106].mxu0 }
 0x228   : > { %v11099_v60 = vpop.f32.mrb[107].mxu0 }
 0x229   : > { %v4719_v18 = vadd.f32 %v11097_v6, %v15610_v52  ;;  %v11100_v48 = vadd.f32 %v11099_v60, %v11098_v59 }
 0x22a   : > { %v11207_v51 = vpop.f32.mrb[104].mxu1 }
 0x22b   : > { %v4722_v43 = vadd.f32 %v11100_v48, %v15611_v49  ;;  %v11208_v29 = vpop.f32.mrb[105].mxu1 }
 0x22c   : > { %v11209_v34 = vadd.f32 %v11208_v29, %v11207_v51  ;;  %v11210_v30 = vpop.f32.mrb[106].mxu1 }
 0x22d   : > { %v11211_v46 = vpop.f32.mrb[107].mxu1 }
 0x22e   : > { %v11212_v36 = vadd.f32 %v11211_v46, %v11210_v30  ;;  %v14022_v13 = vadd.f32 %v11209_v34, %v4719_v18 }
 0x230   : > { %v14024_v27 = vadd.f32 %v11212_v36, %v4722_v43 }
 0x231   : > { %v11101_v17 = vpop.f32.mrb[108].mxu0 }
 0x232   : > { %v11102_v28 = vpop.f32.mrb[109].mxu0 }
 0x233   : > { %v11103_v50 = vadd.f32 %v11102_v28, %v11101_v17  ;;  %v11104_v53 = vpop.f32.mrb[110].mxu0 }
 0x234   : > { %v11105_v3 = vpop.f32.mrb[111].mxu0 }
 0x235   : > { %v4727_v31 = vadd.f32 %v11103_v50, %v13792_v15  ;;  %v11106_v58 = vadd.f32 %v11105_v3, %v11104_v53  ;;  %v12058_v53 = vld [vmem:[#allocation4 + $0x110] sm:$0xff]  }
 0x236   : > { %v11213_v22 = vpop.f32.mrb[108].mxu1  ;;  %11496 = vmatpush3.bf16.msra.mxu1 %v12058_v53 }
 0x237   : > { %v11214_v56 = vpop.f32.mrb[109].mxu1  ;;  %v4730_v24 = vadd.f32 %v11106_v58, %v13807_v38 }
 0x238   : > { %v11215_v14 = vadd.f32 %v11214_v56, %v11213_v22  ;;  %v11216_v7 = vpop.f32.mrb[110].mxu1 }
 0x239   : > { %v11217_v2 = vpop.f32.mrb[111].mxu1 }
 0x23a   : > { %v11218_v45 = vadd.f32 %v11217_v2, %v11216_v7  ;;  %v14028_v6 = vadd.f32 %v11215_v14, %v4727_v31 }
 0x23c   : > { %v14030_v59 = vadd.f32 %v11218_v45, %v4730_v24  ;;  %v11107_v60 = vpop.f32.mrb[112].mxu0 }
 0x23d   : > { %v11108_v52 = vpop.f32.mrb[113].mxu0 }
 0x23e   : > { %v11109_v18 = vadd.f32 %v11108_v52, %v11107_v60  ;;  %v11110_v48 = vpop.f32.mrb[114].mxu0 }
 0x23f   : > { %v11111_v51 = vpop.f32.mrb[115].mxu0 }
 0x240   : > { %v4735_v15 = vadd.f32 %v11109_v18, %v13837_v44  ;;  %v11112_v49 = vadd.f32 %v11111_v51, %v11110_v48  ;;  %v12063_v48 = vld [vmem:[#allocation4 + $0x158] sm:$0xff]  }
 0x241   : > { %v11219_v43 = vpop.f32.mrb[112].mxu1  ;;  %11497 = vmatprep.subr.bf16.mxu1 %v12063_v48 }
 0x242   : > { %v4738_v29 = vadd.f32 %v11112_v49, %v13843_v42  ;;  %v11220_v38 = vpop.f32.mrb[113].mxu1 }
 0x243   : > { %v11221_v34 = vadd.f32 %v11220_v38, %v11219_v43  ;;  %v11222_v30 = vpop.f32.mrb[114].mxu1  ;;  %v12064_v43 = vld [vmem:[#allocation4 + $0x118] sm:$0xff]  }
 0x244   : > { %v11223_v46 = vpop.f32.mrb[115].mxu1  ;;  %11498 = vmatpush3.bf16.msra.mxu1 %v12064_v43 }
 0x245   : > { %v11224_v36 = vadd.f32 %v11223_v46, %v11222_v30  ;;  %v14034_v47 = vadd.f32 %v11221_v34, %v4735_v15  ;;  %v12067_v30 = vld [vmem:[#allocation4 + $0x1c0] sm:$0xff]  }
 0x246   : > { %11603 = vmatprep.subr.bf16.mxu0 %v12067_v30 }
 0x247   : > { %v14036_v17 = vadd.f32 %v11224_v36, %v4738_v29 }
 0x248   : > { %v11113_v28 = vpop.f32.mrb[116].mxu0 }
 0x249   : > { %v11114_v50 = vpop.f32.mrb[117].mxu0 }
 0x24a   : > { %v11115_v3 = vadd.f32 %v11114_v50, %v11113_v28  ;;  %v11116_v44 = vpop.f32.mrb[118].mxu0 }
 0x24b   : > { %v11117_v31 = vpop.f32.mrb[119].mxu0 }
 0x24c   : > { %v4743_v42 = vadd.f32 %v11115_v3, %v13861_v10  ;;  %v11118_v22 = vadd.f32 %v11117_v31, %v11116_v44  ;;  %v11225_v58 = vpop.f32.mrb[116].mxu1 }
 0x24d   : > { %v11226_v24 = vpop.f32.mrb[117].mxu1 }
 0x24e   : > { %v4746_v56 = vadd.f32 %v11118_v22, %v13863_v63  ;;  %v11227_v14 = vadd.f32 %v11226_v24, %v11225_v58  ;;  %v11228_v7 = vpop.f32.mrb[118].mxu1  ;;  %v12072_v24 = vld [vmem:[#allocation4 + $0x120] sm:$0xff]  }
 0x24f   : > { %v11229_v2 = vpop.f32.mrb[119].mxu1 }
 0x250   : > { %v11230_v45 = vadd.f32 %v11229_v2, %v11228_v7  ;;  %v14040_v60 = vadd.f32 %v11227_v14, %v4743_v42 }
 0x252   : > { %v14042_v52 = vadd.f32 %v11230_v45, %v4746_v56 }
 0x253   : > { %v11119_v18 = vpop.f32.mrb[120].mxu0 }
 0x254   : > { %v11120_v51 = vpop.f32.mrb[121].mxu0 }
 0x255   : > { %v11121_v15 = vadd.f32 %v11120_v51, %v11119_v18  ;;  %v11122_v49 = vpop.f32.mrb[122].mxu0 }
 0x256   : > { %v11123_v10 = vpop.f32.mrb[123].mxu0 }
 0x257   : > { %v4751_v29 = vadd.f32 %v11121_v15, %v13868_v33  ;;  %v11124_v63 = vadd.f32 %v11123_v10, %v11122_v49 }
 0x259   : > { %v4754_v38 = vadd.f32 %v11124_v63, %v13892_v12  ;;  %v12071_v12 = vld [vmem:[#allocation4 + $0x160] sm:$0xff]  }
 0x25a   : > { %11499 = vmatprep.subr.bf16.mxu1 %v12071_v12 }
 0x25b   : > { %11500 = vmatpush3.bf16.msra.mxu1 %v12072_v24 }
 0x25d   : > { %v11231_v34 = vpop.f32.mrb[120].mxu1 }
 0x25e   : > { %v11232_v46 = vpop.f32.mrb[121].mxu1 }
 0x25f   : > { %v11233_v36 = vadd.f32 %v11232_v46, %v11231_v34  ;;  %v11234_v40 = vpop.f32.mrb[122].mxu1  ;;  %v11125_v28 = vpop.f32.mrb[124].mxu0 }
 0x260   : > { %v11235_v50 = vpop.f32.mrb[123].mxu1  ;;  %v11126_v53 = vpop.f32.mrb[125].mxu0 }
 0x261   : > { %v11236_v3 = vadd.f32 %v11235_v50, %v11234_v40  ;;  %v11127_v44 = vadd.f32 %v11126_v53, %v11125_v28  ;;  %v11128_v31 = vpop.f32.mrb[126].mxu0  ;;  %v14046_v42 = vadd.f32 %v11233_v36, %v4751_v29  ;;  %v6197_v28 = vld [vmem:[#allocation2] sm:$0xe]  ;;  %v6198_v50 = vld [vmem:[#allocation2 + $0x4] sm:$0xf] }
 0x262   : > { %v11129_v22 = vpop.f32.mrb[127].mxu0  ;;  %v6295_v12 = vrot.slane %v6198_v50, 5 }
 0x263   : > { %v4759_v33 = vadd.f32 %v11127_v44, %v13950_v21  ;;  %v11130_v58 = vadd.f32 %v11129_v22, %v11128_v31  ;;  %v14049_v56 = vadd.f32 %v11236_v3, %v4754_v38  ;;  %v6199_v3 = vld [vmem:[#allocation2 + $0x8] sm:$0x1] }
 0x265   : > { %v4762_v14 = vadd.f32 %v11130_v58, %v13952_v41  ;;  %v10555_v58 = vrot.slane %v6197_v28, 9 }
 0x268   : > { %v11757_v45 = vpop.f32.mrb[128].mxu0 }
 0x269   : > { %v4969_v51 = vadd.f32 %v11757_v45, %v13964_v35  ;;  %v4960_v15 = vpop.f32.mrb[129].mxu0  ;;  %v6298_v45 = vrot.slane %v6199_v3, 5 }
 0x26a   : > { %v11237_v7 = vpop.f32.mrb[124].mxu1  ;;  %v4961_v21 = vadd.f32 %v4960_v15, %v13958_v26  ;;  %v11758_v10 = vpop.f32.mrb[130].mxu0 }
 0x26b   : > { %v11238_v2 = vpop.f32.mrb[125].mxu1  ;;  %v4972_v29 = vadd.f32 %v11758_v10, %v13966_v8  ;;  %v4963_v63 = vpop.f32.mrb[131].mxu0  ;;  %v5089_v34 = vmax.f32 %v4969_v51, 0.0 }
 0x26c   : > { %v11239_v18 = vadd.f32 %v11238_v2, %v11237_v7  ;;  %v11240_v48 = vpop.f32.mrb[126].mxu1  ;;  %v4964_v41 = vadd.f32 %v4963_v63, %v13960_v23  ;;  %v5087_v36 = vmax.f32 %v4961_v21, 0.0 }
 0x26d   : > { %v11241_v49 = vpop.f32.mrb[127].mxu1  ;;  %v5090_v30 = vmax.f32 %v4972_v29, 0.0 }
 0x26e   : > { %v11242_v43 = vadd.f32 %v11241_v49, %v11240_v48  ;;  %v14055_v38 = vadd.f32 %v11239_v18, %v4759_v33  ;;  %v5088_v40 = vmax.f32 %v4964_v41, 0.0  ;;  %v12079_v49 = vld [vmem:[#allocation4 + $0x168] sm:$0xff]  }
 0x26f   : > { %v5120_v35 = vpack.c.bf16 %v5090_v30, %v5089_v34  ;;  %11501 = vmatprep.subr.bf16.mxu1 %v12079_v49 }
 0x270   : > { %v14058_v46 = vadd.f32 %v11242_v43, %v4762_v14  ;;  %v5119_v53 = vpack.c.bf16 %v5088_v40, %v5087_v36  ;;  %v11761_v26 = vpop.f32.mrb[132].mxu0  ;;  %v6297_v40 = vrot.slane %v6295_v12, 4 }
 0x271   : > { %v5149_v44 = vshrl.u32 %v5120_v35, 16  ;;  %v4985_v8 = vadd.f32 %v11761_v26, %v13976_v11  ;;  %v4976_v31 = vpop.f32.mrb[133].mxu0  ;;  %v5152_v14 = vshll.u32 %v5120_v35, 16  ;;  %v12080_v11 = vld [vmem:[#allocation4 + $0x128] sm:$0xff]  }
 0x272   : > { %v5142_v22 = vshrl.u32 %v5119_v53, 16  ;;  %v4977_v33 = vadd.f32 %v4976_v31, %v13970_v62  ;;  %v11762_v23 = vpop.f32.mrb[134].mxu0  ;;  %v5145_v48 = vshll.u32 %v5119_v53, 16  ;;  %11502 = vmatpush3.bf16.msra.mxu1 %v12080_v11 }
 0x273   : > { %v5151_v24 = vrot.slane %v5149_v44, 7  ;;  %v4988_v7 = vadd.f32 %v11762_v23, %v13978_v39  ;;  %v4979_v2 = vpop.f32.mrb[135].mxu0  ;;  %v5093_v51 = vmax.f32 %v4985_v8, 0.0 }
 0x274   : > { %v5144_v18 = vrot.slane %v5142_v22, 7  ;;  %v4980_v15 = vadd.f32 %v4979_v2, %v13972_v19  ;;  %v5091_v43 = vmax.f32 %v4977_v33, 0.0 }
 0x275   : > { %v5154_v21 = vor.u32 %v5152_v14, %v5151_v24  ;;  %v5302_v62 = vsel %vm12468_vm8, %v5151_v24, 0  ;;  %v5094_v29 = vmax.f32 %v4988_v7, 0.0  ;;  %v6296_v14 = vsel %vm12474_vm9, %v10555_v58, %v6295_v12 }
 0x276   : > { %v10480_v63 = vcombine.low %v5302_v62, %v5302_v62  ;;  %v5147_v41 = vor.u32 %v5145_v48, %v5144_v18  ;;  %v5301_v39 = vsel %vm12468_vm8, %v5144_v18, 0  ;;  %v5092_v34 = vmax.f32 %v4980_v15, 0.0 }
 0x277   : > { %v5286_v30 = vsel %vm12468_vm8, 0, %v5154_v21  ;;  %v10477_v36 = vcombine.low %v5301_v39, %v5301_v39  ;;  %v5122_v19 = vpack.c.bf16 %v5094_v29, %v5093_v51  ;;  %v6299_v51 = vsel %vm12474_vm9, %v6297_v40, %v6298_v45  ;;  %v12068_v40 = vld [vmem:[#allocation4 + $0x180] sm:$0xff]  }
 0x278   : > { %v10478_v35 = vcombine.low %v5286_v30, %v5286_v30  ;;  %v10479_v28 = vcombine.high %v5286_v30, %v5286_v30  ;;  %5498 = vst [vmem:[#allocation2 + $0x20] sm:$0x1] %v10480_v63  ;;  %v5285_v50 = vsel %vm12468_vm8, 0, %v5147_v41  ;;  %v5121_v53 = vpack.c.bf16 %v5092_v34, %v5091_v43 }
 0x279   : > { %v11765_v26 = vpop.f32.mrb[136].mxu0  ;;  %v10475_v3 = vcombine.low %v5285_v50, %v5285_v50  ;;  %v10476_v44 = vcombine.high %v5285_v50, %v5285_v50  ;;  %5495 = vst [vmem:[#allocation2 + $0x14] sm:$0x1] %v10477_v36  ;;  %v5163_v8 = vshrl.u32 %v5122_v19, 16  ;;  %v5166_v2 = vshll.u32 %v5122_v19, 16 }
 0x27a   : > { %v4992_v31 = vpop.f32.mrb[137].mxu0  ;;  %5496 = vst [vmem:[#allocation2 + $0x18] sm:$0xf] %v10478_v35  ;;  %5497 = vst [vmem:[#allocation2 + $0x1c] sm:$0xf] %v10479_v28  ;;  %v5156_v22 = vshrl.u32 %v5121_v53, 16  ;;  %v5001_v33 = vadd.f32 %v11765_v26, %v13988_v16  ;;  %v10571_v39 = vcombine.low %v6296_v14, %v6299_v51 }
 0x27b   : > { %v4993_v23 = vadd.f32 %v4992_v31, %v13982_v5  ;;  %v11766_v24 = vpop.f32.mrb[138].mxu0  ;;  %5493 = vst [vmem:[#allocation2 + $0xc] sm:$0xf] %v10475_v3  ;;  %5494 = vst [vmem:[#allocation2 + $0x10] sm:$0xf] %v10476_v44  ;;  %v5165_v7 = vrot.slane %v5163_v8, 7 }
 0x27c   : > { %v5004_v18 = vadd.f32 %v11766_v24, %v13990_v4  ;;  %v4995_v48 = vpop.f32.mrb[139].mxu0  ;;  %v5158_v15 = vrot.slane %v5156_v22, 7  ;;  %v5159_v49 = vshll.u32 %v5121_v53, 16  ;;  %v5097_v11 = vmax.f32 %v5001_v33, 0.0  ;;  %v12075_v3 = vld [vmem:[#allocation4 + $0x1c8] sm:$0xff]  }
 0x27d   : > { %v4996_v16 = vadd.f32 %v4995_v48, %v13984_v57  ;;  %v5168_v5 = vor.u32 %v5166_v2, %v5165_v7  ;;  %v5304_v21 = vsel %vm12468_vm8, %v5165_v7, 0  ;;  %v5095_v58 = vmax.f32 %v4993_v23, 0.0 }
 0x27e   : > { %v5098_v12 = vmax.f32 %v5004_v18, 0.0  ;;  %v10486_v62 = vcombine.low %v5304_v21, %v5304_v21  ;;  %v5161_v43 = vor.u32 %v5159_v49, %v5158_v15  ;;  %v5303_v4 = vsel %vm12468_vm8, %v5158_v15, 0 }
 0x27f   : > { %v5096_v29 = vmax.f32 %v4996_v16, 0.0  ;;  %v5288_v45 = vsel %vm12468_vm8, 0, %v5168_v5  ;;  %v10483_v63 = vcombine.low %v5303_v4, %v5303_v4 }
 0x280   : > { %v5124_v41 = vpack.c.bf16 %v5098_v12, %v5097_v11  ;;  %v10484_v34 = vcombine.low %v5288_v45, %v5288_v45  ;;  %v10485_v57 = vcombine.high %v5288_v45, %v5288_v45  ;;  %5504 = vst [vmem:[#allocation2 + $0x38] sm:$0x1] %v10486_v62  ;;  %v5287_v30 = vsel %vm12468_vm8, 0, %v5161_v43  ;;  %v12076_v12 = vld [vmem:[#allocation4 + $0x188] sm:$0xff]  }
 0x281   : > { %v5123_v36 = vpack.c.bf16 %v5096_v29, %v5095_v58  ;;  %v10481_v35 = vcombine.low %v5287_v30, %v5287_v30  ;;  %v10482_v28 = vcombine.high %v5287_v30, %v5287_v30  ;;  %5501 = vst [vmem:[#allocation2 + $0x2c] sm:$0x1] %v10483_v63  ;;  %v12044_v15 = vld [vmem:[#allocation2 + $0x18] sm:$0xff]  }
 0x282   : > { %v11769_v19 = vpop.f32.mrb[140].mxu0  ;;  %v5177_v50 = vshrl.u32 %v5124_v41, 16  ;;  %v5180_v53 = vshll.u32 %v5124_v41, 16  ;;  %5502 = vst [vmem:[#allocation2 + $0x30] sm:$0xf] %v10484_v34  ;;  %v12043_v23 = vld [vmem:[#allocation2 + $0xc] sm:$0xff]  }
 0x283   : > { %v5008_v26 = vpop.f32.mrb[141].mxu0  ;;  %5503 = vst [vmem:[#allocation2 + $0x34] sm:$0xf] %v10485_v57  ;;  %v5170_v44 = vshrl.u32 %v5123_v36, 16  ;;  %v5173_v8 = vshll.u32 %v5123_v36, 16  ;;  %v5017_v31 = vadd.f32 %v11769_v19, %v14000_v37  ;;  %9293 = vmatprep.mubr.bf16.mxu0 %v12043_v23 }
 0x284   : > { %v5009_v22 = vadd.f32 %v5008_v26, %v13994_v32  ;;  %v11770_v33 = vpop.f32.mrb[142].mxu0  ;;  %5499 = vst [vmem:[#allocation2 + $0x24] sm:$0xf] %v10481_v35  ;;  %5500 = vst [vmem:[#allocation2 + $0x28] sm:$0xf] %v10482_v28  ;;  %v5179_v24 = vrot.slane %v5177_v50, 7  ;;  %9294 = vmatmul.mubr.bf16.vlgmr.msra.gmra.mrb[160].mxu0 %v10571_v39 }
 0x285   : > { %v5020_v14 = vadd.f32 %v11770_v33, %v14002_v0  ;;  %v5011_v7 = vpop.f32.mrb[143].mxu0  ;;  %v5172_v2 = vrot.slane %v5170_v44, 7  ;;  %v5101_v18 = vmax.f32 %v5017_v31, 0.0  ;;  %v5688_v49 = vld [vmem:[#allocation2 + $0xc] sm:$0xf]  ;;  %9301 = vmatprep.mubr.bf16.mxu0 %v12044_v15  ;;  %11604 = vmatpush3.bf16.msra.mxu0 %v12068_v40 }
 0x286   : > { %v5099_v48 = vmax.f32 %v5009_v22, 0.0  ;;  %v5012_v51 = vadd.f32 %v5011_v7, %v13996_v9  ;;  %v5182_v11 = vor.u32 %v5180_v53, %v5179_v24  ;;  %v5306_v32 = vsel %vm12468_vm8, %v5179_v24, 0  ;;  %v12083_v9 = vld [vmem:[#allocation4 + $0x1d0] sm:$0xff]   ;;  %11605 = vmatprep.subr.bf16.mxu0 %v12075_v3  ;;  %v14102_v57 = vld [vmem:[#allocation2 + $0x10] sm:$0xf] }
 0x287   : > { %v5102_v37 = vmax.f32 %v5020_v14, 0.0  ;;  %v5758_v16 = vshrl.u32 %v5688_v49, 16  ;;  %v10492_v5 = vcombine.low %v5306_v32, %v5306_v32  ;;  %v5175_v21 = vor.u32 %v5173_v8, %v5172_v2  ;;  %v12084_v44 = vld [vmem:[#allocation4 + $0x190] sm:$0xff]  }
 0x288   : > { %v5305_v0 = vsel %vm12468_vm8, %v5172_v2, 0  ;;  %v5100_v58 = vmax.f32 %v5012_v51, 0.0  ;;  %v5290_v62 = vsel %vm12468_vm8, 0, %v5182_v11  ;;  %v5761_v33 = vshll.u32 %v5688_v49, 16 }
 0x289   : > { %v10489_v43 = vcombine.low %v5305_v0, %v5305_v0  ;;  %v5126_v4 = vpack.c.bf16 %v5102_v37, %v5101_v18  ;;  %v14098_v29 = vrot.slane %v5758_v16, 4  ;;  %v10490_v45 = vcombine.low %v5290_v62, %v5290_v62  ;;  %5510 = vst [vmem:[#allocation2 + $0x50] sm:$0x1] %v10492_v5  ;;  %11606 = vmatpush3.bf16.msra.mxu0 %v12076_v12  ;;  %v5690_v16 = vld [vmem:[#allocation2 + $0x14] sm:$0x1]  ;;  %v12087_v5 = vld [vmem:[#allocation4 + $0x170] sm:$0xff]  }
 0x28a   : > { %v10491_v63 = vcombine.high %v5290_v62, %v5290_v62  ;;  %v5289_v41 = vsel %vm12468_vm8, 0, %v5175_v21  ;;  %v5125_v39 = vpack.c.bf16 %v5100_v58, %v5099_v48  ;;  %v11773_v34 = vpop.f32.mrb[144].mxu0  ;;  %v5767_v23 = vshll.u32 %v14102_v57, 16  ;;  %11607 = vmatprep.subr.bf16.mxu0 %v12083_v9  ;;  %v6200_v9 = vld [vmem:[#allocation2 + $0xc] sm:$0xe]  ;;  %11503 = vmatprep.subr.bf16.mxu1 %v12087_v5 }
 0x28b   : > { %v10487_v30 = vcombine.low %v5289_v41, %v5289_v41  ;;  %v10488_v36 = vcombine.high %v5289_v41, %v5289_v41  ;;  %5507 = vst [vmem:[#allocation2 + $0x44] sm:$0x1] %v10489_v43  ;;  %v5191_v19 = vshrl.u32 %v5126_v4, 16  ;;  %v5194_v40 = vshll.u32 %v5126_v4, 16  ;;  %v5024_v35 = vpop.f32.mrb[145].mxu0 }
 0x28c   : > { %5508 = vst [vmem:[#allocation2 + $0x48] sm:$0xf] %v10490_v45  ;;  %5509 = vst [vmem:[#allocation2 + $0x4c] sm:$0xf] %v10491_v63  ;;  %v5184_v28 = vshrl.u32 %v5125_v39, 16  ;;  %v5187_v50 = vshll.u32 %v5125_v39, 16  ;;  %v5033_v53 = vadd.f32 %v11773_v34, %v14016_v20  ;;  %v5025_v26 = vadd.f32 %v5024_v35, %v14006_v54 }
 0x28d   : > { %v11774_v3 = vpop.f32.mrb[146].mxu0  ;;  %5505 = vst [vmem:[#allocation2 + $0x3c] sm:$0xf] %v10487_v30  ;;  %5506 = vst [vmem:[#allocation2 + $0x40] sm:$0xf] %v10488_v36  ;;  %v5193_v8 = vrot.slane %v5191_v19, 7  ;;  %11608 = vmatpush3.bf16.msra.mxu0 %v12084_v44 }
 0x28e   : > { %v5036_v31 = vadd.f32 %v11774_v3, %v14018_v25  ;;  %v5027_v22 = vpop.f32.mrb[147].mxu0  ;;  %v5186_v24 = vrot.slane %v5184_v28, 7  ;;  %v5105_v14 = vmax.f32 %v5033_v53, 0.0  ;;  %v5103_v7 = vmax.f32 %v5025_v26, 0.0  ;;  %v6202_v62 = vld [vmem:[#allocation2 + $0x14] sm:$0x1] }
 0x28f   : > { %v5028_v20 = vadd.f32 %v5027_v22, %v14008_v55  ;;  %v5196_v2 = vor.u32 %v5194_v40, %v5193_v8  ;;  %v5308_v54 = vsel %vm12468_vm8, %v5193_v8, 0  ;;  %v5763_v48 = vrot.slane %v5761_v33, 5  ;;  %v6201_v39 = vld [vmem:[#allocation2 + $0x10] sm:$0xf] }
 0x290   : > { %v5106_v18 = vmax.f32 %v5036_v31, 0.0  ;;  %v10498_v51 = vcombine.low %v5308_v54, %v5308_v54  ;;  %v5189_v15 = vor.u32 %v5187_v50, %v5186_v24  ;;  %v5307_v25 = vsel %vm12468_vm8, %v5186_v24, 0  ;;  %v6217_v10 = vld [vmem:[#allocation2 + $0x50] sm:$0x1] }
 0x291   : > { %v5104_v49 = vmax.f32 %v5028_v20, 0.0  ;;  %v5292_v11 = vsel %vm12468_vm8, 0, %v5196_v2  ;;  %v10495_v32 = vcombine.low %v5307_v25, %v5307_v25  ;;  %v5764_v55 = vor.u32 %v5763_v48, %v14098_v29 }
 0x292   : > { %v5128_v37 = vpack.c.bf16 %v5106_v18, %v5105_v14  ;;  %v10496_v21 = vcombine.low %v5292_v11, %v5292_v11  ;;  %v10497_v0 = vcombine.high %v5292_v11, %v5292_v11  ;;  %5516 = vst [vmem:[#allocation2 + $0x68] sm:$0x1] %v10498_v51  ;;  %v5291_v58 = vsel %vm12468_vm8, 0, %v5189_v15  ;;  %v11777_v43 = vpop.f32.mrb[148].mxu0  ;;  %v5691_v14 = vld [vmem:[#allocation2 + $0x18] sm:$0xf] }
 0x293   : > { %v5127_v12 = vpack.c.bf16 %v5104_v49, %v5103_v7  ;;  %v10493_v4 = vcombine.low %v5291_v58, %v5291_v58  ;;  %v10494_v45 = vcombine.high %v5291_v58, %v5291_v58  ;;  %5513 = vst [vmem:[#allocation2 + $0x5c] sm:$0x1] %v10495_v32  ;;  %v14118_v34 = vpop.f32.mrb[149].mxu0  ;;  %v14120_v36 = vrot.slane %v5764_v55, 4  ;;  %v12091_v18 = vld [vmem:[#allocation4 + $0x1d8] sm:$0xff]  }
 0x294   : > { %v5205_v63 = vshrl.u32 %v5128_v37, 16  ;;  %v5208_v41 = vshll.u32 %v5128_v37, 16  ;;  %5514 = vst [vmem:[#allocation2 + $0x60] sm:$0xf] %v10496_v21  ;;  %5515 = vst [vmem:[#allocation2 + $0x64] sm:$0xf] %v10497_v0  ;;  %v5049_v37 = vadd.f32 %v11777_v43, %v14028_v6  ;;  %11609 = vmatprep.subr.bf16.mxu0 %v12091_v18 }
 0x295   : > { %v5198_v29 = vshrl.u32 %v5127_v12, 16  ;;  %v5201_v30 = vshll.u32 %v5127_v12, 16  ;;  %v14122_v19 = vrot.slane %v5767_v23, 5  ;;  %v14124_v40 = vpop.f32.mrb[150].mxu0  ;;  %5511 = vst [vmem:[#allocation2 + $0x54] sm:$0xf] %v10493_v4 }
 0x296   : > { %5512 = vst [vmem:[#allocation2 + $0x58] sm:$0xf] %v10494_v45  ;;  %v5207_v35 = vrot.slane %v5205_v63, 7  ;;  %v5771_v28 = vshrl.u32 %v14102_v57, 16  ;;  %v5777_v50 = vshll.u32 %v5690_v16, 16  ;;  %v10556_v53 = vrot.slane %v6200_v9, 9 }
 0x297   : > { %v14127_v26 = vpop.f32.mrb[151].mxu0  ;;  %v5200_v3 = vrot.slane %v5198_v29, 7  ;;  %v5770_v44 = vsel %vm12458_vm4, %v14120_v36, %v14122_v19  ;;  %v6302_v8 = vrot.slane %v6201_v39, 5  ;;  %v6305_v31 = vrot.slane %v6202_v62, 5  ;;  %v12088_v57 = vld [vmem:[#allocation4 + $0x130] sm:$0xff]  }
 0x298   : > { %v5210_v22 = vor.u32 %v5208_v41, %v5207_v35  ;;  %v5310_v33 = vsel %vm12468_vm8, %v5207_v35, 0  ;;  %v5773_v23 = vrot.slane %v5771_v28, 4  ;;  %v5779_v24 = vrot.slane %v5777_v50, 5  ;;  %11504 = vmatpush3.bf16.msra.mxu1 %v12088_v57  ;;  %v5692_v16 = vld [vmem:[#allocation2 + $0x1c] sm:$0xf]  ;;  %v12048_v9 = vld [vmem:[#allocation2 + $0x24] sm:$0xff]  }
 0x299   : > { %v10504_v7 = vcombine.low %v5310_v33, %v5310_v33  ;;  %v5203_v20 = vor.u32 %v5201_v30, %v5200_v3  ;;  %v5309_v2 = vsel %vm12468_vm8, %v5200_v3, 0  ;;  %v6303_v54 = vsel %vm12474_vm9, %v10556_v53, %v6302_v8  ;;  %v5693_v55 = vld [vmem:[#allocation2 + $0x20] sm:$0x1]  ;;  %v6203_v62 = vld [vmem:[#allocation2 + $0x18] sm:$0xe] }
 0x29a   : > { %v5294_v48 = vsel %vm12468_vm8, 0, %v5210_v22  ;;  %v10501_v51 = vcombine.low %v5309_v2, %v5309_v2  ;;  %v5774_v15 = vor.u32 %v5773_v23, %v14122_v19  ;;  %v6304_v25 = vrot.slane %v6302_v8, 4  ;;  %v11781_v5 = vpop.f32.mrb[152].mxu0  ;;  %v6204_v41 = vld [vmem:[#allocation2 + $0x1c] sm:$0xf]  ;;  %v12047_v22 = vld [vmem:[#allocation2 + $0xc] sm:$0xff]  }
 0x29b   : > { %v10502_v49 = vcombine.low %v5294_v48, %v5294_v48  ;;  %v10503_v11 = vcombine.high %v5294_v48, %v5294_v48  ;;  %5522 = vst [vmem:[#allocation2 + $0x80] sm:$0x1] %v10504_v7  ;;  %v5293_v32 = vsel %vm12468_vm8, 0, %v5203_v20  ;;  %v14147_v4 = vpop.f32.mrb[153].mxu0  ;;  %v5109_v63 = vmax.f32 %v5049_v37, 0.0 }
 0x29c   : > { %v10499_v21 = vcombine.low %v5293_v32, %v5293_v32  ;;  %v10500_v0 = vcombine.high %v5293_v32, %v5293_v32  ;;  %5519 = vst [vmem:[#allocation2 + $0x74] sm:$0x1] %v10501_v51  ;;  %v5775_v58 = vrot.slane %v5774_v15, 4  ;;  %v6306_v12 = vsel %vm12474_vm9, %v6304_v25, %v6305_v31  ;;  %v6205_v39 = vld [vmem:[#allocation2 + $0x20] sm:$0x1]  ;;  %v14149_v29 = vpop.f32.mrb[154].mxu0 }
 0x29d   : > { %5520 = vst [vmem:[#allocation2 + $0x78] sm:$0xf] %v10502_v49  ;;  %5521 = vst [vmem:[#allocation2 + $0x7c] sm:$0xf] %v10503_v11  ;;  %v10572_v45 = vcombine.low %v6303_v54, %v6306_v12  ;;  %v5782_v6 = vshrl.u32 %v5691_v14, 16  ;;  %v5785_v43 = vshll.u32 %v5691_v14, 16  ;;  %v5041_v31 = vadd.f32 %v14118_v34, %v14022_v13 }
 0x29e   : > { %5517 = vst [vmem:[#allocation2 + $0x6c] sm:$0xf] %v10499_v21  ;;  %5518 = vst [vmem:[#allocation2 + $0x70] sm:$0xf] %v10500_v0  ;;  %v5780_v30 = vsel %vm12458_vm4, %v5775_v58, %v5779_v24  ;;  %v5791_v36 = vshll.u32 %v5692_v16, 16  ;;  %v5795_v19 = vshrl.u32 %v5692_v16, 16  ;;  %v5052_v24 = vadd.f32 %v14124_v40, %v14030_v59 }
 0x29f   : > { %v5801_v35 = vshll.u32 %v5693_v55, 16  ;;  %v14153_v28 = vld [vmem:[#allocation2 + $0x24] sm:$0xf]  ;;  %v14155_v50 = vpop.f32.mrb[155].mxu0  ;;  %v10540_v53 = vcombine.low %v5770_v44, %v5780_v30  ;;  %9302 = vmatmul.mubr.bf16.gmra.mrb[164].mxu0 %v10572_v45  ;;  %v5784_v3 = vrot.slane %v5782_v6, 4  ;;  %v5787_v8 = vrot.slane %v5785_v43, 5 }
 0x2a0   : > { %9309 = vmatprep.mubr.bf16.mxu0 %v12048_v9  ;;  %v5793_v33 = vrot.slane %v5791_v36, 5  ;;  %v5797_v23 = vrot.slane %v5795_v19, 4  ;;  %v5107_v7 = vmax.f32 %v5041_v31, 0.0  ;;  %v5044_v44 = vadd.f32 %v14127_v26, %v14024_v27  ;;  %v12049_v12 = vld [vmem:[#allocation2 + $0x18] sm:$0xff]   ;;  %v12050_v9 = vld [vmem:[#allocation2 + $0x30] sm:$0xff]  }
 0x2a1   : > { %v5803_v14 = vrot.slane %v5801_v35, 5  ;;  %9140 = vmatprep.mubr.bf16.mxu1 %v10540_v53  ;;  %v5788_v57 = vor.u32 %v5787_v8, %v5784_v3  ;;  %v10557_v20 = vrot.slane %v6203_v62, 9  ;;  %v5110_v54 = vmax.f32 %v5052_v24, 0.0  ;;  %v5696_v62 = vld [vmem:[#allocation2 + $0x2c] sm:$0x1] }
 0x2a2   : > { %9141 = vmatmul.mubr.bf16.gmra.mrb[132].mxu1 %v12047_v22  ;;  %v5798_v2 = vor.u32 %v5797_v23, %v5793_v33  ;;  %v6309_v18 = vrot.slane %v6204_v41, 5  ;;  %v6312_v13 = vrot.slane %v6205_v39, 5  ;;  %v5108_v48 = vmax.f32 %v5044_v44, 0.0  ;;  %v14167_v59 = vpop.f32.mrb[156].mxu0  ;;  %v6207_v44 = vld [vmem:[#allocation2 + $0x28] sm:$0xf] }
 0x2a3   : > { %v5789_v34 = vrot.slane %v5788_v57, 4  ;;  %v14164_v51 = vadd.f32 %v11781_v5, %v14040_v60  ;;  %v5806_v15 = vshrl.u32 %v14153_v28, 16  ;;  %v5130_v25 = vpack.c.bf16 %v5110_v54, %v5109_v63  ;;  %v14171_v49 = vpop.f32.mrb[157].mxu0  ;;  %v5695_v60 = vld [vmem:[#allocation2 + $0x28] sm:$0xf] }
 0x2a4   : > { %v5799_v40 = vrot.slane %v5798_v2, 4  ;;  %v6310_v27 = vsel %vm12474_vm9, %v10557_v20, %v6309_v18  ;;  %v6311_v26 = vrot.slane %v6309_v18, 4  ;;  %v5129_v32 = vpack.c.bf16 %v5108_v48, %v5107_v7  ;;  %v14176_v55 = vpop.f32.mrb[158].mxu0  ;;  %v6206_v7 = vld [vmem:[#allocation2 + $0x24] sm:$0xe] }
 0x2a5   : > { %v5794_v11 = vsel %vm12458_vm4, %v5789_v34, %v5793_v33  ;;  %v5113_v37 = vmax.f32 %v14164_v51, 0.0  ;;  %v5808_v16 = vrot.slane %v5806_v15, 4  ;;  %v5219_v21 = vshrl.u32 %v5130_v25, 16  ;;  %v14182_v45 = vpop.f32.mrb[159].mxu0  ;;  %v6208_v20 = vld [vmem:[#allocation2 + $0x2c] sm:$0x1] }
 0x2a6   : > { %v5804_v5 = vsel %vm12458_vm4, %v5799_v40, %v5803_v14  ;;  %v5222_v0 = vshll.u32 %v5130_v25, 16  ;;  %v6313_v58 = vsel %vm12474_vm9, %v6311_v26, %v6312_v13  ;;  %v5212_v6 = vshrl.u32 %v5129_v32, 16  ;;  %v5697_v2 = vld [vmem:[#allocation2 + $0x30] sm:$0xf] }
 0x2a7   : > { %v10541_v63 = vcombine.low %v5794_v11, %v5804_v5  ;;  %v5215_v43 = vshll.u32 %v5129_v32, 16  ;;  %v10573_v41 = vcombine.low %v6310_v27, %v6313_v58  ;;  %v5221_v39 = vrot.slane %v5219_v21, 7 }
 0x2a8   : > { %v5809_v30 = vshll.u32 %v14153_v28, 16  ;;  %v5815_v36 = vshll.u32 %v5695_v60, 16  ;;  %v5819_v19 = vshrl.u32 %v5695_v60, 16  ;;  %v5214_v35 = vrot.slane %v5212_v6, 7 }
 0x2a9   : > { %9148 = vmatprep.mubr.bf16.mxu1 %v10541_v63  ;;  %9310 = vmatmul.mubr.bf16.gmra.mrb[168].mxu0 %v10573_v41  ;;  %v5825_v53 = vshll.u32 %v5696_v62, 16  ;;  %v5057_v3 = vadd.f32 %v14147_v4, %v14034_v47  ;;  %v5068_v8 = vadd.f32 %v14149_v29, %v14042_v52  ;;  %v5224_v31 = vor.u32 %v5222_v0, %v5221_v39  ;;  %v5699_v41 = vld [vmem:[#allocation2 + $0x38] sm:$0x1] }
 0x2aa   : > { %v5312_v22 = vsel %vm12468_vm8, %v5221_v39, 0  ;;  %9149 = vmatmul.mubr.bf16.gmra.mrb[136].mxu1 %v12049_v12  ;;  %9317 = vmatprep.mubr.bf16.mxu0 %v12050_v9  ;;  %v5811_v33 = vrot.slane %v5809_v30, 5  ;;  %v5817_v28 = vrot.slane %v5815_v36, 5  ;;  %v5217_v14 = vor.u32 %v5215_v43, %v5214_v35  ;;  %v12092_v36 = vld [vmem:[#allocation4 + $0x198] sm:$0xff]  }
 0x2ab   : > { %v10510_v23 = vcombine.low %v5312_v22, %v5312_v22  ;;  %v5311_v24 = vsel %vm12468_vm8, %v5214_v35, 0  ;;  %v5821_v57 = vrot.slane %v5819_v19, 4  ;;  %v5296_v47 = vsel %vm12468_vm8, 0, %v5224_v31  ;;  %11610 = vmatpush3.bf16.msra.mxu0 %v12092_v36 }
 0x2ac   : > { %v10507_v52 = vcombine.low %v5311_v24, %v5311_v24  ;;  %v5812_v4 = vor.u32 %v5811_v33, %v5808_v16  ;;  %v5827_v29 = vrot.slane %v5825_v53, 5  ;;  %v10508_v54 = vcombine.low %v5296_v47, %v5296_v47  ;;  %v12093_v53 = vld [vmem:[#allocation4 + $0x1e0] sm:$0xff]   ;;  %v12096_v33 = vld [vmem:[#allocation4 + $0x178] sm:$0xff]  }
 0x2ad   : > { %v10509_v18 = vcombine.high %v5296_v47, %v5296_v47  ;;  %5528 = vst [vmem:[#allocation2 + $0x98] sm:$0x1] %v10510_v23  ;;  %v5295_v13 = vsel %vm12468_vm8, 0, %v5217_v14  ;;  %v5822_v34 = vor.u32 %v5821_v57, %v5817_v28  ;;  %v5111_v25 = vmax.f32 %v5057_v3, 0.0  ;;  %11611 = vmatprep.subr.bf16.mxu0 %v12093_v53  ;;  %11505 = vmatprep.subr.bf16.mxu1 %v12096_v33 }
 0x2ae   : > { %v10505_v48 = vcombine.low %v5295_v13, %v5295_v13  ;;  %v10506_v15 = vcombine.high %v5295_v13, %v5295_v13  ;;  %5525 = vst [vmem:[#allocation2 + $0x8c] sm:$0x1] %v10507_v52  ;;  %v5813_v40 = vrot.slane %v5812_v4, 4  ;;  %5526 = vst [vmem:[#allocation2 + $0x90] sm:$0xf] %v10508_v54  ;;  %v5114_v26 = vmax.f32 %v5068_v8, 0.0 }
 0x2af   : > { %5527 = vst [vmem:[#allocation2 + $0x94] sm:$0xf] %v10509_v18  ;;  %v5823_v27 = vrot.slane %v5822_v34, 4  ;;  %v5060_v11 = vadd.f32 %v14155_v50, %v14036_v17  ;;  %v10558_v32 = vrot.slane %v6206_v7, 9  ;;  %v6316_v16 = vrot.slane %v6207_v44, 5  ;;  %v12053_v17 = vld [vmem:[#allocation2 + $0x24] sm:$0xff]  }
 0x2b0   : > { %5523 = vst [vmem:[#allocation2 + $0x84] sm:$0xf] %v10505_v48  ;;  %5524 = vst [vmem:[#allocation2 + $0x88] sm:$0xf] %v10506_v15  ;;  %v5818_v60 = vsel %vm12458_vm4, %v5813_v40, %v5817_v28  ;;  %v6319_v5 = vrot.slane %v6208_v20, 5  ;;  %v14203_v21 = vadd.f32 %v14167_v59, %v14055_v38  ;;  %v5132_v58 = vpack.c.bf16 %v5114_v26, %v5113_v37  ;;  %v12054_v28 = vld [vmem:[#allocation2 + $0x3c] sm:$0xff]  }
 0x2b1   : > { %v5828_v0 = vsel %vm12458_vm4, %v5823_v27, %v5827_v29  ;;  %v5112_v12 = vmax.f32 %v5060_v11, 0.0  ;;  %v5698_v50 = vld [vmem:[#allocation2 + $0x34] sm:$0xf]  ;;  %v5830_v9 = vshrl.u32 %v5697_v2, 16  ;;  %v6317_v63 = vsel %vm12474_vm9, %v10558_v32, %v6316_v16  ;;  %v6209_v54 = vld [vmem:[#allocation2 + $0x30] sm:$0xe] }
 0x2b2   : > { %v10542_v62 = vcombine.low %v5818_v60, %v5828_v0  ;;  %v6318_v6 = vrot.slane %v6316_v16, 4  ;;  %v5117_v43 = vmax.f32 %v14203_v21, 0.0  ;;  %v5233_v38 = vshrl.u32 %v5132_v58, 16  ;;  %v6210_v18 = vld [vmem:[#allocation2 + $0x34] sm:$0xf] }
 0x2b3   : > { %v5236_v59 = vshll.u32 %v5132_v58, 16  ;;  %v5131_v39 = vpack.c.bf16 %v5112_v12, %v5111_v25  ;;  %v5832_v30 = vrot.slane %v5830_v9, 4  ;;  %v5833_v37 = vshll.u32 %v5697_v2, 16  ;;  %v6211_v40 = vld [vmem:[#allocation2 + $0x38] sm:$0x1] }
 0x2b4   : > { %9156 = vmatprep.mubr.bf16.mxu1 %v10542_v62  ;;  %v6320_v51 = vsel %vm12474_vm9, %v6318_v6, %v6319_v5  ;;  %v5839_v19 = vshll.u32 %v5698_v50, 16  ;;  %v5843_v35 = vshrl.u32 %v5698_v50, 16  ;;  %v5235_v3 = vrot.slane %v5233_v38, 7  ;;  %v5700_v25 = vld [vmem:[#allocation2 + $0x3c] sm:$0xf] }
 0x2b5   : > { %v5226_v8 = vshrl.u32 %v5131_v39, 16  ;;  %v5229_v31 = vshll.u32 %v5131_v39, 16  ;;  %v10574_v22 = vcombine.low %v6317_v63, %v6320_v51  ;;  %9157 = vmatmul.mubr.bf16.gmra.mrb[140].mxu1 %v12053_v17  ;;  %v5835_v23 = vrot.slane %v5833_v37, 5  ;;  %v12055_v63 = vld [vmem:[#allocation2 + $0x30] sm:$0xff]   ;;  %v5702_v6 = vld [vmem:[#allocation2 + $0x44] sm:$0x1] }
 0x2b6   : > { %v5841_v14 = vrot.slane %v5839_v19, 5  ;;  %v5845_v24 = vrot.slane %v5843_v35, 4  ;;  %v5849_v57 = vshll.u32 %v5699_v41, 16  ;;  %v5238_v7 = vor.u32 %v5236_v59, %v5235_v3  ;;  %v12098_v59 = vld [vmem:[#allocation4 + $0x138] sm:$0xff]   ;;  %v6212_v37 = vld [vmem:[#allocation2 + $0x3c] sm:$0xe] }
 0x2b7   : > { %v5314_v44 = vsel %vm12468_vm8, %v5235_v3, 0  ;;  %v5228_v47 = vrot.slane %v5226_v8, 7  ;;  %9318 = vmatmul.mubr.bf16.gmra.mrb[172].mxu0 %v10574_v22  ;;  %v5073_v52 = vadd.f32 %v14171_v49, %v14046_v42  ;;  %v5836_v29 = vor.u32 %v5835_v23, %v5832_v30  ;;  %v6213_v19 = vld [vmem:[#allocation2 + $0x40] sm:$0xf]  ;;  %11506 = vmatpush3.bf16.msra.mxu1 %v12098_v59  ;;  %v5706_v59 = vld [vmem:[#allocation2 + $0x54] sm:$0xf] }
 0x2b8   : > { %v10516_v4 = vcombine.low %v5314_v44, %v5314_v44  ;;  %9325 = vmatprep.mubr.bf16.mxu0 %v12054_v28  ;;  %v5846_v20 = vor.u32 %v5845_v24, %v5841_v14  ;;  %v5851_v2 = vrot.slane %v5849_v57, 5  ;;  %v5298_v13 = vsel %vm12468_vm8, 0, %v5238_v7  ;;  %v12099_v35 = vld [vmem:[#allocation4 + $0x1e8] sm:$0xff]  }
 0x2b9   : > { %v5231_v34 = vor.u32 %v5229_v31, %v5228_v47  ;;  %v5313_v48 = vsel %vm12468_vm8, %v5228_v47, 0  ;;  %v5115_v15 = vmax.f32 %v5073_v52, 0.0  ;;  %v10514_v27 = vcombine.low %v5298_v13, %v5298_v13  ;;  %v12056_v52 = vld [vmem:[#allocation2 + $0x48] sm:$0xff]  }
 0x2ba   : > { %v10515_v42 = vcombine.high %v5298_v13, %v5298_v13  ;;  %5534 = vst [vmem:[#allocation2 + $0xb0] sm:$0x1] %v10516_v4  ;;  %v10513_v49 = vcombine.low %v5313_v48, %v5313_v48  ;;  %v5837_v26 = vrot.slane %v5836_v29, 4  ;;  %v5847_v32 = vrot.slane %v5846_v20, 4  ;;  %v6214_v20 = vld [vmem:[#allocation2 + $0x44] sm:$0x1] }
 0x2bb   : > { %v5297_v11 = vsel %vm12468_vm8, 0, %v5231_v34  ;;  %v5084_v60 = vadd.f32 %v14176_v55, %v14058_v46  ;;  %v5076_v16 = vadd.f32 %v14182_v45, %v14049_v56  ;;  %5532 = vst [vmem:[#allocation2 + $0xa8] sm:$0xf] %v10514_v27  ;;  %v10559_v12 = vrot.slane %v6209_v54, 9  ;;  %v5701_v46 = vld [vmem:[#allocation2 + $0x40] sm:$0xf] }
 0x2bc   : > { %5533 = vst [vmem:[#allocation2 + $0xac] sm:$0xf] %v10515_v42  ;;  %v10511_v5 = vcombine.low %v5297_v11, %v5297_v11  ;;  %v10512_v0 = vcombine.high %v5297_v11, %v5297_v11  ;;  %5531 = vst [vmem:[#allocation2 + $0xa4] sm:$0x1] %v10513_v49  ;;  %v5842_v58 = vsel %vm12458_vm4, %v5837_v26, %v5841_v14  ;;  %v6323_v62 = vrot.slane %v6210_v18, 5  ;;  %v12097_v55 = vld [vmem:[#allocation4 + $0x1a0] sm:$0xff]  }
 0x2bd   : > { %v5852_v17 = vsel %vm12458_vm4, %v5847_v32, %v5851_v2  ;;  %v5118_v50 = vmax.f32 %v5084_v60, 0.0  ;;  %v5116_v9 = vmax.f32 %v5076_v16, 0.0  ;;  %v6326_v45 = vrot.slane %v6211_v40, 5  ;;  %11612 = vmatpush3.bf16.msra.mxu0 %v12097_v55  ;;  %v5704_v40 = vld [vmem:[#allocation2 + $0x4c] sm:$0xf] }
 0x2be   : > { %5529 = vst [vmem:[#allocation2 + $0x9c] sm:$0xf] %v10511_v5  ;;  %5530 = vst [vmem:[#allocation2 + $0xa0] sm:$0xf] %v10512_v0  ;;  %v10543_v56 = vcombine.low %v5842_v58, %v5852_v17  ;;  %v5854_v41 = vshrl.u32 %v5700_v25, 16  ;;  %v5857_v38 = vshll.u32 %v5700_v25, 16  ;;  %v6324_v36 = vsel %vm12474_vm9, %v10559_v12, %v6323_v62  ;;  %11613 = vmatprep.subr.bf16.mxu0 %v12099_v35 }
 0x2bf   : > { %v5134_v39 = vpack.c.bf16 %v5118_v50, %v5117_v43  ;;  %v5133_v30 = vpack.c.bf16 %v5116_v9, %v5115_v15  ;;  %v6325_v51 = vrot.slane %v6323_v62, 4  ;;  %v5863_v8 = vshll.u32 %v5701_v46, 16  ;;  %v5703_v15 = vld [vmem:[#allocation2 + $0x48] sm:$0xf]  ;;  %v5705_v26 = vld [vmem:[#allocation2 + $0x50] sm:$0x1] }
 0x2c0   : > { %9164 = vmatprep.mubr.bf16.mxu1 %v10543_v56  ;;  %v5856_v53 = vrot.slane %v5854_v41, 4  ;;  %v5859_v3 = vrot.slane %v5857_v38, 5  ;;  %v5867_v31 = vshrl.u32 %v5701_v46, 16  ;;  %v5873_v47 = vshll.u32 %v5702_v6, 16  ;;  %v6215_v11 = vld [vmem:[#allocation2 + $0x48] sm:$0xe] }
 0x2c1   : > { %v5247_v22 = vshrl.u32 %v5134_v39, 16  ;;  %v5250_v33 = vshll.u32 %v5134_v39, 16  ;;  %v5240_v28 = vshrl.u32 %v5133_v30, 16  ;;  %v5243_v21 = vshll.u32 %v5133_v30, 16  ;;  %9165 = vmatmul.mubr.bf16.gmra.mrb[144].mxu1 %v12055_v63  ;;  %v6216_v50 = vld [vmem:[#allocation2 + $0x4c] sm:$0xf] }
 0x2c2   : > { %v6327_v43 = vsel %vm12474_vm9, %v6325_v51, %v6326_v45  ;;  %v5860_v23 = vor.u32 %v5859_v3, %v5856_v53  ;;  %v5865_v14 = vrot.slane %v5863_v8, 5  ;;  %v5869_v24 = vrot.slane %v5867_v31, 4  ;;  %v12059_v46 = vld [vmem:[#allocation2 + $0x3c] sm:$0xff]   ;;  %v12101_v39 = vld [vmem:[#allocation4 + $0x1f0] sm:$0xff]   ;;  %v5707_v35 = vld [vmem:[#allocation2 + $0x58] sm:$0xf] }
 0x2c3   : > { %v5249_v57 = vrot.slane %v5247_v22, 7  ;;  %v5242_v7 = vrot.slane %v5240_v28, 7  ;;  %v10575_v44 = vcombine.low %v6324_v36, %v6327_v43  ;;  %v10560_v2 = vrot.slane %v6212_v37, 9  ;;  %v12100_v56 = vld [vmem:[#allocation4 + $0x1a8] sm:$0xff]   ;;  %v12060_v36 = vld [vmem:[#allocation2 + $0x54] sm:$0xff]   ;;  %v12103_v53 = vld [vmem:[#allocation4 + $0x1b0] sm:$0xff]  }
 0x2c4   : > { %v5861_v4 = vrot.slane %v5860_v23, 4  ;;  %v5870_v29 = vor.u32 %v5869_v24, %v5865_v14  ;;  %v6330_v54 = vrot.slane %v6213_v19, 5  ;;  %v5875_v16 = vrot.slane %v5873_v47, 5  ;;  %11614 = vmatpush3.bf16.msra.mxu0 %v12100_v56  ;;  %v12104_v28 = vld [vmem:[#allocation4 + $0x1f8] sm:$0xff]   ;;  %v6223_v56 = vld [vmem:[#allocation2 + $0x68] sm:$0x1] }
 0x2c5   : > { %v5252_v18 = vor.u32 %v5250_v33, %v5249_v57  ;;  %v5316_v13 = vsel %vm12468_vm8, %v5249_v57, 0  ;;  %v5245_v34 = vor.u32 %v5243_v21, %v5242_v7  ;;  %v5315_v48 = vsel %vm12468_vm8, %v5242_v7, 0  ;;  %9326 = vmatmul.mubr.bf16.gmra.mrb[176].mxu0 %v10575_v44  ;;  %v5708_v33 = vld [vmem:[#allocation2 + $0x5c] sm:$0x1]  ;;  %11615 = vmatprep.subr.bf16.mxu0 %v12101_v39  ;;  %v6218_v24 = vld [vmem:[#allocation2 + $0x54] sm:$0xe] }
 0x2c6   : > { %v10522_v25 = vcombine.low %v5316_v13, %v5316_v13  ;;  %v10519_v27 = vcombine.low %v5315_v48, %v5315_v48  ;;  %9333 = vmatprep.mubr.bf16.mxu0 %v12056_v52  ;;  %v5866_v42 = vsel %vm12458_vm4, %v5861_v4, %v5865_v14  ;;  %v5871_v49 = vrot.slane %v5870_v29, 4  ;;  %v6219_v52 = vld [vmem:[#allocation2 + $0x58] sm:$0xf]  ;;  %v12105_v13 = vld [vmem:[#allocation4 + $0x1b8] sm:$0xff]   ;;  %v5712_v39 = vld [vmem:[#allocation2 + $0x6c] sm:$0xf] }
 0x2c7   : > { %v5300_v32 = vsel %vm12468_vm8, 0, %v5252_v18  ;;  %v5299_v60 = vsel %vm12468_vm8, 0, %v5245_v34  ;;  %v6331_v5 = vsel %vm12474_vm9, %v10560_v2, %v6330_v54  ;;  %v6332_v62 = vrot.slane %v6330_v54, 4  ;;  %v6220_v54 = vld [vmem:[#allocation2 + $0x5c] sm:$0x1] }
 0x2c8   : > { %v10520_v0 = vcombine.low %v5300_v32, %v5300_v32  ;;  %v10521_v58 = vcombine.high %v5300_v32, %v5300_v32  ;;  %5540 = vst [vmem:[#allocation2 + $0xc8] sm:$0x1] %v10522_v25  ;;  %v10517_v12 = vcombine.low %v5299_v60, %v5299_v60  ;;  %v10518_v17 = vcombine.high %v5299_v60, %v5299_v60  ;;  %v5709_v18 = vld [vmem:[#allocation2 + $0x60] sm:$0xf] }
 0x2c9   : > { %5537 = vst [vmem:[#allocation2 + $0xbc] sm:$0x1] %v10519_v27  ;;  %v5876_v9 = vsel %vm12458_vm4, %v5871_v49, %v5875_v16  ;;  %v6333_v63 = vrot.slane %v6214_v20, 5  ;;  %v5878_v55 = vshrl.u32 %v5703_v15, 16  ;;  %v5881_v6 = vshll.u32 %v5703_v15, 16  ;;  %11616 = vmatpush3.bf16.msra.mxu0 %v12103_v53 }
 0x2ca   : > { %5538 = vst [vmem:[#allocation2 + $0xc0] sm:$0xf] %v10520_v0  ;;  %5539 = vst [vmem:[#allocation2 + $0xc4] sm:$0xf] %v10521_v58  ;;  %v10544_v45 = vcombine.low %v5866_v42, %v5876_v9  ;;  %v5887_v41 = vshll.u32 %v5704_v40, 16  ;;  %v5891_v38 = vshrl.u32 %v5704_v40, 16  ;;  %11617 = vmatprep.subr.bf16.mxu0 %v12104_v28 }
 0x2cb   : > { %5535 = vst [vmem:[#allocation2 + $0xb4] sm:$0xf] %v10517_v12  ;;  %5536 = vst [vmem:[#allocation2 + $0xb8] sm:$0xf] %v10518_v17  ;;  %v6334_v30 = vsel %vm12474_vm9, %v6332_v62, %v6333_v63  ;;  %v5880_v51 = vrot.slane %v5878_v55, 4  ;;  %v5897_v37 = vshll.u32 %v5705_v26, 16 }
 0x2cc   : > { %v10561_v19 = vrot.slane %v6215_v11, 9  ;;  %9172 = vmatprep.mubr.bf16.mxu1 %v10544_v45  ;;  %v10576_v3 = vcombine.low %v6331_v5, %v6334_v30  ;;  %v5883_v8 = vrot.slane %v5881_v6, 5  ;;  %v5889_v31 = vrot.slane %v5887_v41, 5  ;;  %v5710_v16 = vld [vmem:[#allocation2 + $0x64] sm:$0xf]  ;;  %v12061_v0 = vld [vmem:[#allocation2 + $0x48] sm:$0xff]  }
 0x2cd   : > { %v5893_v22 = vrot.slane %v5891_v38, 4  ;;  %9173 = vmatmul.mubr.bf16.gmra.mrb[148].mxu1 %v12059_v46  ;;  %v5899_v21 = vrot.slane %v5897_v37, 5  ;;  %v6337_v43 = vrot.slane %v6216_v50, 5  ;;  %v6340_v23 = vrot.slane %v6217_v10, 5  ;;  %v5711_v50 = vld [vmem:[#allocation2 + $0x68] sm:$0x1]  ;;  %11618 = vmatpush3.bf16.msra.mxu0 %v12105_v13 }
 0x2ce   : > { %v5902_v14 = vshrl.u32 %v5706_v59, 16  ;;  %9334 = vmatmul.mubr.bf16.gmra.mrb[180].mxu0 %v10576_v3  ;;  %v5884_v57 = vor.u32 %v5883_v8, %v5880_v51  ;;  %v5905_v44 = vshll.u32 %v5706_v59, 16  ;;  %v5911_v47 = vshll.u32 %v5707_v35, 16  ;;  %v6221_v55 = vld [vmem:[#allocation2 + $0x60] sm:$0xe] }
 0x2cf   : > { %v5894_v7 = vor.u32 %v5893_v22, %v5889_v31  ;;  %9341 = vmatprep.mubr.bf16.mxu0 %v12060_v36  ;;  %v6338_v4 = vsel %vm12474_vm9, %v10561_v19, %v6337_v43  ;;  %v6339_v29 = vrot.slane %v6337_v43, 4  ;;  %v5915_v2 = vshrl.u32 %v5707_v35, 16  ;;  %v6222_v10 = vld [vmem:[#allocation2 + $0x64] sm:$0xf]  ;;  %v5713_v28 = vld [vmem:[#allocation2 + $0x70] sm:$0xf] }
 0x2d0   : > { %v5904_v20 = vrot.slane %v5902_v14, 4  ;;  %v5885_v34 = vrot.slane %v5884_v57, 4  ;;  %v5907_v15 = vrot.slane %v5905_v44, 5  ;;  %v5913_v40 = vrot.slane %v5911_v47, 5  ;;  %v12062_v45 = vld [vmem:[#allocation2 + $0x60] sm:$0xff]  }
 0x2d1   : > { %v5895_v48 = vrot.slane %v5894_v7, 4  ;;  %v6341_v25 = vsel %vm12474_vm9, %v6339_v29, %v6340_v23  ;;  %v5917_v27 = vrot.slane %v5915_v2, 4  ;;  %v5921_v42 = vshll.u32 %v5708_v33, 16  ;;  %v6224_v57 = vld [vmem:[#allocation2 + $0x6c] sm:$0xe]  ;;  %v14270_v29 = vld [vmem:[#allocation4 + $0x200] sm:$0xff]  }
 0x2d2   : > { %v10562_v49 = vrot.slane %v6218_v24, 9  ;;  %v5890_v26 = vsel %vm12458_vm4, %v5885_v34, %v5889_v31  ;;  %v10577_v32 = vcombine.low %v6338_v4, %v6341_v25  ;;  %v5908_v60 = vor.u32 %v5907_v15, %v5904_v20  ;;  %v6225_v4 = vld [vmem:[#allocation2 + $0x70] sm:$0xf]  ;;  %v6226_v13 = vld [vmem:[#allocation2 + $0x74] sm:$0x1]  ;;  %11787 = vmatprep.subr.bf16.mxu1 %v14270_v29 }
 0x2d3   : > { %v5900_v11 = vsel %vm12458_vm4, %v5895_v48, %v5899_v21  ;;  %v5918_v58 = vor.u32 %v5917_v27, %v5913_v40  ;;  %v5923_v12 = vrot.slane %v5921_v42, 5  ;;  %v6344_v17 = vrot.slane %v6219_v52, 5  ;;  %v5714_v21 = vld [vmem:[#allocation2 + $0x74] sm:$0x1]  ;;  %v5715_v34 = vld [vmem:[#allocation2 + $0x78] sm:$0xf] }
 0x2d4   : > { %v10545_v5 = vcombine.low %v5890_v26, %v5900_v11  ;;  %v5909_v9 = vrot.slane %v5908_v60, 4  ;;  %v6347_v62 = vrot.slane %v6220_v54, 5  ;;  %v5926_v63 = vshrl.u32 %v5709_v18, 16  ;;  %v12065_v48 = vld [vmem:[#allocation2 + $0x54] sm:$0xff]   ;;  %v5716_v42 = vld [vmem:[#allocation2 + $0x7c] sm:$0xf] }
 0x2d5   : > { %v5929_v46 = vshll.u32 %v5709_v18, 16  ;;  %v5919_v6 = vrot.slane %v5918_v58, 4  ;;  %v6345_v41 = vsel %vm12474_vm9, %v10562_v49, %v6344_v17  ;;  %v6346_v38 = vrot.slane %v6344_v17, 4  ;;  %v12066_v49 = vld [vmem:[#allocation2 + $0x6c] sm:$0xff]  }
 0x2d6   : > { %9180 = vmatprep.mubr.bf16.mxu1 %v10545_v5  ;;  %v5935_v59 = vshll.u32 %v5710_v16, 16  ;;  %9342 = vmatmul.mubr.bf16.gmra.mrb[184].mxu0 %v10577_v32  ;;  %v5914_v30 = vsel %vm12458_vm4, %v5909_v9, %v5913_v40  ;;  %v5928_v36 = vrot.slane %v5926_v63, 4  ;;  %v5939_v37 = vshrl.u32 %v5710_v16, 16 }
 0x2d7   : > { %9181 = vmatmul.mubr.bf16.gmra.mrb[152].mxu1 %v12061_v0  ;;  %v5931_v51 = vrot.slane %v5929_v46, 5  ;;  %9349 = vmatprep.mubr.bf16.mxu0 %v12062_v45  ;;  %v5924_v19 = vsel %vm12458_vm4, %v5919_v6, %v5923_v12  ;;  %v6348_v35 = vsel %vm12474_vm9, %v6346_v38, %v6347_v62  ;;  %v5945_v3 = vshll.u32 %v5711_v50, 16  ;;  %v5717_v62 = vld [vmem:[#allocation2 + $0x80] sm:$0x1] }
 0x2d8   : > { %v5937_v53 = vrot.slane %v5935_v59, 5  ;;  %v10546_v8 = vcombine.low %v5914_v30, %v5924_v19  ;;  %v10578_v31 = vcombine.low %v6345_v41, %v6348_v35  ;;  %v5941_v33 = vrot.slane %v5939_v37, 4  ;;  %v6228_v59 = vld [vmem:[#allocation2 + $0x7c] sm:$0xf]  ;;  %v6229_v19 = vld [vmem:[#allocation2 + $0x80] sm:$0x1] }
 0x2d9   : > { %v5932_v22 = vor.u32 %v5931_v51, %v5928_v36  ;;  %v5947_v43 = vrot.slane %v5945_v3, 5  ;;  %v10563_v23 = vrot.slane %v6221_v55, 9  ;;  %v6351_v14 = vrot.slane %v6222_v10, 5 }
 0x2da   : > { %v6354_v24 = vrot.slane %v6223_v56, 5  ;;  %9188 = vmatprep.mubr.bf16.mxu1 %v10546_v8  ;;  %v5942_v44 = vor.u32 %v5941_v33, %v5937_v53  ;;  %v5950_v47 = vshrl.u32 %v5712_v39, 16  ;;  %v5953_v52 = vshll.u32 %v5712_v39, 16  ;;  %v6227_v56 = vld [vmem:[#allocation2 + $0x78] sm:$0xe]  ;;  %v12069_v39 = vld [vmem:[#allocation2 + $0x60] sm:$0xff]  }
 0x2db   : > { %v5933_v7 = vrot.slane %v5932_v22, 4  ;;  %v14274_v20 = vsel %vm12474_vm9, %v10563_v23, %v6351_v14  ;;  %v6353_v2 = vrot.slane %v6351_v14, 4  ;;  %v5959_v54 = vshll.u32 %v5713_v28, 16  ;;  %v5719_v22 = vld [vmem:[#allocation2 + $0x88] sm:$0xf]  ;;  %v12070_v33 = vld [vmem:[#allocation2 + $0x78] sm:$0xff]  }
 0x2dc   : > { %v5963_v18 = vshrl.u32 %v5713_v28, 16  ;;  %v5943_v40 = vrot.slane %v5942_v44, 4  ;;  %v5952_v25 = vrot.slane %v5950_v47, 4  ;;  %v5955_v27 = vrot.slane %v5953_v52, 5  ;;  %v5720_v14 = vld [vmem:[#allocation2 + $0x8c] sm:$0x1] }
 0x2dd   : > { %v5938_v15 = vsel %vm12458_vm4, %v5933_v7, %v5937_v53  ;;  %v6355_v26 = vsel %vm12474_vm9, %v6353_v2, %v6354_v24  ;;  %v5961_v11 = vrot.slane %v5959_v54, 5  ;;  %v5969_v60 = vshll.u32 %v5714_v21, 16  ;;  %v6230_v47 = vld [vmem:[#allocation2 + $0x84] sm:$0xe] }
 0x2de   : > { %v5965_v32 = vrot.slane %v5963_v18, 4  ;;  %9350 = vmatmul.mubr.bf16.gmra.mrb[188].mxu0 %v10578_v31  ;;  %v5948_v16 = vsel %vm12458_vm4, %v5943_v40, %v5947_v43  ;;  %v10579_v5 = vcombine.low %v14274_v20, %v6355_v26  ;;  %v5956_v0 = vor.u32 %v5955_v27, %v5952_v25  ;;  %v5718_v31 = vld [vmem:[#allocation2 + $0x84] sm:$0xf] }
 0x2df   : > { %9189 = vmatmul.mubr.bf16.gmra.mrb[156].mxu1 %v12065_v48  ;;  %v10564_v58 = vrot.slane %v6224_v57, 9  ;;  %9357 = vmatprep.mubr.bf16.mxu0 %v12066_v49  ;;  %v10547_v12 = vcombine.low %v5938_v15, %v5948_v16  ;;  %v5971_v50 = vrot.slane %v5969_v60, 5  ;;  %v6358_v9 = vrot.slane %v6225_v4, 5  ;;  %v6231_v48 = vld [vmem:[#allocation2 + $0x88] sm:$0xf]  ;;  %v12073_v16 = vld [vmem:[#allocation2 + $0x6c] sm:$0xff]  }
 0x2e0   : > { %v5966_v17 = vor.u32 %v5965_v32, %v5961_v11  ;;  %v5957_v63 = vrot.slane %v5956_v0, 4  ;;  %v6361_v46 = vrot.slane %v6226_v13, 5  ;;  %v5974_v55 = vshrl.u32 %v5715_v34, 16  ;;  %v5721_v60 = vld [vmem:[#allocation2 + $0x90] sm:$0xf] }
 0x2e1   : > { %v5977_v10 = vshll.u32 %v5715_v34, 16  ;;  %9196 = vmatprep.mubr.bf16.mxu1 %v10547_v12  ;;  %v14286_v6 = vsel %vm12474_vm9, %v10564_v58, %v6358_v9  ;;  %v6360_v41 = vrot.slane %v6358_v9, 4  ;;  %v5983_v38 = vshll.u32 %v5716_v42, 16 }
 0x2e2   : > { %v5967_v45 = vrot.slane %v5966_v17, 4  ;;  %v5962_v30 = vsel %vm12458_vm4, %v5957_v63, %v5961_v11  ;;  %v5976_v36 = vrot.slane %v5974_v55, 4  ;;  %v5987_v37 = vshrl.u32 %v5716_v42, 16  ;;  %v6232_v42 = vld [vmem:[#allocation2 + $0x8c] sm:$0x1] }
 0x2e3   : > { %v5979_v51 = vrot.slane %v5977_v10, 5  ;;  %v6362_v53 = vsel %vm12474_vm9, %v6360_v41, %v6361_v46  ;;  %v5985_v3 = vrot.slane %v5983_v38, 5  ;;  %v5993_v8 = vshll.u32 %v5717_v62, 16  ;;  %v5722_v17 = vld [vmem:[#allocation2 + $0x94] sm:$0xf]  ;;  %v12074_v41 = vld [vmem:[#allocation2 + $0x84] sm:$0xff]  }
 0x2e4   : > { %v5972_v35 = vsel %vm12458_vm4, %v5967_v45, %v5971_v50  ;;  %v10580_v21 = vcombine.low %v14286_v6, %v6362_v53  ;;  %v5989_v23 = vrot.slane %v5987_v37, 4  ;;  %v10565_v57 = vrot.slane %v6227_v56, 9  ;;  %v5723_v46 = vld [vmem:[#allocation2 + $0x98] sm:$0x1]  ;;  %v6233_v6 = vld [vmem:[#allocation2 + $0x90] sm:$0xe] }
 0x2e5   : > { %v10548_v28 = vcombine.low %v5962_v30, %v5972_v35  ;;  %v5980_v43 = vor.u32 %v5979_v51, %v5976_v36  ;;  %v5995_v24 = vrot.slane %v5993_v8, 5  ;;  %v6365_v7 = vrot.slane %v6228_v59, 5  ;;  %v6234_v36 = vld [vmem:[#allocation2 + $0x94] sm:$0xf]  ;;  %v6235_v53 = vld [vmem:[#allocation2 + $0x98] sm:$0x1] }
 0x2e6   : > { %v6368_v44 = vrot.slane %v6229_v19, 5  ;;  %9358 = vmatmul.mubr.bf16.gmra.mrb[192].mxu0 %v10579_v5  ;;  %v5990_v4 = vor.u32 %v5989_v23, %v5985_v3  ;;  %v5998_v20 = vshrl.u32 %v5718_v31, 16  ;;  %v6001_v2 = vshll.u32 %v5718_v31, 16 }
 0x2e7   : > { %9197 = vmatmul.mubr.bf16.gmra.mrb[160].mxu1 %v12069_v39  ;;  %v5981_v52 = vrot.slane %v5980_v43, 4  ;;  %9365 = vmatprep.mubr.bf16.mxu0 %v12070_v33  ;;  %v14297_v54 = vsel %vm12474_vm9, %v10565_v57, %v6365_v7  ;;  %v6367_v18 = vrot.slane %v6365_v7, 4  ;;  %v6007_v13 = vshll.u32 %v5719_v22, 16  ;;  %v5724_v33 = vld [vmem:[#allocation2 + $0x9c] sm:$0xf] }
 0x2e8   : > { %9204 = vmatprep.mubr.bf16.mxu1 %v10548_v28  ;;  %v6011_v34 = vshrl.u32 %v5719_v22, 16  ;;  %v5991_v40 = vrot.slane %v5990_v4, 4  ;;  %v6000_v25 = vrot.slane %v5998_v20, 4  ;;  %v6003_v27 = vrot.slane %v6001_v2, 5 }
 0x2e9   : > { %v5986_v15 = vsel %vm12458_vm4, %v5981_v52, %v5985_v3  ;;  %v14303_v49 = vsel %vm12474_vm9, %v6367_v18, %v6368_v44  ;;  %v6009_v26 = vrot.slane %v6007_v13, 5  ;;  %v6017_v32 = vshll.u32 %v5720_v14, 16  ;;  %v5725_v14 = vld [vmem:[#allocation2 + $0xa0] sm:$0xf]  ;;  %v6236_v52 = vld [vmem:[#allocation2 + $0x9c] sm:$0xe] }
 0x2ea   : > { %v6013_v11 = vrot.slane %v6011_v34, 4  ;;  %v5996_v5 = vsel %vm12458_vm4, %v5991_v40, %v5995_v24  ;;  %v10581_v0 = vcombine.low %v14297_v54, %v14303_v49  ;;  %v6004_v58 = vor.u32 %v6003_v27, %v6000_v25  ;;  %v5726_v24 = vld [vmem:[#allocation2 + $0xa4] sm:$0x1]  ;;  %v6237_v40 = vld [vmem:[#allocation2 + $0xa0] sm:$0xf]  ;;  %v12077_v25 = vld [vmem:[#allocation2 + $0x78] sm:$0xff]  }
 0x2eb   : > { %v10566_v12 = vrot.slane %v6230_v47, 9  ;;  %v10549_v50 = vcombine.low %v5986_v15, %v5996_v5  ;;  %v6019_v62 = vrot.slane %v6017_v32, 5  ;;  %v6372_v63 = vrot.slane %v6231_v48, 5  ;;  %v6238_v32 = vld [vmem:[#allocation2 + $0xa4] sm:$0x1] }
 0x2ec   : > { %v6014_v9 = vor.u32 %v6013_v11, %v6009_v26  ;;  %v6005_v55 = vrot.slane %v6004_v58, 4  ;;  %v6375_v10 = vrot.slane %v6232_v42, 5  ;;  %v6022_v56 = vshrl.u32 %v5721_v60, 16 }
 0x2ed   : > { %v6025_v45 = vshll.u32 %v5721_v60, 16  ;;  %v14311_v59 = vsel %vm12474_vm9, %v10566_v12, %v6372_v63  ;;  %v6374_v39 = vrot.slane %v6372_v63, 4  ;;  %v6031_v30 = vshll.u32 %v5722_v17, 16  ;;  %v12078_v60 = vld [vmem:[#allocation2 + $0x90] sm:$0xff]  }
 0x2ee   : > { %v6015_v38 = vrot.slane %v6014_v9, 4  ;;  %9366 = vmatmul.mubr.bf16.gmra.mrb[196].mxu0 %v10580_v21  ;;  %v6010_v51 = vsel %vm12458_vm4, %v6005_v55, %v6009_v26  ;;  %v6024_v37 = vrot.slane %v6022_v56, 4  ;;  %v6035_v35 = vshrl.u32 %v5722_v17, 16  ;;  %v5727_v17 = vld [vmem:[#allocation2 + $0xa8] sm:$0xf] }
 0x2ef   : > { %9205 = vmatmul.mubr.bf16.gmra.mrb[164].mxu1 %v12073_v16  ;;  %v6027_v19 = vrot.slane %v6025_v45, 5  ;;  %9373 = vmatprep.mubr.bf16.mxu0 %v12074_v41  ;;  %v14319_v8 = vsel %vm12474_vm9, %v6374_v39, %v6375_v10  ;;  %v6033_v31 = vrot.slane %v6031_v30, 5  ;;  %v6041_v22 = vshll.u32 %v5723_v46, 16  ;;  %v5728_v46 = vld [vmem:[#allocation2 + $0xac] sm:$0xf] }
 0x2f0   : > { %9212 = vmatprep.mubr.bf16.mxu1 %v10549_v50  ;;  %v6020_v3 = vsel %vm12458_vm4, %v6015_v38, %v6019_v62  ;;  %v10582_v21 = vcombine.low %v14311_v59, %v14319_v8  ;;  %v6037_v23 = vrot.slane %v6035_v35, 4  ;;  %v10567_v7 = vrot.slane %v6233_v6, 9  ;;  %v5729_v6 = vld [vmem:[#allocation2 + $0xb0] sm:$0x1]  ;;  %v6239_v38 = vld [vmem:[#allocation2 + $0xa8] sm:$0xe] }
 0x2f1   : > { %v10550_v28 = vcombine.low %v6010_v51, %v6020_v3  ;;  %v6028_v43 = vor.u32 %v6027_v19, %v6024_v37  ;;  %v6043_v57 = vrot.slane %v6041_v22, 5  ;;  %v6379_v44 = vrot.slane %v6234_v36, 5  ;;  %v6240_v39 = vld [vmem:[#allocation2 + $0xac] sm:$0xf]  ;;  %v6241_v19 = vld [vmem:[#allocation2 + $0xb0] sm:$0x1] }
 0x2f2   : > { %v6382_v47 = vrot.slane %v6235_v53, 5  ;;  %v6038_v20 = vor.u32 %v6037_v23, %v6033_v31  ;;  %v6046_v2 = vshrl.u32 %v5724_v33, 16  ;;  %v6049_v18 = vshll.u32 %v5724_v33, 16  ;;  %v5730_v23 = vld [vmem:[#allocation2 + $0xb4] sm:$0xf] }
 0x2f3   : > { %v6029_v4 = vrot.slane %v6028_v43, 4  ;;  %v14325_v13 = vsel %vm12474_vm9, %v10567_v7, %v6379_v44  ;;  %v6381_v34 = vrot.slane %v6379_v44, 4  ;;  %v6055_v48 = vshll.u32 %v5725_v14, 16 }
 0x2f4   : > { %v6059_v15 = vshrl.u32 %v5725_v14, 16  ;;  %v6039_v42 = vrot.slane %v6038_v20, 4  ;;  %v6048_v26 = vrot.slane %v6046_v2, 4  ;;  %v6051_v11 = vrot.slane %v6049_v18, 5  ;;  %v12081_v14 = vld [vmem:[#allocation2 + $0x84] sm:$0xff]  }
 0x2f5   : > { %v6034_v27 = vsel %vm12458_vm4, %v6029_v4, %v6033_v31  ;;  %v14331_v16 = vsel %vm12474_vm9, %v6381_v34, %v6382_v47  ;;  %v6057_v5 = vrot.slane %v6055_v48, 5  ;;  %v6065_v12 = vshll.u32 %v5726_v24, 16  ;;  %v12082_v24 = vld [vmem:[#allocation2 + $0x9c] sm:$0xff]  }
 0x2f6   : > { %v6061_v58 = vrot.slane %v6059_v15, 4  ;;  %9374 = vmatmul.mubr.bf16.gmra.mrb[200].mxu0 %v10581_v0  ;;  %v6044_v50 = vsel %vm12458_vm4, %v6039_v42, %v6043_v57  ;;  %v10583_v9 = vcombine.low %v14325_v13, %v14331_v16  ;;  %v6052_v62 = vor.u32 %v6051_v11, %v6048_v26  ;;  %v5732_v34 = vld [vmem:[#allocation2 + $0xbc] sm:$0x1] }
 0x2f7   : > { %9213 = vmatmul.mubr.bf16.gmra.mrb[168].mxu1 %v12077_v25  ;;  %v10568_v63 = vrot.slane %v6236_v52, 9  ;;  %9381 = vmatprep.mubr.bf16.mxu0 %v12078_v60  ;;  %v10551_v55 = vcombine.low %v6034_v27, %v6044_v50  ;;  %v6067_v56 = vrot.slane %v6065_v12, 5  ;;  %v6386_v45 = vrot.slane %v6237_v40, 5  ;;  %v5731_v52 = vld [vmem:[#allocation2 + $0xb8] sm:$0xf] }
 0x2f8   : > { %9220 = vmatprep.mubr.bf16.mxu1 %v10550_v28  ;;  %v6062_v10 = vor.u32 %v6061_v58, %v6057_v5  ;;  %v6053_v41 = vrot.slane %v6052_v62, 4  ;;  %v6389_v54 = vrot.slane %v6238_v32, 5  ;;  %v6070_v49 = vshrl.u32 %v5727_v17, 16  ;;  %v6242_v27 = vld [vmem:[#allocation2 + $0xb4] sm:$0xe] }
 0x2f9   : > { %v6073_v0 = vshll.u32 %v5727_v17, 16  ;;  %v14342_v36 = vsel %vm12474_vm9, %v10568_v63, %v6386_v45  ;;  %v6388_v51 = vrot.slane %v6386_v45, 4  ;;  %v6079_v37 = vshll.u32 %v5728_v46, 16  ;;  %v6243_v60 = vld [vmem:[#allocation2 + $0xb8] sm:$0xf] }
 0x2fa   : > { %v6063_v30 = vrot.slane %v6062_v10, 4  ;;  %v6058_v35 = vsel %vm12458_vm4, %v6053_v41, %v6057_v5  ;;  %v6072_v53 = vrot.slane %v6070_v49, 4  ;;  %v6083_v31 = vshrl.u32 %v5728_v46, 16  ;;  %v6244_v58 = vld [vmem:[#allocation2 + $0xbc] sm:$0x1]  ;;  %v12085_v46 = vld [vmem:[#allocation2 + $0x90] sm:$0xff]  }
 0x2fb   : > { %v6075_v3 = vrot.slane %v6073_v0, 5  ;;  %v14350_v33 = vsel %vm12474_vm9, %v6388_v51, %v6389_v54  ;;  %v6081_v28 = vrot.slane %v6079_v37, 5  ;;  %v6089_v43 = vshll.u32 %v5729_v6, 16  ;;  %v7573_v63 = vld [vmem:[#allocation2 + $0x18] sm:$0xf]  ;;  %v14373_v41 = vpop.f32.mrb[128].mxu1 }
 0x2fc   : > { %v6068_v22 = vsel %vm12458_vm4, %v6063_v30, %v6067_v56  ;;  %v10584_v7 = vcombine.low %v14342_v36, %v14350_v33  ;;  %v6085_v47 = vrot.slane %v6083_v31, 4  ;;  %v10569_v20 = vrot.slane %v6239_v38, 9  ;;  %v7574_v6 = vld [vmem:[#allocation2 + $0x1c] sm:$0xf]  ;;  %v12086_v54 = vld [vmem:[#allocation2 + $0xa8] sm:$0xff]  }
 0x2fd   : > { %v14352_v57 = vcombine.low %v6058_v35, %v6068_v22  ;;  %v6076_v44 = vor.u32 %v6075_v3, %v6072_v53  ;;  %v6091_v4 = vrot.slane %v6089_v43, 5  ;;  %v6393_v2 = vrot.slane %v6240_v39, 5  ;;  %v7575_v30 = vld [vmem:[#allocation2 + $0x20] sm:$0x1]  ;;  %v7141_v53 = vld [vmem:[#allocation2 + $0xc] sm:$0xe] }
 0x2fe   : > { %v6396_v18 = vrot.slane %v6241_v19, 5  ;;  %9382 = vmatmul.mubr.bf16.gmra.mrb[204].mxu0 %v10582_v21  ;;  %v6086_v15 = vor.u32 %v6085_v47, %v6081_v28  ;;  %v6094_v40 = vshrl.u32 %v5730_v23, 16  ;;  %v6097_v25 = vshll.u32 %v5730_v23, 16  ;;  %v7142_v43 = vld [vmem:[#allocation2 + $0x10] sm:$0xf]  ;;  %v14381_v23 = vpop.f32.mrb[129].mxu1 }
 0x2ff   : > { %9221 = vmatmul.mubr.bf16.gmra.mrb[172].mxu1 %v12081_v14  ;;  %v6077_v48 = vrot.slane %v6076_v44, 4  ;;  %9389 = vmatprep.mubr.bf16.mxu0 %v12082_v24  ;;  %v14361_v42 = vsel %vm12474_vm9, %v10569_v20, %v6393_v2  ;;  %v6395_v26 = vrot.slane %v6393_v2, 4  ;;  %v6103_v11 = vshll.u32 %v5731_v52, 16  ;;  %v6629_v2 = vld [vmem:[#allocation2 + $0xc] sm:$0xf] }
 0x300   : > { %9228 = vmatprep.mubr.bf16.mxu1 %v10551_v55  ;;  %v6107_v32 = vshrl.u32 %v5731_v52, 16  ;;  %v6087_v8 = vrot.slane %v6086_v15, 4  ;;  %v6096_v21 = vrot.slane %v6094_v40, 4  ;;  %v6099_v5 = vrot.slane %v6097_v25, 5  ;;  %v7143_v52 = vld [vmem:[#allocation2 + $0x14] sm:$0x1] }
 0x301   : > { %v6082_v59 = vsel %vm12458_vm4, %v6077_v48, %v6081_v28  ;;  %v14367_v12 = vsel %vm12474_vm9, %v6395_v26, %v6396_v18  ;;  %v6105_v17 = vrot.slane %v6103_v11, 5  ;;  %v6113_v62 = vshll.u32 %v5732_v34, 16  ;;  %v6630_v40 = vld [vmem:[#allocation2 + $0x10] sm:$0xf]  ;;  %v6631_v25 = vld [vmem:[#allocation2 + $0x14] sm:$0x1] }
 0x302   : > { %v6109_v50 = vrot.slane %v6107_v32, 4  ;;  %v6092_v55 = vsel %vm12458_vm4, %v6087_v8, %v6091_v4  ;;  %v10585_v10 = vcombine.low %v14361_v42, %v14367_v12  ;;  %v6100_v56 = vor.u32 %v6099_v5, %v6096_v21  ;;  %v14388_v4 = vpop.f32.mrb[130].mxu1  ;;  %v7145_v33 = vld [vmem:[#allocation2 + $0x1c] sm:$0xf] }
 0x303   : > { %v10570_v45 = vrot.slane %v6242_v27, 9  ;;  %v14375_v49 = vcombine.low %v6082_v59, %v6092_v55  ;;  %v6115_v38 = vrot.slane %v6113_v62, 5  ;;  %v6400_v39 = vrot.slane %v6243_v60, 5  ;;  %v7576_v60 = vld [vmem:[#allocation2 + $0x24] sm:$0xf] }
 0x304   : > { %v6110_v0 = vor.u32 %v6109_v50, %v6105_v17  ;;  %v6101_v51 = vrot.slane %v6100_v56, 4  ;;  %v6403_v37 = vrot.slane %v6244_v58, 5  ;;  %v7622_v19 = vshrl.u32 %v7573_v63, 16 }
 0x305   : > { %v7625_v35 = vshll.u32 %v7573_v63, 16  ;;  %v14379_v31 = vsel %vm12474_vm9, %v10570_v45, %v6400_v39  ;;  %v6402_v22 = vrot.slane %v6400_v39, 4  ;;  %v7631_v28 = vshll.u32 %v7574_v6, 16  ;;  %v12089_v63 = vld [vmem:[#allocation2 + $0x9c] sm:$0xff]  }
 0x306   : > { %v6111_v3 = vrot.slane %v6110_v0, 4  ;;  %9390 = vmatmul.mubr.bf16.gmra.mrb[208].mxu0 %v10583_v9  ;;  %v6106_v14 = vsel %vm12458_vm4, %v6101_v51, %v6105_v17  ;;  %v7624_v24 = vrot.slane %v7622_v19, 4  ;;  %v7635_v47 = vshrl.u32 %v7574_v6, 16  ;;  %v12090_v6 = vld [vmem:[#allocation2 + $0xb4] sm:$0xff]  }
 0x307   : > { %9229 = vmatmul.mubr.bf16.gmra.mrb[176].mxu1 %v12085_v46  ;;  %v7627_v44 = vrot.slane %v7625_v35, 5  ;;  %9397 = vmatprep.mubr.bf16.mxu0 %v12086_v54  ;;  %v14395_v13 = vsel %vm12474_vm9, %v6402_v22, %v6403_v37  ;;  %v7633_v16 = vrot.slane %v7631_v28, 5  ;;  %v7641_v9 = vshll.u32 %v7575_v30, 16  ;;  %v7577_v30 = vld [vmem:[#allocation2 + $0x28] sm:$0xf] }
 0x308   : > { %9236 = vmatprep.mubr.bf16.mxu1 %v14352_v57  ;;  %v6116_v20 = vsel %vm12458_vm4, %v6111_v3, %v6115_v38  ;;  %v10586_v34 = vcombine.low %v14379_v31, %v14395_v13  ;;  %v7637_v15 = vrot.slane %v7635_v47, 4  ;;  %v14401_v57 = vpop.f32.mrb[131].mxu1  ;;  %v10619_v26 = vrot.slane %v7141_v53, 9  ;;  %v7578_v35 = vld [vmem:[#allocation2 + $0x2c] sm:$0x1] }
 0x309   : > { %v14397_v18 = vcombine.low %v6106_v14, %v6116_v20  ;;  %v7628_v48 = vor.u32 %v7627_v44, %v7624_v24  ;;  %v7643_v27 = vrot.slane %v7641_v9, 5  ;;  %v7239_v11 = vrot.slane %v7142_v43, 5  ;;  %v7144_v3 = vld [vmem:[#allocation2 + $0x18] sm:$0xe] }
 0x30a   : > { %v7242_v32 = vrot.slane %v7143_v52, 5  ;;  %v7638_v8 = vor.u32 %v7637_v15, %v7633_v16  ;;  %v6678_v21 = vshrl.u32 %v6629_v2, 16  ;;  %v6681_v5 = vshll.u32 %v6629_v2, 16  ;;  %v6632_v52 = vld [vmem:[#allocation2 + $0x18] sm:$0xf] }
 0x30b   : > { %v7629_v59 = vrot.slane %v7628_v48, 4  ;;  %v14405_v58 = vsel %vm12474_vm9, %v10619_v26, %v7239_v11  ;;  %v7241_v17 = vrot.slane %v7239_v11, 4  ;;  %v6687_v50 = vshll.u32 %v6630_v40, 16  ;;  %v6633_v48 = vld [vmem:[#allocation2 + $0x1c] sm:$0xf] }
 0x30c   : > { %v6691_v62 = vshrl.u32 %v6630_v40, 16  ;;  %v7639_v55 = vrot.slane %v7638_v8, 4  ;;  %v6680_v56 = vrot.slane %v6678_v21, 4  ;;  %v6683_v45 = vrot.slane %v6681_v5, 5  ;;  %v12095_v8 = vld [vmem:[#allocation2 + $0xc0] sm:$0xff]  }
 0x30d   : > { %v7634_v46 = vsel %vm12458_vm4, %v7629_v59, %v7633_v16  ;;  %v14411_v54 = vsel %vm12474_vm9, %v7241_v17, %v7242_v32  ;;  %v6689_v0 = vrot.slane %v6687_v50, 5  ;;  %v6697_v39 = vshll.u32 %v6631_v25, 16  ;;  %v12094_v59 = vld [vmem:[#allocation2 + $0xa8] sm:$0xff]  }
 0x30e   : > { %v6693_v38 = vrot.slane %v6691_v62, 4  ;;  %9398 = vmatmul.mubr.bf16.gmra.mrb[212].mxu0 %v10584_v7  ;;  %v7644_v51 = vsel %vm12458_vm4, %v7639_v55, %v7643_v27  ;;  %v10635_v37 = vcombine.low %v14405_v58, %v14411_v54  ;;  %v6684_v19 = vor.u32 %v6683_v45, %v6680_v56  ;;  %v7146_v7 = vld [vmem:[#allocation2 + $0x20] sm:$0x1]  ;;  %v7579_v56 = vld [vmem:[#allocation2 + $0x30] sm:$0xf] }
 0x30f   : > { %9237 = vmatmul.mubr.bf16.gmra.mrb[180].mxu1 %v12089_v63  ;;  %v7646_v53 = vshrl.u32 %v7576_v60, 16  ;;  %9405 = vmatprep.mubr.bf16.mxu0 %v12090_v6  ;;  %v14421_v22 = vcombine.low %v7634_v46, %v7644_v51  ;;  %v6699_v43 = vrot.slane %v6697_v39, 5  ;;  %v7649_v36 = vshll.u32 %v7576_v60, 16  ;;  %v6634_v27 = vld [vmem:[#allocation2 + $0x20] sm:$0x1] }
 0x310   : > { %9244 = vmatprep.mubr.bf16.mxu1 %v14375_v49  ;;  %v6694_v28 = vor.u32 %v6693_v38, %v6689_v0  ;;  %v6685_v14 = vrot.slane %v6684_v19, 4  ;;  %v7655_v44 = vshll.u32 %v7577_v30, 16  ;;  %v7659_v47 = vshrl.u32 %v7577_v30, 16  ;;  %v7580_v39 = vld [vmem:[#allocation2 + $0x34] sm:$0xf] }
 0x311   : > { %v7648_v24 = vrot.slane %v7646_v53, 4  ;;  %v7651_v16 = vrot.slane %v7649_v36, 5  ;;  %v7665_v9 = vshll.u32 %v7578_v35, 16  ;;  %v10620_v2 = vrot.slane %v7144_v3, 9  ;;  %v7147_v19 = vld [vmem:[#allocation2 + $0x24] sm:$0xe] }
 0x312   : > { %v6695_v20 = vrot.slane %v6694_v28, 4  ;;  %v6690_v49 = vsel %vm12458_vm4, %v6685_v14, %v6689_v0  ;;  %v7657_v15 = vrot.slane %v7655_v44, 5  ;;  %v7661_v40 = vrot.slane %v7659_v47, 4  ;;  %v7149_v14 = vld [vmem:[#allocation2 + $0x2c] sm:$0x1] }
 0x313   : > { %v7246_v25 = vrot.slane %v7145_v33, 5  ;;  %v7652_v11 = vor.u32 %v7651_v16, %v7648_v24  ;;  %v7667_v32 = vrot.slane %v7665_v9, 5  ;;  %v7249_v60 = vrot.slane %v7146_v7, 5  ;;  %v6635_v24 = vld [vmem:[#allocation2 + $0x24] sm:$0xf] }
 0x314   : > { %v6700_v26 = vsel %vm12458_vm4, %v6695_v20, %v6699_v43  ;;  %v7662_v5 = vor.u32 %v7661_v40, %v7657_v15  ;;  %v6702_v63 = vshrl.u32 %v6632_v52, 16  ;;  %v6705_v46 = vshll.u32 %v6632_v52, 16  ;;  %v7148_v43 = vld [vmem:[#allocation2 + $0x28] sm:$0xf] }
 0x315   : > { %v14427_v21 = vcombine.low %v6690_v49, %v6700_v26  ;;  %v14431_v17 = vsel %vm12474_vm9, %v10620_v2, %v7246_v25  ;;  %v7248_v50 = vrot.slane %v7246_v25, 4  ;;  %v7653_v62 = vrot.slane %v7652_v11, 4  ;;  %v12102_v49 = vld [vmem:[#allocation2 + $0xb4] sm:$0xff]  }
 0x316   : > { %v6711_v55 = vshll.u32 %v6633_v48, 16  ;;  %9406 = vmatmul.mubr.bf16.gmra.mrb[216].mxu0 %v10585_v10  ;;  %v7663_v45 = vrot.slane %v7662_v5, 4  ;;  %v6715_v0 = vshrl.u32 %v6633_v48, 16  ;;  %v6721_v38 = vshll.u32 %v6634_v27, 16  ;;  %v7581_v10 = vld [vmem:[#allocation2 + $0x38] sm:$0x1] }
 0x317   : > { %9245 = vmatmul.mubr.bf16.gmra.mrb[184].mxu1 %v12094_v59  ;;  %v14438_v6 = vsel %vm12474_vm9, %v7248_v50, %v7249_v60  ;;  %9413 = vmatprep.mubr.bf16.mxu0 %v12095_v8  ;;  %v7658_v30 = vsel %vm12458_vm4, %v7653_v62, %v7657_v15  ;;  %v6704_v42 = vrot.slane %v6702_v63, 4  ;;  %v6707_v12 = vrot.slane %v6705_v46, 5  ;;  %v6636_v59 = vld [vmem:[#allocation2 + $0x28] sm:$0xf]  ;;  %v6637_v50 = vld [vmem:[#allocation2 + $0x2c] sm:$0x1] }
 0x318   : > { %9252 = vmatprep.mubr.bf16.mxu1 %v14397_v18  ;;  %v10636_v51 = vcombine.low %v14431_v17, %v14438_v6  ;;  %v7668_v35 = vsel %vm12458_vm4, %v7663_v45, %v7667_v32  ;;  %v6713_v53 = vrot.slane %v6711_v55, 5  ;;  %v6717_v3 = vrot.slane %v6715_v0, 4 }
 0x319   : > { %v6723_v28 = vrot.slane %v6721_v38, 5  ;;  %v14447_v36 = vcombine.low %v7658_v30, %v7668_v35  ;;  %v6708_v18 = vor.u32 %v6707_v12, %v6704_v42  ;;  %v7670_v33 = vshrl.u32 %v7579_v56, 16  ;;  %v7584_v30 = vld [vmem:[#allocation2 + $0x44] sm:$0x1]  ;;  %v7150_v35 = vld [vmem:[#allocation2 + $0x30] sm:$0xe] }
 0x31a   : > { %v7673_v7 = vshll.u32 %v7579_v56, 16  ;;  %v6718_v44 = vor.u32 %v6717_v3, %v6713_v53  ;;  %v7679_v47 = vshll.u32 %v7580_v39, 16  ;;  %v7683_v52 = vshrl.u32 %v7580_v39, 16  ;;  %v7583_v39 = vld [vmem:[#allocation2 + $0x40] sm:$0xf] }
 0x31b   : > { %v7689_v20 = vshll.u32 %v7581_v10, 16  ;;  %v6709_v16 = vrot.slane %v6708_v18, 4  ;;  %v7672_v9 = vrot.slane %v7670_v33, 4  ;;  %v10621_v48 = vrot.slane %v7147_v19, 9  ;;  %v7151_v33 = vld [vmem:[#allocation2 + $0x34] sm:$0xf] }
 0x31c   : > { %v7675_v2 = vrot.slane %v7673_v7, 5  ;;  %v6719_v15 = vrot.slane %v6718_v44, 4  ;;  %v7681_v40 = vrot.slane %v7679_v47, 5  ;;  %v7685_v25 = vrot.slane %v7683_v52, 4  ;;  %v7152_v47 = vld [vmem:[#allocation2 + $0x38] sm:$0x1] }
 0x31d   : > { %v7691_v27 = vrot.slane %v7689_v20, 5  ;;  %v6714_v26 = vsel %vm12458_vm4, %v6709_v16, %v6713_v53  ;;  %v7253_v32 = vrot.slane %v7148_v43, 5  ;;  %v7256_v60 = vrot.slane %v7149_v14, 5  ;;  %v12106_v53 = vld [vmem:[#allocation2 + $0x18] sm:$0xff]  }
 0x31e   : > { %v7676_v11 = vor.u32 %v7675_v2, %v7672_v9  ;;  %9414 = vmatmul.mubr.bf16.gmra.mrb[220].mxu0 %v10586_v34  ;;  %v6724_v8 = vsel %vm12458_vm4, %v6719_v15, %v6723_v28  ;;  %v7686_v5 = vor.u32 %v7685_v25, %v7681_v40  ;;  %v6726_v62 = vshrl.u32 %v6635_v24, 16  ;;  %v7582_v34 = vld [vmem:[#allocation2 + $0x3c] sm:$0xf]  ;;  %v12110_v9 = vld [vmem:[#allocation4 + $0x208] sm:$0xff]  }
 0x31f   : > { %9253 = vmatmul.mubr.bf16.gmra.mrb[188].mxu1 %v12102_v49  ;;  %v6729_v63 = vshll.u32 %v6635_v24, 16  ;;  %9615 = vmatprep.mubr.bf16.mxu0 %v14421_v22  ;;  %v14460_v46 = vcombine.low %v6714_v26, %v6724_v8  ;;  %v14464_v31 = vsel %vm12474_vm9, %v10621_v48, %v7253_v32  ;;  %v7255_v13 = vrot.slane %v7253_v32, 4  ;;  %v6638_v48 = vld [vmem:[#allocation2 + $0x30] sm:$0xf]  ;;  %v6640_v8 = vld [vmem:[#allocation2 + $0x38] sm:$0x1] }
 0x320   : > { %9454 = vmatprep.mubr.bf16.mxu1 %v10635_v37  ;;  %v7677_v55 = vrot.slane %v7676_v11, 4  ;;  %v7687_v56 = vrot.slane %v7686_v5, 4  ;;  %v6728_v45 = vrot.slane %v6726_v62, 4  ;;  %v6735_v38 = vshll.u32 %v6636_v59, 16  ;;  %v12113_v62 = vld [vmem:[#allocation4 + $0x210] sm:$0xff]  }
 0x321   : > { %v6731_v0 = vrot.slane %v6729_v63, 5  ;;  %v14470_v58 = vsel %vm12474_vm9, %v7255_v13, %v7256_v60  ;;  %v6739_v54 = vshrl.u32 %v6636_v59, 16  ;;  %v6745_v37 = vshll.u32 %v6637_v50, 16 }
 0x322   : > { %v7682_v22 = vsel %vm12458_vm4, %v7677_v55, %v7681_v40  ;;  %v7692_v42 = vsel %vm12458_vm4, %v7687_v56, %v7691_v27  ;;  %v10637_v12 = vcombine.low %v14464_v31, %v14470_v58  ;;  %v6737_v19 = vrot.slane %v6735_v38, 5  ;;  %v6639_v27 = vld [vmem:[#allocation2 + $0x34] sm:$0xf]  ;;  %v12119_v31 = vld [vmem:[#allocation4 + $0x220] sm:$0xff]  }
 0x323   : > { %v6732_v10 = vor.u32 %v6731_v0, %v6728_v45  ;;  %v14476_v3 = vcombine.low %v7682_v22, %v7692_v42  ;;  %v6741_v28 = vrot.slane %v6739_v54, 4  ;;  %v6747_v43 = vrot.slane %v6745_v37, 5  ;;  %v12108_v22 = vld [vmem:[#allocation2 + $0x24] sm:$0xff]  }
 0x324   : > { %v7694_v18 = vshrl.u32 %v7582_v34, 16  ;;  %v7697_v14 = vshll.u32 %v7582_v34, 16  ;;  %v7703_v24 = vshll.u32 %v7583_v39, 16  ;;  %v7707_v44 = vshrl.u32 %v7583_v39, 16  ;;  %v7586_v39 = vld [vmem:[#allocation2 + $0x4c] sm:$0xf] }
 0x325   : > { %v6733_v7 = vrot.slane %v6732_v10, 4  ;;  %v6742_v52 = vor.u32 %v6741_v28, %v6737_v19  ;;  %v7713_v16 = vshll.u32 %v7584_v30, 16  ;;  %v10622_v2 = vrot.slane %v7150_v35, 9  ;;  %v7587_v10 = vld [vmem:[#allocation2 + $0x50] sm:$0x1] }
 0x326   : > { %v7696_v20 = vrot.slane %v7694_v18, 4  ;;  %9616 = vmatmul.mubr.bf16.vlgmr.msra.gmra.mrb[224].mxu0 %v12106_v53  ;;  %v7699_v15 = vrot.slane %v7697_v14, 5  ;;  %v7705_v40 = vrot.slane %v7703_v24, 5  ;;  %v7709_v25 = vrot.slane %v7707_v44, 4  ;;  %v7153_v18 = vld [vmem:[#allocation2 + $0x3c] sm:$0xe] }
 0x327   : > { %9455 = vmatmul.mubr.bf16.vlgmr.msra.gmra.mrb[192].mxu1 %v14427_v21  ;;  %v6738_v49 = vsel %vm12458_vm4, %v6733_v7, %v6737_v19  ;;  %9623 = vmatprep.mubr.bf16.mxu0 %v14447_v36  ;;  %v6743_v26 = vrot.slane %v6742_v52, 4  ;;  %v7715_v11 = vrot.slane %v7713_v16, 5  ;;  %v7260_v32 = vrot.slane %v7151_v33, 5  ;;  %v7585_v36 = vld [vmem:[#allocation2 + $0x48] sm:$0xf]  ;;  %v12116_v19 = vld [vmem:[#allocation4 + $0x218] sm:$0xff]  }
 0x328   : > { %9462 = vmatprep.mubr.bf16.mxu1 %v10636_v51  ;;  %v7263_v60 = vrot.slane %v7152_v47, 5  ;;  %11788 = vmatpush3.bf16.msra.mxu1 %v14270_v29  ;;  %v7700_v21 = vor.u32 %v7699_v15, %v7696_v20  ;;  %v7710_v59 = vor.u32 %v7709_v25, %v7705_v40  ;;  %v6750_v5 = vshrl.u32 %v6638_v48, 16  ;;  %v7154_v33 = vld [vmem:[#allocation2 + $0x40] sm:$0xf]  ;;  %v7155_v47 = vld [vmem:[#allocation2 + $0x44] sm:$0x1] }
 0x329   : > { %v6753_v50 = vshll.u32 %v6638_v48, 16  ;;  %v6748_v63 = vsel %vm12458_vm4, %v6743_v26, %v6747_v43  ;;  %11789 = vmatprep.subr.bf16.mxu1 %v12110_v9  ;;  %v14490_v17 = vsel %vm12474_vm9, %v10622_v2, %v7260_v32  ;;  %v7262_v6 = vrot.slane %v7260_v32, 4  ;;  %v6641_v2 = vld [vmem:[#allocation2 + $0x3c] sm:$0xf]  ;;  %v6642_v26 = vld [vmem:[#allocation2 + $0x40] sm:$0xf] }
 0x32a   : > { %v6759_v51 = vshll.u32 %v6639_v27, 16  ;;  %v14492_v55 = vcombine.low %v6738_v49, %v6748_v63  ;;  %v7701_v29 = vrot.slane %v7700_v21, 4  ;;  %v7711_v13 = vrot.slane %v7710_v59, 4 }
 0x32b   : > { %v6752_v34 = vrot.slane %v6750_v5, 4  ;;  %v14496_v56 = vsel %vm12474_vm9, %v7262_v6, %v7263_v60  ;;  %v6755_v45 = vrot.slane %v6753_v50, 5  ;;  %v6763_v38 = vshrl.u32 %v6639_v27, 16  ;;  %v12109_v50 = vld [vmem:[#allocation2 + $0x30] sm:$0xff]  }
 0x32c   : > { %v6761_v0 = vrot.slane %v6759_v51, 5  ;;  %v7706_v54 = vsel %vm12458_vm4, %v7701_v29, %v7705_v40  ;;  %v7716_v37 = vsel %vm12458_vm4, %v7711_v13, %v7715_v11  ;;  %v10638_v30 = vcombine.low %v14490_v17, %v14496_v56  ;;  %11790 = vmatpush3.bf16.msra.mxu1 %v12110_v9  ;;  %v12125_v17 = vld [vmem:[#allocation4 + $0x230] sm:$0xff]  }
 0x32d   : > { %v6769_v42 = vshll.u32 %v6640_v8, 16  ;;  %v14504_v35 = vcombine.low %v7706_v54, %v7716_v37  ;;  %v6756_v53 = vor.u32 %v6755_v45, %v6752_v34  ;;  %v6765_v28 = vrot.slane %v6763_v38, 4  ;;  %11791 = vmatprep.subr.bf16.mxu1 %v12113_v62  ;;  %v6643_v8 = vld [vmem:[#allocation2 + $0x44] sm:$0x1] }
 0x32e   : > { %v7718_v43 = vshrl.u32 %v7585_v36, 16  ;;  %9624 = vmatmul.mubr.bf16.gmra.mrb[228].mxu0 %v12108_v22  ;;  %v7721_v14 = vshll.u32 %v7585_v36, 16  ;;  %v7727_v24 = vshll.u32 %v7586_v39, 16  ;;  %v7731_v44 = vshrl.u32 %v7586_v39, 16  ;;  %v7588_v36 = vld [vmem:[#allocation2 + $0x54] sm:$0xf] }
 0x32f   : > { %9463 = vmatmul.mubr.bf16.gmra.mrb[196].mxu1 %v14460_v46  ;;  %v6771_v7 = vrot.slane %v6769_v42, 5  ;;  %9631 = vmatprep.mubr.bf16.mxu0 %v14476_v3  ;;  %v6757_v52 = vrot.slane %v6756_v53, 4  ;;  %v6766_v20 = vor.u32 %v6765_v28, %v6761_v0  ;;  %v7737_v9 = vshll.u32 %v7587_v10, 16  ;;  %v12122_v38 = vld [vmem:[#allocation4 + $0x228] sm:$0xff]   ;;  %v7590_v42 = vld [vmem:[#allocation2 + $0x5c] sm:$0x1] }
 0x330   : > { %9470 = vmatprep.mubr.bf16.mxu1 %v10637_v12  ;;  %v7720_v16 = vrot.slane %v7718_v43, 4  ;;  %v7723_v48 = vrot.slane %v7721_v14, 5  ;;  %v7729_v49 = vrot.slane %v7727_v24, 5  ;;  %v7733_v15 = vrot.slane %v7731_v44, 4  ;;  %11792 = vmatpush3.bf16.msra.mxu1 %v12113_v62  ;;  %v7156_v10 = vld [vmem:[#allocation2 + $0x48] sm:$0xe] }
 0x331   : > { %v10623_v46 = vrot.slane %v7153_v18, 9  ;;  %v6762_v40 = vsel %vm12458_vm4, %v6757_v52, %v6761_v0  ;;  %v6767_v25 = vrot.slane %v6766_v20, 4  ;;  %v7739_v27 = vrot.slane %v7737_v9, 5  ;;  %11793 = vmatprep.subr.bf16.mxu1 %v12116_v19  ;;  %v7589_v0 = vld [vmem:[#allocation2 + $0x58] sm:$0xf] }
 0x332   : > { %v7267_v3 = vrot.slane %v7154_v33, 5  ;;  %v7724_v58 = vor.u32 %v7723_v48, %v7720_v16  ;;  %v7734_v12 = vor.u32 %v7733_v15, %v7729_v49  ;;  %v7270_v11 = vrot.slane %v7155_v47, 5  ;;  %v7157_v43 = vld [vmem:[#allocation2 + $0x4c] sm:$0xf]  ;;  %v7158_v18 = vld [vmem:[#allocation2 + $0x50] sm:$0x1] }
 0x333   : > { %v6774_v32 = vshrl.u32 %v6641_v2, 16  ;;  %v6772_v60 = vsel %vm12458_vm4, %v6767_v25, %v6771_v7  ;;  %v6777_v5 = vshll.u32 %v6641_v2, 16  ;;  %v6783_v34 = vshll.u32 %v6642_v26, 16  ;;  %v6644_v33 = vld [vmem:[#allocation2 + $0x48] sm:$0xf] }
 0x334   : > { %v14517_v21 = vsel %vm12474_vm9, %v10623_v46, %v7267_v3  ;;  %v7269_v59 = vrot.slane %v7267_v3, 4  ;;  %v14519_v62 = vcombine.low %v6762_v40, %v6772_v60  ;;  %v7725_v63 = vrot.slane %v7724_v58, 4  ;;  %11794 = vmatpush3.bf16.msra.mxu1 %v12116_v19  ;;  %v6645_v47 = vld [vmem:[#allocation2 + $0x4c] sm:$0xf]  ;;  %v12111_v40 = vld [vmem:[#allocation2 + $0x3c] sm:$0xff]   ;;  %v12128_v60 = vld [vmem:[#allocation4 + $0x238] sm:$0xff]  }
 0x335   : > { %v7735_v6 = vrot.slane %v7734_v12, 4  ;;  %v6776_v51 = vrot.slane %v6774_v32, 4  ;;  %v6779_v13 = vrot.slane %v6777_v5, 5  ;;  %v6787_v45 = vshrl.u32 %v6642_v26, 16  ;;  %11795 = vmatprep.subr.bf16.mxu1 %v12119_v31  ;;  %v6646_v12 = vld [vmem:[#allocation2 + $0x50] sm:$0x1] }
 0x336   : > { %v14523_v29 = vsel %vm12474_vm9, %v7269_v59, %v7270_v11  ;;  %9632 = vmatmul.mubr.bf16.gmra.mrb[232].mxu0 %v12109_v50  ;;  %v7730_v39 = vsel %vm12458_vm4, %v7725_v63, %v7729_v49  ;;  %v6793_v37 = vshll.u32 %v6643_v8, 16  ;;  %v6785_v53 = vrot.slane %v6783_v34, 5  ;;  %v7591_v50 = vld [vmem:[#allocation2 + $0x60] sm:$0xf] }
 0x337   : > { %9471 = vmatmul.mubr.bf16.gmra.mrb[200].mxu1 %v14492_v55  ;;  %v7740_v22 = vsel %vm12458_vm4, %v7735_v6, %v7739_v27  ;;  %v10639_v54 = vcombine.low %v14517_v21, %v14523_v29  ;;  %9639 = vmatprep.mubr.bf16.mxu0 %v14504_v35  ;;  %v6780_v55 = vor.u32 %v6779_v13, %v6776_v51  ;;  %v6789_v28 = vrot.slane %v6787_v45, 4  ;;  %v7592_v29 = vld [vmem:[#allocation2 + $0x64] sm:$0xf] }
 0x338   : > { %9478 = vmatprep.mubr.bf16.mxu1 %v10638_v30  ;;  %v10671_v19 = vcombine.low %v7730_v39, %v7740_v22  ;;  %v6795_v7 = vrot.slane %v6793_v37, 5  ;;  %v7742_v14 = vshrl.u32 %v7588_v36, 16  ;;  %v7745_v24 = vshll.u32 %v7588_v36, 16  ;;  %11796 = vmatpush3.bf16.msra.mxu1 %v12119_v31 }
 0x339   : > { %v7751_v44 = vshll.u32 %v7589_v0, 16  ;;  %v6781_v52 = vrot.slane %v6780_v55, 4  ;;  %v6790_v20 = vor.u32 %v6789_v28, %v6785_v53  ;;  %v7755_v35 = vshrl.u32 %v7589_v0, 16  ;;  %11797 = vmatprep.subr.bf16.mxu1 %v12122_v38  ;;  %v7593_v0 = vld [vmem:[#allocation2 + $0x68] sm:$0x1] }
 0x33a   : > { %v7761_v16 = vshll.u32 %v7590_v42, 16  ;;  %v7744_v56 = vrot.slane %v7742_v14, 4  ;;  %v7747_v30 = vrot.slane %v7745_v24, 5  ;;  %v10624_v2 = vrot.slane %v7156_v10, 9  ;;  %v12112_v14 = vld [vmem:[#allocation2 + $0x48] sm:$0xff]  }
 0x33b   : > { %v7753_v9 = vrot.slane %v7751_v44, 5  ;;  %v6786_v48 = vsel %vm12458_vm4, %v6781_v52, %v6785_v53  ;;  %v6791_v49 = vrot.slane %v6790_v20, 4  ;;  %v7757_v15 = vrot.slane %v7755_v35, 4  ;;  %v7160_v53 = vld [vmem:[#allocation2 + $0x58] sm:$0xf] }
 0x33c   : > { %v7763_v46 = vrot.slane %v7761_v16, 5  ;;  %v7748_v25 = vor.u32 %v7747_v30, %v7744_v56  ;;  %v7274_v27 = vrot.slane %v7157_v43, 5  ;;  %v7277_v3 = vrot.slane %v7158_v18, 5  ;;  %11798 = vmatpush3.bf16.msra.mxu1 %v12122_v38  ;;  %v7159_v38 = vld [vmem:[#allocation2 + $0x54] sm:$0xe] }
 0x33d   : > { %v6798_v26 = vshrl.u32 %v6644_v33, 16  ;;  %v6796_v31 = vsel %vm12458_vm4, %v6791_v49, %v6795_v7  ;;  %v7758_v58 = vor.u32 %v7757_v15, %v7753_v9  ;;  %v6801_v11 = vshll.u32 %v6644_v33, 16  ;;  %11799 = vmatprep.subr.bf16.mxu1 %v12125_v17  ;;  %v7161_v7 = vld [vmem:[#allocation2 + $0x5c] sm:$0x1]  ;;  %v6647_v20 = vld [vmem:[#allocation2 + $0x54] sm:$0xf] }
 0x33e   : > { %v6807_v32 = vshll.u32 %v6645_v47, 16  ;;  %9640 = vmatmul.mubr.bf16.gmra.mrb[236].mxu0 %v12111_v40  ;;  %v10607_v21 = vcombine.low %v6786_v48, %v6796_v31  ;;  %v7749_v59 = vrot.slane %v7748_v25, 4  ;;  %v7275_v8 = vsel %vm12474_vm9, %v10624_v2, %v7274_v27  ;;  %v6648_v30 = vld [vmem:[#allocation2 + $0x58] sm:$0xf]  ;;  %v6649_v25 = vld [vmem:[#allocation2 + $0x5c] sm:$0x1] }
 0x33f   : > { %9479 = vmatmul.mubr.bf16.gmra.mrb[204].mxu1 %v14519_v62  ;;  %v7276_v5 = vrot.slane %v7274_v27, 4  ;;  %9647 = vmatprep.mubr.bf16.mxu0 %v10671_v19  ;;  %v7759_v63 = vrot.slane %v7758_v58, 4  ;;  %v6800_v6 = vrot.slane %v6798_v26, 4  ;;  %v6803_v51 = vrot.slane %v6801_v11, 5 }
 0x340   : > { %9486 = vmatprep.mubr.bf16.mxu1 %v10639_v54  ;;  %v6809_v36 = vrot.slane %v6807_v32, 5  ;;  %v7754_v13 = vsel %vm12458_vm4, %v7749_v59, %v7753_v9  ;;  %v6811_v34 = vshrl.u32 %v6645_v47, 16  ;;  %v6817_v45 = vshll.u32 %v6646_v12, 16  ;;  %11800 = vmatpush3.bf16.msra.mxu1 %v12125_v17  ;;  %v7594_v12 = vld [vmem:[#allocation2 + $0x6c] sm:$0xf] }
 0x341   : > { %v7278_v62 = vsel %vm12474_vm9, %v7276_v5, %v7277_v3  ;;  %v7764_v39 = vsel %vm12458_vm4, %v7759_v63, %v7763_v46  ;;  %v6804_v54 = vor.u32 %v6803_v51, %v6800_v6  ;;  %v7766_v37 = vshrl.u32 %v7591_v50, 16  ;;  %11801 = vmatprep.subr.bf16.mxu1 %v12128_v60  ;;  %v7595_v59 = vld [vmem:[#allocation2 + $0x70] sm:$0xf]  ;;  %v12114_v6 = vld [vmem:[#allocation2 + $0x54] sm:$0xff]  }
 0x342   : > { %v10640_v22 = vcombine.low %v7275_v8, %v7278_v62  ;;  %v10672_v42 = vcombine.low %v7754_v13, %v7764_v39  ;;  %v6813_v10 = vrot.slane %v6811_v34, 4  ;;  %v6819_v19 = vrot.slane %v6817_v45, 5  ;;  %v7596_v13 = vld [vmem:[#allocation2 + $0x74] sm:$0x1]  ;;  %v7162_v39 = vld [vmem:[#allocation2 + $0x60] sm:$0xe] }
 0x343   : > { %v7769_v55 = vshll.u32 %v7591_v50, 16  ;;  %v6805_v28 = vrot.slane %v6804_v54, 4  ;;  %v7768_v43 = vrot.slane %v7766_v37, 4  ;;  %v7775_v18 = vshll.u32 %v7592_v29, 16 }
 0x344   : > { %v7779_v33 = vshrl.u32 %v7592_v29, 16  ;;  %v6814_v24 = vor.u32 %v6813_v10, %v6809_v36  ;;  %v7785_v47 = vshll.u32 %v7593_v0, 16  ;;  %v10625_v52 = vrot.slane %v7159_v38, 9  ;;  %11802 = vmatpush3.bf16.msra.mxu1 %v12128_v60 }
 0x345   : > { %v7771_v44 = vrot.slane %v7769_v55, 5  ;;  %v6810_v35 = vsel %vm12458_vm4, %v6805_v28, %v6809_v36  ;;  %v7777_v16 = vrot.slane %v7775_v18, 5  ;;  %v7281_v56 = vrot.slane %v7160_v53, 5  ;;  %v6650_v18 = vld [vmem:[#allocation2 + $0x60] sm:$0xf] }
 0x346   : > { %v7781_v17 = vrot.slane %v7779_v33, 4  ;;  %9648 = vmatmul.mubr.bf16.gmra.mrb[240].mxu0 %v12112_v14  ;;  %v6815_v9 = vrot.slane %v6814_v24, 4  ;;  %v7787_v48 = vrot.slane %v7785_v47, 5  ;;  %v7284_v49 = vrot.slane %v7161_v7, 5 }
 0x347   : > { %9487 = vmatmul.mubr.bf16.gmra.mrb[208].mxu1 %v10607_v21  ;;  %v7772_v2 = vor.u32 %v7771_v44, %v7768_v43  ;;  %9655 = vmatprep.mubr.bf16.mxu0 %v10672_v42  ;;  %v7282_v46 = vsel %vm12474_vm9, %v10625_v52, %v7281_v56  ;;  %v7283_v40 = vrot.slane %v7281_v56, 4  ;;  %v6822_v27 = vshrl.u32 %v6647_v20, 16  ;;  %v6651_v44 = vld [vmem:[#allocation2 + $0x64] sm:$0xf] }
 0x348   : > { %9494 = vmatprep.mubr.bf16.mxu1 %v10640_v22  ;;  %v7782_v15 = vor.u32 %v7781_v17, %v7777_v16  ;;  %v6820_v3 = vsel %vm12458_vm4, %v6815_v9, %v6819_v19  ;;  %v6825_v31 = vshll.u32 %v6647_v20, 16  ;;  %v6831_v58 = vshll.u32 %v6648_v30, 16  ;;  %v7163_v22 = vld [vmem:[#allocation2 + $0x64] sm:$0xf]  ;;  %v7164_v19 = vld [vmem:[#allocation2 + $0x68] sm:$0x1] }
 0x349   : > { %v7773_v26 = vrot.slane %v7772_v2, 4  ;;  %v10608_v11 = vcombine.low %v6810_v35, %v6820_v3  ;;  %v7285_v60 = vsel %vm12474_vm9, %v7283_v40, %v7284_v49  ;;  %v6824_v21 = vrot.slane %v6822_v27, 4  ;;  %v7597_v3 = vld [vmem:[#allocation2 + $0x78] sm:$0xf] }
 0x34a   : > { %v7783_v32 = vrot.slane %v7782_v15, 4  ;;  %v10641_v5 = vcombine.low %v7282_v46, %v7285_v60  ;;  %v6827_v50 = vrot.slane %v6825_v31, 5  ;;  %v6833_v63 = vrot.slane %v6831_v58, 5 }
 0x34b   : > { %v7778_v8 = vsel %vm12458_vm4, %v7773_v26, %v7777_v16  ;;  %v6835_v36 = vshrl.u32 %v6648_v30, 16  ;;  %v6841_v29 = vshll.u32 %v6649_v25, 16  ;;  %v7790_v62 = vshrl.u32 %v7594_v12, 16  ;;  %v6652_v25 = vld [vmem:[#allocation2 + $0x68] sm:$0x1]  ;;  %v12115_v26 = vld [vmem:[#allocation2 + $0x60] sm:$0xff]  }
 0x34c   : > { %v7788_v51 = vsel %vm12458_vm4, %v7783_v32, %v7787_v48  ;;  %v6828_v45 = vor.u32 %v6827_v50, %v6824_v21  ;;  %v7793_v0 = vshll.u32 %v7594_v12, 16  ;;  %v7799_v38 = vshll.u32 %v7595_v59, 16  ;;  %v7598_v32 = vld [vmem:[#allocation2 + $0x7c] sm:$0xf] }
 0x34d   : > { %v10673_v34 = vcombine.low %v7778_v8, %v7788_v51  ;;  %v6837_v54 = vrot.slane %v6835_v36, 4  ;;  %v6843_v37 = vrot.slane %v6841_v29, 5  ;;  %v7792_v42 = vrot.slane %v7790_v62, 4  ;;  %v7165_v36 = vld [vmem:[#allocation2 + $0x6c] sm:$0xe] }
 0x34e   : > { %v7803_v10 = vshrl.u32 %v7595_v59, 16  ;;  %9656 = vmatmul.mubr.bf16.gmra.mrb[244].mxu0 %v12114_v6  ;;  %v6829_v55 = vrot.slane %v6828_v45, 4  ;;  %v7795_v53 = vrot.slane %v7793_v0, 5  ;;  %v7801_v28 = vrot.slane %v7799_v38, 5  ;;  %v7166_v45 = vld [vmem:[#allocation2 + $0x70] sm:$0xf] }
 0x34f   : > { %9495 = vmatmul.mubr.bf16.gmra.mrb[212].mxu1 %v10608_v11  ;;  %v7809_v43 = vshll.u32 %v7596_v13, 16  ;;  %9663 = vmatprep.mubr.bf16.mxu0 %v10673_v34  ;;  %v6838_v33 = vor.u32 %v6837_v54, %v6833_v63  ;;  %v10626_v14 = vrot.slane %v7162_v39, 9  ;;  %v7288_v24 = vrot.slane %v7163_v22, 5  ;;  %v7167_v0 = vld [vmem:[#allocation2 + $0x74] sm:$0x1] }
 0x350   : > { %9502 = vmatprep.mubr.bf16.mxu1 %v10641_v5  ;;  %v7805_v7 = vrot.slane %v7803_v10, 4  ;;  %v6834_v47 = vsel %vm12458_vm4, %v6829_v55, %v6833_v63  ;;  %v7796_v52 = vor.u32 %v7795_v53, %v7792_v42  ;;  %v7291_v35 = vrot.slane %v7164_v19, 5  ;;  %v7599_v5 = vld [vmem:[#allocation2 + $0x80] sm:$0x1]  ;;  %v6654_v42 = vld [vmem:[#allocation2 + $0x70] sm:$0xf] }
 0x351   : > { %v7811_v20 = vrot.slane %v7809_v43, 5  ;;  %v6839_v16 = vrot.slane %v6838_v33, 4  ;;  %v7289_v56 = vsel %vm12474_vm9, %v10626_v14, %v7288_v24  ;;  %v7290_v30 = vrot.slane %v7288_v24, 4 }
 0x352   : > { %v7806_v17 = vor.u32 %v7805_v7, %v7801_v28  ;;  %v7797_v9 = vrot.slane %v7796_v52, 4  ;;  %v6846_v2 = vshrl.u32 %v6650_v18, 16  ;;  %v6849_v48 = vshll.u32 %v6650_v18, 16 }
 0x353   : > { %v6855_v49 = vshll.u32 %v6651_v44, 16  ;;  %v6844_v15 = vsel %vm12458_vm4, %v6839_v16, %v6843_v37  ;;  %v7292_v40 = vsel %vm12474_vm9, %v7290_v30, %v7291_v35  ;;  %v6859_v27 = vshrl.u32 %v6651_v44, 16  ;;  %v6653_v37 = vld [vmem:[#allocation2 + $0x6c] sm:$0xf]  ;;  %v7600_v30 = vld [vmem:[#allocation2 + $0x84] sm:$0xf] }
 0x354   : > { %v7807_v46 = vrot.slane %v7806_v17, 4  ;;  %v10609_v31 = vcombine.low %v6834_v47, %v6844_v15  ;;  %v7802_v58 = vsel %vm12458_vm4, %v7797_v9, %v7801_v28  ;;  %v10642_v12 = vcombine.low %v7289_v56, %v7292_v40  ;;  %v6655_v47 = vld [vmem:[#allocation2 + $0x74] sm:$0x1] }
 0x355   : > { %v6848_v11 = vrot.slane %v6846_v2, 4  ;;  %v6851_v21 = vrot.slane %v6849_v48, 5  ;;  %v6857_v59 = vrot.slane %v6855_v49, 5  ;;  %v6861_v8 = vrot.slane %v6859_v27, 4 }
 0x356   : > { %v7812_v60 = vsel %vm12458_vm4, %v7807_v46, %v7811_v20  ;;  %9664 = vmatmul.mubr.bf16.gmra.mrb[248].mxu0 %v12115_v26  ;;  %v6865_v63 = vshll.u32 %v6652_v25, 16  ;;  %v7814_v6 = vshrl.u32 %v7597_v3, 16  ;;  %v7817_v51 = vshll.u32 %v7597_v3, 16  ;;  %v12117_v20 = vld [vmem:[#allocation2 + $0x6c] sm:$0xff]   ;;  %v7601_v26 = vld [vmem:[#allocation2 + $0x88] sm:$0xf] }
 0x357   : > { %9503 = vmatmul.mubr.bf16.gmra.mrb[216].mxu1 %v10609_v31  ;;  %v10674_v50 = vcombine.low %v7802_v58, %v7812_v60  ;;  %v6852_v29 = vor.u32 %v6851_v21, %v6848_v11  ;;  %v6862_v13 = vor.u32 %v6861_v8, %v6857_v59  ;;  %v7823_v62 = vshll.u32 %v7598_v32, 16  ;;  %v14577_v52 = vpop.f32.mrb[160].mxu0  ;;  %v7602_v60 = vld [vmem:[#allocation2 + $0x8c] sm:$0x1]  ;;  %v7168_v21 = vld [vmem:[#allocation2 + $0x78] sm:$0xe] }
 0x358   : > { %9510 = vmatprep.mubr.bf16.mxu1 %v10642_v12  ;;  %v7827_v34 = vshrl.u32 %v7598_v32, 16  ;;  %v6867_v38 = vrot.slane %v6865_v63, 5  ;;  %v7816_v39 = vrot.slane %v7814_v6, 4  ;;  %v7819_v22 = vrot.slane %v7817_v51, 5  ;;  %v14581_v9 = vpop.f32.mrb[161].mxu0 }
 0x359   : > { %9671 = vmatprep.mubr.bf16.mxu0 %v10674_v50  ;;  %v7833_v54 = vshll.u32 %v7599_v5, 16  ;;  %v6853_v10 = vrot.slane %v6852_v29, 4  ;;  %v6863_v19 = vrot.slane %v6862_v13, 4  ;;  %v7825_v55 = vrot.slane %v7823_v62, 5  ;;  %v14583_v46 = vpop.f32.mrb[162].mxu0  ;;  %v12118_v62 = vld [vmem:[#allocation2 + $0x78] sm:$0xff]  }
 0x35a   : > { %v7829_v53 = vrot.slane %v7827_v34, 4  ;;  %v7820_v28 = vor.u32 %v7819_v22, %v7816_v39  ;;  %v10627_v18 = vrot.slane %v7165_v36, 9  ;;  %v7295_v33 = vrot.slane %v7166_v45, 5  ;;  %v14589_v31 = vpop.f32.mrb[163].mxu0  ;;  %v7169_v63 = vld [vmem:[#allocation2 + $0x7c] sm:$0xf] }
 0x35b   : > { %v7835_v43 = vrot.slane %v7833_v54, 5  ;;  %v6858_v7 = vsel %vm12458_vm4, %v6853_v10, %v6857_v59  ;;  %v6868_v14 = vsel %vm12458_vm4, %v6863_v19, %v6867_v38  ;;  %v7298_v44 = vrot.slane %v7167_v0, 5  ;;  %v7170_v13 = vld [vmem:[#allocation2 + $0x80] sm:$0x1]  ;;  %v6656_v39 = vld [vmem:[#allocation2 + $0x78] sm:$0xf] }
 0x35c   : > { %v7830_v24 = vor.u32 %v7829_v53, %v7825_v55  ;;  %v10610_v35 = vcombine.low %v6858_v7, %v6868_v14  ;;  %v7821_v16 = vrot.slane %v7820_v28, 4  ;;  %v7296_v17 = vsel %vm12474_vm9, %v10627_v18, %v7295_v33 }
 0x35d   : > { %v7297_v56 = vrot.slane %v7295_v33, 4  ;;  %v6870_v48 = vshrl.u32 %v6653_v37, 16  ;;  %v6873_v49 = vshll.u32 %v6653_v37, 16  ;;  %v6879_v15 = vshll.u32 %v6654_v42, 16  ;;  %v6657_v33 = vld [vmem:[#allocation2 + $0x7c] sm:$0xf] }
 0x35e   : > { %v7831_v2 = vrot.slane %v7830_v24, 4  ;;  %9672 = vmatmul.mubr.bf16.gmra.mrb[252].mxu0 %v12117_v20  ;;  %v7826_v40 = vsel %vm12458_vm4, %v7821_v16, %v7825_v55  ;;  %v6883_v27 = vshrl.u32 %v6654_v42, 16  ;;  %v6889_v3 = vshll.u32 %v6655_v47, 16  ;;  %v6658_v20 = vld [vmem:[#allocation2 + $0x80] sm:$0x1] }
 0x35f   : > { %9511 = vmatmul.mubr.bf16.gmra.mrb[220].mxu1 %v10610_v35  ;;  %v7299_v25 = vsel %vm12474_vm9, %v7297_v56, %v7298_v44  ;;  %v6872_v11 = vrot.slane %v6870_v48, 4  ;;  %v6875_v32 = vrot.slane %v6873_v49, 5  ;;  %v6881_v8 = vrot.slane %v6879_v15, 5 }
 0x360   : > { %v7836_v58 = vsel %vm12458_vm4, %v7831_v2, %v7835_v43  ;;  %v10643_v12 = vcombine.low %v7296_v17, %v7299_v25  ;;  %v6885_v5 = vrot.slane %v6883_v27, 4  ;;  %v6891_v50 = vrot.slane %v6889_v3, 5 }
 0x361   : > { %v10675_v59 = vcombine.low %v7826_v40, %v7836_v58  ;;  %v6876_v6 = vor.u32 %v6875_v32, %v6872_v11  ;;  %v7838_v51 = vshrl.u32 %v7600_v30, 16  ;;  %v7841_v36 = vshll.u32 %v7600_v30, 16  ;;  %v7603_v30 = vld [vmem:[#allocation2 + $0x90] sm:$0xf]  ;;  %v7605_v58 = vld [vmem:[#allocation2 + $0x98] sm:$0x1] }
 0x362   : > { %9518 = vmatprep.mubr.bf16.mxu1 %v10643_v12  ;;  %v7847_v29 = vshll.u32 %v7601_v26, 16  ;;  %v6886_v34 = vor.u32 %v6885_v5, %v6881_v8  ;;  %v7851_v45 = vshrl.u32 %v7601_v26, 16  ;;  %v7857_v0 = vshll.u32 %v7602_v60, 16  ;;  %v7604_v26 = vld [vmem:[#allocation2 + $0x94] sm:$0xf] }
 0x363   : > { %9679 = vmatprep.mubr.bf16.mxu0 %v10675_v59  ;;  %v10628_v38 = vrot.slane %v7168_v21, 9  ;;  %v6877_v22 = vrot.slane %v6876_v6, 4  ;;  %v7840_v54 = vrot.slane %v7838_v51, 4  ;;  %v7843_v37 = vrot.slane %v7841_v36, 5  ;;  %v7171_v21 = vld [vmem:[#allocation2 + $0x84] sm:$0xe] }
 0x364   : > { %v7849_v42 = vrot.slane %v7847_v29, 5  ;;  %v6887_v10 = vrot.slane %v6886_v34, 4  ;;  %v7853_v19 = vrot.slane %v7851_v45, 4  ;;  %v7859_v55 = vrot.slane %v7857_v0, 5  ;;  %v12120_v6 = vld [vmem:[#allocation2 + $0x84] sm:$0xff]  }
 0x365   : > { %v7302_v53 = vrot.slane %v7169_v63, 5  ;;  %v6882_v28 = vsel %vm12458_vm4, %v6877_v22, %v6881_v8  ;;  %v7844_v43 = vor.u32 %v7843_v37, %v7840_v54  ;;  %v7305_v18 = vrot.slane %v7170_v13, 5  ;;  %v7172_v63 = vld [vmem:[#allocation2 + $0x88] sm:$0xf] }
 0x366   : > { %v6894_v7 = vshrl.u32 %v6656_v39, 16  ;;  %9680 = vmatmul.mubr.bf16.gmra.mrb[0].mxu0 %v12118_v62  ;;  %v6892_v14 = vsel %vm12458_vm4, %v6887_v10, %v6891_v50  ;;  %v7854_v24 = vor.u32 %v7853_v19, %v7849_v42  ;;  %v6897_v56 = vshll.u32 %v6656_v39, 16  ;;  %v7173_v62 = vld [vmem:[#allocation2 + $0x8c] sm:$0x1] }
 0x367   : > { %v7303_v44 = vsel %vm12474_vm9, %v10628_v38, %v7302_v53  ;;  %v7304_v47 = vrot.slane %v7302_v53, 4  ;;  %v10611_v35 = vcombine.low %v6882_v28, %v6892_v14  ;;  %v7845_v16 = vrot.slane %v7844_v43, 4  ;;  %v6660_v28 = vld [vmem:[#allocation2 + $0x88] sm:$0xf]  ;;  %v6661_v14 = vld [vmem:[#allocation2 + $0x8c] sm:$0x1] }
 0x368   : > { %v6896_v17 = vrot.slane %v6894_v7, 4  ;;  %v7855_v2 = vrot.slane %v7854_v24, 4  ;;  %v6903_v49 = vshll.u32 %v6657_v33, 16  ;;  %v6907_v15 = vshrl.u32 %v6657_v33, 16 }
 0x369   : > { %v7306_v48 = vsel %vm12474_vm9, %v7304_v47, %v7305_v18  ;;  %9519 = vmatmul.mubr.bf16.gmra.mrb[224].mxu1 %v10611_v35  ;;  %v7850_v40 = vsel %vm12458_vm4, %v7845_v16, %v7849_v42  ;;  %v6899_v27 = vrot.slane %v6897_v56, 5  ;;  %v6913_v3 = vshll.u32 %v6658_v20, 16  ;;  %v6659_v42 = vld [vmem:[#allocation2 + $0x84] sm:$0xf]  ;;  %v7606_v35 = vld [vmem:[#allocation2 + $0x9c] sm:$0xf] }
 0x36a   : > { %v10644_v25 = vcombine.low %v7303_v44, %v7306_v48  ;;  %v7860_v12 = vsel %vm12458_vm4, %v7855_v2, %v7859_v55  ;;  %v6905_v11 = vrot.slane %v6903_v49, 5  ;;  %v6909_v32 = vrot.slane %v6907_v15, 4  ;;  %v7607_v2 = vld [vmem:[#allocation2 + $0xa0] sm:$0xf] }
 0x36b   : > { %v7862_v60 = vshrl.u32 %v7603_v30, 16  ;;  %v10676_v59 = vcombine.low %v7850_v40, %v7860_v12  ;;  %v6900_v8 = vor.u32 %v6899_v27, %v6896_v17  ;;  %v6915_v5 = vrot.slane %v6913_v3, 5  ;;  %v7608_v27 = vld [vmem:[#allocation2 + $0xa4] sm:$0x1] }
 0x36c   : > { %9526 = vmatprep.mubr.bf16.mxu1 %v10644_v25  ;;  %v7865_v50 = vshll.u32 %v7603_v30, 16  ;;  %v6910_v51 = vor.u32 %v6909_v32, %v6905_v11  ;;  %v7871_v29 = vshll.u32 %v7604_v26, 16  ;;  %v7875_v13 = vshrl.u32 %v7604_v26, 16 }
 0x36d   : > { %v7864_v36 = vrot.slane %v7862_v60, 4  ;;  %9687 = vmatprep.mubr.bf16.mxu0 %v10676_v59  ;;  %v6901_v34 = vrot.slane %v6900_v8, 4  ;;  %v7881_v0 = vshll.u32 %v7605_v58, 16  ;;  %v10629_v38 = vrot.slane %v7171_v21, 9  ;;  %v12121_v58 = vld [vmem:[#allocation2 + $0x90] sm:$0xff]  }
 0x36e   : > { %v7867_v45 = vrot.slane %v7865_v50, 5  ;;  %9688 = vmatmul.mubr.bf16.gmra.mrb[4].mxu0 %v12120_v6  ;;  %v6911_v39 = vrot.slane %v6910_v51, 4  ;;  %v7873_v22 = vrot.slane %v7871_v29, 5  ;;  %v7877_v54 = vrot.slane %v7875_v13, 4  ;;  %v7174_v60 = vld [vmem:[#allocation2 + $0x90] sm:$0xe] }
 0x36f   : > { %v7309_v37 = vrot.slane %v7172_v63, 5  ;;  %v6906_v10 = vsel %vm12458_vm4, %v6901_v34, %v6905_v11  ;;  %v7883_v55 = vrot.slane %v7881_v0, 5  ;;  %v7312_v53 = vrot.slane %v7173_v62, 5  ;;  %v7175_v63 = vld [vmem:[#allocation2 + $0x94] sm:$0xf] }
 0x370   : > { %v7868_v19 = vor.u32 %v7867_v45, %v7864_v36  ;;  %v6916_v43 = vsel %vm12458_vm4, %v6911_v39, %v6915_v5  ;;  %v7878_v18 = vor.u32 %v7877_v54, %v7873_v22  ;;  %v6918_v47 = vshrl.u32 %v6659_v42, 16  ;;  %v7176_v34 = vld [vmem:[#allocation2 + $0x98] sm:$0x1] }
 0x371   : > { %v7310_v33 = vsel %vm12474_vm9, %v10629_v38, %v7309_v37  ;;  %v7311_v7 = vrot.slane %v7309_v37, 4  ;;  %v10612_v24 = vcombine.low %v6906_v10, %v6916_v43  ;;  %v6921_v20 = vshll.u32 %v6659_v42, 16 }
 0x372   : > { %v7869_v44 = vrot.slane %v7868_v19, 4  ;;  %v7879_v16 = vrot.slane %v7878_v18, 4  ;;  %v6927_v56 = vshll.u32 %v6660_v28, 16  ;;  %v6931_v30 = vshrl.u32 %v6660_v28, 16  ;;  %v14613_v48 = vpop.f32.mrb[164].mxu0 }
 0x373   : > { %v7313_v17 = vsel %vm12474_vm9, %v7311_v7, %v7312_v53  ;;  %9527 = vmatmul.mubr.bf16.gmra.mrb[228].mxu1 %v10612_v24  ;;  %v6920_v40 = vrot.slane %v6918_v47, 4  ;;  %v6923_v25 = vrot.slane %v6921_v20, 5  ;;  %v14617_v3 = vpop.f32.mrb[165].mxu0  ;;  %v6937_v32 = vshll.u32 %v6661_v14, 16  ;;  %v6662_v47 = vld [vmem:[#allocation2 + $0x90] sm:$0xf] }
 0x374   : > { %v7874_v49 = vsel %vm12458_vm4, %v7869_v44, %v7873_v22  ;;  %v10645_v15 = vcombine.low %v7310_v33, %v7313_v17  ;;  %v7884_v26 = vsel %vm12458_vm4, %v7879_v16, %v7883_v55  ;;  %v6929_v12 = vrot.slane %v6927_v56, 5  ;;  %v14621_v21 = vpop.f32.mrb[166].mxu0  ;;  %v14638_v33 = vld [vmem:[%s15500_s4] ss:$0 sm:$0xff] }
 0x375   : > { %v6933_v11 = vrot.slane %v6931_v30, 4  ;;  %v10677_v59 = vcombine.low %v7874_v49, %v7884_v26  ;;  %v6924_v8 = vor.u32 %v6923_v25, %v6920_v40  ;;  %v7886_v5 = vshrl.u32 %v7606_v35, 16  ;;  %v14623_v6 = vpop.f32.mrb[132].mxu1  ;;  %v14625_v51 = vpop.f32.mrb[167].mxu0  ;;  %v6664_v40 = vld [vmem:[#allocation2 + $0x98] sm:$0x1] }
 0x376   : > { %9534 = vmatprep.mubr.bf16.mxu1 %v10645_v15  ;;  %v7889_v50 = vshll.u32 %v7606_v35, 16  ;;  %v6939_v29 = vrot.slane %v6937_v32, 5  ;;  %v7895_v13 = vshll.u32 %v7607_v2, 16  ;;  %v7899_v62 = vshrl.u32 %v7607_v2, 16  ;;  %v14627_v45 = vpop.f32.mrb[133].mxu1 }
 0x377   : > { %v6934_v36 = vor.u32 %v6933_v11, %v6929_v12  ;;  %9695 = vmatprep.mubr.bf16.mxu0 %v10677_v59  ;;  %v6925_v0 = vrot.slane %v6924_v8, 4  ;;  %v7888_v38 = vrot.slane %v7886_v5, 4  ;;  %v7905_v22 = vshll.u32 %v7608_v27, 16  ;;  %v14629_v54 = vpop.f32.mrb[134].mxu1  ;;  %v6663_v15 = vld [vmem:[#allocation2 + $0x94] sm:$0xf] }
 0x378   : > { %v7891_v39 = vrot.slane %v7889_v50, 5  ;;  %9696 = vmatmul.mubr.bf16.gmra.mrb[8].mxu0 %v12121_v58  ;;  %v7897_v42 = vrot.slane %v7895_v13, 5  ;;  %v7901_v10 = vrot.slane %v7899_v62, 4  ;;  %v10630_v19 = vrot.slane %v7174_v60, 9  ;;  %v14631_v55 = vpop.f32.mrb[135].mxu1 }
 0x379   : > { %v6935_v37 = vrot.slane %v6934_v36, 4  ;;  %v6930_v53 = vsel %vm12458_vm4, %v6925_v0, %v6929_v12  ;;  %v7907_v43 = vrot.slane %v7905_v22, 5  ;;  %v7316_v18 = vrot.slane %v7175_v63, 5  ;;  %v7609_v58 = vld [vmem:[#allocation2 + $0xa8] sm:$0xf] }
 0x37a   : > { %v7892_v28 = vor.u32 %v7891_v39, %v7888_v38  ;;  %v7902_v14 = vor.u32 %v7901_v10, %v7897_v42  ;;  %v7319_v24 = vrot.slane %v7176_v34, 5  ;;  %v11285_v44 = vadd.f32 %v14381_v23, %v14373_v41  ;;  %v7610_v32 = vld [vmem:[#allocation2 + $0xac] sm:$0xf]  ;;  %v7611_v60 = vld [vmem:[#allocation2 + $0xb0] sm:$0x1] }
 0x37b   : > { %v6940_v7 = vsel %vm12458_vm4, %v6935_v37, %v6939_v29  ;;  %v7317_v16 = vsel %vm12474_vm9, %v10630_v19, %v7316_v18  ;;  %v7318_v17 = vrot.slane %v7316_v18, 4  ;;  %v11288_v2 = vadd.f32 %v14401_v57, %v14388_v4  ;;  %v7177_v38 = vld [vmem:[#allocation2 + $0x9c] sm:$0xe]  ;;  %v7178_v19 = vld [vmem:[#allocation2 + $0xa0] sm:$0xf] }
 0x37c   : > { %v10613_v20 = vcombine.low %v6930_v53, %v6940_v7  ;;  %v7893_v35 = vrot.slane %v7892_v28, 4  ;;  %v7903_v56 = vrot.slane %v7902_v14, 4  ;;  %v9135_v30 = vadd.f32 %v11285_v44, %v14638_v33  ;;  %v14651_v25 = vpop.f32.mrb[168].mxu0  ;;  %v7179_v7 = vld [vmem:[#allocation2 + $0xa4] sm:$0x1] }
 0x37d   : > { %v11397_v49 = vadd.f32 %v14581_v9, %v14577_v52  ;;  %v7320_v23 = vsel %vm12474_vm9, %v7318_v17, %v7319_v24  ;;  %v11400_v27 = vadd.f32 %v14589_v31, %v14583_v46  ;;  %v6942_v26 = vshrl.u32 %v6662_v47, 16  ;;  %v14659_v4 = vpop.f32.mrb[136].mxu1  ;;  %v14661_v57 = vpop.f32.mrb[169].mxu0  ;;  %v12123_v31 = vld [vmem:[#allocation2 + $0x9c] sm:$0xff]  }
 0x37e   : > { %9535 = vmatmul.mubr.bf16.gmra.mrb[232].mxu1 %v10613_v20  ;;  %v7898_v41 = vsel %vm12458_vm4, %v7893_v35, %v7897_v42  ;;  %v7908_v52 = vsel %vm12458_vm4, %v7903_v56, %v7907_v43  ;;  %v10646_v9 = vcombine.low %v7317_v16, %v7320_v23  ;;  %v9138_v12 = vadd.f32 %v11288_v2, %v14638_v33  ;;  %v14668_v59 = vpop.f32.mrb[137].mxu1  ;;  %v14670_v8 = vpop.f32.mrb[170].mxu0 }
 0x37f   : > { %v14666_v11 = vadd.f32 %v11397_v49, %v9135_v30  ;;  %v10678_v46 = vcombine.low %v7898_v41, %v7908_v52  ;;  %v6944_v5 = vrot.slane %v6942_v26, 4  ;;  %v6945_v50 = vshll.u32 %v6662_v47, 16  ;;  %v14672_v36 = vpop.f32.mrb[138].mxu1  ;;  %v14674_v29 = vpop.f32.mrb[171].mxu0 }
 0x380   : > { %v6951_v63 = vshll.u32 %v6663_v15, 16  ;;  %9542 = vmatprep.mubr.bf16.mxu1 %v10646_v9  ;;  %v14676_v13 = vadd.f32 %v11400_v27, %v9138_v12  ;;  %v6955_v62 = vshrl.u32 %v6663_v15, 16  ;;  %v6961_v34 = vshll.u32 %v6664_v40, 16  ;;  %v14678_v39 = vpop.f32.mrb[139].mxu1  ;;  %v6665_v9 = vld [vmem:[#allocation2 + $0x9c] sm:$0xf] }
 0x381   : > { %15613 = vst [vmem:[#allocation30_spill] sm:$0xff] %v14666_v11  ;;  %v7910_v0 = vshrl.u32 %v7609_v58, 16  ;;  %9703 = vmatprep.mubr.bf16.mxu0 %v10678_v46  ;;  %v6947_v22 = vrot.slane %v6945_v50, 5  ;;  %v7913_v42 = vshll.u32 %v7609_v58, 16  ;;  %v7919_v10 = vshll.u32 %v7610_v32, 16 }
 0x382   : > { %15614 = vst [vmem:[#allocation34_spill] sm:$0xff] %v14676_v13  ;;  %v6953_v37 = vrot.slane %v6951_v63, 5  ;;  %9704 = vmatmul.mubr.bf16.gmra.mrb[12].mxu0 %v12123_v31  ;;  %v6957_v53 = vrot.slane %v6955_v62, 4  ;;  %v6963_v28 = vrot.slane %v6961_v34, 5  ;;  %v7923_v18 = vshrl.u32 %v7610_v32, 16 }
 0x383   : > { %v7912_v43 = vrot.slane %v7910_v0, 4  ;;  %v6948_v14 = vor.u32 %v6947_v22, %v6944_v5  ;;  %v7915_v24 = vrot.slane %v7913_v42, 5  ;;  %v7921_v44 = vrot.slane %v7919_v10, 5  ;;  %v6666_v31 = vld [vmem:[#allocation2 + $0xa0] sm:$0xf] }
 0x384   : > { %v7929_v47 = vshll.u32 %v7611_v60, 16  ;;  %v6958_v20 = vor.u32 %v6957_v53, %v6953_v37  ;;  %v7925_v35 = vrot.slane %v7923_v18, 4  ;;  %v10631_v16 = vrot.slane %v7177_v38, 9  ;;  %v6667_v5 = vld [vmem:[#allocation2 + $0xa4] sm:$0x1] }
 0x385   : > { %v7323_v17 = vrot.slane %v7178_v19, 5  ;;  %v6949_v56 = vrot.slane %v6948_v14, 4  ;;  %v7916_v30 = vor.u32 %v7915_v24, %v7912_v43  ;;  %v7326_v49 = vrot.slane %v7179_v7, 5  ;;  %v7612_v50 = vld [vmem:[#allocation2 + $0xb4] sm:$0xf]  ;;  %v12124_v19 = vld [vmem:[#allocation2 + $0xa8] sm:$0xff]  }
 0x386   : > { %v7931_v2 = vrot.slane %v7929_v47, 5  ;;  %v6959_v15 = vrot.slane %v6958_v20, 4  ;;  %v7926_v40 = vor.u32 %v7925_v35, %v7921_v44  ;;  %v14686_v58 = vadd.f32 %v14617_v3, %v14613_v48  ;;  %v7613_v63 = vld [vmem:[#allocation2 + $0xb8] sm:$0xf]  ;;  %v7614_v38 = vld [vmem:[#allocation2 + $0xbc] sm:$0x1] }
 0x387   : > { %v7324_v41 = vsel %vm12474_vm9, %v10631_v16, %v7323_v17  ;;  %v7325_v23 = vrot.slane %v7323_v17, 4  ;;  %v6954_v27 = vsel %vm12458_vm4, %v6949_v56, %v6953_v37  ;;  %v7917_v26 = vrot.slane %v7916_v30, 4  ;;  %v7180_v22 = vld [vmem:[#allocation2 + $0xa8] sm:$0xe]  ;;  %v7181_v24 = vld [vmem:[#allocation2 + $0xac] sm:$0xf] }
 0x388   : > { %v14690_v52 = vadd.f32 %v14627_v45, %v14623_v6  ;;  %v6964_v12 = vsel %vm12458_vm4, %v6959_v15, %v6963_v28  ;;  %v7927_v32 = vrot.slane %v7926_v40, 4  ;;  %v14698_v46 = vadd.f32 %v14625_v51, %v14621_v21  ;;  %v14700_v48 = vpop.f32.mrb[140].mxu1  ;;  %v7182_v15 = vld [vmem:[#allocation2 + $0xb0] sm:$0x1]  ;;  %v8087_v13 = vld [vmem:[#allocation2 + $0x20] sm:$0x1] }
 0x389   : > { %v7327_v60 = vsel %vm12474_vm9, %v7325_v23, %v7326_v49  ;;  %v10614_v3 = vcombine.low %v6954_v27, %v6964_v12  ;;  %v7922_v6 = vsel %vm12458_vm4, %v7917_v26, %v7921_v44  ;;  %v14704_v62 = vpop.f32.mrb[141].mxu1  ;;  %v14710_v21 = vadd.f32 %v14631_v55, %v14629_v54 }
 0x38a   : > { %v10647_v45 = vcombine.low %v7324_v41, %v7327_v60  ;;  %v7932_v34 = vsel %vm12458_vm4, %v7927_v32, %v7931_v2  ;;  %v6966_v51 = vshrl.u32 %v6665_v9, 16  ;;  %v6969_v0 = vshll.u32 %v6665_v9, 16  ;;  %v14712_v37 = vpop.f32.mrb[172].mxu0  ;;  %v14714_v42 = vpop.f32.mrb[142].mxu1 }
 0x38b   : > { %9543 = vmatmul.mubr.bf16.gmra.mrb[236].mxu1 %v10614_v3  ;;  %v10679_v10 = vcombine.low %v7922_v6, %v7932_v34  ;;  %v6975_v53 = vshll.u32 %v6666_v31, 16  ;;  %v6979_v28 = vshrl.u32 %v6666_v31, 16  ;;  %v6985_v43 = vshll.u32 %v6667_v5, 16  ;;  %v14716_v18 = vpop.f32.mrb[173].mxu0  ;;  %v14718_v7 = vpop.f32.mrb[143].mxu1 }
 0x38c   : > { %9550 = vmatprep.mubr.bf16.mxu1 %v10647_v45  ;;  %v6968_v54 = vrot.slane %v6966_v51, 4  ;;  %v6971_v55 = vrot.slane %v6969_v0, 5  ;;  %v7934_v14 = vshrl.u32 %v7612_v50, 16  ;;  %v14720_v44 = vpop.f32.mrb[174].mxu0  ;;  %v7937_v16 = vshll.u32 %v7612_v50, 16 }
 0x38d   : > { %9711 = vmatprep.mubr.bf16.mxu0 %v10679_v10  ;;  %v6977_v47 = vrot.slane %v6975_v53, 5  ;;  %v6981_v20 = vrot.slane %v6979_v28, 4  ;;  %v6987_v35 = vrot.slane %v6985_v43, 5  ;;  %v14722_v17 = vpop.f32.mrb[175].mxu0  ;;  %v7943_v2 = vshll.u32 %v7613_v63, 16 }
 0x38e   : > { %9712 = vmatmul.mubr.bf16.gmra.mrb[16].mxu0 %v12124_v19  ;;  %v6972_v56 = vor.u32 %v6971_v55, %v6968_v54  ;;  %v7936_v30 = vrot.slane %v7934_v14, 4  ;;  %v7947_v49 = vshrl.u32 %v7613_v63, 16  ;;  %v7939_v41 = vrot.slane %v7937_v16, 5  ;;  %v6669_v10 = vld [vmem:[#allocation2 + $0xac] sm:$0xf] }
 0x38f   : > { %v6982_v40 = vor.u32 %v6981_v20, %v6977_v47  ;;  %v7953_v23 = vshll.u32 %v7614_v38, 16  ;;  %v10632_v27 = vrot.slane %v7180_v22, 9  ;;  %v7945_v9 = vrot.slane %v7943_v2, 5  ;;  %v6668_v22 = vld [vmem:[#allocation2 + $0xa8] sm:$0xf] }
 0x390   : > { %v6973_v26 = vrot.slane %v6972_v56, 4  ;;  %v7949_v12 = vrot.slane %v7947_v49, 4  ;;  %v7330_v32 = vrot.slane %v7181_v24, 5  ;;  %v7940_v31 = vor.u32 %v7939_v41, %v7936_v30  ;;  %v6670_v54 = vld [vmem:[#allocation2 + $0xb0] sm:$0x1] }
 0x391   : > { %v6983_v60 = vrot.slane %v6982_v40, 4  ;;  %v7955_v5 = vrot.slane %v7953_v23, 5  ;;  %v7333_v3 = vrot.slane %v7182_v15, 5  ;;  %v14732_v0 = vadd.f32 %v14661_v57, %v14651_v25  ;;  %v7615_v55 = vld [vmem:[#allocation2 + $0xc0] sm:$0xf]  ;;  %v12126_v15 = vld [vmem:[#allocation2 + $0xb4] sm:$0xff]  }
 0x392   : > { %v6978_v6 = vsel %vm12458_vm4, %v6973_v26, %v6977_v47  ;;  %v7950_v45 = vor.u32 %v7949_v12, %v7945_v9  ;;  %v7331_v50 = vsel %vm12474_vm9, %v10632_v27, %v7330_v32  ;;  %v7332_v63 = vrot.slane %v7330_v32, 4  ;;  %v7617_v24 = vld [vmem:[#allocation2 + $0xc8] sm:$0x1]  ;;  %v7183_v16 = vld [vmem:[#allocation2 + $0xb4] sm:$0xe] }
 0x393   : > { %v6988_v34 = vsel %vm12458_vm4, %v6983_v60, %v6987_v35  ;;  %v7941_v51 = vrot.slane %v7940_v31, 4  ;;  %v14736_v38 = vadd.f32 %v14668_v59, %v14659_v4  ;;  %v14742_v43 = vadd.f32 %v14674_v29, %v14670_v8  ;;  %v7616_v59 = vld [vmem:[#allocation2 + $0xc4] sm:$0xf] }
 0x394   : > { %v10615_v19 = vcombine.low %v6978_v6, %v6988_v34  ;;  %v7951_v53 = vrot.slane %v7950_v45, 4  ;;  %v7334_v28 = vsel %vm12474_vm9, %v7332_v63, %v7333_v3  ;;  %v14744_v14 = vpop.f32.mrb[144].mxu1  ;;  %v14750_v57 = vadd.f32 %v14678_v39, %v14672_v36  ;;  %v7184_v36 = vld [vmem:[#allocation2 + $0xb8] sm:$0xf] }
 0x395   : > { %v7946_v25 = vsel %vm12458_vm4, %v7941_v51, %v7945_v9  ;;  %v10648_v4 = vcombine.low %v7331_v50, %v7334_v28  ;;  %v14752_v47 = vpop.f32.mrb[145].mxu1  ;;  %v6990_v29 = vshrl.u32 %v6668_v22, 16  ;;  %v6993_v20 = vshll.u32 %v6668_v22, 16  ;;  %v7185_v50 = vld [vmem:[#allocation2 + $0xbc] sm:$0x1] }
 0x396   : > { %9551 = vmatmul.mubr.bf16.gmra.mrb[240].mxu1 %v10615_v19  ;;  %v7956_v8 = vsel %vm12458_vm4, %v7951_v53, %v7955_v5  ;;  %v6999_v35 = vshll.u32 %v6669_v10, 16  ;;  %v14756_v56 = vpop.f32.mrb[146].mxu1  ;;  %v7003_v2 = vshrl.u32 %v6669_v10, 16  ;;  %v7009_v49 = vshll.u32 %v6670_v54, 16 }
 0x397   : > { %v10680_v30 = vcombine.low %v7946_v25, %v7956_v8  ;;  %9558 = vmatprep.mubr.bf16.mxu1 %v10648_v4  ;;  %v14758_v39 = vpop.f32.mrb[147].mxu1  ;;  %v6992_v40 = vrot.slane %v6990_v29, 4  ;;  %v6995_v41 = vrot.slane %v6993_v20, 5  ;;  %v7958_v27 = vshrl.u32 %v7615_v55, 16 }
 0x398   : > { %v7001_v23 = vrot.slane %v6999_v35, 5  ;;  %v14760_v26 = vpop.f32.mrb[176].mxu0  ;;  %v7005_v9 = vrot.slane %v7003_v2, 4  ;;  %v7011_v12 = vrot.slane %v7009_v49, 5  ;;  %v7961_v32 = vshll.u32 %v7615_v55, 16 }
 0x399   : > { %9719 = vmatprep.mubr.bf16.mxu0 %v10680_v30  ;;  %v7967_v60 = vshll.u32 %v7616_v59, 16  ;;  %v14762_v31 = vpop.f32.mrb[177].mxu0  ;;  %v6996_v5 = vor.u32 %v6995_v41, %v6992_v40  ;;  %v7960_v3 = vrot.slane %v7958_v27, 4  ;;  %v7971_v6 = vshrl.u32 %v7616_v59, 16  ;;  %v7186_v27 = vld [vmem:[#allocation2 + $0xc0] sm:$0xe] }
 0x39a   : > { %9720 = vmatmul.mubr.bf16.gmra.mrb[20].mxu0 %v12126_v15  ;;  %v7977_v45 = vshll.u32 %v7617_v24, 16  ;;  %v14764_v63 = vpop.f32.mrb[178].mxu0  ;;  %v7006_v34 = vor.u32 %v7005_v9, %v7001_v23  ;;  %v7963_v51 = vrot.slane %v7961_v32, 5  ;;  %v10633_v10 = vrot.slane %v7183_v16, 9  ;;  %v6671_v16 = vld [vmem:[#allocation2 + $0xb4] sm:$0xf] }
 0x39b   : > { %v7969_v22 = vrot.slane %v7967_v60, 5  ;;  %v14766_v19 = vpop.f32.mrb[179].mxu0  ;;  %v6997_v53 = vrot.slane %v6996_v5, 4  ;;  %v7973_v28 = vrot.slane %v7971_v6, 4  ;;  %v7337_v55 = vrot.slane %v7184_v36, 5 }
 0x39c   : > { %v7979_v54 = vrot.slane %v7977_v45, 5  ;;  %v7007_v25 = vrot.slane %v7006_v34, 4  ;;  %v7964_v4 = vor.u32 %v7963_v51, %v7960_v3  ;;  %v7340_v8 = vrot.slane %v7185_v50, 5  ;;  %v7188_v5 = vld [vmem:[#allocation2 + $0xc8] sm:$0x1] }
 0x39d   : > { %v14770_v59 = vadd.f32 %v14716_v18, %v14712_v37  ;;  %v7002_v24 = vsel %vm12458_vm4, %v6997_v53, %v7001_v23  ;;  %v7974_v29 = vor.u32 %v7973_v28, %v7969_v22  ;;  %v7338_v20 = vsel %vm12474_vm9, %v10633_v10, %v7337_v55  ;;  %v6672_v18 = vld [vmem:[#allocation2 + $0xb8] sm:$0xf]  ;;  %v6673_v23 = vld [vmem:[#allocation2 + $0xbc] sm:$0x1]  ;;  %v6674_v51 = vld [vmem:[#allocation2 + $0xc0] sm:$0xf] }
 0x39e   : > { %v7339_v35 = vrot.slane %v7337_v55, 4  ;;  %v7012_v30 = vsel %vm12458_vm4, %v7007_v25, %v7011_v12  ;;  %v7965_v2 = vrot.slane %v7964_v4, 4  ;;  %v14780_v49 = vadd.f32 %v14704_v62, %v14700_v48  ;;  %v12127_v53 = vld [vmem:[#allocation2 + $0xc0] sm:$0xff]  }
 0x39f   : > { %v14784_v37 = vadd.f32 %v14722_v17, %v14720_v44  ;;  %v10616_v36 = vcombine.low %v7002_v24, %v7012_v30  ;;  %v7975_v15 = vrot.slane %v7974_v29, 4  ;;  %v14790_v41 = vadd.f32 %v14718_v7, %v14714_v42  ;;  %v7187_v17 = vld [vmem:[#allocation2 + $0xc4] sm:$0xf] }
 0x3a0   : > { %v7341_v40 = vsel %vm12474_vm9, %v7339_v35, %v7340_v8  ;;  %v14792_v9 = vpop.f32.mrb[148].mxu1  ;;  %v7970_v48 = vsel %vm12458_vm4, %v7965_v2, %v7969_v22  ;;  %v7014_v44 = vshrl.u32 %v6671_v16, 16  ;;  %v7017_v42 = vshll.u32 %v6671_v16, 16  ;;  %v6675_v2 = vld [vmem:[#allocation2 + $0xc4] sm:$0xf] }
 0x3a1   : > { %v10649_v62 = vcombine.low %v7338_v20, %v7341_v40  ;;  %v14796_v12 = vpop.f32.mrb[180].mxu0  ;;  %v14798_v32 = vpop.f32.mrb[149].mxu1  ;;  %9559 = vmatmul.mubr.bf16.gmra.mrb[244].mxu1 %v10616_v36  ;;  %v7980_v60 = vsel %vm12458_vm4, %v7975_v15, %v7979_v54  ;;  %v7023_v7 = vshll.u32 %v6672_v18, 16  ;;  %v7027_v34 = vshrl.u32 %v6672_v18, 16  ;;  %v7618_v40 = vld [vmem:[#allocation2 + $0xcc] sm:$0xf] }
 0x3a2   : > { %v14802_v3 = vpop.f32.mrb[181].mxu0  ;;  %v14804_v6 = vpop.f32.mrb[150].mxu1  ;;  %v10681_v45 = vcombine.low %v7970_v48, %v7980_v60  ;;  %v7016_v50 = vrot.slane %v7014_v44, 4  ;;  %v7019_v28 = vrot.slane %v7017_v42, 5  ;;  %v7033_v54 = vshll.u32 %v6673_v23, 16 }
 0x3a3   : > { %9566 = vmatprep.mubr.bf16.mxu1 %v10649_v62  ;;  %v14806_v22 = vpop.f32.mrb[182].mxu0  ;;  %v14808_v10 = vpop.f32.mrb[151].mxu1  ;;  %v7025_v55 = vrot.slane %v7023_v7, 5  ;;  %v7344_v25 = vrot.slane %v7187_v17, 5  ;;  %v7029_v8 = vrot.slane %v7027_v34, 4  ;;  %v10634_v24 = vrot.slane %v7186_v27, 9 }
 0x3a4   : > { %v14810_v4 = vpop.f32.mrb[183].mxu0  ;;  %9727 = vmatprep.mubr.bf16.mxu0 %v10681_v45  ;;  %v14814_v29 = vadd.f32 %v14762_v31, %v14760_v26  ;;  %v7020_v20 = vor.u32 %v7019_v28, %v7016_v50  ;;  %v7347_v16 = vrot.slane %v7188_v5, 5  ;;  %v14818_v30 = vadd.f32 %v14752_v47, %v14744_v14  ;;  %v6676_v26 = vld [vmem:[#allocation2 + $0xc8] sm:$0x1]  ;;  %v7619_v62 = vld [vmem:[#allocation2 + $0xd0] sm:$0xf] }
 0x3a5   : > { %9728 = vmatmul.mubr.bf16.gmra.mrb[24].mxu0 %v12127_v53  ;;  %v7346_v35 = vrot.slane %v7344_v25, 4  ;;  %v7030_v18 = vor.u32 %v7029_v8, %v7025_v55  ;;  %v14822_v36 = vadd.f32 %v14766_v19, %v14764_v63  ;;  %v14826_v15 = vadd.f32 %v14758_v39, %v14756_v56  ;;  %v7620_v19 = vld [vmem:[#allocation2 + $0xd4] sm:$0x1]  ;;  %v8085_v5 = vld [vmem:[#allocation2 + $0x18] sm:$0xe] }
 0x3a6   : > { %v7038_v31 = vshrl.u32 %v6674_v51, 16  ;;  %v7021_v23 = vrot.slane %v7020_v20, 4  ;;  %v7035_v27 = vrot.slane %v7033_v54, 5  ;;  %v7041_v48 = vshll.u32 %v6674_v51, 16 }
 0x3a7   : > { %v7031_v44 = vrot.slane %v7030_v18, 4  ;;  %v7345_v14 = vsel %vm12474_vm9, %v10634_v24, %v7344_v25  ;;  %v7348_v47 = vsel %vm12474_vm9, %v7346_v35, %v7347_v16  ;;  %v7047_v42 = vshll.u32 %v6675_v2, 16  ;;  %v8086_v35 = vld [vmem:[#allocation2 + $0x1c] sm:$0xf] }
 0x3a8   : > { %v7040_v63 = vrot.slane %v7038_v31, 4  ;;  %v7026_v39 = vsel %vm12458_vm4, %v7021_v23, %v7025_v55  ;;  %v7043_v60 = vrot.slane %v7041_v48, 5  ;;  %v7051_v7 = vshrl.u32 %v6675_v2, 16 }
 0x3a9   : > { %v14832_v17 = vpop.f32.mrb[184].mxu0  ;;  %v7036_v34 = vsel %vm12458_vm4, %v7031_v44, %v7035_v27  ;;  %v7057_v51 = vshll.u32 %v6676_v26, 16  ;;  %v7982_v53 = vshrl.u32 %v7618_v40, 16  ;;  %v7985_v28 = vshll.u32 %v7618_v40, 16 }
 0x3aa   : > { %v14834_v56 = vpop.f32.mrb[152].mxu1  ;;  %v14838_v45 = vpop.f32.mrb[185].mxu0  ;;  %v10617_v8 = vcombine.low %v7026_v39, %v7036_v34  ;;  %v7044_v55 = vor.u32 %v7043_v60, %v7040_v63  ;;  %v7049_v24 = vrot.slane %v7047_v42, 5  ;;  %v7053_v20 = vrot.slane %v7051_v7, 4 }
 0x3ab   : > { %v14840_v50 = vpop.f32.mrb[153].mxu1  ;;  %v14844_v54 = vpop.f32.mrb[186].mxu0  ;;  %v10650_v18 = vcombine.low %v7345_v14, %v7348_v47  ;;  %v7984_v31 = vrot.slane %v7982_v53, 4  ;;  %v7987_v23 = vrot.slane %v7985_v28, 5  ;;  %v7991_v27 = vshll.u32 %v7619_v62, 16 }
 0x3ac   : > { %v14846_v25 = vpop.f32.mrb[154].mxu1  ;;  %v14848_v16 = vpop.f32.mrb[187].mxu0  ;;  %9567 = vmatmul.mubr.bf16.gmra.mrb[248].mxu1 %v10617_v8  ;;  %v7045_v26 = vrot.slane %v7044_v55, 4  ;;  %v7054_v40 = vor.u32 %v7053_v20, %v7049_v24  ;;  %v7995_v48 = vshrl.u32 %v7619_v62, 16  ;;  %v8001_v44 = vshll.u32 %v7620_v19, 16 }
 0x3ad   : > { %v14850_v2 = vpop.f32.mrb[155].mxu1  ;;  %9574 = vmatprep.mubr.bf16.mxu1 %v10650_v18  ;;  %v7988_v39 = vor.u32 %v7987_v23, %v7984_v31  ;;  %v7993_v63 = vrot.slane %v7991_v27, 5  ;;  %v10683_v60 = vrot.slane %v8085_v5, 9  ;;  %v8183_v42 = vrot.slane %v8086_v35, 5  ;;  %v8089_v35 = vld [vmem:[#allocation2 + $0x28] sm:$0xf] }
 0x3ae   : > { %v7050_v7 = vsel %vm12458_vm4, %v7045_v26, %v7049_v24  ;;  %v7055_v34 = vrot.slane %v7054_v40, 4  ;;  %v7059_v11 = vrot.slane %v7057_v51, 5  ;;  %v7997_v14 = vrot.slane %v7995_v48, 4  ;;  %v8088_v24 = vld [vmem:[#allocation2 + $0x24] sm:$0xe] }
 0x3af   : > { %v7989_v47 = vrot.slane %v7988_v39, 4  ;;  %v8003_v53 = vrot.slane %v8001_v44, 5  ;;  %v8185_v28 = vrot.slane %v8183_v42, 4  ;;  %v8186_v8 = vrot.slane %v8087_v13, 5  ;;  %v8091_v44 = vld [vmem:[#allocation2 + $0x30] sm:$0xe] }
 0x3b0   : > { %v7060_v19 = vsel %vm12458_vm4, %v7055_v34, %v7059_v11  ;;  %v7998_v20 = vor.u32 %v7997_v14, %v7993_v63  ;;  %v14862_v5 = vadd.f32 %v14802_v3, %v14796_v12  ;;  %v14866_v51 = vadd.f32 %v14798_v32, %v14792_v9  ;;  %v8090_v12 = vld [vmem:[#allocation2 + $0x2c] sm:$0x1]  ;;  %v8092_v3 = vld [vmem:[#allocation2 + $0x34] sm:$0xf] }
 0x3b1   : > { %v14854_v55 = vpop.f32.mrb[188].mxu0  ;;  %v8184_v31 = vsel %vm12474_vm9, %v10683_v60, %v8183_v42  ;;  %v8187_v23 = vsel %vm12474_vm9, %v8185_v28, %v8186_v8  ;;  %v14874_v11 = vadd.f32 %v14810_v4, %v14806_v22  ;;  %v10618_v9 = vcombine.low %v7050_v7, %v7060_v19  ;;  %v8093_v22 = vld [vmem:[#allocation2 + $0x38] sm:$0x1]  ;;  %v12129_v14 = vld [vmem:[#allocation2 + $0xcc] sm:$0xff]  }
 0x3b2   : > { %v14856_v62 = vpop.f32.mrb[156].mxu1  ;;  %v11438_v18 = vpop.f32.mrb[189].mxu0  ;;  %v7994_v32 = vsel %vm12458_vm4, %v7989_v47, %v7993_v63  ;;  %v7999_v40 = vrot.slane %v7998_v20, 4  ;;  %v14880_v48 = vadd.f32 %v14808_v10, %v14804_v6  ;;  %v10699_v42 = vcombine.low %v8184_v31, %v8187_v23  ;;  %v8095_v63 = vld [vmem:[#allocation2 + $0x40] sm:$0xf] }
 0x3b3   : > { %v11326_v13 = vpop.f32.mrb[157].mxu1  ;;  %v11440_v27 = vpop.f32.mrb[190].mxu0  ;;  %v8190_v34 = vrot.slane %v8089_v35, 5  ;;  %v10684_v7 = vrot.slane %v8088_v24, 9  ;;  %v8193_v28 = vrot.slane %v8090_v12, 5  ;;  %v8197_v8 = vrot.slane %v8092_v3, 5 }
 0x3b4   : > { %v11328_v26 = vpop.f32.mrb[158].mxu1  ;;  %v11441_v39 = vpop.f32.mrb[191].mxu0  ;;  %9575 = vmatmul.mubr.bf16.gmra.mrb[252].mxu1 %v10618_v9  ;;  %v8004_v4 = vsel %vm12458_vm4, %v7999_v40, %v8003_v53  ;;  %v10685_v6 = vrot.slane %v8091_v44, 9  ;;  %v14886_v10 = vadd.f32 %v14838_v45, %v14832_v17  ;;  %v8200_v35 = vrot.slane %v8093_v22, 5  ;;  %v8098_v45 = vld [vmem:[#allocation2 + $0x4c] sm:$0xf] }
 0x3b5   : > { %v11329_v60 = vpop.f32.mrb[159].mxu1  ;;  %v10682_v47 = vcombine.low %v7994_v32, %v8004_v4  ;;  %11803 = vmatprep.mubr.bf16.mxu1 %v10699_v42  ;;  %v8192_v19 = vrot.slane %v8190_v34, 4  ;;  %v8199_v20 = vrot.slane %v8197_v8, 4  ;;  %v14890_v31 = vadd.f32 %v14840_v50, %v14834_v56  ;;  %v8094_v9 = vld [vmem:[#allocation2 + $0x3c] sm:$0xe] }
 0x3b6   : > { %v14894_v1 = vadd.f32 %v14848_v16, %v14844_v54  ;;  %v14900_v24 = vadd.f32 %v14850_v2, %v14846_v25  ;;  %v8204_v17 = vrot.slane %v8095_v63, 5  ;;  %v8191_v54 = vsel %vm12474_vm9, %v10684_v7, %v8190_v34  ;;  %v8096_v32 = vld [vmem:[#allocation2 + $0x44] sm:$0x1]  ;;  %v8097_v42 = vld [vmem:[#allocation2 + $0x48] sm:$0xe] }
 0x3b7   : > { %9735 = vmatprep.mubr.bf16.mxu0 %v10682_v47  ;;  %v8194_v53 = vsel %vm12474_vm9, %v8192_v19, %v8193_v28  ;;  %v8201_v56 = vsel %vm12474_vm9, %v8199_v20, %v8200_v35  ;;  %v8198_v16 = vsel %vm12474_vm9, %v10685_v6, %v8197_v8  ;;  %v8211_v22 = vrot.slane %v8098_v45, 5  ;;  %v8099_v47 = vld [vmem:[#allocation2 + $0x50] sm:$0x1]  ;;  %v8101_v19 = vld [vmem:[#allocation2 + $0x58] sm:$0xf] }
 0x3b8   : > { %9736 = vmatmul.mubr.bf16.gmra.mrb[28].mxu0 %v12129_v14  ;;  %v10700_v40 = vcombine.low %v8191_v54, %v8194_v53  ;;  %v10701_v44 = vcombine.low %v8198_v16, %v8201_v56  ;;  %v14909_v4 = vadd.f32 %v11438_v18, %v14854_v55  ;;  %v8206_v63 = vrot.slane %v8204_v17, 4  ;;  %v14918_v53 = vld [vmem:[#allocation2 + $0x64] sm:$0xf] }
 0x3b9   : > { %v11443_v23 = vpop.f32.mrb[192].mxu0  ;;  %v14912_v34 = vadd.f32 %v11326_v13, %v14856_v62  ;;  %v14914_v7 = vadd.f32 %v11441_v39, %v11440_v27  ;;  %v14916_v8 = vadd.f32 %v11329_v60, %v11328_v26  ;;  %v8213_v6 = vrot.slane %v8211_v22, 4 }
 0x3ba   : > { %v11331_v12 = vpop.f32.mrb[160].mxu1  ;;  %v11444_v50 = vpop.f32.mrb[193].mxu0  ;;  %v10686_v20 = vrot.slane %v8094_v9, 9  ;;  %v8207_v35 = vrot.slane %v8096_v32, 5  ;;  %v10687_v55 = vrot.slane %v8097_v42, 9  ;;  %v8214_v18 = vrot.slane %v8099_v47, 5 }
 0x3bb   : > { %v11332_v3 = vpop.f32.mrb[161].mxu1  ;;  %v11446_v25 = vpop.f32.mrb[194].mxu0  ;;  %15615 = vst [vmem:[#allocation37_spill] sm:$0xff] %v14914_v7  ;;  %v8218_v45 = vrot.slane %v8101_v19, 5  ;;  %v14922_v62 = vadd.f32 %v11444_v50, %v11443_v23  ;;  %v8225_v39 = vrot.slane %v14918_v53, 5 }
 0x3bc   : > { %v11334_v2 = vpop.f32.mrb[162].mxu1  ;;  %v11447_v14 = vpop.f32.mrb[195].mxu0  ;;  %11804 = vmatmul.mubr.bf16.vlgmr.msra.gmra.mrb[0].mxu1 %v10700_v40  ;;  %v8208_v56 = vsel %vm12474_vm9, %v8206_v63, %v8207_v35  ;;  %v8215_v26 = vsel %vm12474_vm9, %v8213_v6, %v8214_v18  ;;  %v14927_v60 = vadd.f32 %v11332_v3, %v11331_v12  ;;  %v8205_v32 = vsel %vm12474_vm9, %v10686_v20, %v8204_v17  ;;  %v8100_v40 = vld [vmem:[#allocation2 + $0x54] sm:$0xe]  ;;  %v8103_v12 = vld [vmem:[#allocation2 + $0x60] sm:$0xe] }
 0x3bd   : > { %v11335_v28 = vpop.f32.mrb[163].mxu1  ;;  %11807 = vmatprep.mubr.bf16.mxu1 %v10701_v44  ;;  %15616 = vst [vmem:[#allocation40_spill] sm:$0xff] %v14922_v62  ;;  %v14929_v54 = vadd.f32 %v11447_v14, %v11446_v25  ;;  %v8102_v44 = vld [vmem:[#allocation2 + $0x5c] sm:$0x1]  ;;  %v10702_v63 = vcombine.low %v8205_v32, %v8208_v56  ;;  %v8212_v47 = vsel %vm12474_vm9, %v10687_v55, %v8211_v22  ;;  %v8220_v19 = vrot.slane %v8218_v45, 4 }
 0x3be   : > { %v14933_v23 = vadd.f32 %v11335_v28, %v11334_v2  ;;  %v10703_v14 = vcombine.low %v8212_v47, %v8215_v26  ;;  %v8105_v6 = vld [vmem:[#allocation2 + $0x68] sm:$0x1]  ;;  %v14937_v35 = vld [vmem:[#allocation2 + $0x70] sm:$0xf]  ;;  %v10688_v17 = vrot.slane %v8100_v40, 9  ;;  %v8221_v20 = vrot.slane %v8102_v44, 5 }
 0x3bf   : > { %15617 = vst [vmem:[#allocation43_spill] sm:$0xff] %v14929_v54  ;;  %v8227_v53 = vrot.slane %v8225_v39, 4  ;;  %v10689_v28 = vrot.slane %v8103_v12, 9  ;;  %v14941_v18 = vld [vmem:[#allocation2 + $0x7c] sm:$0xf]  ;;  %v14951_v26 = vadd.f32 %v14690_v52, %v14638_v33  ;;  %v8228_v40 = vrot.slane %v8105_v6, 5 }
 0x3c0   : > { %v8222_v32 = vsel %vm12474_vm9, %v8220_v19, %v8221_v20  ;;  %v14970_v52 = vadd.f32 %v14780_v49, %v14638_v33  ;;  %v14972_v44 = vld [vmem:[#allocation2 + $0x88] sm:$0xf]  ;;  %v8106_v47 = vld [vmem:[#allocation2 + $0x6c] sm:$0xe]  ;;  %v8239_v49 = vrot.slane %v14941_v18, 5 }
 0x3c1   : > { %v11449_v13 = vpop.f32.mrb[196].mxu0  ;;  %v8109_v6 = vld [vmem:[#allocation2 + $0x78] sm:$0xe]  ;;  %v15039_v7 = vld [vmem:[#allocation2 + $0xac] sm:$0xf] }
 0x3c2   : > { %v11337_v27 = vpop.f32.mrb[164].mxu1  ;;  %v11450_v16 = vpop.f32.mrb[197].mxu0 }
 0x3c3   : > { %v11338_v9 = vpop.f32.mrb[165].mxu1  ;;  %v11452_v50 = vpop.f32.mrb[198].mxu0  ;;  %v14939_v2 = vadd.f32 %v11450_v16, %v11449_v13  ;;  %v8232_v13 = vrot.slane %v14937_v35, 5  ;;  %v14958_v16 = vadd.f32 %v14710_v21, %v14638_v33  ;;  %v14978_v21 = vadd.f32 %v14790_v41, %v14638_v33 }
 0x3c4   : > { %v11340_v42 = vpop.f32.mrb[166].mxu1  ;;  %v11453_v3 = vpop.f32.mrb[199].mxu0  ;;  %11808 = vmatmul.mubr.bf16.gmra.mrb[4].mxu1 %v10702_v63  ;;  %v14943_v56 = vadd.f32 %v11338_v9, %v11337_v27  ;;  %v14962_v27 = vadd.f32 %v14736_v38, %v14638_v33  ;;  %v14966_v9 = vadd.f32 %v14750_v57, %v14638_v33  ;;  %v8219_v38 = vsel %vm12474_vm9, %v10688_v17, %v8218_v45 }
 0x3c5   : > { %v11341_v25 = vpop.f32.mrb[167].mxu1  ;;  %15618 = vst [vmem:[#allocation31_spill] sm:$0xff] %v14939_v2  ;;  %11811 = vmatprep.mubr.bf16.mxu1 %v10703_v14  ;;  %v14945_v22 = vadd.f32 %v11453_v3, %v11452_v50  ;;  %v14974_v50 = vld [vmem:[#allocation2 + $0x94] sm:$0xf]  ;;  %v8229_v57 = vsel %vm12474_vm9, %v8227_v53, %v8228_v40  ;;  %v14987_v3 = vadd.f32 %v14818_v30, %v14638_v33  ;;  %v8234_v20 = vrot.slane %v8232_v13, 4 }
 0x3c6   : > { %v14947_v55 = vadd.f32 %v11341_v25, %v11340_v42  ;;  %v10704_v25 = vcombine.low %v8219_v38, %v8222_v32  ;;  %v8226_v41 = vsel %vm12474_vm9, %v10689_v28, %v8225_v39  ;;  %v8108_v14 = vld [vmem:[#allocation2 + $0x74] sm:$0x1]  ;;  %v8246_v53 = vrot.slane %v14972_v44, 5  ;;  %v8111_v38 = vld [vmem:[#allocation2 + $0x80] sm:$0x1] }
 0x3c7   : > { %15619 = vst [vmem:[#allocation36_spill] sm:$0xff] %v14945_v22  ;;  %v8253_v18 = vrot.slane %v14974_v50, 5  ;;  %v10705_v2 = vcombine.low %v8226_v41, %v8229_v57  ;;  %v10690_v32 = vrot.slane %v8106_v47, 9  ;;  %v15001_v28 = vadd.f32 %v14826_v15, %v14638_v33  ;;  %v8115_v47 = vld [vmem:[#allocation2 + $0x90] sm:$0xe] }
 0x3c8   : > { %v8235_v44 = vrot.slane %v8108_v14, 5  ;;  %v8241_v50 = vrot.slane %v8239_v49, 4  ;;  %v15009_v57 = vadd.f32 %v14880_v48, %v14638_v33  ;;  %v15017_v15 = vadd.f32 %v14900_v24, %v14638_v33 }
 0x3c9   : > { %v11455_v42 = vpop.f32.mrb[200].mxu0  ;;  %v8242_v41 = vrot.slane %v8111_v38, 5  ;;  %v8248_v14 = vrot.slane %v8246_v53, 4  ;;  %v15023_v48 = vadd.f32 %v14912_v34, %v14638_v33  ;;  %v8233_v24 = vsel %vm12474_vm9, %v10690_v32, %v8232_v13 }
 0x3ca   : > { %v11343_v63 = vpop.f32.mrb[168].mxu1  ;;  %v11456_v19 = vpop.f32.mrb[201].mxu0 }
 0x3cb   : > { %v11344_v12 = vpop.f32.mrb[169].mxu1  ;;  %v14991_v35 = vadd.f32 %v11456_v19, %v11455_v42  ;;  %v11458_v45 = vpop.f32.mrb[202].mxu0  ;;  %v15005_v42 = vadd.f32 %v14866_v51, %v14638_v33  ;;  %v8114_v19 = vld [vmem:[#allocation2 + $0x8c] sm:$0x1]  ;;  %v10691_v51 = vrot.slane %v8109_v6, 9 }
 0x3cc   : > { %v11346_v17 = vpop.f32.mrb[170].mxu1  ;;  %v14995_v40 = vadd.f32 %v11344_v12, %v11343_v63  ;;  %v11459_v22 = vpop.f32.mrb[203].mxu0  ;;  %11812 = vmatmul.mubr.bf16.gmra.mrb[8].mxu1 %v10704_v25  ;;  %v8112_v63 = vld [vmem:[#allocation2 + $0x84] sm:$0xe]  ;;  %v8117_v12 = vld [vmem:[#allocation2 + $0x98] sm:$0x1]  ;;  %v8236_v25 = vsel %vm12474_vm9, %v8234_v20, %v8235_v44  ;;  %v8243_v20 = vsel %vm12474_vm9, %v8241_v50, %v8242_v41 }
 0x3cd   : > { %15620 = vst [vmem:[#allocation39_spill] sm:$0xff] %v14991_v35  ;;  %v11347_v30 = vpop.f32.mrb[171].mxu1  ;;  %v14997_v54 = vadd.f32 %v11459_v22, %v11458_v45  ;;  %v15013_v22 = vadd.f32 %v14890_v31, %v14638_v33  ;;  %11815 = vmatprep.mubr.bf16.mxu1 %v10705_v2  ;;  %v8255_v45 = vrot.slane %v8253_v18, 4  ;;  %v15027_v31 = vadd.f32 %v14916_v8, %v14638_v33  ;;  %v15031_v6 = vld [vmem:[#allocation2 + $0xa0] sm:$0xf] }
 0x3ce   : > { %v11348_v39 = vadd.f32 %v11347_v30, %v11346_v17  ;;  %v10692_v2 = vrot.slane %v8112_v63, 9  ;;  %v8249_v38 = vrot.slane %v8114_v19, 5  ;;  %v10693_v44 = vrot.slane %v8115_v47, 9 }
 0x3cf   : > { %15621 = vst [vmem:[#allocation12_spill] sm:$0xff] %v14997_v54  ;;  %15622 = vst [vmem:[#allocation14_spill] sm:$0xff] %v15027_v31  ;;  %v8256_v54 = vrot.slane %v8117_v12, 5  ;;  %v15037_v8 = vadd.f32 %v14927_v60, %v14638_v33  ;;  %v10706_v62 = vcombine.low %v8233_v24, %v8236_v25  ;;  %v8240_v50 = vsel %vm12474_vm9, %v10691_v51, %v8239_v49  ;;  %v15053_v25 = vld [vmem:[%s15500_s4] ss:$0 sm:$0xff] }
 0x3d0   : > { %v8250_v19 = vsel %vm12474_vm9, %v8248_v14, %v8249_v38  ;;  %v8260_v33 = vrot.slane %v15031_v6, 5  ;;  %v10707_v41 = vcombine.low %v8240_v50, %v8243_v20  ;;  %v8247_v14 = vsel %vm12474_vm9, %v10692_v2, %v8246_v53 }
 0x3d1   : > { %v11461_v17 = vpop.f32.mrb[204].mxu0  ;;  %v8257_v47 = vsel %vm12474_vm9, %v8255_v45, %v8256_v54  ;;  %v9207_v54 = vadd.f32 %v15053_v25, %v14943_v56  ;;  %v8254_v45 = vsel %vm12474_vm9, %v10693_v44, %v8253_v18  ;;  %v8267_v24 = vrot.slane %v15039_v7, 5  ;;  %v8130_v7 = vld [vmem:[#allocation2 + $0xcc] sm:$0xe] }
 0x3d2   : > { %v11349_v30 = vpop.f32.mrb[172].mxu1  ;;  %v11462_v34 = vpop.f32.mrb[205].mxu0  ;;  %v8262_v56 = vrot.slane %v8260_v33, 4  ;;  %v15075_v53 = vadd.f32 %v14686_v58, %v14951_v26  ;;  %v15079_v18 = vadd.f32 %v14698_v46, %v14958_v16  ;;  %v15083_v20 = vadd.f32 %v14732_v0, %v14962_v27 }
 0x3d3   : > { %v11350_v35 = vpop.f32.mrb[173].mxu1  ;;  %v15041_v13 = vadd.f32 %v11462_v34, %v11461_v17  ;;  %v11464_v63 = vpop.f32.mrb[206].mxu0  ;;  %v10708_v17 = vcombine.low %v8247_v14, %v8250_v19  ;;  %v15095_v58 = vadd.f32 %v14784_v37, %v14978_v21  ;;  %v8269_v46 = vrot.slane %v8267_v24, 4  ;;  %v8125_v19 = vld [vmem:[#allocation2 + $0xb8] sm:$0xf] }
 0x3d4   : > { %v11351_v32 = vadd.f32 %v11350_v35, %v11349_v30  ;;  %v11352_v31 = vpop.f32.mrb[174].mxu1  ;;  %v11465_v60 = vpop.f32.mrb[207].mxu0  ;;  %v9202_v35 = vadd.f32 %v15053_v25, %v14933_v23  ;;  %11816 = vmatmul.mubr.bf16.gmra.mrb[12].mxu1 %v10706_v62  ;;  %v9210_v23 = vadd.f32 %v15053_v25, %v14947_v55  ;;  %v10709_v30 = vcombine.low %v8254_v45, %v8257_v47  ;;  %v15629_v14 = vld [vmem:[#allocation39_spill] sm:$0xff] }
 0x3d5   : > { %v11353_v12 = vpop.f32.mrb[175].mxu1  ;;  %v15057_v49 = vadd.f32 %v11465_v60, %v11464_v63  ;;  %11819 = vmatprep.mubr.bf16.mxu1 %v10707_v41  ;;  %v9215_v62 = vadd.f32 %v15053_v25, %v14995_v40  ;;  %v15087_v40 = vadd.f32 %v14742_v43, %v14966_v9  ;;  %v15101_v0 = vadd.f32 %v14814_v29, %v14987_v3  ;;  %v8118_v29 = vld [vmem:[#allocation2 + $0x9c] sm:$0xe]  ;;  %v8120_v3 = vld [vmem:[#allocation2 + $0xa4] sm:$0x1] }
 0x3d6   : > { %v11354_v51 = vadd.f32 %v11353_v12, %v11352_v31  ;;  %v9218_v31 = vadd.f32 %v15053_v25, %v11348_v39  ;;  %v15091_v39 = vadd.f32 %v14770_v59, %v14970_v52  ;;  %v15105_v43 = vadd.f32 %v14822_v36, %v15001_v28  ;;  %v15623_v34 = vld [vmem:[#allocation14_spill] sm:$0xff]  ;;  %v8123_v63 = vld [vmem:[#allocation2 + $0xb0] sm:$0x1]  ;;  %v15628_v12 = vld [vmem:[#allocation36_spill] sm:$0xff] }
 0x3d7   : > { %v15109_v59 = vadd.f32 %v14862_v5, %v15005_v42  ;;  %v9223_v37 = vadd.f32 %v15053_v25, %v11351_v32  ;;  %v15116_v38 = vadd.f32 %v14874_v11, %v15009_v57  ;;  %v15120_v28 = vadd.f32 %v14886_v10, %v15013_v22  ;;  %v15624_v32 = vld [vmem:[#allocation37_spill] sm:$0xff]  ;;  %v8121_v57 = vld [vmem:[#allocation2 + $0xa8] sm:$0xe] }
 0x3d8   : > { %v15124_v5 = vadd.f32 %v14894_v1, %v15017_v15  ;;  %v15128_v42 = vadd.f32 %v14909_v4, %v15023_v48  ;;  %v15132_v11 = vadd.f32 %v15624_v32, %v15623_v34  ;;  %v9226_v50 = vadd.f32 %v15053_v25, %v11354_v51  ;;  %v15625_v22 = vld [vmem:[#allocation40_spill] sm:$0xff]  ;;  %v15626_v15 = vld [vmem:[#allocation43_spill] sm:$0xff] }
 0x3d9   : > { %v11467_v2 = vpop.f32.mrb[208].mxu0  ;;  %v15139_v1 = vadd.f32 %v15625_v22, %v15037_v8  ;;  %v15142_v4 = vadd.f32 %v15626_v15, %v9202_v35  ;;  %v15627_v48 = vld [vmem:[#allocation31_spill] sm:$0xff]  ;;  %v15148_v41 = vadd.f32 %v15628_v12, %v9210_v23  ;;  %v15151_v51 = vadd.f32 %v15629_v14, %v9215_v62 }
 0x3da   : > { %v11355_v55 = vpop.f32.mrb[176].mxu1  ;;  %v11468_v26 = vpop.f32.mrb[209].mxu0  ;;  %v15145_v60 = vadd.f32 %v15627_v48, %v9207_v54  ;;  %v10694_v45 = vrot.slane %v8118_v29, 9  ;;  %v10695_v35 = vrot.slane %v8121_v57, 9  ;;  %v8274_v54 = vrot.slane %v8125_v19, 5 }
 0x3db   : > { %v11356_v16 = vpop.f32.mrb[177].mxu1  ;;  %v15112_v27 = vadd.f32 %v11468_v26, %v11467_v2  ;;  %v11470_v52 = vpop.f32.mrb[210].mxu0  ;;  %v8263_v2 = vrot.slane %v8120_v3, 5  ;;  %v15630_v26 = vld [vmem:[#allocation12_spill] sm:$0xff]  ;;  %v8127_v22 = vld [vmem:[#allocation2 + $0xc0] sm:$0xe] }
 0x3dc   : > { %v11357_v9 = vadd.f32 %v11356_v16, %v11355_v55  ;;  %v11358_v21 = vpop.f32.mrb[178].mxu1  ;;  %v11471_v44 = vpop.f32.mrb[211].mxu0  ;;  %11820 = vmatmul.mubr.bf16.gmra.mrb[16].mxu1 %v10708_v17  ;;  %v8128_v55 = vld [vmem:[#allocation2 + $0xc4] sm:$0xf]  ;;  %v15154_v8 = vadd.f32 %v15630_v26, %v9218_v31  ;;  %v15157_v17 = vadd.f32 %v15041_v13, %v9223_v37  ;;  %v8270_v16 = vrot.slane %v8123_v63, 5 }
 0x3dd   : > { %v11359_v36 = vpop.f32.mrb[179].mxu1  ;;  %v15135_v47 = vadd.f32 %v11471_v44, %v11470_v52  ;;  %11823 = vmatprep.mubr.bf16.mxu1 %v10709_v30  ;;  %v8264_v23 = vsel %vm12474_vm9, %v8262_v56, %v8263_v2  ;;  %v8281_v62 = vrot.slane %v8128_v55, 5  ;;  %v15164_v31 = vadd.f32 %v15057_v49, %v9226_v50  ;;  %v8124_v37 = vld [vmem:[#allocation2 + $0xb4] sm:$0xe]  ;;  %v8126_v44 = vld [vmem:[#allocation2 + $0xbc] sm:$0x1] }
 0x3de   : > { %v11360_v10 = vadd.f32 %v11359_v36, %v11358_v21  ;;  %v8271_v30 = vsel %vm12474_vm9, %v8269_v46, %v8270_v16  ;;  %v8261_v13 = vsel %vm12474_vm9, %v10694_v45, %v8260_v33  ;;  %v8268_v46 = vsel %vm12474_vm9, %v10695_v35, %v8267_v24  ;;  %v8131_v63 = vld [vmem:[#allocation2 + $0xd0] sm:$0xf]  ;;  %v8129_v33 = vld [vmem:[#allocation2 + $0xc8] sm:$0x1]  ;;  %v8132_v35 = vld [vmem:[#allocation2 + $0xd4] sm:$0x1] }
 0x3df   : > { %v10710_v57 = vcombine.low %v8261_v13, %v8264_v23  ;;  %v8276_v49 = vrot.slane %v8274_v54, 4  ;;  %v10711_v19 = vcombine.low %v8268_v46, %v8271_v30  ;;  %v9231_v15 = vadd.f32 %v15053_v25, %v11357_v9 }
 0x3e0   : > { %v10696_v14 = vrot.slane %v8124_v37, 9  ;;  %v8283_v45 = vrot.slane %v8281_v62, 4  ;;  %v8277_v2 = vrot.slane %v8126_v44, 5  ;;  %v8288_v55 = vrot.slane %v8131_v63, 5 }
 0x3e1   : > { %v11473_v52 = vpop.f32.mrb[212].mxu0  ;;  %v10697_v26 = vrot.slane %v8127_v22, 9  ;;  %v8284_v24 = vrot.slane %v8129_v33, 5  ;;  %v9234_v23 = vadd.f32 %v15053_v25, %v11360_v10  ;;  %v15181_v9 = vadd.f32 %v15112_v27, %v9231_v15 }
 0x3e2   : > { %v11361_v21 = vpop.f32.mrb[180].mxu1  ;;  %v11474_v29 = vpop.f32.mrb[213].mxu0  ;;  %v8278_v16 = vsel %vm12474_vm9, %v8276_v49, %v8277_v2  ;;  %v8275_v30 = vsel %vm12474_vm9, %v10696_v14, %v8274_v54  ;;  %v8290_v44 = vrot.slane %v8288_v55, 4 }
 0x3e3   : > { %v11362_v3 = vpop.f32.mrb[181].mxu1  ;;  %v15170_v36 = vadd.f32 %v11474_v29, %v11473_v52  ;;  %v11476_v34 = vpop.f32.mrb[214].mxu0  ;;  %v8285_v29 = vsel %vm12474_vm9, %v8283_v45, %v8284_v24  ;;  %v10712_v49 = vcombine.low %v8275_v30, %v8278_v16  ;;  %v8282_v27 = vsel %vm12474_vm9, %v10697_v26, %v8281_v62 }
 0x3e4   : > { %v11363_v56 = vadd.f32 %v11362_v3, %v11361_v21  ;;  %v11364_v32 = vpop.f32.mrb[182].mxu1  ;;  %v11477_v50 = vpop.f32.mrb[215].mxu0  ;;  %11824 = vmatmul.mubr.bf16.gmra.mrb[20].mxu1 %v10710_v57  ;;  %v10698_v3 = vrot.slane %v8130_v7, 9  ;;  %v15190_v22 = vadd.f32 %v15135_v47, %v9234_v23 }
 0x3e5   : > { %v11365_v6 = vpop.f32.mrb[183].mxu1  ;;  %v11478_v48 = vadd.f32 %v11477_v50, %v11476_v34  ;;  %11827 = vmatprep.mubr.bf16.mxu1 %v10711_v19  ;;  %v8291_v34 = vrot.slane %v8132_v35, 5 }
 0x3e6   : > { %v11366_v12 = vadd.f32 %v11365_v6, %v11364_v32  ;;  %v10713_v6 = vcombine.low %v8282_v27, %v8285_v29  ;;  %v8289_v33 = vsel %vm12474_vm9, %v10698_v3, %v8288_v55  ;;  %v9239_v14 = vadd.f32 %v15053_v25, %v11363_v56 }
 0x3e7   : > { %v8292_v15 = vsel %vm12474_vm9, %v8290_v44, %v8291_v34 }
 0x3e8   : > { %v10714_v2 = vcombine.low %v8289_v33, %v8292_v15  ;;  %v15199_v61 = vadd.f32 %v15170_v36, %v9239_v14  ;;  %v15632_v33 = vld [vmem:[#allocation34_spill] sm:$0xff] }
 0x3e9   : > { %v11479_v52 = vpop.f32.mrb[216].mxu0 }
 0x3ea   : > { %v11367_v21 = vpop.f32.mrb[184].mxu1  ;;  %v11480_v13 = vpop.f32.mrb[217].mxu0 }
 0x3eb   : > { %v11368_v37 = vpop.f32.mrb[185].mxu1  ;;  %v11481_v32 = vadd.f32 %v11480_v13, %v11479_v52  ;;  %v11482_v46 = vpop.f32.mrb[218].mxu0 }
 0x3ec   : > { %v11369_v57 = vadd.f32 %v11368_v37, %v11367_v21  ;;  %v11370_v10 = vpop.f32.mrb[186].mxu1  ;;  %v11483_v63 = vpop.f32.mrb[219].mxu0  ;;  %11828 = vmatmul.mubr.bf16.gmra.mrb[24].mxu1 %v10712_v49  ;;  %v9242_v21 = vadd.f32 %v15053_v25, %v11366_v12 }
 0x3ed   : > { %v11371_v50 = vpop.f32.mrb[187].mxu1  ;;  %v11484_v54 = vadd.f32 %v11483_v63, %v11482_v46  ;;  %11831 = vmatprep.mubr.bf16.mxu1 %v10713_v6  ;;  %v15631_v63 = vld [vmem:[#allocation30_spill] sm:$0xff] }
 0x3ee   : > { %v11372_v19 = vadd.f32 %v11371_v50, %v11370_v10  ;;  %v15201_v3 = vadd.f32 %v11478_v48, %v9242_v21  ;;  %v9247_v12 = vadd.f32 %v15053_v25, %v11369_v57 }
 0x3f0   : > { %v9250_v14 = vadd.f32 %v15053_v25, %v11372_v19 }
 0x3f1   : > { %v11485_v45 = vpop.f32.mrb[220].mxu0 }
 0x3f2   : > { %v11373_v62 = vpop.f32.mrb[188].mxu1  ;;  %v11486_v7 = vpop.f32.mrb[221].mxu0 }
 0x3f3   : > { %v11374_v26 = vpop.f32.mrb[189].mxu1  ;;  %v11487_v24 = vadd.f32 %v11486_v7, %v11485_v45  ;;  %v11488_v16 = vpop.f32.mrb[222].mxu0 }
 0x3f4   : > { %v11375_v35 = vadd.f32 %v11374_v26, %v11373_v62  ;;  %v11376_v47 = vpop.f32.mrb[190].mxu1  ;;  %v11489_v23 = vpop.f32.mrb[223].mxu0  ;;  %11832 = vmatmul.mubr.bf16.gmra.mrb[28].mxu1 %v10714_v2  ;;  %v15207_v62 = vadd.f32 %v11481_v32, %v9247_v12 }
 0x3f5   : > { %v11377_v52 = vpop.f32.mrb[191].mxu1  ;;  %v11490_v30 = vadd.f32 %v11489_v23, %v11488_v16 }
 0x3f6   : > { %v11378_v55 = vadd.f32 %v11377_v52, %v11376_v47  ;;  %v9255_v57 = vadd.f32 %v15053_v25, %v11375_v35 }
 0x3f8   : > { %v9258_v32 = vadd.f32 %v15053_v25, %v11378_v55 }
 0x3f9   : > { %v11619_v56 = vpop.f32.mrb[224].mxu0 }
 0x3fa   : > { %v11507_v29 = vpop.f32.mrb[192].mxu1  ;;  %v11620_v13 = vpop.f32.mrb[225].mxu0 }
 0x3fb   : > { %v11508_v37 = vpop.f32.mrb[193].mxu1  ;;  %v11621_v44 = vadd.f32 %v11620_v13, %v11619_v56  ;;  %v11622_v46 = vpop.f32.mrb[226].mxu0 }
 0x3fc   : > { %v11509_v34 = vadd.f32 %v11508_v37, %v11507_v29  ;;  %v11510_v10 = vpop.f32.mrb[194].mxu1  ;;  %v11623_v49 = vpop.f32.mrb[227].mxu0  ;;  %v15211_v37 = vadd.f32 %v11484_v54, %v9250_v14 }
 0x3fd   : > { %v11511_v27 = vpop.f32.mrb[195].mxu1  ;;  %v11624_v6 = vadd.f32 %v11623_v49, %v11622_v46 }
 0x3fe   : > { %v9457_v50 = vadd.f32 %v11509_v34, %v15631_v63  ;;  %v11512_v36 = vadd.f32 %v11511_v27, %v11510_v10  ;;  %v15215_v10 = vadd.f32 %v11487_v24, %v9255_v57 }
 0x400   : > { %v9460_v15 = vadd.f32 %v11512_v36, %v15632_v33 }
 0x401   : > { %v11625_v48 = vpop.f32.mrb[228].mxu0 }
 0x402   : > { %v11513_v45 = vpop.f32.mrb[196].mxu1  ;;  %v11626_v2 = vpop.f32.mrb[229].mxu0 }
 0x403   : > { %v11514_v7 = vpop.f32.mrb[197].mxu1  ;;  %v11627_v26 = vadd.f32 %v11626_v2, %v11625_v48  ;;  %v11628_v47 = vpop.f32.mrb[230].mxu0 }
 0x404   : > { %v11515_v16 = vadd.f32 %v11514_v7, %v11513_v45  ;;  %v11516_v23 = vpop.f32.mrb[198].mxu1  ;;  %v11629_v52 = vpop.f32.mrb[231].mxu0  ;;  %v15218_v45 = vadd.f32 %v11490_v30, %v9258_v32  ;;  %v15225_v32 = vadd.f32 %v11621_v44, %v9457_v50 }
 0x405   : > { %v11517_v21 = vpop.f32.mrb[199].mxu1  ;;  %v11630_v29 = vadd.f32 %v11629_v52, %v11628_v47 }
 0x406   : > { %v9465_v56 = vadd.f32 %v11515_v16, %v15075_v53  ;;  %v11518_v13 = vadd.f32 %v11517_v21, %v11516_v23 }
 0x408   : > { %v9468_v19 = vadd.f32 %v11518_v13, %v15079_v18  ;;  %v15221_v24 = vadd.f32 %v11627_v26, %v9465_v56 }
 0x409   : > { %v11631_v34 = vpop.f32.mrb[232].mxu0 }
 0x40a   : > { %v11519_v46 = vpop.f32.mrb[200].mxu1  ;;  %v11632_v49 = vpop.f32.mrb[233].mxu0  ;;  %v15227_v26 = vadd.f32 %v11630_v29, %v9468_v19 }
 0x40b   : > { %v11520_v27 = vpop.f32.mrb[201].mxu1  ;;  %v11633_v12 = vadd.f32 %v11632_v49, %v11631_v34  ;;  %v11634_v63 = vpop.f32.mrb[234].mxu0 }
 0x40c   : > { %v11521_v35 = vadd.f32 %v11520_v27, %v11519_v46  ;;  %v11522_v36 = vpop.f32.mrb[202].mxu1  ;;  %v11635_v33 = vpop.f32.mrb[235].mxu0  ;;  %v15229_v27 = vadd.f32 %v11624_v6, %v9460_v15 }
 0x40d   : > { %v11523_v53 = vpop.f32.mrb[203].mxu1  ;;  %v11636_v54 = vadd.f32 %v11635_v33, %v11634_v63 }
 0x40e   : > { %v9473_v48 = vadd.f32 %v11521_v35, %v15083_v20  ;;  %v11524_v14 = vadd.f32 %v11523_v53, %v11522_v36 }
 0x410   : > { %v9476_v25 = vadd.f32 %v11524_v14, %v15087_v40  ;;  %v15235_v29 = vadd.f32 %v11633_v12, %v9473_v48 }
 0x411   : > { %v11637_v18 = vpop.f32.mrb[236].mxu0 }
 0x412   : > { %v11525_v55 = vpop.f32.mrb[204].mxu1  ;;  %v11638_v2 = vpop.f32.mrb[237].mxu0 }
 0x413   : > { %v11526_v7 = vpop.f32.mrb[205].mxu1  ;;  %v11639_v16 = vadd.f32 %v11638_v2, %v11637_v18  ;;  %v11640_v23 = vpop.f32.mrb[238].mxu0 }
 0x414   : > { %v11527_v47 = vadd.f32 %v11526_v7, %v11525_v55  ;;  %v11528_v57 = vpop.f32.mrb[206].mxu1  ;;  %v11641_v52 = vpop.f32.mrb[239].mxu0  ;;  %v15239_v7 = vadd.f32 %v11636_v54, %v9476_v25 }
 0x415   : > { %v11529_v21 = vpop.f32.mrb[207].mxu1  ;;  %v11642_v13 = vadd.f32 %v11641_v52, %v11640_v23 }
 0x416   : > { %v9481_v20 = vadd.f32 %v11527_v47, %v15091_v39  ;;  %v11530_v34 = vadd.f32 %v11529_v21, %v11528_v57 }
 0x418   : > { %v9484_v30 = vadd.f32 %v11530_v34, %v15095_v58  ;;  %v15231_v53 = vadd.f32 %v11639_v16, %v9481_v20 }
 0x419   : > { %v11643_v40 = vpop.f32.mrb[240].mxu0 }
 0x41a   : > { %v11531_v46 = vpop.f32.mrb[208].mxu1  ;;  %v11644_v56 = vpop.f32.mrb[241].mxu0  ;;  %v15237_v6 = vadd.f32 %v11642_v13, %v9484_v30 }
 0x41b   : > { %v11532_v49 = vpop.f32.mrb[209].mxu1  ;;  %v11645_v35 = vadd.f32 %v11644_v56, %v11643_v40  ;;  %v11646_v36 = vpop.f32.mrb[242].mxu0 }
 0x41c   : > { %v11533_v63 = vadd.f32 %v11532_v49, %v11531_v46  ;;  %v11534_v33 = vpop.f32.mrb[210].mxu1  ;;  %v11647_v39 = vpop.f32.mrb[243].mxu0 }
 0x41d   : > { %v11535_v14 = vpop.f32.mrb[211].mxu1  ;;  %v11648_v44 = vadd.f32 %v11647_v39, %v11646_v36 }
 0x41e   : > { %v9489_v58 = vadd.f32 %v11533_v63, %v15101_v0  ;;  %v11536_v50 = vadd.f32 %v11535_v14, %v11534_v33 }
 0x420   : > { %v9492_v18 = vadd.f32 %v11536_v50, %v15105_v43  ;;  %v15245_v13 = vadd.f32 %v11645_v35, %v9489_v58 }
 0x421   : > { %v11649_v19 = vpop.f32.mrb[244].mxu0 }
 0x422   : > { %v11537_v55 = vpop.f32.mrb[212].mxu1  ;;  %v11650_v15 = vpop.f32.mrb[245].mxu0  ;;  %v15249_v46 = vadd.f32 %v11648_v44, %v9492_v18 }
 0x423   : > { %v11538_v2 = vpop.f32.mrb[213].mxu1  ;;  %v11651_v16 = vadd.f32 %v11650_v15, %v11649_v19  ;;  %v11652_v23 = vpop.f32.mrb[246].mxu0 }
 0x424   : > { %v11539_v47 = vadd.f32 %v11538_v2, %v11537_v55  ;;  %v11540_v57 = vpop.f32.mrb[214].mxu1  ;;  %v11653_v52 = vpop.f32.mrb[247].mxu0 }
 0x425   : > { %v11541_v0 = vpop.f32.mrb[215].mxu1  ;;  %v11654_v20 = vadd.f32 %v11653_v52, %v11652_v23 }
 0x426   : > { %v9497_v21 = vadd.f32 %v11539_v47, %v15109_v59  ;;  %v11542_v43 = vadd.f32 %v11541_v0, %v11540_v57 }
 0x428   : > { %v9500_v12 = vadd.f32 %v11542_v43, %v15116_v38  ;;  %v15243_v48 = vadd.f32 %v11651_v16, %v9497_v21 }
 0x429   : > { %v11655_v34 = vpop.f32.mrb[248].mxu0 }
 0x42a   : > { %v11543_v30 = vpop.f32.mrb[216].mxu1  ;;  %v15247_v54 = vadd.f32 %v11654_v20, %v9500_v12  ;;  %v11656_v25 = vpop.f32.mrb[249].mxu0 }
 0x42b   : > { %v11544_v40 = vpop.f32.mrb[217].mxu1  ;;  %v11657_v56 = vadd.f32 %v11656_v25, %v11655_v34  ;;  %v11658_v63 = vpop.f32.mrb[250].mxu0 }
 0x42c   : > { %v11545_v49 = vadd.f32 %v11544_v40, %v11543_v30  ;;  %v11546_v59 = vpop.f32.mrb[218].mxu1  ;;  %v11659_v36 = vpop.f32.mrb[251].mxu0 }
 0x42d   : > { %v11547_v33 = vpop.f32.mrb[219].mxu1  ;;  %v11660_v39 = vadd.f32 %v11659_v36, %v11658_v63 }
 0x42e   : > { %v9505_v38 = vadd.f32 %v11545_v49, %v15120_v28  ;;  %v11548_v14 = vadd.f32 %v11547_v33, %v11546_v59 }
 0x430   : > { %v9508_v35 = vadd.f32 %v11548_v14, %v15124_v5  ;;  %v15253_v58 = vadd.f32 %v11657_v56, %v9505_v38 }
 0x431   : > { %v11661_v50 = vpop.f32.mrb[252].mxu0 }
 0x432   : > { %v11549_v19 = vpop.f32.mrb[220].mxu1  ;;  %v11662_v55 = vpop.f32.mrb[253].mxu0  ;;  %v15255_v44 = vadd.f32 %v11660_v39, %v9508_v35 }
 0x433   : > { %v11550_v15 = vpop.f32.mrb[221].mxu1  ;;  %v11663_v18 = vadd.f32 %v11662_v55, %v11661_v50  ;;  %v11664_v16 = vpop.f32.mrb[254].mxu0 }
 0x434   : > { %v11551_v2 = vadd.f32 %v11550_v15, %v11549_v19  ;;  %v11552_v47 = vpop.f32.mrb[222].mxu1  ;;  %v11665_v23 = vpop.f32.mrb[255].mxu0 }
 0x435   : > { %v11553_v57 = vpop.f32.mrb[223].mxu1  ;;  %v11666_v52 = vadd.f32 %v11665_v23, %v11664_v16 }
 0x436   : > { %v9513_v28 = vadd.f32 %v11551_v2, %v15128_v42  ;;  %v11554_v0 = vadd.f32 %v11553_v57, %v11552_v47 }
 0x438   : > { %v9516_v5 = vadd.f32 %v11554_v0, %v15132_v11  ;;  %v15259_v21 = vadd.f32 %v11663_v18, %v9513_v28 }
 0x439   : > { %v11667_v20 = vpop.f32.mrb[0].mxu0 }
 0x43a   : > { %v15261_v43 = vadd.f32 %v11666_v52, %v9516_v5  ;;  %v11668_v12 = vpop.f32.mrb[1].mxu0 }
 0x43b   : > { %v11669_v34 = vadd.f32 %v11668_v12, %v11667_v20  ;;  %v11670_v30 = vpop.f32.mrb[2].mxu0 }
 0x43c   : > { %v11555_v25 = vpop.f32.mrb[224].mxu1  ;;  %v11671_v40 = vpop.f32.mrb[3].mxu0 }
 0x43d   : > { %v11556_v56 = vpop.f32.mrb[225].mxu1  ;;  %v11672_v49 = vadd.f32 %v11671_v40, %v11670_v30 }
 0x43e   : > { %v11557_v63 = vadd.f32 %v11556_v56, %v11555_v25  ;;  %v11558_v59 = vpop.f32.mrb[226].mxu1 }
 0x43f   : > { %v11559_v36 = vpop.f32.mrb[227].mxu1 }
 0x440   : > { %v9521_v42 = vadd.f32 %v11557_v63, %v15139_v1  ;;  %v11560_v33 = vadd.f32 %v11559_v36, %v11558_v59 }
 0x441   : > { %v11673_v38 = vpop.f32.mrb[4].mxu0 }
 0x442   : > { %v9524_v11 = vadd.f32 %v11560_v33, %v15142_v4  ;;  %v11674_v39 = vpop.f32.mrb[5].mxu0  ;;  %v15265_v14 = vadd.f32 %v11669_v34, %v9521_v42 }
 0x443   : > { %v11675_v35 = vadd.f32 %v11674_v39, %v11673_v38  ;;  %v11676_v50 = vpop.f32.mrb[6].mxu0 }
 0x444   : > { %v11677_v19 = vpop.f32.mrb[7].mxu0  ;;  %v15267_v55 = vadd.f32 %v11672_v49, %v9524_v11 }
 0x445   : > { %v11678_v15 = vadd.f32 %v11677_v19, %v11676_v50 }
 0x446   : > { %v11561_v18 = vpop.f32.mrb[228].mxu1 }
 0x447   : > { %v11562_v2 = vpop.f32.mrb[229].mxu1 }
 0x448   : > { %v11563_v16 = vadd.f32 %v11562_v2, %v11561_v18  ;;  %v11564_v47 = vpop.f32.mrb[230].mxu1 }
 0x449   : > { %v11565_v23 = vpop.f32.mrb[231].mxu1 }
 0x44a   : > { %v9529_v1 = vadd.f32 %v11563_v16, %v15145_v60  ;;  %v11566_v57 = vadd.f32 %v11565_v23, %v11564_v47 }
 0x44b   : > { %v11679_v28 = vpop.f32.mrb[8].mxu0 }
 0x44c   : > { %v9532_v4 = vadd.f32 %v11566_v57, %v15148_v41  ;;  %v11680_v52 = vpop.f32.mrb[9].mxu0  ;;  %v15271_v0 = vadd.f32 %v11675_v35, %v9529_v1 }
 0x44d   : > { %v11681_v5 = vadd.f32 %v11680_v52, %v11679_v28  ;;  %v11682_v20 = vpop.f32.mrb[10].mxu0 }
 0x44e   : > { %v11683_v12 = vpop.f32.mrb[11].mxu0  ;;  %v15273_v34 = vadd.f32 %v11678_v15, %v9532_v4 }
 0x44f   : > { %v11684_v30 = vadd.f32 %v11683_v12, %v11682_v20 }
 0x451   : > { %v11567_v25 = vpop.f32.mrb[232].mxu1 }
 0x452   : > { %v11568_v40 = vpop.f32.mrb[233].mxu1 }
 0x453   : > { %v11569_v56 = vadd.f32 %v11568_v40, %v11567_v25  ;;  %v11570_v49 = vpop.f32.mrb[234].mxu1 }
 0x454   : > { %v11571_v63 = vpop.f32.mrb[235].mxu1 }
 0x455   : > { %v9537_v60 = vadd.f32 %v11569_v56, %v15151_v51  ;;  %v11572_v59 = vadd.f32 %v11571_v63, %v11570_v49  ;;  %v11685_v36 = vpop.f32.mrb[12].mxu0 }
 0x456   : > { %v11686_v42 = vpop.f32.mrb[13].mxu0 }
 0x457   : > { %v9540_v41 = vadd.f32 %v11572_v59, %v15154_v8  ;;  %v15277_v33 = vadd.f32 %v11681_v5, %v9537_v60  ;;  %v11687_v38 = vadd.f32 %v11686_v42, %v11685_v36  ;;  %v11688_v11 = vpop.f32.mrb[14].mxu0 }
 0x458   : > { %v11689_v39 = vpop.f32.mrb[15].mxu0 }
 0x459   : > { %v15279_v35 = vadd.f32 %v11684_v30, %v9540_v41  ;;  %v11690_v50 = vadd.f32 %v11689_v39, %v11688_v11 }
 0x45e   : > { %v11573_v19 = vpop.f32.mrb[236].mxu1 }
 0x45f   : > { %v11574_v15 = vpop.f32.mrb[237].mxu1 }
 0x460   : > { %v11575_v18 = vadd.f32 %v11574_v15, %v11573_v19  ;;  %v11576_v2 = vpop.f32.mrb[238].mxu1 }
 0x461   : > { %v11577_v16 = vpop.f32.mrb[239].mxu1  ;;  %v11691_v47 = vpop.f32.mrb[16].mxu0 }
 0x462   : > { %v9545_v51 = vadd.f32 %v11575_v18, %v15157_v17  ;;  %v11578_v23 = vadd.f32 %v11577_v16, %v11576_v2  ;;  %v11692_v1 = vpop.f32.mrb[17].mxu0 }
 0x463   : > { %v11693_v8 = vadd.f32 %v11692_v1, %v11691_v47  ;;  %v11694_v57 = vpop.f32.mrb[18].mxu0 }
 0x464   : > { %v9548_v28 = vadd.f32 %v11578_v23, %v15164_v31  ;;  %v11695_v4 = vpop.f32.mrb[19].mxu0  ;;  %v15283_v52 = vadd.f32 %v11687_v38, %v9545_v51 }
 0x465   : > { %v11696_v5 = vadd.f32 %v11695_v4, %v11694_v57 }
 0x466   : > { %v15285_v20 = vadd.f32 %v11690_v50, %v9548_v28 }
 0x469   : > { %v11579_v12 = vpop.f32.mrb[240].mxu1 }
 0x46a   : > { %v11580_v30 = vpop.f32.mrb[241].mxu1 }
 0x46b   : > { %v11581_v25 = vadd.f32 %v11580_v30, %v11579_v12  ;;  %v11582_v40 = vpop.f32.mrb[242].mxu1 }
 0x46c   : > { %v11583_v56 = vpop.f32.mrb[243].mxu1 }
 0x46d   : > { %v9553_v49 = vadd.f32 %v11581_v25, %v15181_v9  ;;  %v11584_v17 = vadd.f32 %v11583_v56, %v11582_v40  ;;  %v11697_v63 = vpop.f32.mrb[20].mxu0 }
 0x46e   : > { %v11698_v60 = vpop.f32.mrb[21].mxu0 }
 0x46f   : > { %v9556_v59 = vadd.f32 %v11584_v17, %v15190_v22  ;;  %v11699_v36 = vadd.f32 %v11698_v60, %v11697_v63  ;;  %v11700_v31 = vpop.f32.mrb[22].mxu0  ;;  %v15289_v41 = vadd.f32 %v11693_v8, %v9553_v49 }
 0x470   : > { %v11701_v42 = vpop.f32.mrb[23].mxu0 }
 0x471   : > { %v11702_v38 = vadd.f32 %v11701_v42, %v11700_v31  ;;  %v15291_v11 = vadd.f32 %v11696_v5, %v9556_v59 }
 0x474   : > { %v11585_v39 = vpop.f32.mrb[244].mxu1 }
 0x475   : > { %v11586_v50 = vpop.f32.mrb[245].mxu1 }
 0x476   : > { %v11587_v19 = vadd.f32 %v11586_v50, %v11585_v39  ;;  %v11588_v15 = vpop.f32.mrb[246].mxu1 }
 0x477   : > { %v11589_v18 = vpop.f32.mrb[247].mxu1 }
 0x478   : > { %v9561_v9 = vadd.f32 %v11587_v19, %v15199_v61  ;;  %v11590_v2 = vadd.f32 %v11589_v18, %v11588_v15  ;;  %v11703_v16 = vpop.f32.mrb[24].mxu0  ;;  %v9905_v15 = vld [vmem:[%s12454_s9] sm:$0xff] }
 0x479   : > { %v11704_v47 = vpop.f32.mrb[25].mxu0 }
 0x47a   : > { %v9564_v22 = vadd.f32 %v11590_v2, %v15201_v3  ;;  %v11705_v51 = vadd.f32 %v11704_v47, %v11703_v16  ;;  %v11706_v23 = vpop.f32.mrb[26].mxu0  ;;  %v15295_v1 = vadd.f32 %v11699_v36, %v9561_v9  ;;  %v9908_v9 = vld [vmem:[%s12454_s9 + $0x18] sm:$0xff] }
 0x47b   : > { %v11707_v8 = vpop.f32.mrb[27].mxu0 }
 0x47c   : > { %v11708_v57 = vadd.f32 %v11707_v8, %v11706_v23  ;;  %v15297_v28 = vadd.f32 %v11702_v38, %v9564_v22  ;;  %v9906_v22 = vld [vmem:[%s12454_s9 + $0x8] sm:$0xff] }
 0x47f   : > { %v11591_v4 = vpop.f32.mrb[248].mxu1 }
 0x480   : > { %v11592_v5 = vpop.f32.mrb[249].mxu1 }
 0x481   : > { %v11593_v12 = vadd.f32 %v11592_v5, %v11591_v4  ;;  %v11594_v30 = vpop.f32.mrb[250].mxu1  ;;  %v9940_v4 = vsel %vm287_vm3, %v9908_v9, 0.0 }
 0x482   : > { %v11595_v25 = vpop.f32.mrb[251].mxu1 }
 0x483   : > { %v9569_v61 = vadd.f32 %v11593_v12, %v15207_v62  ;;  %v11596_v40 = vadd.f32 %v11595_v25, %v11594_v30 }
 0x485   : > { %v9572_v56 = vadd.f32 %v11596_v40, %v15211_v37  ;;  %v15301_v3 = vadd.f32 %v11705_v51, %v9569_v61  ;;  %v9907_v37 = vld [vmem:[%s12454_s9 + $0x10] sm:$0xff]  ;;  %v9938_v61 = vsel %vm287_vm3, %v9906_v22, 0.0 }
 0x486   : > { %v9939_v47 = vsel %vm287_vm3, %v9907_v37, 0.0 }
 0x487   : > { %v11597_v49 = vpop.f32.mrb[252].mxu1  ;;  %v15303_v17 = vadd.f32 %v11708_v57, %v9572_v56 }
 0x488   : > { %v11598_v63 = vpop.f32.mrb[253].mxu1 }
 0x489   : > { %v11599_v60 = vadd.f32 %v11598_v63, %v11597_v49  ;;  %v11600_v59 = vpop.f32.mrb[254].mxu1  ;;  %v9911_v63 = vld [vmem:[%s12454_s9 + $0x30] sm:$0xff] }
 0x48a   : > { %v11601_v36 = vpop.f32.mrb[255].mxu1 }
 0x48b   : > { %v9577_v31 = vadd.f32 %v11599_v60, %v15215_v10  ;;  %v11709_v42 = vpop.f32.mrb[28].mxu0  ;;  %v11602_v62 = vadd.f32 %v11601_v36, %v11600_v59  ;;  %v9909_v59 = vld [vmem:[%s12454_s9 + $0x20] sm:$0xff]  ;;  %v9912_v36 = vld [vmem:[%s12454_s9 + $0x38] sm:$0xff] }
 0x48c   : > { %v11710_v38 = vpop.f32.mrb[29].mxu0 }
 0x48d   : > { %v9580_v39 = vadd.f32 %v11602_v62, %v15218_v45  ;;  %v11711_v50 = vadd.f32 %v11710_v38, %v11709_v42  ;;  %v11712_v19 = vpop.f32.mrb[30].mxu0  ;;  %v9937_v45 = vsel %vm287_vm3, %v9905_v15, 0.0  ;;  %v9910_v62 = vld [vmem:[%s12454_s9 + $0x28] sm:$0xff]  ;;  %v9944_v15 = vsel %vm287_vm3, %v9912_v36, 0.0 }
 0x48e   : > { %v11713_v18 = vpop.f32.mrb[31].mxu0 }
 0x48f   : > { %v11714_v2 = vadd.f32 %v11713_v18, %v11712_v19  ;;  %v11805_v16 = vpop.f32.mrb[0].mxu1  ;;  %v15313_v51 = vadd.f32 %v11711_v50, %v9577_v31 }
 0x490   : > { %v9787_v10 = vadd.f32 %v11805_v16, %v15221_v24  ;;  %v9778_v23 = vpop.f32.mrb[1].mxu1  ;;  %v9942_v16 = vsel %vm287_vm3, %v9910_v62, 0.0  ;;  %v9917_v62 = vld [vmem:[%s12454_s9 + $0x60] sm:$0xff] }
 0x491   : > { %v9779_v8 = vadd.f32 %v9778_v23, %v15225_v32  ;;  %v11806_v57 = vpop.f32.mrb[2].mxu1  ;;  %v15321_v5 = vadd.f32 %v11714_v2, %v9580_v39  ;;  %v9941_v39 = vsel %vm287_vm3, %v9909_v59, 0.0  ;;  %v9915_v23 = vld [vmem:[%s12454_s9 + $0x50] sm:$0xff] }
 0x492   : > { %v9971_v12 = vadd.f32 %v9939_v47, %v9787_v10  ;;  %v9790_v30 = vadd.f32 %v11806_v57, %v15227_v26  ;;  %v9781_v25 = vpop.f32.mrb[3].mxu1 }
 0x493   : > { %v9969_v40 = vadd.f32 %v9937_v45, %v9779_v8  ;;  %v9782_v24 = vadd.f32 %v9781_v25, %v15229_v27  ;;  %v9943_v27 = vsel %vm287_vm3, %v9911_v63, 0.0  ;;  %v9913_v8 = vld [vmem:[%s12454_s9 + $0x40] sm:$0xff]  ;;  %v9914_v25 = vld [vmem:[%s12454_s9 + $0x48] sm:$0xff] }
 0x494   : > { %v10003_v56 = vmax.f32 %v9971_v12, 0.0  ;;  %v9972_v49 = vadd.f32 %v9940_v4, %v9790_v30  ;;  %v9916_v4 = vld [vmem:[%s12454_s9 + $0x58] sm:$0xff]  ;;  %v9947_v30 = vsel %vm287_vm3, %v9915_v23, 0.0  ;;  %v9946_v59 = vsel %vm287_vm3, %v9914_v25, 0.0 }
 0x495   : > { %v10001_v32 = vmax.f32 %v9969_v40, 0.0  ;;  %v9970_v60 = vadd.f32 %v9938_v61, %v9782_v24  ;;  %v9945_v40 = vsel %vm287_vm3, %v9913_v8, 0.0  ;;  %v9923_v8 = vld [vmem:[%s12454_s9 + $0x90] sm:$0xff] }
 0x496   : > { %10035 = vst [vmem:[%s15328_s7 + $0x10] sm:$0xff] %v10003_v56  ;;  %v10004_v26 = vmax.f32 %v9972_v49, 0.0  ;;  %v9948_v49 = vsel %vm287_vm3, %v9916_v4, 0.0  ;;  %v9921_v4 = vld [vmem:[%s12454_s9 + $0x80] sm:$0xff]  ;;  %v9955_v25 = vsel %vm287_vm3, %v9923_v8, 0.0 }
 0x497   : > { %10033 = vst [vmem:[%s15328_s7] sm:$0xff] %v10001_v32  ;;  %v10002_v31 = vmax.f32 %v9970_v60, 0.0  ;;  %v11809_v42 = vpop.f32.mrb[4].mxu1 }
 0x498   : > { %10036 = vst [vmem:[%s15328_s7 + $0x18] sm:$0xff] %v10004_v26  ;;  %v9803_v38 = vadd.f32 %v11809_v42, %v15231_v53  ;;  %v9794_v37 = vpop.f32.mrb[5].mxu1  ;;  %v9919_v42 = vld [vmem:[%s12454_s9 + $0x70] sm:$0xff] }
 0x499   : > { %10034 = vst [vmem:[%s15328_s7 + $0x8] sm:$0xff] %v10002_v31  ;;  %v9795_v50 = vadd.f32 %v9794_v37, %v15235_v29  ;;  %v11810_v19 = vpop.f32.mrb[6].mxu1  ;;  %v9920_v37 = vld [vmem:[%s12454_s9 + $0x78] sm:$0xff] }
 0x49a   : > { %v9975_v18 = vadd.f32 %v9943_v27, %v9803_v38  ;;  %v9806_v9 = vadd.f32 %v11810_v19, %v15237_v6  ;;  %v9797_v2 = vpop.f32.mrb[7].mxu1  ;;  %v9918_v19 = vld [vmem:[%s12454_s9 + $0x68] sm:$0xff] }
 0x49b   : > { %v9973_v53 = vadd.f32 %v9941_v39, %v9795_v50  ;;  %v9798_v47 = vadd.f32 %v9797_v2, %v15239_v7  ;;  %v9951_v50 = vsel %vm287_vm3, %v9919_v42, 0.0 }
 0x49c   : > { %v10007_v22 = vmax.f32 %v9975_v18, 0.0  ;;  %v9976_v10 = vadd.f32 %v9944_v15, %v9806_v9  ;;  %v9949_v18 = vsel %vm287_vm3, %v9917_v62, 0.0  ;;  %v9928_v62 = vld [vmem:[%s12454_s9 + $0xb8] sm:$0xff] }
 0x49d   : > { %v10005_v29 = vmax.f32 %v9973_v53, 0.0  ;;  %v9974_v45 = vadd.f32 %v9942_v16, %v9798_v47  ;;  %v9952_v16 = vsel %vm287_vm3, %v9920_v37, 0.0 }
 0x49e   : > { %10039 = vst [vmem:[%s15328_s7 + $0x30] sm:$0xff] %v10007_v22  ;;  %v10008_v57 = vmax.f32 %v9976_v10, 0.0  ;;  %v9950_v10 = vsel %vm287_vm3, %v9918_v19, 0.0 }
 0x49f   : > { %10037 = vst [vmem:[%s15328_s7 + $0x20] sm:$0xff] %v10005_v29  ;;  %v10006_v6 = vmax.f32 %v9974_v45, 0.0  ;;  %v11813_v12 = vpop.f32.mrb[8].mxu1 }
 0x4a0   : > { %10040 = vst [vmem:[%s15328_s7 + $0x38] sm:$0xff] %v10008_v57  ;;  %v9819_v7 = vadd.f32 %v11813_v12, %v15243_v48  ;;  %v9810_v61 = vpop.f32.mrb[9].mxu1  ;;  %v9924_v12 = vld [vmem:[%s12454_s9 + $0x98] sm:$0xff] }
 0x4a1   : > { %10038 = vst [vmem:[%s15328_s7 + $0x28] sm:$0xff] %v10006_v6  ;;  %v9811_v24 = vadd.f32 %v9810_v61, %v15245_v13  ;;  %v11814_v56 = vpop.f32.mrb[10].mxu1 }
 0x4a2   : > { %v9979_v63 = vadd.f32 %v9947_v30, %v9819_v7  ;;  %v9822_v32 = vadd.f32 %v11814_v56, %v15247_v54  ;;  %v9813_v60 = vpop.f32.mrb[11].mxu1  ;;  %v9922_v7 = vld [vmem:[%s12454_s9 + $0x88] sm:$0xff] }
 0x4a3   : > { %v9977_v48 = vadd.f32 %v9945_v40, %v9811_v24  ;;  %v9814_v26 = vadd.f32 %v9813_v60, %v15249_v46  ;;  %v9953_v40 = vsel %vm287_vm3, %v9921_v4, 0.0 }
 0x4a4   : > { %v10011_v36 = vmax.f32 %v9979_v63, 0.0  ;;  %v9980_v31 = vadd.f32 %v9948_v49, %v9822_v32  ;;  %v9956_v49 = vsel %vm287_vm3, %v9924_v12, 0.0 }
 0x4a5   : > { %v10009_v13 = vmax.f32 %v9977_v48, 0.0  ;;  %v9978_v27 = vadd.f32 %v9946_v59, %v9814_v26  ;;  %v9954_v59 = vsel %vm287_vm3, %v9922_v7, 0.0 }
 0x4a6   : > { %10043 = vst [vmem:[%s15328_s7 + $0x50] sm:$0xff] %v10011_v36  ;;  %v10012_v38 = vmax.f32 %v9980_v31, 0.0  ;;  %v9927_v31 = vld [vmem:[%s12454_s9 + $0xb0] sm:$0xff] }
 0x4a7   : > { %10041 = vst [vmem:[%s15328_s7 + $0x40] sm:$0xff] %v10009_v13  ;;  %v10010_v54 = vmax.f32 %v9978_v27, 0.0  ;;  %v11817_v39 = vpop.f32.mrb[12].mxu1  ;;  %v9925_v13 = vld [vmem:[%s12454_s9 + $0xa0] sm:$0xff]  ;;  %v9959_v37 = vsel %vm287_vm3, %v9927_v31, 0.0 }
 0x4a8   : > { %10044 = vst [vmem:[%s15328_s7 + $0x58] sm:$0xff] %v10012_v38  ;;  %v9835_v46 = vadd.f32 %v11817_v39, %v15259_v21  ;;  %v9826_v15 = vpop.f32.mrb[13].mxu1 }
 0x4a9   : > { %10042 = vst [vmem:[%s15328_s7 + $0x48] sm:$0xff] %v10010_v54  ;;  %v9827_v9 = vadd.f32 %v9826_v15, %v15253_v58  ;;  %v11818_v2 = vpop.f32.mrb[14].mxu1  ;;  %v9926_v54 = vld [vmem:[%s12454_s9 + $0xa8] sm:$0xff]  ;;  %v9960_v15 = vsel %vm287_vm3, %v9928_v62, 0.0 }
 0x4aa   : > { %v9983_v53 = vadd.f32 %v9951_v50, %v9835_v46  ;;  %v9838_v47 = vadd.f32 %v11818_v2, %v15261_v43  ;;  %v9829_v22 = vpop.f32.mrb[15].mxu1  ;;  %v9957_v50 = vsel %vm287_vm3, %v9925_v13, 0.0 }
 0x4ab   : > { %v9981_v21 = vadd.f32 %v9949_v18, %v9827_v9  ;;  %v9830_v23 = vadd.f32 %v9829_v22, %v15255_v44 }
 0x4ac   : > { %v10015_v29 = vmax.f32 %v9983_v53, 0.0  ;;  %v9984_v45 = vadd.f32 %v9952_v16, %v9838_v47  ;;  %v9958_v16 = vsel %vm287_vm3, %v9926_v54, 0.0 }
 0x4ad   : > { %v10013_v58 = vmax.f32 %v9981_v21, 0.0  ;;  %v9982_v57 = vadd.f32 %v9950_v10, %v9830_v23  ;;  %v9931_v10 = vld [vmem:[%s12454_s9 + $0xd0] sm:$0xff]  ;;  %v9929_v23 = vld [vmem:[%s12454_s9 + $0xc0] sm:$0xff] }
 0x4ae   : > { %10047 = vst [vmem:[%s15328_s7 + $0x70] sm:$0xff] %v10015_v29  ;;  %v10016_v6 = vmax.f32 %v9984_v45, 0.0  ;;  %v9932_v45 = vld [vmem:[%s12454_s9 + $0xd8] sm:$0xff] }
 0x4af   : > { %10045 = vst [vmem:[%s15328_s7 + $0x60] sm:$0xff] %v10013_v58  ;;  %v10014_v43 = vmax.f32 %v9982_v57, 0.0  ;;  %v11821_v30 = vpop.f32.mrb[16].mxu1  ;;  %v9963_v58 = vsel %vm287_vm3, %v9931_v10, 0.0  ;;  %v9930_v57 = vld [vmem:[%s12454_s9 + $0xc8] sm:$0xff] }
 0x4b0   : > { %10048 = vst [vmem:[%s15328_s7 + $0x78] sm:$0xff] %v10016_v6  ;;  %v9851_v44 = vadd.f32 %v11821_v30, %v15271_v0  ;;  %v9842_v61 = vpop.f32.mrb[17].mxu1  ;;  %v9961_v6 = vsel %vm287_vm3, %v9929_v23, 0.0  ;;  %v9964_v30 = vsel %vm287_vm3, %v9932_v45, 0.0 }
 0x4b1   : > { %10046 = vst [vmem:[%s15328_s7 + $0x68] sm:$0xff] %v10014_v43  ;;  %v9843_v24 = vadd.f32 %v9842_v61, %v15265_v14  ;;  %v11822_v56 = vpop.f32.mrb[18].mxu1  ;;  %v9962_v61 = vsel %vm287_vm3, %v9930_v57, 0.0 }
 0x4b2   : > { %v9987_v63 = vadd.f32 %v9955_v25, %v9851_v44  ;;  %v9854_v32 = vadd.f32 %v11822_v56, %v15273_v34  ;;  %v9845_v60 = vpop.f32.mrb[19].mxu1 }
 0x4b3   : > { %v9985_v0 = vadd.f32 %v9953_v40, %v9843_v24  ;;  %v9846_v48 = vadd.f32 %v9845_v60, %v15267_v55 }
 0x4b4   : > { %v10019_v26 = vmax.f32 %v9987_v63, 0.0  ;;  %v9988_v36 = vadd.f32 %v9956_v49, %v9854_v32  ;;  %v9935_v49 = vld [vmem:[%s12454_s9 + $0xf0] sm:$0xff]  ;;  %v9933_v32 = vld [vmem:[%s12454_s9 + $0xe0] sm:$0xff] }
 0x4b5   : > { %v10017_v14 = vmax.f32 %v9985_v0, 0.0  ;;  %v9986_v42 = vadd.f32 %v9954_v59, %v9846_v48  ;;  %v9936_v59 = vld [vmem:[%s12454_s9 + $0xf8] sm:$0xff]  ;;  %v9967_v48 = vsel %vm287_vm3, %v9935_v49, 0.0  ;;  %v9965_v31 = vsel %vm287_vm3, %v9933_v32, 0.0 }
 0x4b6   : > { %10051 = vst [vmem:[%s15328_s7 + $0x90] sm:$0xff] %v10019_v26  ;;  %v10020_v27 = vmax.f32 %v9988_v36, 0.0  ;;  %v9934_v26 = vld [vmem:[%s12454_s9 + $0xe8] sm:$0xff]  ;;  %v9968_v13 = vsel %vm287_vm3, %v9936_v59, 0.0  ;;  %s10794_s9 = sshll.u32 %s12285_s22, 12  ;;  %s15455_s22 = scalar_lea.sflag [#allocation6], %s230_s30 }
 0x4b7   : > { %10049 = vst [vmem:[%s15328_s7 + $0x80] sm:$0xff] %v10017_v14  ;;  %v10018_v34 = vmax.f32 %v9986_v42, 0.0  ;;  %v11825_v38 = vpop.f32.mrb[20].mxu1  ;;  %s15446_s12 = scalar_lea.hbm %s15501_s5, %s10794_s9 }
 0x4b8   : > { %10052 = vst [vmem:[%s15328_s7 + $0x98] sm:$0xff] %v10020_v27  ;;  %v9867_v55 = vadd.f32 %v11825_v38, %v15283_v52  ;;  %v9858_v39 = vpop.f32.mrb[21].mxu1  ;;  %v9966_v38 = vsel %vm287_vm3, %v9934_v26, 0.0 }
 0x4b9   : > { %10050 = vst [vmem:[%s15328_s7 + $0x88] sm:$0xff] %v10018_v34  ;;  %v9859_v19 = vadd.f32 %v9858_v39, %v15277_v33  ;;  %v11826_v46 = vpop.f32.mrb[22].mxu1 }
 0x4ba   : > { %v9991_v18 = vadd.f32 %v9959_v37, %v9867_v55  ;;  %v9870_v9 = vadd.f32 %v11826_v46, %v15285_v20  ;;  %v9861_v2 = vpop.f32.mrb[23].mxu1 }
 0x4bb   : > { %v9989_v52 = vadd.f32 %v9957_v50, %v9859_v19  ;;  %v9862_v53 = vadd.f32 %v9861_v2, %v15279_v35 }
 0x4bc   : > { %v10023_v47 = vmax.f32 %v9991_v18, 0.0  ;;  %v9992_v22 = vadd.f32 %v9960_v15, %v9870_v9 }
 0x4bd   : > { %v10021_v33 = vmax.f32 %v9989_v52, 0.0  ;;  %v9990_v21 = vadd.f32 %v9958_v16, %v9862_v53 }
 0x4be   : > { %10055 = vst [vmem:[%s15328_s7 + $0xb0] sm:$0xff] %v10023_v47  ;;  %v10024_v29 = vmax.f32 %v9992_v22, 0.0 }
 0x4bf   : > { %10053 = vst [vmem:[%s15328_s7 + $0xa0] sm:$0xff] %v10021_v33  ;;  %v10022_v20 = vmax.f32 %v9990_v21, 0.0  ;;  %v11829_v8 = vpop.f32.mrb[24].mxu1 }
 0x4c0   : > { %10056 = vst [vmem:[%s15328_s7 + $0xb8] sm:$0xff] %v10024_v29  ;;  %v9883_v35 = vadd.f32 %v11829_v8, %v15295_v1  ;;  %v9874_v4 = vpop.f32.mrb[25].mxu1 }
 0x4c1   : > { %10054 = vst [vmem:[%s15328_s7 + $0xa8] sm:$0xff] %v10022_v20  ;;  %v9875_v12 = vadd.f32 %v9874_v4, %v15289_v41  ;;  %v11830_v43 = vpop.f32.mrb[26].mxu1 }
 0x4c2   : > { %v9995_v25 = vadd.f32 %v9963_v58, %v9883_v35  ;;  %v9886_v7 = vadd.f32 %v11830_v43, %v15297_v28  ;;  %v9877_v44 = vpop.f32.mrb[27].mxu1 }
 0x4c3   : > { %v9993_v1 = vadd.f32 %v9961_v6, %v9875_v12  ;;  %v9878_v40 = vadd.f32 %v9877_v44, %v15291_v11 }
 0x4c4   : > { %v10027_v24 = vmax.f32 %v9995_v25, 0.0  ;;  %v9996_v56 = vadd.f32 %v9964_v30, %v9886_v7 }
 0x4c5   : > { %v10025_v41 = vmax.f32 %v9993_v1, 0.0  ;;  %v9994_v63 = vadd.f32 %v9962_v61, %v9878_v40 }
 0x4c6   : > { %10059 = vst [vmem:[%s15328_s7 + $0xd0] sm:$0xff] %v10027_v24  ;;  %v10028_v60 = vmax.f32 %v9996_v56, 0.0 }
 0x4c7   : > { %10057 = vst [vmem:[%s15328_s7 + $0xc0] sm:$0xff] %v10025_v41  ;;  %v10026_v28 = vmax.f32 %v9994_v63, 0.0  ;;  %v11833_v0 = vpop.f32.mrb[28].mxu1 }
 0x4c8   : > { %10060 = vst [vmem:[%s15328_s7 + $0xd8] sm:$0xff] %v10028_v60  ;;  %v9899_v11 = vadd.f32 %v11833_v0, %v15313_v51  ;;  %v9890_v36 = vpop.f32.mrb[29].mxu1 }
 0x4c9   : > { %10058 = vst [vmem:[%s15328_s7 + $0xc8] sm:$0xff] %v10026_v28  ;;  %v9891_v14 = vadd.f32 %v9890_v36, %v15301_v3  ;;  %v11834_v42 = vpop.f32.mrb[30].mxu1 }
 0x4ca   : > { %v9999_v27 = vadd.f32 %v9967_v48, %v9899_v11  ;;  %v9902_v62 = vadd.f32 %v11834_v42, %v15321_v5  ;;  %v9893_v34 = vpop.f32.mrb[31].mxu1 }
 0x4cb   : > { %v9997_v51 = vadd.f32 %v9965_v31, %v9891_v14  ;;  %v9894_v37 = vadd.f32 %v9893_v34, %v15303_v17 }
 0x4cc   : > { %v10031_v3 = vmax.f32 %v9999_v27, 0.0  ;;  %v10000_v54 = vadd.f32 %v9968_v13, %v9902_v62 }
 0x4cd   : > { %v10029_v55 = vmax.f32 %v9997_v51, 0.0  ;;  %v9998_v39 = vadd.f32 %v9966_v38, %v9894_v37 }
 0x4ce   : > { %10063 = vst [vmem:[%s15328_s7 + $0xf0] sm:$0xff] %v10031_v3  ;;  %v10032_v50 = vmax.f32 %v10000_v54, 0.0 }
 0x4cf   : > { %10061 = vst [vmem:[%s15328_s7 + $0xe0] sm:$0xff] %v10029_v55  ;;  %v10030_v17 = vmax.f32 %v9998_v39, 0.0 }
 0x4d0   : > { %10064 = vst [vmem:[%s15328_s7 + $0xf8] sm:$0xff] %v10032_v50 }
 0x4d1   : > { %10062 = vst [vmem:[%s15328_s7 + $0xe8] sm:$0xff] %v10030_v17 }
 0x4d2   : > { %12172 = shalt.err (!%p12169_p7)
}
 0x4d3   : > { %s12173_s17 = scalar_lea.hbm %s15446_s12, 4096  ;;  %s12177_s26 = scalar_lea.hbm %s15501_s5, 8192 }
 0x4d4   : > { %p12174_p8 = scmp.ne.s32.totalorder %s15446_s12, %s12173_s17  ;;  %p12178_p1 = scmp.lt.u32.totalorder %s15446_s12, %s15501_s5 }
 0x4d5   : > { %p12179_p0 = scmp.lt.u32.totalorder %s12177_s26, %s12173_s17  ;;  %p12181_p6 = scmp.lt.u32.totalorder %s12173_s17, %s15446_s12 }
 0x4d6   : > { %p12175_p11 = pnand %p12174_p8, %p15633_p9 }
 0x4d7   : > { %p12180_p5 = por %p12179_p0, %p12178_p1 }
 0x4d8   : > { %p12176_p13 = pneg %p12175_p11 }
 0x4d9   : > { %p12182_p10 = por %p12181_p6, %p12180_p5 }
 0x4db   : > { %p12183_p12 = pnand %p12182_p10, %p12176_p13 }
 0x4dd   : > { %12186 = shalt.err (!%p12183_p12)
}
 0x4de   : > { %s12232_s7 = smov 128   ;;  %s12233_s9 = smov 8  }
 0x4df   : > { %11839 = dma.vmem_to_hbm [thread:$0]  (%p15633_p9), %s15448_s8, 4096, %s15446_s12, %s15455_s22, %s12232_s7, %s12232_s7, %s12233_s9  }
 0x4e0 PF: > { %p11851_p2 = scmp.ge.s32.totalorder %s12225_s21, 2  ;;  %s10094_s10 = sand.u32 1, %s12213_s18  }
 0x4e1   : > { %p15634_p3 = scmp.ne.s32.totalorder %s15512_s29, 0  ;;  %s10095_s11 = scalar_lea.sflag [#allocation6], %s10094_s10 }
 0x4e3   : > { %p11846_p4 = pnand %p11851_p2, %p15634_p3 }
 0x4e5   : > { %12208 = dma.done.wait (!%p11846_p4), %s10095_s11, 4096  }
 0x4e6   : > { %12210 = vsyncadd (!%p11846_p4), %s10095_s11, 4294963200  ;;  %p16_p7 = scmp.ge.s32.totalorder %s12289_s24, 4   ;;  %s15635_s18 = smov %s12217_s19 }
 0x4e7   : > { %s15636_s19 = smov %s12221_s20  ;;  %s15637_s20 = smov %s12300_s27 }
 0x4e8   : > { %s15638_s21 = smov %s12289_s24  ;;  %18 = sbr.rel (!%p16_p7) target bundleno = 4 (0x4), region = 83 }
 0x4ef   :  { %10100 = vsyncpa [#allocation5], 1 }
 0x4f0   :  { %10102 = vsyncpa [#allocation5 + $0x1], 1 }
 0x4f1   :  { %10103 = vsyncpa [#allocation6], 1 }
 0x4f2   :  { %10105 = vsyncpa [#allocation6 + $0x1], 1 }

</bundles_post_ra>
